<compile_context>
chip_gen: v5e
topology: v5e:2x2
jax: 0.10.0
libtpu: 0.0.40
codegen_flags: <defaults>
</compile_context>

<pallas_src>
import functools

import numpy as np
import jax
import jax.numpy as jnp
from jax.experimental import pallas as pl
from jax.experimental.pallas import tpu as pltpu


# ---------------------------------------------------------------------------
# In-kernel GroupNorm over [C, N] (one batch sample), all statistics in f32.
# gmat[c, c'] = 1 / (group_size * N) if c, c' share a group else 0, so
# gmat @ (row sums) yields the per-channel group statistic directly.
# Two-pass (mean first, then centered second moment) for numerical robustness.
# ---------------------------------------------------------------------------
def _group_norm(h, gmat, gamma, beta, eps):
    s1 = jnp.sum(h, axis=1, keepdims=True)                          # [C, 1]
    mean = jnp.dot(gmat, s1, preferred_element_type=jnp.float32)    # group mean
    d = h - mean
    s2 = jnp.sum(d * d, axis=1, keepdims=True)                      # [C, 1]
    var = jnp.dot(gmat, s2, preferred_element_type=jnp.float32)     # biased var (torch GN)
    inv = jax.lax.rsqrt(var + eps)
    return d * inv * gamma + beta


# ---------------------------------------------------------------------------
# Fused kernel: conv1 (3x3x3) -> GN -> time scale/shift -> SiLU ->
#               conv2 (3x3x3) -> GN -> SiLU -> (+ 1x1 residual conv w/ bias).
# One batch sample per grid step.  Both 3-D convs are a single bf16 MXU matmul
# against an in-VMEM bf16 im2col built from static lane-offset slices of a
# zero-haloed slab (boundaries handled by a precomputed bf16 [27, N] {0,1} mask).
# ---------------------------------------------------------------------------
def fused_resnet_block_kernel(xh_ref, mask_ref, scale_ref, shift_ref,
                              w1_ref, g1_ref, b1_ref,
                              w2_ref, g2_ref, b2_ref,
                              rw_ref, rb_ref, gmat_ref,
                              out_ref,
                              im1_ref, im2_ref, h1h_ref,
                              *, offsets, halo, n_vox, c_in_p, c_out, eps):
    # ---- conv1 im2col: 27 shifted + masked bf16 views of the haloed input ---
    for k, off in enumerate(offsets):
        tap = xh_ref[0, :, halo + off: halo + off + n_vox]           # bf16 [c_in_p, N]
        im1_ref[k * c_in_p:(k + 1) * c_in_p, :] = tap * mask_ref[k:k + 1, :]

    # one K = 27*c_in_p matmul, bf16 x bf16 -> f32 accumulate on the MXU
    h = jnp.dot(w1_ref[...], im1_ref[...],
                preferred_element_type=jnp.float32)                  # [c_out, N] f32
    h = _group_norm(h, gmat_ref[...], g1_ref[...], b1_ref[...], eps)
    h = h * (scale_ref[0] + 1.0) + shift_ref[0]                      # time scale/shift
    h = h * jax.nn.sigmoid(h)                                        # SiLU

    # ---- stage h1 (bf16) into the zero-haloed VMEM slab (no HBM round-trip) --
    # Only the halos need zeroing; the interior is fully overwritten every step.
    zero_halo = jnp.zeros((c_out, halo), jnp.bfloat16)
    h1h_ref[:, :halo] = zero_halo
    h1h_ref[:, halo + n_vox:] = zero_halo
    h1h_ref[:, halo:halo + n_vox] = h.astype(jnp.bfloat16)

    # ---- conv2 im2col from the staged bf16 h1 --------------------------------
    for k, off in enumerate(offsets):
        tap = h1h_ref[:, halo + off: halo + off + n_vox]             # bf16 [c_out, N]
        im2_ref[k * c_out:(k + 1) * c_out, :] = tap * mask_ref[k:k + 1, :]

    h2 = jnp.dot(w2_ref[...], im2_ref[...],
                 preferred_element_type=jnp.float32)                 # [c_out, N] f32
    h2 = _group_norm(h2, gmat_ref[...], g2_ref[...], b2_ref[...], eps)
    h2 = h2 * jax.nn.sigmoid(h2)                                     # SiLU

    # ---- 1x1 residual conv (with bias) on the centre tap, bf16 operands ------
    x_c = xh_ref[0, :, halo:halo + n_vox]
    res = jnp.dot(rw_ref[...], x_c, preferred_element_type=jnp.float32) + rb_ref[...]

    out_ref[0] = (h2 + res).astype(out_ref.dtype)


# ---------------------------------------------------------------------------
# VMEM sizing helpers (per-generation limit with headroom; never the full VMEM).
# ---------------------------------------------------------------------------
def _estimate_vmem_bytes(c_in_p, c_out, N, Nh, K1, K2):
    bf = 2
    scratch = (K1 + K2) * N * bf + c_out * Nh * bf                   # im1, im2, h1h
    per_step = c_in_p * Nh * bf + c_out * N * bf + 2 * c_out * 4     # x slab, out, scale/shift
    invariant = (27 * N * bf + c_out * (K1 + K2) * bf + c_out * c_in_p * bf
                 + (c_out * c_out + 6 * c_out) * 4)                  # masks, weights, gmat, gn
    temporaries = 8 * c_out * N * 4                                  # f32 h/h2/d/p live values
    # per-step and invariant blocks are double-buffered by default.
    return scratch + 2 * per_step + 2 * invariant + temporaries


def _pick_vmem_limit(estimate_bytes):
    phys = 128 * 1024 * 1024
    try:
        info = pltpu.get_tpu_info()
        phys = int(getattr(info, "vmem_capacity_bytes", phys))
    except Exception:
        pass
    cap = (phys * 3) // 4                      # leave headroom for compiler scratch
    want = max(2 * int(estimate_bytes), 32 * 1024 * 1024)
    return max(min(want, cap), 16 * 1024 * 1024)


# ---------------------------------------------------------------------------
# Wrapper: host-side layout prep (halo pad, weight folding, masks, time MLP).
# ---------------------------------------------------------------------------
def resnet_block_forward(x, time_emb, params, *, groups=8, out_dtype=jnp.bfloat16):
    # x: [B, c_in, D, H, W]   time_emb: [B, ch_time]
    B, c_in, D, H, W = x.shape
    N = D * H * W
    k_vol, c_out, _ = params["w1"].shape
    assert k_vol == 27, "3x3x3 kernel expected"
    assert c_out % groups == 0 and c_out % 8 == 0, "c_out must be multiple of groups and 8"
    assert N % 128 == 0, "voxel count must be lane-dense (multiple of 128)"

    c_in_p = ((c_in + 7) // 8) * 8                      # sublane-pad input channels
    max_off = H * W + W + 1                             # largest |flattened tap offset|
    halo = ((max_off + 127) // 128) * 128               # lane-aligned halo
    Nh = N + 2 * halo

    # --- static tap offsets + validity masks (emulate 3-D zero padding) -----
    nidx = np.arange(N)
    di, hi, wi = nidx // (H * W), (nidx // W) % H, nidx % W
    offsets, masks = [], []
    for kd in range(3):
        for kh in range(3):
            for kw in range(3):
                od, oh, ow = kd - 1, kh - 1, kw - 1
                offsets.append(od * H * W + oh * W + ow)
                valid = ((di + od >= 0) & (di + od < D) &
                         (hi + oh >= 0) & (hi + oh < H) &
                         (wi + ow >= 0) & (wi + ow < W))
                masks.append(valid)
    offsets = tuple(int(o) for o in offsets)
    masks = jnp.asarray(np.stack(masks), dtype=jnp.bfloat16)          # [27, N], exact {0,1}

    # --- haloed, channel-padded bf16 input slab: [B, c_in_p, Nh] -------------
    xf = x.reshape(B, c_in, N)
    xf = jnp.pad(xf, ((0, 0), (0, c_in_p - c_in), (0, 0)))
    xh = jnp.pad(xf, ((0, 0), (0, 0), (halo, halo))).astype(jnp.bfloat16)

    # --- fold the 27 conv taps into single matmul weights (bf16) -------------
    w1 = jnp.pad(params["w1"], ((0, 0), (0, 0), (0, c_in_p - c_in)))  # [27,c_out,c_in_p]
    w1f = jnp.transpose(w1, (1, 0, 2)).reshape(c_out, 27 * c_in_p).astype(jnp.bfloat16)
    w2f = jnp.transpose(params["w2"], (1, 0, 2)).reshape(c_out, 27 * c_out).astype(jnp.bfloat16)
    rwp = jnp.pad(params["res_w"], ((0, 0), (0, c_in_p - c_in))).astype(jnp.bfloat16)

    # --- time MLP (SiLU -> Linear -> chunk) done once in XLA for all samples -
    t = time_emb * jax.nn.sigmoid(time_emb)
    te = t @ params["mlp_w"].T + params["mlp_b"][:, 0][None, :]       # [B, 2*c_out]
    scale = te[:, :c_out, None].astype(jnp.float32)                   # [B, c_out, 1]
    shift = te[:, c_out:, None].astype(jnp.float32)

    # --- GroupNorm averaging matrix ------------------------------------------
    gsz = c_out // groups
    gid = np.arange(c_out) // gsz
    gmat = jnp.asarray((gid[:, None] == gid[None, :]).astype(np.float32) / (gsz * N))

    K1, K2 = 27 * c_in_p, 27 * c_out
    vmem_limit = _pick_vmem_limit(_estimate_vmem_bytes(c_in_p, c_out, N, Nh, K1, K2))

    grid_spec = pltpu.PrefetchScalarGridSpec(
        num_scalar_prefetch=0,
        grid=(B,),                                             # batch axis sharded across TCs
        in_specs=[
            pl.BlockSpec((1, c_in_p, Nh), lambda b: (b, 0, 0)),   # haloed bf16 input
            pl.BlockSpec((27, N), lambda b: (0, 0)),              # bf16 tap masks
            pl.BlockSpec((1, c_out, 1), lambda b: (b, 0, 0)),     # scale
            pl.BlockSpec((1, c_out, 1), lambda b: (b, 0, 0)),     # shift
            pl.BlockSpec((c_out, K1), lambda b: (0, 0)),          # folded w1 (bf16)
            pl.BlockSpec((c_out, 1), lambda b: (0, 0)),           # gn1 gamma
            pl.BlockSpec((c_out, 1), lambda b: (0, 0)),           # gn1 beta
            pl.BlockSpec((c_out, K2), lambda b: (0, 0)),          # folded w2 (bf16)
            pl.BlockSpec((c_out, 1), lambda b: (0, 0)),           # gn2 gamma
            pl.BlockSpec((c_out, 1), lambda b: (0, 0)),           # gn2 beta
            pl.BlockSpec((c_out, c_in_p), lambda b: (0, 0)),      # res conv weight (bf16)
            pl.BlockSpec((c_out, 1), lambda b: (0, 0)),           # res conv bias
            pl.BlockSpec((c_out, c_out), lambda b: (0, 0)),       # gmat
        ],
        out_specs=pl.BlockSpec((1, c_out, N), lambda b: (b, 0, 0)),
        scratch_shapes=[
            pltpu.VMEM((K1, N), jnp.bfloat16),     # conv1 im2col (bf16)
            pltpu.VMEM((K2, N), jnp.bfloat16),     # conv2 im2col (bf16)
            pltpu.VMEM((c_out, Nh), jnp.bfloat16),  # haloed h1 (bf16)
        ],
    )

    out = pl.pallas_call(
        functools.partial(fused_resnet_block_kernel,
                          offsets=offsets, halo=halo, n_vox=N,
                          c_in_p=c_in_p, c_out=c_out, eps=1e-5),
        out_shape=jax.ShapeDtypeStruct((B, c_out, N), out_dtype),
        grid_spec=grid_spec,
        compiler_params=pltpu.CompilerParams(
            dimension_semantics=("parallel",),
            vmem_limit_bytes=int(vmem_limit)),
    )(xh, masks, scale, shift, w1f,
      params["gn1_g"], params["gn1_b"], w2f,
      params["gn2_g"], params["gn2_b"],
      rwp, params["res_b"], gmat)

    return out.reshape(B, c_out, D, H, W)


# ---------------------------------------------------------------------------
# Pure-JAX f32 reference (same math, XLA ops) for the correctness cross-check.
# ---------------------------------------------------------------------------
def _shifted_windows(x_grid):
    B, C, D, H, W = x_grid.shape
    xp = jnp.pad(x_grid, ((0, 0), (0, 0), (1, 1), (1, 1), (1, 1)))
    outs = []
    for kd in range(3):
        for kh in range(3):
            for kw in range(3):
                outs.append(
                    xp[:, :, kd:kd + D, kh:kh + H, kw:kw + W].reshape(B, C, D * H * W))
    return jnp.stack(outs, axis=1)  # [B, 27, C, N]


def reference_forward(x, time_emb, params, *, groups=8):
    B, c_in, D, H, W = x.shape
    c_out = params["w1"].shape[1]
    N = D * H * W
    silu = lambda v: v * jax.nn.sigmoid(v)

    te = silu(time_emb) @ params["mlp_w"].T + params["mlp_b"][:, 0]   # [B, 2*c_out]
    scale, shift = te[:, :c_out], te[:, c_out:]

    def conv3(inp, w):                                # inp [B,C,D,H,W], w [27,c_out,C]
        xw = _shifted_windows(inp)
        return jnp.einsum("bkcn,koc->bon", xw, w)

    def gn(h, gamma, beta):                           # h [B,C,N]
        gsz = h.shape[1] // groups
        hr = h.reshape(B, groups, gsz, N)
        mean = hr.mean(axis=(2, 3), keepdims=True)
        var = ((hr - mean) ** 2).mean(axis=(2, 3), keepdims=True)
        hn = ((hr - mean) / jnp.sqrt(var + 1e-5)).reshape(B, -1, N)
        return hn * gamma[None, :, :] + beta[None, :, :]

    h = conv3(x, params["w1"])
    h = gn(h, params["gn1_g"], params["gn1_b"])
    h = h * (scale[:, :, None] + 1.0) + shift[:, :, None]
    h = silu(h)
    h = conv3(h.reshape(B, c_out, D, H, W), params["w2"])
    h = gn(h, params["gn2_g"], params["gn2_b"])
    h = silu(h)
    res = jnp.einsum("oc,bcn->bon", params["res_w"], x.reshape(B, c_in, N)) \
        + params["res_b"][None, :, :]
    return (h + res).reshape(B, c_out, D, H, W)


if __name__ == "__main__":
    B, c_in, c_out, ch_time = 2, 4, 8, 16
    D = H = W = 8

    key = jax.random.PRNGKey(0)
    ks = jax.random.split(key, 12)
    params = {
        "mlp_w": 0.1 * jax.random.normal(ks[0], (2 * c_out, ch_time), jnp.float32),
        "mlp_b": 0.1 * jax.random.normal(ks[1], (2 * c_out, 1), jnp.float32),
        "w1":    0.2 * jax.random.normal(ks[2], (27, c_out, c_in), jnp.float32),
        "gn1_g": 1.0 + 0.1 * jax.random.normal(ks[3], (c_out, 1), jnp.float32),
        "gn1_b": 0.1 * jax.random.normal(ks[4], (c_out, 1), jnp.float32),
        "w2":    0.2 * jax.random.normal(ks[5], (27, c_out, c_out), jnp.float32),
        "gn2_g": 1.0 + 0.1 * jax.random.normal(ks[6], (c_out, 1), jnp.float32),
        "gn2_b": 0.1 * jax.random.normal(ks[7], (c_out, 1), jnp.float32),
        "res_w": 0.2 * jax.random.normal(ks[8], (c_out, c_in), jnp.float32),
        "res_b": 0.1 * jax.random.normal(ks[9], (c_out, 1), jnp.float32),
    }
    x = jax.random.normal(ks[10], (B, c_in, D, H, W), jnp.float32)
    time_emb = jax.random.normal(ks[11], (B, ch_time), jnp.float32)

    out = resnet_block_forward(x, time_emb, params)
    out = jax.block_until_ready(out)

    ref = reference_forward(x, time_emb, params)
    # bf16 activations/weights/output => compare with a bf16-appropriate tolerance.
    out_f32 = out.astype(jnp.float32)
    if not bool(jnp.allclose(out_f32, ref, atol=1e-1, rtol=1e-1)):
        err = float(jnp.max(jnp.abs(out_f32 - ref)))
        raise AssertionError(
            f"Pallas fused ResNetBlock output does not match reference (max abs err {err:.4f})")

    print("KERNEL_OK")
</pallas_src>

<mosaic_0001>
module attributes {stable_mosaic.version = 11 : i64} {
  func.func @fused_resnet_block_kernel(%arg0: i32, %arg1: memref<1x8x768xbf16, #tpu.memory_space<vmem>>, %arg2: memref<27x512xbf16, #tpu.memory_space<vmem>>, %arg3: memref<1x8x1xf32, #tpu.memory_space<vmem>>, %arg4: memref<1x8x1xf32, #tpu.memory_space<vmem>>, %arg5: memref<8x216xbf16, #tpu.memory_space<vmem>>, %arg6: memref<8x1xf32, #tpu.memory_space<vmem>>, %arg7: memref<8x1xf32, #tpu.memory_space<vmem>>, %arg8: memref<8x216xbf16, #tpu.memory_space<vmem>>, %arg9: memref<8x1xf32, #tpu.memory_space<vmem>>, %arg10: memref<8x1xf32, #tpu.memory_space<vmem>>, %arg11: memref<8x8xbf16, #tpu.memory_space<vmem>>, %arg12: memref<8x1xf32, #tpu.memory_space<vmem>>, %arg13: memref<8x8xf32, #tpu.memory_space<vmem>>, %arg14: memref<1x8x512xbf16, #tpu.memory_space<vmem>>, %arg15: memref<216x512xbf16, #tpu.memory_space<vmem>>, %arg16: memref<216x512xbf16, #tpu.memory_space<vmem>>, %arg17: memref<8x768xbf16, #tpu.memory_space<vmem>>) attributes {dimension_semantics = [#tpu.dimension_semantics<parallel>], iteration_bounds = array<i64: 2>, scalar_prefetch = 0 : i64, scratch_operands = 3 : i64, tpu.core_type = #tpu.core_type<tc>, window_params = [{transform_indices = @transform_0, window_bounds = array<i64: 1, 8, 768>}, {pipeline_mode = #tpu.pipeline_mode<synchronous>, transform_indices = @transform_1, window_bounds = array<i64: 27, 512>}, {transform_indices = @transform_2, window_bounds = array<i64: 1, 8, 1>}, {transform_indices = @transform_3, window_bounds = array<i64: 1, 8, 1>}, {pipeline_mode = #tpu.pipeline_mode<synchronous>, transform_indices = @transform_4, window_bounds = array<i64: 8, 216>}, {pipeline_mode = #tpu.pipeline_mode<synchronous>, transform_indices = @transform_5, window_bounds = array<i64: 8, 1>}, {pipeline_mode = #tpu.pipeline_mode<synchronous>, transform_indices = @transform_6, window_bounds = array<i64: 8, 1>}, {pipeline_mode = #tpu.pipeline_mode<synchronous>, transform_indices = @transform_7, window_bounds = array<i64: 8, 216>}, {pipeline_mode = #tpu.pipeline_mode<synchronous>, transform_indices = @transform_8, window_bounds = array<i64: 8, 1>}, {pipeline_mode = #tpu.pipeline_mode<synchronous>, transform_indices = @transform_9, window_bounds = array<i64: 8, 1>}, {pipeline_mode = #tpu.pipeline_mode<synchronous>, transform_indices = @transform_10, window_bounds = array<i64: 8, 8>}, {pipeline_mode = #tpu.pipeline_mode<synchronous>, transform_indices = @transform_11, window_bounds = array<i64: 8, 1>}, {pipeline_mode = #tpu.pipeline_mode<synchronous>, transform_indices = @transform_12, window_bounds = array<i64: 8, 8>}, {transform_indices = @transform_13, window_bounds = array<i64: 1, 8, 512>}]} {
    %c0 = arith.constant 0 : index
    %c0_0 = arith.constant 0 : index
    %c55 = arith.constant 55 : index
    %0 = vector.load %arg1[%c0, %c0_0, %c55] : memref<1x8x768xbf16, #tpu.memory_space<vmem>>, vector<1x8x512xbf16>
    %1 = vector.shape_cast %0 : vector<1x8x512xbf16> to vector<8x512xbf16>
    %c0_1 = arith.constant 0 : index
    %c0_2 = arith.constant 0 : index
    %2 = vector.load %arg2[%c0_1, %c0_2] : memref<27x512xbf16, #tpu.memory_space<vmem>>, vector<1x512xbf16>
    %3 = vector.broadcast %2 : vector<1x512xbf16> to vector<8x512xbf16>
    %4 = arith.mulf %1, %3 : vector<8x512xbf16>
    %c0_3 = arith.constant 0 : index
    %c0_4 = arith.constant 0 : index
    %5 = vector.load %arg15[%c0_3, %c0_4] : memref<216x512xbf16, #tpu.memory_space<vmem>>, vector<8x512xbf16>
    tpu.vector_store %arg15[%c0_3, %c0_4], %4 {strides = array<i32>} : memref<216x512xbf16, #tpu.memory_space<vmem>>, vector<8x512xbf16>,
    %c0_5 = arith.constant 0 : index
    %c0_6 = arith.constant 0 : index
    %c56 = arith.constant 56 : index
    %6 = vector.load %arg1[%c0_5, %c0_6, %c56] : memref<1x8x768xbf16, #tpu.memory_space<vmem>>, vector<1x8x512xbf16>
    %7 = vector.shape_cast %6 : vector<1x8x512xbf16> to vector<8x512xbf16>
    %c1 = arith.constant 1 : index
    %c0_7 = arith.constant 0 : index
    %8 = vector.load %arg2[%c1, %c0_7] : memref<27x512xbf16, #tpu.memory_space<vmem>>, vector<1x512xbf16>
    %9 = vector.broadcast %8 : vector<1x512xbf16> to vector<8x512xbf16>
    %10 = arith.mulf %7, %9 : vector<8x512xbf16>
    %c8 = arith.constant 8 : index
    %c0_8 = arith.constant 0 : index
    %11 = vector.load %arg15[%c8, %c0_8] : memref<216x512xbf16, #tpu.memory_space<vmem>>, vector<8x512xbf16>
    tpu.vector_store %arg15[%c8, %c0_8], %10 {strides = array<i32>} : memref<216x512xbf16, #tpu.memory_space<vmem>>, vector<8x512xbf16>,
    %c0_9 = arith.constant 0 : index
    %c0_10 = arith.constant 0 : index
    %c57 = arith.constant 57 : index
    %12 = vector.load %arg1[%c0_9, %c0_10, %c57] : memref<1x8x768xbf16, #tpu.memory_space<vmem>>, vector<1x8x512xbf16>
    %13 = vector.shape_cast %12 : vector<1x8x512xbf16> to vector<8x512xbf16>
    %c2 = arith.constant 2 : index
    %c0_11 = arith.constant 0 : index
    %14 = vector.load %arg2[%c2, %c0_11] : memref<27x512xbf16, #tpu.memory_space<vmem>>, vector<1x512xbf16>
    %15 = vector.broadcast %14 : vector<1x512xbf16> to vector<8x512xbf16>
    %16 = arith.mulf %13, %15 : vector<8x512xbf16>
    %c16 = arith.constant 16 : index
    %c0_12 = arith.constant 0 : index
    %17 = vector.load %arg15[%c16, %c0_12] : memref<216x512xbf16, #tpu.memory_space<vmem>>, vector<8x512xbf16>
    tpu.vector_store %arg15[%c16, %c0_12], %16 {strides = array<i32>} : memref<216x512xbf16, #tpu.memory_space<vmem>>, vector<8x512xbf16>,
    %c0_13 = arith.constant 0 : index
    %c0_14 = arith.constant 0 : index
    %c63 = arith.constant 63 : index
    %18 = vector.load %arg1[%c0_13, %c0_14, %c63] : memref<1x8x768xbf16, #tpu.memory_space<vmem>>, vector<1x8x512xbf16>
    %19 = vector.shape_cast %18 : vector<1x8x512xbf16> to vector<8x512xbf16>
    %c3 = arith.constant 3 : index
    %c0_15 = arith.constant 0 : index
    %20 = vector.load %arg2[%c3, %c0_15] : memref<27x512xbf16, #tpu.memory_space<vmem>>, vector<1x512xbf16>
    %21 = vector.broadcast %20 : vector<1x512xbf16> to vector<8x512xbf16>
    %22 = arith.mulf %19, %21 : vector<8x512xbf16>
    %c24 = arith.constant 24 : index
    %c0_16 = arith.constant 0 : index
    %23 = vector.load %arg15[%c24, %c0_16] : memref<216x512xbf16, #tpu.memory_space<vmem>>, vector<8x512xbf16>
    tpu.vector_store %arg15[%c24, %c0_16], %22 {strides = array<i32>} : memref<216x512xbf16, #tpu.memory_space<vmem>>, vector<8x512xbf16>,
    %c0_17 = arith.constant 0 : index
    %c0_18 = arith.constant 0 : index
    %c64 = arith.constant 64 : index
    %24 = vector.load %arg1[%c0_17, %c0_18, %c64] : memref<1x8x768xbf16, #tpu.memory_space<vmem>>, vector<1x8x512xbf16>
    %25 = vector.shape_cast %24 : vector<1x8x512xbf16> to vector<8x512xbf16>
    %c4 = arith.constant 4 : index
    %c0_19 = arith.constant 0 : index
    %26 = vector.load %arg2[%c4, %c0_19] : memref<27x512xbf16, #tpu.memory_space<vmem>>, vector<1x512xbf16>
    %27 = vector.broadcast %26 : vector<1x512xbf16> to vector<8x512xbf16>
    %28 = arith.mulf %25, %27 : vector<8x512xbf16>
    %c32 = arith.constant 32 : index
    %c0_20 = arith.constant 0 : index
    %29 = vector.load %arg15[%c32, %c0_20] : memref<216x512xbf16, #tpu.memory_space<vmem>>, vector<8x512xbf16>
    tpu.vector_store %arg15[%c32, %c0_20], %28 {strides = array<i32>} : memref<216x512xbf16, #tpu.memory_space<vmem>>, vector<8x512xbf16>,
    %c0_21 = arith.constant 0 : index
    %c0_22 = arith.constant 0 : index
    %c65 = arith.constant 65 : index
    %30 = vector.load %arg1[%c0_21, %c0_22, %c65] : memref<1x8x768xbf16, #tpu.memory_space<vmem>>, vector<1x8x512xbf16>
    %31 = vector.shape_cast %30 : vector<1x8x512xbf16> to vector<8x512xbf16>
    %c5 = arith.constant 5 : index
    %c0_23 = arith.constant 0 : index
    %32 = vector.load %arg2[%c5, %c0_23] : memref<27x512xbf16, #tpu.memory_space<vmem>>, vector<1x512xbf16>
    %33 = vector.broadcast %32 : vector<1x512xbf16> to vector<8x512xbf16>
    %34 = arith.mulf %31, %33 : vector<8x512xbf16>
    %c40 = arith.constant 40 : index
    %c0_24 = arith.constant 0 : index
    %35 = vector.load %arg15[%c40, %c0_24] : memref<216x512xbf16, #tpu.memory_space<vmem>>, vector<8x512xbf16>
    tpu.vector_store %arg15[%c40, %c0_24], %34 {strides = array<i32>} : memref<216x512xbf16, #tpu.memory_space<vmem>>, vector<8x512xbf16>,
    %c0_25 = arith.constant 0 : index
    %c0_26 = arith.constant 0 : index
    %c71 = arith.constant 71 : index
    %36 = vector.load %arg1[%c0_25, %c0_26, %c71] : memref<1x8x768xbf16, #tpu.memory_space<vmem>>, vector<1x8x512xbf16>
    %37 = vector.shape_cast %36 : vector<1x8x512xbf16> to vector<8x512xbf16>
    %c6 = arith.constant 6 : index
    %c0_27 = arith.constant 0 : index
    %38 = vector.load %arg2[%c6, %c0_27] : memref<27x512xbf16, #tpu.memory_space<vmem>>, vector<1x512xbf16>
    %39 = vector.broadcast %38 : vector<1x512xbf16> to vector<8x512xbf16>
    %40 = arith.mulf %37, %39 : vector<8x512xbf16>
    %c48 = arith.constant 48 : index
    %c0_28 = arith.constant 0 : index
    %41 = vector.load %arg15[%c48, %c0_28] : memref<216x512xbf16, #tpu.memory_space<vmem>>, vector<8x512xbf16>
    tpu.vector_store %arg15[%c48, %c0_28], %40 {strides = array<i32>} : memref<216x512xbf16, #tpu.memory_space<vmem>>, vector<8x512xbf16>,
    %c0_29 = arith.constant 0 : index
    %c0_30 = arith.constant 0 : index
    %c72 = arith.constant 72 : index
    %42 = vector.load %arg1[%c0_29, %c0_30, %c72] : memref<1x8x768xbf16, #tpu.memory_space<vmem>>, vector<1x8x512xbf16>
    %43 = vector.shape_cast %42 : vector<1x8x512xbf16> to vector<8x512xbf16>
    %c7 = arith.constant 7 : index
    %c0_31 = arith.constant 0 : index
    %44 = vector.load %arg2[%c7, %c0_31] : memref<27x512xbf16, #tpu.memory_space<vmem>>, vector<1x512xbf16>
    %45 = vector.broadcast %44 : vector<1x512xbf16> to vector<8x512xbf16>
    %46 = arith.mulf %43, %45 : vector<8x512xbf16>
    %c56_32 = arith.constant 56 : index
    %c0_33 = arith.constant 0 : index
    %47 = vector.load %arg15[%c56_32, %c0_33] : memref<216x512xbf16, #tpu.memory_space<vmem>>, vector<8x512xbf16>
    tpu.vector_store %arg15[%c56_32, %c0_33], %46 {strides = array<i32>} : memref<216x512xbf16, #tpu.memory_space<vmem>>, vector<8x512xbf16>,
    %c0_34 = arith.constant 0 : index
    %c0_35 = arith.constant 0 : index
    %c73 = arith.constant 73 : index
    %48 = vector.load %arg1[%c0_34, %c0_35, %c73] : memref<1x8x768xbf16, #tpu.memory_space<vmem>>, vector<1x8x512xbf16>
    %49 = vector.shape_cast %48 : vector<1x8x512xbf16> to vector<8x512xbf16>
    %c8_36 = arith.constant 8 : index
    %c0_37 = arith.constant 0 : index
    %50 = vector.load %arg2[%c8_36, %c0_37] : memref<27x512xbf16, #tpu.memory_space<vmem>>, vector<1x512xbf16>
    %51 = vector.broadcast %50 : vector<1x512xbf16> to vector<8x512xbf16>
    %52 = arith.mulf %49, %51 : vector<8x512xbf16>
    %c64_38 = arith.constant 64 : index
    %c0_39 = arith.constant 0 : index
    %53 = vector.load %arg15[%c64_38, %c0_39] : memref<216x512xbf16, #tpu.memory_space<vmem>>, vector<8x512xbf16>
    tpu.vector_store %arg15[%c64_38, %c0_39], %52 {strides = array<i32>} : memref<216x512xbf16, #tpu.memory_space<vmem>>, vector<8x512xbf16>,
    %c0_40 = arith.constant 0 : index
    %c0_41 = arith.constant 0 : index
    %c119 = arith.constant 119 : index
    %54 = vector.load %arg1[%c0_40, %c0_41, %c119] : memref<1x8x768xbf16, #tpu.memory_space<vmem>>, vector<1x8x512xbf16>
    %55 = vector.shape_cast %54 : vector<1x8x512xbf16> to vector<8x512xbf16>
    %c9 = arith.constant 9 : index
    %c0_42 = arith.constant 0 : index
    %56 = vector.load %arg2[%c9, %c0_42] : memref<27x512xbf16, #tpu.memory_space<vmem>>, vector<1x512xbf16>
    %57 = vector.broadcast %56 : vector<1x512xbf16> to vector<8x512xbf16>
    %58 = arith.mulf %55, %57 : vector<8x512xbf16>
    %c72_43 = arith.constant 72 : index
    %c0_44 = arith.constant 0 : index
    %59 = vector.load %arg15[%c72_43, %c0_44] : memref<216x512xbf16, #tpu.memory_space<vmem>>, vector<8x512xbf16>
    tpu.vector_store %arg15[%c72_43, %c0_44], %58 {strides = array<i32>} : memref<216x512xbf16, #tpu.memory_space<vmem>>, vector<8x512xbf16>,
    %c0_45 = arith.constant 0 : index
    %c0_46 = arith.constant 0 : index
    %c120 = arith.constant 120 : index
    %60 = vector.load %arg1[%c0_45, %c0_46, %c120] : memref<1x8x768xbf16, #tpu.memory_space<vmem>>, vector<1x8x512xbf16>
    %61 = vector.shape_cast %60 : vector<1x8x512xbf16> to vector<8x512xbf16>
    %c10 = arith.constant 10 : index
    %c0_47 = arith.constant 0 : index
    %62 = vector.load %arg2[%c10, %c0_47] : memref<27x512xbf16, #tpu.memory_space<vmem>>, vector<1x512xbf16>
    %63 = vector.broadcast %62 : vector<1x512xbf16> to vector<8x512xbf16>
    %64 = arith.mulf %61, %63 : vector<8x512xbf16>
    %c80 = arith.constant 80 : index
    %c0_48 = arith.constant 0 : index
    %65 = vector.load %arg15[%c80, %c0_48] : memref<216x512xbf16, #tpu.memory_space<vmem>>, vector<8x512xbf16>
    tpu.vector_store %arg15[%c80, %c0_48], %64 {strides = array<i32>} : memref<216x512xbf16, #tpu.memory_space<vmem>>, vector<8x512xbf16>,
    %c0_49 = arith.constant 0 : index
    %c0_50 = arith.constant 0 : index
    %c121 = arith.constant 121 : index
    %66 = vector.load %arg1[%c0_49, %c0_50, %c121] : memref<1x8x768xbf16, #tpu.memory_space<vmem>>, vector<1x8x512xbf16>
    %67 = vector.shape_cast %66 : vector<1x8x512xbf16> to vector<8x512xbf16>
    %c11 = arith.constant 11 : index
    %c0_51 = arith.constant 0 : index
    %68 = vector.load %arg2[%c11, %c0_51] : memref<27x512xbf16, #tpu.memory_space<vmem>>, vector<1x512xbf16>
    %69 = vector.broadcast %68 : vector<1x512xbf16> to vector<8x512xbf16>
    %70 = arith.mulf %67, %69 : vector<8x512xbf16>
    %c88 = arith.constant 88 : index
    %c0_52 = arith.constant 0 : index
    %71 = vector.load %arg15[%c88, %c0_52] : memref<216x512xbf16, #tpu.memory_space<vmem>>, vector<8x512xbf16>
    tpu.vector_store %arg15[%c88, %c0_52], %70 {strides = array<i32>} : memref<216x512xbf16, #tpu.memory_space<vmem>>, vector<8x512xbf16>,
    %c0_53 = arith.constant 0 : index
    %c0_54 = arith.constant 0 : index
    %c127 = arith.constant 127 : index
    %72 = vector.load %arg1[%c0_53, %c0_54, %c127] : memref<1x8x768xbf16, #tpu.memory_space<vmem>>, vector<1x8x512xbf16>
    %73 = vector.shape_cast %72 : vector<1x8x512xbf16> to vector<8x512xbf16>
    %c12 = arith.constant 12 : index
    %c0_55 = arith.constant 0 : index
    %74 = vector.load %arg2[%c12, %c0_55] : memref<27x512xbf16, #tpu.memory_space<vmem>>, vector<1x512xbf16>
    %75 = vector.broadcast %74 : vector<1x512xbf16> to vector<8x512xbf16>
    %76 = arith.mulf %73, %75 : vector<8x512xbf16>
    %c96 = arith.constant 96 : index
    %c0_56 = arith.constant 0 : index
    %77 = vector.load %arg15[%c96, %c0_56] : memref<216x512xbf16, #tpu.memory_space<vmem>>, vector<8x512xbf16>
    tpu.vector_store %arg15[%c96, %c0_56], %76 {strides = array<i32>} : memref<216x512xbf16, #tpu.memory_space<vmem>>, vector<8x512xbf16>,
    %c0_57 = arith.constant 0 : index
    %c0_58 = arith.constant 0 : index
    %c128 = arith.constant 128 : index
    %78 = vector.load %arg1[%c0_57, %c0_58, %c128] : memref<1x8x768xbf16, #tpu.memory_space<vmem>>, vector<1x8x512xbf16>
    %79 = vector.shape_cast %78 : vector<1x8x512xbf16> to vector<8x512xbf16>
    %c13 = arith.constant 13 : index
    %c0_59 = arith.constant 0 : index
    %80 = vector.load %arg2[%c13, %c0_59] : memref<27x512xbf16, #tpu.memory_space<vmem>>, vector<1x512xbf16>
    %81 = vector.broadcast %80 : vector<1x512xbf16> to vector<8x512xbf16>
    %82 = arith.mulf %79, %81 : vector<8x512xbf16>
    %c104 = arith.constant 104 : index
    %c0_60 = arith.constant 0 : index
    %83 = vector.load %arg15[%c104, %c0_60] : memref<216x512xbf16, #tpu.memory_space<vmem>>, vector<8x512xbf16>
    tpu.vector_store %arg15[%c104, %c0_60], %82 {strides = array<i32>} : memref<216x512xbf16, #tpu.memory_space<vmem>>, vector<8x512xbf16>,
    %c0_61 = arith.constant 0 : index
    %c0_62 = arith.constant 0 : index
    %c129 = arith.constant 129 : index
    %84 = vector.load %arg1[%c0_61, %c0_62, %c129] : memref<1x8x768xbf16, #tpu.memory_space<vmem>>, vector<1x8x512xbf16>
    %85 = vector.shape_cast %84 : vector<1x8x512xbf16> to vector<8x512xbf16>
    %c14 = arith.constant 14 : index
    %c0_63 = arith.constant 0 : index
    %86 = vector.load %arg2[%c14, %c0_63] : memref<27x512xbf16, #tpu.memory_space<vmem>>, vector<1x512xbf16>
    %87 = vector.broadcast %86 : vector<1x512xbf16> to vector<8x512xbf16>
    %88 = arith.mulf %85, %87 : vector<8x512xbf16>
    %c112 = arith.constant 112 : index
    %c0_64 = arith.constant 0 : index
    %89 = vector.load %arg15[%c112, %c0_64] : memref<216x512xbf16, #tpu.memory_space<vmem>>, vector<8x512xbf16>
    tpu.vector_store %arg15[%c112, %c0_64], %88 {strides = array<i32>} : memref<216x512xbf16, #tpu.memory_space<vmem>>, vector<8x512xbf16>,
    %c0_65 = arith.constant 0 : index
    %c0_66 = arith.constant 0 : index
    %c135 = arith.constant 135 : index
    %90 = vector.load %arg1[%c0_65, %c0_66, %c135] : memref<1x8x768xbf16, #tpu.memory_space<vmem>>, vector<1x8x512xbf16>
    %91 = vector.shape_cast %90 : vector<1x8x512xbf16> to vector<8x512xbf16>
    %c15 = arith.constant 15 : index
    %c0_67 = arith.constant 0 : index
    %92 = vector.load %arg2[%c15, %c0_67] : memref<27x512xbf16, #tpu.memory_space<vmem>>, vector<1x512xbf16>
    %93 = vector.broadcast %92 : vector<1x512xbf16> to vector<8x512xbf16>
    %94 = arith.mulf %91, %93 : vector<8x512xbf16>
    %c120_68 = arith.constant 120 : index
    %c0_69 = arith.constant 0 : index
    %95 = vector.load %arg15[%c120_68, %c0_69] : memref<216x512xbf16, #tpu.memory_space<vmem>>, vector<8x512xbf16>
    tpu.vector_store %arg15[%c120_68, %c0_69], %94 {strides = array<i32>} : memref<216x512xbf16, #tpu.memory_space<vmem>>, vector<8x512xbf16>,
    %c0_70 = arith.constant 0 : index
    %c0_71 = arith.constant 0 : index
    %c136 = arith.constant 136 : index
    %96 = vector.load %arg1[%c0_70, %c0_71, %c136] : memref<1x8x768xbf16, #tpu.memory_space<vmem>>, vector<1x8x512xbf16>
    %97 = vector.shape_cast %96 : vector<1x8x512xbf16> to vector<8x512xbf16>
    %c16_72 = arith.constant 16 : index
    %c0_73 = arith.constant 0 : index
    %98 = vector.load %arg2[%c16_72, %c0_73] : memref<27x512xbf16, #tpu.memory_space<vmem>>, vector<1x512xbf16>
    %99 = vector.broadcast %98 : vector<1x512xbf16> to vector<8x512xbf16>
    %100 = arith.mulf %97, %99 : vector<8x512xbf16>
    %c128_74 = arith.constant 128 : index
    %c0_75 = arith.constant 0 : index
    %101 = vector.load %arg15[%c128_74, %c0_75] : memref<216x512xbf16, #tpu.memory_space<vmem>>, vector<8x512xbf16>
    tpu.vector_store %arg15[%c128_74, %c0_75], %100 {strides = array<i32>} : memref<216x512xbf16, #tpu.memory_space<vmem>>, vector<8x512xbf16>,
    %c0_76 = arith.constant 0 : index
    %c0_77 = arith.constant 0 : index
    %c137 = arith.constant 137 : index
    %102 = vector.load %arg1[%c0_76, %c0_77, %c137] : memref<1x8x768xbf16, #tpu.memory_space<vmem>>, vector<1x8x512xbf16>
    %103 = vector.shape_cast %102 : vector<1x8x512xbf16> to vector<8x512xbf16>
    %c17 = arith.constant 17 : index
    %c0_78 = arith.constant 0 : index
    %104 = vector.load %arg2[%c17, %c0_78] : memref<27x512xbf16, #tpu.memory_space<vmem>>, vector<1x512xbf16>
    %105 = vector.broadcast %104 : vector<1x512xbf16> to vector<8x512xbf16>
    %106 = arith.mulf %103, %105 : vector<8x512xbf16>
    %c136_79 = arith.constant 136 : index
    %c0_80 = arith.constant 0 : index
    %107 = vector.load %arg15[%c136_79, %c0_80] : memref<216x512xbf16, #tpu.memory_space<vmem>>, vector<8x512xbf16>
    tpu.vector_store %arg15[%c136_79, %c0_80], %106 {strides = array<i32>} : memref<216x512xbf16, #tpu.memory_space<vmem>>, vector<8x512xbf16>,
    %c0_81 = arith.constant 0 : index
    %c0_82 = arith.constant 0 : index
    %c183 = arith.constant 183 : index
    %108 = vector.load %arg1[%c0_81, %c0_82, %c183] : memref<1x8x768xbf16, #tpu.memory_space<vmem>>, vector<1x8x512xbf16>
    %109 = vector.shape_cast %108 : vector<1x8x512xbf16> to vector<8x512xbf16>
    %c18 = arith.constant 18 : index
    %c0_83 = arith.constant 0 : index
    %110 = vector.load %arg2[%c18, %c0_83] : memref<27x512xbf16, #tpu.memory_space<vmem>>, vector<1x512xbf16>
    %111 = vector.broadcast %110 : vector<1x512xbf16> to vector<8x512xbf16>
    %112 = arith.mulf %109, %111 : vector<8x512xbf16>
    %c144 = arith.constant 144 : index
    %c0_84 = arith.constant 0 : index
    %113 = vector.load %arg15[%c144, %c0_84] : memref<216x512xbf16, #tpu.memory_space<vmem>>, vector<8x512xbf16>
    tpu.vector_store %arg15[%c144, %c0_84], %112 {strides = array<i32>} : memref<216x512xbf16, #tpu.memory_space<vmem>>, vector<8x512xbf16>,
    %c0_85 = arith.constant 0 : index
    %c0_86 = arith.constant 0 : index
    %c184 = arith.constant 184 : index
    %114 = vector.load %arg1[%c0_85, %c0_86, %c184] : memref<1x8x768xbf16, #tpu.memory_space<vmem>>, vector<1x8x512xbf16>
    %115 = vector.shape_cast %114 : vector<1x8x512xbf16> to vector<8x512xbf16>
    %c19 = arith.constant 19 : index
    %c0_87 = arith.constant 0 : index
    %116 = vector.load %arg2[%c19, %c0_87] : memref<27x512xbf16, #tpu.memory_space<vmem>>, vector<1x512xbf16>
    %117 = vector.broadcast %116 : vector<1x512xbf16> to vector<8x512xbf16>
    %118 = arith.mulf %115, %117 : vector<8x512xbf16>
    %c152 = arith.constant 152 : index
    %c0_88 = arith.constant 0 : index
    %119 = vector.load %arg15[%c152, %c0_88] : memref<216x512xbf16, #tpu.memory_space<vmem>>, vector<8x512xbf16>
    tpu.vector_store %arg15[%c152, %c0_88], %118 {strides = array<i32>} : memref<216x512xbf16, #tpu.memory_space<vmem>>, vector<8x512xbf16>,
    %c0_89 = arith.constant 0 : index
    %c0_90 = arith.constant 0 : index
    %c185 = arith.constant 185 : index
    %120 = vector.load %arg1[%c0_89, %c0_90, %c185] : memref<1x8x768xbf16, #tpu.memory_space<vmem>>, vector<1x8x512xbf16>
    %121 = vector.shape_cast %120 : vector<1x8x512xbf16> to vector<8x512xbf16>
    %c20 = arith.constant 20 : index
    %c0_91 = arith.constant 0 : index
    %122 = vector.load %arg2[%c20, %c0_91] : memref<27x512xbf16, #tpu.memory_space<vmem>>, vector<1x512xbf16>
    %123 = vector.broadcast %122 : vector<1x512xbf16> to vector<8x512xbf16>
    %124 = arith.mulf %121, %123 : vector<8x512xbf16>
    %c160 = arith.constant 160 : index
    %c0_92 = arith.constant 0 : index
    %125 = vector.load %arg15[%c160, %c0_92] : memref<216x512xbf16, #tpu.memory_space<vmem>>, vector<8x512xbf16>
    tpu.vector_store %arg15[%c160, %c0_92], %124 {strides = array<i32>} : memref<216x512xbf16, #tpu.memory_space<vmem>>, vector<8x512xbf16>,
    %c0_93 = arith.constant 0 : index
    %c0_94 = arith.constant 0 : index
    %c191 = arith.constant 191 : index
    %126 = vector.load %arg1[%c0_93, %c0_94, %c191] : memref<1x8x768xbf16, #tpu.memory_space<vmem>>, vector<1x8x512xbf16>
    %127 = vector.shape_cast %126 : vector<1x8x512xbf16> to vector<8x512xbf16>
    %c21 = arith.constant 21 : index
    %c0_95 = arith.constant 0 : index
    %128 = vector.load %arg2[%c21, %c0_95] : memref<27x512xbf16, #tpu.memory_space<vmem>>, vector<1x512xbf16>
    %129 = vector.broadcast %128 : vector<1x512xbf16> to vector<8x512xbf16>
    %130 = arith.mulf %127, %129 : vector<8x512xbf16>
    %c168 = arith.constant 168 : index
    %c0_96 = arith.constant 0 : index
    %131 = vector.load %arg15[%c168, %c0_96] : memref<216x512xbf16, #tpu.memory_space<vmem>>, vector<8x512xbf16>
    tpu.vector_store %arg15[%c168, %c0_96], %130 {strides = array<i32>} : memref<216x512xbf16, #tpu.memory_space<vmem>>, vector<8x512xbf16>,
    %c0_97 = arith.constant 0 : index
    %c0_98 = arith.constant 0 : index
    %c192 = arith.constant 192 : index
    %132 = vector.load %arg1[%c0_97, %c0_98, %c192] : memref<1x8x768xbf16, #tpu.memory_space<vmem>>, vector<1x8x512xbf16>
    %133 = vector.shape_cast %132 : vector<1x8x512xbf16> to vector<8x512xbf16>
    %c22 = arith.constant 22 : index
    %c0_99 = arith.constant 0 : index
    %134 = vector.load %arg2[%c22, %c0_99] : memref<27x512xbf16, #tpu.memory_space<vmem>>, vector<1x512xbf16>
    %135 = vector.broadcast %134 : vector<1x512xbf16> to vector<8x512xbf16>
    %136 = arith.mulf %133, %135 : vector<8x512xbf16>
    %c176 = arith.constant 176 : index
    %c0_100 = arith.constant 0 : index
    %137 = vector.load %arg15[%c176, %c0_100] : memref<216x512xbf16, #tpu.memory_space<vmem>>, vector<8x512xbf16>
    tpu.vector_store %arg15[%c176, %c0_100], %136 {strides = array<i32>} : memref<216x512xbf16, #tpu.memory_space<vmem>>, vector<8x512xbf16>,
    %c0_101 = arith.constant 0 : index
    %c0_102 = arith.constant 0 : index
    %c193 = arith.constant 193 : index
    %138 = vector.load %arg1[%c0_101, %c0_102, %c193] : memref<1x8x768xbf16, #tpu.memory_space<vmem>>, vector<1x8x512xbf16>
    %139 = vector.shape_cast %138 : vector<1x8x512xbf16> to vector<8x512xbf16>
    %c23 = arith.constant 23 : index
    %c0_103 = arith.constant 0 : index
    %140 = vector.load %arg2[%c23, %c0_103] : memref<27x512xbf16, #tpu.memory_space<vmem>>, vector<1x512xbf16>
    %141 = vector.broadcast %140 : vector<1x512xbf16> to vector<8x512xbf16>
    %142 = arith.mulf %139, %141 : vector<8x512xbf16>
    %c184_104 = arith.constant 184 : index
    %c0_105 = arith.constant 0 : index
    %143 = vector.load %arg15[%c184_104, %c0_105] : memref<216x512xbf16, #tpu.memory_space<vmem>>, vector<8x512xbf16>
    tpu.vector_store %arg15[%c184_104, %c0_105], %142 {strides = array<i32>} : memref<216x512xbf16, #tpu.memory_space<vmem>>, vector<8x512xbf16>,
    %c0_106 = arith.constant 0 : index
    %c0_107 = arith.constant 0 : index
    %c199 = arith.constant 199 : index
    %144 = vector.load %arg1[%c0_106, %c0_107, %c199] : memref<1x8x768xbf16, #tpu.memory_space<vmem>>, vector<1x8x512xbf16>
    %145 = vector.shape_cast %144 : vector<1x8x512xbf16> to vector<8x512xbf16>
    %c24_108 = arith.constant 24 : index
    %c0_109 = arith.constant 0 : index
    %146 = vector.load %arg2[%c24_108, %c0_109] : memref<27x512xbf16, #tpu.memory_space<vmem>>, vector<1x512xbf16>
    %147 = vector.broadcast %146 : vector<1x512xbf16> to vector<8x512xbf16>
    %148 = arith.mulf %145, %147 : vector<8x512xbf16>
    %c192_110 = arith.constant 192 : index
    %c0_111 = arith.constant 0 : index
    %149 = vector.load %arg15[%c192_110, %c0_111] : memref<216x512xbf16, #tpu.memory_space<vmem>>, vector<8x512xbf16>
    tpu.vector_store %arg15[%c192_110, %c0_111], %148 {strides = array<i32>} : memref<216x512xbf16, #tpu.memory_space<vmem>>, vector<8x512xbf16>,
    %c0_112 = arith.constant 0 : index
    %c0_113 = arith.constant 0 : index
    %c200 = arith.constant 200 : index
    %150 = vector.load %arg1[%c0_112, %c0_113, %c200] : memref<1x8x768xbf16, #tpu.memory_space<vmem>>, vector<1x8x512xbf16>
    %151 = vector.shape_cast %150 : vector<1x8x512xbf16> to vector<8x512xbf16>
    %c25 = arith.constant 25 : index
    %c0_114 = arith.constant 0 : index
    %152 = vector.load %arg2[%c25, %c0_114] : memref<27x512xbf16, #tpu.memory_space<vmem>>, vector<1x512xbf16>
    %153 = vector.broadcast %152 : vector<1x512xbf16> to vector<8x512xbf16>
    %154 = arith.mulf %151, %153 : vector<8x512xbf16>
    %c200_115 = arith.constant 200 : index
    %c0_116 = arith.constant 0 : index
    %155 = vector.load %arg15[%c200_115, %c0_116] : memref<216x512xbf16, #tpu.memory_space<vmem>>, vector<8x512xbf16>
    tpu.vector_store %arg15[%c200_115, %c0_116], %154 {strides = array<i32>} : memref<216x512xbf16, #tpu.memory_space<vmem>>, vector<8x512xbf16>,
    %c0_117 = arith.constant 0 : index
    %c0_118 = arith.constant 0 : index
    %c201 = arith.constant 201 : index
    %156 = vector.load %arg1[%c0_117, %c0_118, %c201] : memref<1x8x768xbf16, #tpu.memory_space<vmem>>, vector<1x8x512xbf16>
    %157 = vector.shape_cast %156 : vector<1x8x512xbf16> to vector<8x512xbf16>
    %c26 = arith.constant 26 : index
    %c0_119 = arith.constant 0 : index
    %158 = vector.load %arg2[%c26, %c0_119] : memref<27x512xbf16, #tpu.memory_space<vmem>>, vector<1x512xbf16>
    %159 = vector.broadcast %158 : vector<1x512xbf16> to vector<8x512xbf16>
    %160 = arith.mulf %157, %159 : vector<8x512xbf16>
    %c208 = arith.constant 208 : index
    %c0_120 = arith.constant 0 : index
    %161 = vector.load %arg15[%c208, %c0_120] : memref<216x512xbf16, #tpu.memory_space<vmem>>, vector<8x512xbf16>
    tpu.vector_store %arg15[%c208, %c0_120], %160 {strides = array<i32>} : memref<216x512xbf16, #tpu.memory_space<vmem>>, vector<8x512xbf16>,
    %c0_121 = arith.constant 0 : index
    %c0_122 = arith.constant 0 : index
    %162 = vector.load %arg5[%c0_121, %c0_122] : memref<8x216xbf16, #tpu.memory_space<vmem>>, vector<8x216xbf16>
    %c0_123 = arith.constant 0 : index
    %c0_124 = arith.constant 0 : index
    %163 = vector.load %arg15[%c0_123, %c0_124] : memref<216x512xbf16, #tpu.memory_space<vmem>>, vector<216x512xbf16>
    %cst = arith.constant dense<0.000000e+00> : vector<8x512xf32>
    %164 = tpu.matmul %162, %163, %cst {dimension_numbers = #tpu.dot_dimension_numbers<[1], [0], [0], [1], [0, 0, 1, 1], [], []>} : vector<8x216xbf16>, vector<216x512xbf16>, vector<8x512xf32> -> vector<8x512xf32>
    %c0_125 = arith.constant 0 : index
    %c0_126 = arith.constant 0 : index
    %165 = vector.load %arg13[%c0_125, %c0_126] : memref<8x8xf32, #tpu.memory_space<vmem>>, vector<8x8xf32>
    %c0_127 = arith.constant 0 : index
    %c0_128 = arith.constant 0 : index
    %166 = vector.load %arg6[%c0_127, %c0_128] : memref<8x1xf32, #tpu.memory_space<vmem>>, vector<8x1xf32>
    %c0_129 = arith.constant 0 : index
    %c0_130 = arith.constant 0 : index
    %167 = vector.load %arg7[%c0_129, %c0_130] : memref<8x1xf32, #tpu.memory_space<vmem>>, vector<8x1xf32>
    %cst_131 = arith.constant dense<0.000000e+00> : vector<8xf32>
    %168 = vector.multi_reduction <add>, %164, %cst_131 [1] : vector<8x512xf32> to vector<8xf32>
    %169 = vector.shape_cast %168 : vector<8xf32> to vector<8x1xf32>
    %cst_132 = arith.constant dense<0.000000e+00> : vector<8x1xf32>
    %170 = tpu.matmul %165, %169, %cst_132 {dimension_numbers = #tpu.dot_dimension_numbers<[1], [0], [0], [1], [0, 0, 1, 1], [], []>} : vector<8x8xf32>, vector<8x1xf32>, vector<8x1xf32> -> vector<8x1xf32>
    %171 = vector.broadcast %170 : vector<8x1xf32> to vector<8x512xf32>
    %172 = arith.subf %164, %171 : vector<8x512xf32>
    %173 = arith.mulf %172, %172 : vector<8x512xf32>
    %cst_133 = arith.constant dense<0.000000e+00> : vector<8xf32>
    %174 = vector.multi_reduction <add>, %173, %cst_133 [1] : vector<8x512xf32> to vector<8xf32>
    %175 = vector.shape_cast %174 : vector<8xf32> to vector<8x1xf32>
    %cst_134 = arith.constant dense<0.000000e+00> : vector<8x1xf32>
    %176 = tpu.matmul %165, %175, %cst_134 {dimension_numbers = #tpu.dot_dimension_numbers<[1], [0], [0], [1], [0, 0, 1, 1], [], []>} : vector<8x8xf32>, vector<8x1xf32>, vector<8x1xf32> -> vector<8x1xf32>
    %cst_135 = arith.constant 9.99999974E-6 : f32
    %177 = vector.broadcast %cst_135 : f32 to vector<8x1xf32>
    %178 = arith.addf %176, %177 : vector<8x1xf32>
    %179 = math.rsqrt %178 : vector<8x1xf32>
    %180 = vector.broadcast %179 : vector<8x1xf32> to vector<8x512xf32>
    %181 = arith.mulf %172, %180 : vector<8x512xf32>
    %182 = vector.broadcast %166 : vector<8x1xf32> to vector<8x512xf32>
    %183 = arith.mulf %181, %182 : vector<8x512xf32>
    %184 = vector.broadcast %167 : vector<8x1xf32> to vector<8x512xf32>
    %185 = arith.addf %183, %184 : vector<8x512xf32>
    %c0_136 = arith.constant 0 : index
    %c0_137 = arith.constant 0 : index
    %c0_138 = arith.constant 0 : index
    %186 = vector.load %arg3[%c0_136, %c0_137, %c0_138] : memref<1x8x1xf32, #tpu.memory_space<vmem>>, vector<1x8x1xf32>
    %187 = vector.shape_cast %186 : vector<1x8x1xf32> to vector<8x1xf32>
    %cst_139 = arith.constant 1.000000e+00 : f32
    %188 = vector.broadcast %cst_139 : f32 to vector<8x1xf32>
    %189 = arith.addf %187, %188 : vector<8x1xf32>
    %190 = vector.broadcast %189 : vector<8x1xf32> to vector<8x512xf32>
    %191 = arith.mulf %185, %190 : vector<8x512xf32>
    %c0_140 = arith.constant 0 : index
    %c0_141 = arith.constant 0 : index
    %c0_142 = arith.constant 0 : index
    %192 = vector.load %arg4[%c0_140, %c0_141, %c0_142] : memref<1x8x1xf32, #tpu.memory_space<vmem>>, vector<1x8x1xf32>
    %193 = vector.shape_cast %192 : vector<1x8x1xf32> to vector<8x1xf32>
    %194 = vector.broadcast %193 : vector<8x1xf32> to vector<8x512xf32>
    %195 = arith.addf %191, %194 : vector<8x512xf32>
    %196 = arith.negf %195 : vector<8x512xf32>
    %197 = math.exp %196 : vector<8x512xf32>
    %cst_143 = arith.constant 1.000000e+00 : f32
    %198 = vector.broadcast %cst_143 : f32 to vector<8x512xf32>
    %199 = arith.addf %198, %197 : vector<8x512xf32>
    %200 = arith.divf %198, %199 : vector<8x512xf32>
    %201 = arith.mulf %195, %200 : vector<8x512xf32>
    %cst_144 = arith.constant 0.000000e+00 : bf16
    %202 = vector.broadcast %cst_144 : bf16 to vector<8x128xbf16>
    %c0_145 = arith.constant 0 : index
    %c0_146 = arith.constant 0 : index
    %203 = vector.load %arg17[%c0_145, %c0_146] : memref<8x768xbf16, #tpu.memory_space<vmem>>, vector<8x128xbf16>
    tpu.vector_store %arg17[%c0_145, %c0_146], %202 {strides = array<i32>} : memref<8x768xbf16, #tpu.memory_space<vmem>>, vector<8x128xbf16>,
    %c0_147 = arith.constant 0 : index
    %c640 = arith.constant 640 : index
    %204 = vector.load %arg17[%c0_147, %c640] : memref<8x768xbf16, #tpu.memory_space<vmem>>, vector<8x128xbf16>
    tpu.vector_store %arg17[%c0_147, %c640], %202 {strides = array<i32>} : memref<8x768xbf16, #tpu.memory_space<vmem>>, vector<8x128xbf16>,
    %205 = arith.truncf %201 : vector<8x512xf32> to vector<8x512xbf16>
    %c0_148 = arith.constant 0 : index
    %c128_149 = arith.constant 128 : index
    %206 = vector.load %arg17[%c0_148, %c128_149] : memref<8x768xbf16, #tpu.memory_space<vmem>>, vector<8x512xbf16>
    tpu.vector_store %arg17[%c0_148, %c128_149], %205 {strides = array<i32>} : memref<8x768xbf16, #tpu.memory_space<vmem>>, vector<8x512xbf16>,
    %c0_150 = arith.constant 0 : index
    %c55_151 = arith.constant 55 : index
    %207 = vector.load %arg17[%c0_150, %c55_151] : memref<8x768xbf16, #tpu.memory_space<vmem>>, vector<8x512xbf16>
    %c0_152 = arith.constant 0 : index
    %c0_153 = arith.constant 0 : index
    %208 = vector.load %arg2[%c0_152, %c0_153] : memref<27x512xbf16, #tpu.memory_space<vmem>>, vector<1x512xbf16>
    %209 = vector.broadcast %208 : vector<1x512xbf16> to vector<8x512xbf16>
    %210 = arith.mulf %207, %209 : vector<8x512xbf16>
    %c0_154 = arith.constant 0 : index
    %c0_155 = arith.constant 0 : index
    %211 = vector.load %arg16[%c0_154, %c0_155] : memref<216x512xbf16, #tpu.memory_space<vmem>>, vector<8x512xbf16>
    tpu.vector_store %arg16[%c0_154, %c0_155], %210 {strides = array<i32>} : memref<216x512xbf16, #tpu.memory_space<vmem>>, vector<8x512xbf16>,
    %c0_156 = arith.constant 0 : index
    %c56_157 = arith.constant 56 : index
    %212 = vector.load %arg17[%c0_156, %c56_157] : memref<8x768xbf16, #tpu.memory_space<vmem>>, vector<8x512xbf16>
    %c1_158 = arith.constant 1 : index
    %c0_159 = arith.constant 0 : index
    %213 = vector.load %arg2[%c1_158, %c0_159] : memref<27x512xbf16, #tpu.memory_space<vmem>>, vector<1x512xbf16>
    %214 = vector.broadcast %213 : vector<1x512xbf16> to vector<8x512xbf16>
    %215 = arith.mulf %212, %214 : vector<8x512xbf16>
    %c8_160 = arith.constant 8 : index
    %c0_161 = arith.constant 0 : index
    %216 = vector.load %arg16[%c8_160, %c0_161] : memref<216x512xbf16, #tpu.memory_space<vmem>>, vector<8x512xbf16>
    tpu.vector_store %arg16[%c8_160, %c0_161], %215 {strides = array<i32>} : memref<216x512xbf16, #tpu.memory_space<vmem>>, vector<8x512xbf16>,
    %c0_162 = arith.constant 0 : index
    %c57_163 = arith.constant 57 : index
    %217 = vector.load %arg17[%c0_162, %c57_163] : memref<8x768xbf16, #tpu.memory_space<vmem>>, vector<8x512xbf16>
    %c2_164 = arith.constant 2 : index
    %c0_165 = arith.constant 0 : index
    %218 = vector.load %arg2[%c2_164, %c0_165] : memref<27x512xbf16, #tpu.memory_space<vmem>>, vector<1x512xbf16>
    %219 = vector.broadcast %218 : vector<1x512xbf16> to vector<8x512xbf16>
    %220 = arith.mulf %217, %219 : vector<8x512xbf16>
    %c16_166 = arith.constant 16 : index
    %c0_167 = arith.constant 0 : index
    %221 = vector.load %arg16[%c16_166, %c0_167] : memref<216x512xbf16, #tpu.memory_space<vmem>>, vector<8x512xbf16>
    tpu.vector_store %arg16[%c16_166, %c0_167], %220 {strides = array<i32>} : memref<216x512xbf16, #tpu.memory_space<vmem>>, vector<8x512xbf16>,
    %c0_168 = arith.constant 0 : index
    %c63_169 = arith.constant 63 : index
    %222 = vector.load %arg17[%c0_168, %c63_169] : memref<8x768xbf16, #tpu.memory_space<vmem>>, vector<8x512xbf16>
    %c3_170 = arith.constant 3 : index
    %c0_171 = arith.constant 0 : index
    %223 = vector.load %arg2[%c3_170, %c0_171] : memref<27x512xbf16, #tpu.memory_space<vmem>>, vector<1x512xbf16>
    %224 = vector.broadcast %223 : vector<1x512xbf16> to vector<8x512xbf16>
    %225 = arith.mulf %222, %224 : vector<8x512xbf16>
    %c24_172 = arith.constant 24 : index
    %c0_173 = arith.constant 0 : index
    %226 = vector.load %arg16[%c24_172, %c0_173] : memref<216x512xbf16, #tpu.memory_space<vmem>>, vector<8x512xbf16>
    tpu.vector_store %arg16[%c24_172, %c0_173], %225 {strides = array<i32>} : memref<216x512xbf16, #tpu.memory_space<vmem>>, vector<8x512xbf16>,
    %c0_174 = arith.constant 0 : index
    %c64_175 = arith.constant 64 : index
    %227 = vector.load %arg17[%c0_174, %c64_175] : memref<8x768xbf16, #tpu.memory_space<vmem>>, vector<8x512xbf16>
    %c4_176 = arith.constant 4 : index
    %c0_177 = arith.constant 0 : index
    %228 = vector.load %arg2[%c4_176, %c0_177] : memref<27x512xbf16, #tpu.memory_space<vmem>>, vector<1x512xbf16>
    %229 = vector.broadcast %228 : vector<1x512xbf16> to vector<8x512xbf16>
    %230 = arith.mulf %227, %229 : vector<8x512xbf16>
    %c32_178 = arith.constant 32 : index
    %c0_179 = arith.constant 0 : index
    %231 = vector.load %arg16[%c32_178, %c0_179] : memref<216x512xbf16, #tpu.memory_space<vmem>>, vector<8x512xbf16>
    tpu.vector_store %arg16[%c32_178, %c0_179], %230 {strides = array<i32>} : memref<216x512xbf16, #tpu.memory_space<vmem>>, vector<8x512xbf16>,
    %c0_180 = arith.constant 0 : index
    %c65_181 = arith.constant 65 : index
    %232 = vector.load %arg17[%c0_180, %c65_181] : memref<8x768xbf16, #tpu.memory_space<vmem>>, vector<8x512xbf16>
    %c5_182 = arith.constant 5 : index
    %c0_183 = arith.constant 0 : index
    %233 = vector.load %arg2[%c5_182, %c0_183] : memref<27x512xbf16, #tpu.memory_space<vmem>>, vector<1x512xbf16>
    %234 = vector.broadcast %233 : vector<1x512xbf16> to vector<8x512xbf16>
    %235 = arith.mulf %232, %234 : vector<8x512xbf16>
    %c40_184 = arith.constant 40 : index
    %c0_185 = arith.constant 0 : index
    %236 = vector.load %arg16[%c40_184, %c0_185] : memref<216x512xbf16, #tpu.memory_space<vmem>>, vector<8x512xbf16>
    tpu.vector_store %arg16[%c40_184, %c0_185], %235 {strides = array<i32>} : memref<216x512xbf16, #tpu.memory_space<vmem>>, vector<8x512xbf16>,
    %c0_186 = arith.constant 0 : index
    %c71_187 = arith.constant 71 : index
    %237 = vector.load %arg17[%c0_186, %c71_187] : memref<8x768xbf16, #tpu.memory_space<vmem>>, vector<8x512xbf16>
    %c6_188 = arith.constant 6 : index
    %c0_189 = arith.constant 0 : index
    %238 = vector.load %arg2[%c6_188, %c0_189] : memref<27x512xbf16, #tpu.memory_space<vmem>>, vector<1x512xbf16>
    %239 = vector.broadcast %238 : vector<1x512xbf16> to vector<8x512xbf16>
    %240 = arith.mulf %237, %239 : vector<8x512xbf16>
    %c48_190 = arith.constant 48 : index
    %c0_191 = arith.constant 0 : index
    %241 = vector.load %arg16[%c48_190, %c0_191] : memref<216x512xbf16, #tpu.memory_space<vmem>>, vector<8x512xbf16>
    tpu.vector_store %arg16[%c48_190, %c0_191], %240 {strides = array<i32>} : memref<216x512xbf16, #tpu.memory_space<vmem>>, vector<8x512xbf16>,
    %c0_192 = arith.constant 0 : index
    %c72_193 = arith.constant 72 : index
    %242 = vector.load %arg17[%c0_192, %c72_193] : memref<8x768xbf16, #tpu.memory_space<vmem>>, vector<8x512xbf16>
    %c7_194 = arith.constant 7 : index
    %c0_195 = arith.constant 0 : index
    %243 = vector.load %arg2[%c7_194, %c0_195] : memref<27x512xbf16, #tpu.memory_space<vmem>>, vector<1x512xbf16>
    %244 = vector.broadcast %243 : vector<1x512xbf16> to vector<8x512xbf16>
    %245 = arith.mulf %242, %244 : vector<8x512xbf16>
    %c56_196 = arith.constant 56 : index
    %c0_197 = arith.constant 0 : index
    %246 = vector.load %arg16[%c56_196, %c0_197] : memref<216x512xbf16, #tpu.memory_space<vmem>>, vector<8x512xbf16>
    tpu.vector_store %arg16[%c56_196, %c0_197], %245 {strides = array<i32>} : memref<216x512xbf16, #tpu.memory_space<vmem>>, vector<8x512xbf16>,
    %c0_198 = arith.constant 0 : index
    %c73_199 = arith.constant 73 : index
    %247 = vector.load %arg17[%c0_198, %c73_199] : memref<8x768xbf16, #tpu.memory_space<vmem>>, vector<8x512xbf16>
    %c8_200 = arith.constant 8 : index
    %c0_201 = arith.constant 0 : index
    %248 = vector.load %arg2[%c8_200, %c0_201] : memref<27x512xbf16, #tpu.memory_space<vmem>>, vector<1x512xbf16>
    %249 = vector.broadcast %248 : vector<1x512xbf16> to vector<8x512xbf16>
    %250 = arith.mulf %247, %249 : vector<8x512xbf16>
    %c64_202 = arith.constant 64 : index
    %c0_203 = arith.constant 0 : index
    %251 = vector.load %arg16[%c64_202, %c0_203] : memref<216x512xbf16, #tpu.memory_space<vmem>>, vector<8x512xbf16>
    tpu.vector_store %arg16[%c64_202, %c0_203], %250 {strides = array<i32>} : memref<216x512xbf16, #tpu.memory_space<vmem>>, vector<8x512xbf16>,
    %c0_204 = arith.constant 0 : index
    %c119_205 = arith.constant 119 : index
    %252 = vector.load %arg17[%c0_204, %c119_205] : memref<8x768xbf16, #tpu.memory_space<vmem>>, vector<8x512xbf16>
    %c9_206 = arith.constant 9 : index
    %c0_207 = arith.constant 0 : index
    %253 = vector.load %arg2[%c9_206, %c0_207] : memref<27x512xbf16, #tpu.memory_space<vmem>>, vector<1x512xbf16>
    %254 = vector.broadcast %253 : vector<1x512xbf16> to vector<8x512xbf16>
    %255 = arith.mulf %252, %254 : vector<8x512xbf16>
    %c72_208 = arith.constant 72 : index
    %c0_209 = arith.constant 0 : index
    %256 = vector.load %arg16[%c72_208, %c0_209] : memref<216x512xbf16, #tpu.memory_space<vmem>>, vector<8x512xbf16>
    tpu.vector_store %arg16[%c72_208, %c0_209], %255 {strides = array<i32>} : memref<216x512xbf16, #tpu.memory_space<vmem>>, vector<8x512xbf16>,
    %c0_210 = arith.constant 0 : index
    %c120_211 = arith.constant 120 : index
    %257 = vector.load %arg17[%c0_210, %c120_211] : memref<8x768xbf16, #tpu.memory_space<vmem>>, vector<8x512xbf16>
    %c10_212 = arith.constant 10 : index
    %c0_213 = arith.constant 0 : index
    %258 = vector.load %arg2[%c10_212, %c0_213] : memref<27x512xbf16, #tpu.memory_space<vmem>>, vector<1x512xbf16>
    %259 = vector.broadcast %258 : vector<1x512xbf16> to vector<8x512xbf16>
    %260 = arith.mulf %257, %259 : vector<8x512xbf16>
    %c80_214 = arith.constant 80 : index
    %c0_215 = arith.constant 0 : index
    %261 = vector.load %arg16[%c80_214, %c0_215] : memref<216x512xbf16, #tpu.memory_space<vmem>>, vector<8x512xbf16>
    tpu.vector_store %arg16[%c80_214, %c0_215], %260 {strides = array<i32>} : memref<216x512xbf16, #tpu.memory_space<vmem>>, vector<8x512xbf16>,
    %c0_216 = arith.constant 0 : index
    %c121_217 = arith.constant 121 : index
    %262 = vector.load %arg17[%c0_216, %c121_217] : memref<8x768xbf16, #tpu.memory_space<vmem>>, vector<8x512xbf16>
    %c11_218 = arith.constant 11 : index
    %c0_219 = arith.constant 0 : index
    %263 = vector.load %arg2[%c11_218, %c0_219] : memref<27x512xbf16, #tpu.memory_space<vmem>>, vector<1x512xbf16>
    %264 = vector.broadcast %263 : vector<1x512xbf16> to vector<8x512xbf16>
    %265 = arith.mulf %262, %264 : vector<8x512xbf16>
    %c88_220 = arith.constant 88 : index
    %c0_221 = arith.constant 0 : index
    %266 = vector.load %arg16[%c88_220, %c0_221] : memref<216x512xbf16, #tpu.memory_space<vmem>>, vector<8x512xbf16>
    tpu.vector_store %arg16[%c88_220, %c0_221], %265 {strides = array<i32>} : memref<216x512xbf16, #tpu.memory_space<vmem>>, vector<8x512xbf16>,
    %c0_222 = arith.constant 0 : index
    %c127_223 = arith.constant 127 : index
    %267 = vector.load %arg17[%c0_222, %c127_223] : memref<8x768xbf16, #tpu.memory_space<vmem>>, vector<8x512xbf16>
    %c12_224 = arith.constant 12 : index
    %c0_225 = arith.constant 0 : index
    %268 = vector.load %arg2[%c12_224, %c0_225] : memref<27x512xbf16, #tpu.memory_space<vmem>>, vector<1x512xbf16>
    %269 = vector.broadcast %268 : vector<1x512xbf16> to vector<8x512xbf16>
    %270 = arith.mulf %267, %269 : vector<8x512xbf16>
    %c96_226 = arith.constant 96 : index
    %c0_227 = arith.constant 0 : index
    %271 = vector.load %arg16[%c96_226, %c0_227] : memref<216x512xbf16, #tpu.memory_space<vmem>>, vector<8x512xbf16>
    tpu.vector_store %arg16[%c96_226, %c0_227], %270 {strides = array<i32>} : memref<216x512xbf16, #tpu.memory_space<vmem>>, vector<8x512xbf16>,
    %c0_228 = arith.constant 0 : index
    %c128_229 = arith.constant 128 : index
    %272 = vector.load %arg17[%c0_228, %c128_229] : memref<8x768xbf16, #tpu.memory_space<vmem>>, vector<8x512xbf16>
    %c13_230 = arith.constant 13 : index
    %c0_231 = arith.constant 0 : index
    %273 = vector.load %arg2[%c13_230, %c0_231] : memref<27x512xbf16, #tpu.memory_space<vmem>>, vector<1x512xbf16>
    %274 = vector.broadcast %273 : vector<1x512xbf16> to vector<8x512xbf16>
    %275 = arith.mulf %272, %274 : vector<8x512xbf16>
    %c104_232 = arith.constant 104 : index
    %c0_233 = arith.constant 0 : index
    %276 = vector.load %arg16[%c104_232, %c0_233] : memref<216x512xbf16, #tpu.memory_space<vmem>>, vector<8x512xbf16>
    tpu.vector_store %arg16[%c104_232, %c0_233], %275 {strides = array<i32>} : memref<216x512xbf16, #tpu.memory_space<vmem>>, vector<8x512xbf16>,
    %c0_234 = arith.constant 0 : index
    %c129_235 = arith.constant 129 : index
    %277 = vector.load %arg17[%c0_234, %c129_235] : memref<8x768xbf16, #tpu.memory_space<vmem>>, vector<8x512xbf16>
    %c14_236 = arith.constant 14 : index
    %c0_237 = arith.constant 0 : index
    %278 = vector.load %arg2[%c14_236, %c0_237] : memref<27x512xbf16, #tpu.memory_space<vmem>>, vector<1x512xbf16>
    %279 = vector.broadcast %278 : vector<1x512xbf16> to vector<8x512xbf16>
    %280 = arith.mulf %277, %279 : vector<8x512xbf16>
    %c112_238 = arith.constant 112 : index
    %c0_239 = arith.constant 0 : index
    %281 = vector.load %arg16[%c112_238, %c0_239] : memref<216x512xbf16, #tpu.memory_space<vmem>>, vector<8x512xbf16>
    tpu.vector_store %arg16[%c112_238, %c0_239], %280 {strides = array<i32>} : memref<216x512xbf16, #tpu.memory_space<vmem>>, vector<8x512xbf16>,
    %c0_240 = arith.constant 0 : index
    %c135_241 = arith.constant 135 : index
    %282 = vector.load %arg17[%c0_240, %c135_241] : memref<8x768xbf16, #tpu.memory_space<vmem>>, vector<8x512xbf16>
    %c15_242 = arith.constant 15 : index
    %c0_243 = arith.constant 0 : index
    %283 = vector.load %arg2[%c15_242, %c0_243] : memref<27x512xbf16, #tpu.memory_space<vmem>>, vector<1x512xbf16>
    %284 = vector.broadcast %283 : vector<1x512xbf16> to vector<8x512xbf16>
    %285 = arith.mulf %282, %284 : vector<8x512xbf16>
    %c120_244 = arith.constant 120 : index
    %c0_245 = arith.constant 0 : index
    %286 = vector.load %arg16[%c120_244, %c0_245] : memref<216x512xbf16, #tpu.memory_space<vmem>>, vector<8x512xbf16>
    tpu.vector_store %arg16[%c120_244, %c0_245], %285 {strides = array<i32>} : memref<216x512xbf16, #tpu.memory_space<vmem>>, vector<8x512xbf16>,
    %c0_246 = arith.constant 0 : index
    %c136_247 = arith.constant 136 : index
    %287 = vector.load %arg17[%c0_246, %c136_247] : memref<8x768xbf16, #tpu.memory_space<vmem>>, vector<8x512xbf16>
    %c16_248 = arith.constant 16 : index
    %c0_249 = arith.constant 0 : index
    %288 = vector.load %arg2[%c16_248, %c0_249] : memref<27x512xbf16, #tpu.memory_space<vmem>>, vector<1x512xbf16>
    %289 = vector.broadcast %288 : vector<1x512xbf16> to vector<8x512xbf16>
    %290 = arith.mulf %287, %289 : vector<8x512xbf16>
    %c128_250 = arith.constant 128 : index
    %c0_251 = arith.constant 0 : index
    %291 = vector.load %arg16[%c128_250, %c0_251] : memref<216x512xbf16, #tpu.memory_space<vmem>>, vector<8x512xbf16>
    tpu.vector_store %arg16[%c128_250, %c0_251], %290 {strides = array<i32>} : memref<216x512xbf16, #tpu.memory_space<vmem>>, vector<8x512xbf16>,
    %c0_252 = arith.constant 0 : index
    %c137_253 = arith.constant 137 : index
    %292 = vector.load %arg17[%c0_252, %c137_253] : memref<8x768xbf16, #tpu.memory_space<vmem>>, vector<8x512xbf16>
    %c17_254 = arith.constant 17 : index
    %c0_255 = arith.constant 0 : index
    %293 = vector.load %arg2[%c17_254, %c0_255] : memref<27x512xbf16, #tpu.memory_space<vmem>>, vector<1x512xbf16>
    %294 = vector.broadcast %293 : vector<1x512xbf16> to vector<8x512xbf16>
    %295 = arith.mulf %292, %294 : vector<8x512xbf16>
    %c136_256 = arith.constant 136 : index
    %c0_257 = arith.constant 0 : index
    %296 = vector.load %arg16[%c136_256, %c0_257] : memref<216x512xbf16, #tpu.memory_space<vmem>>, vector<8x512xbf16>
    tpu.vector_store %arg16[%c136_256, %c0_257], %295 {strides = array<i32>} : memref<216x512xbf16, #tpu.memory_space<vmem>>, vector<8x512xbf16>,
    %c0_258 = arith.constant 0 : index
    %c183_259 = arith.constant 183 : index
    %297 = vector.load %arg17[%c0_258, %c183_259] : memref<8x768xbf16, #tpu.memory_space<vmem>>, vector<8x512xbf16>
    %c18_260 = arith.constant 18 : index
    %c0_261 = arith.constant 0 : index
    %298 = vector.load %arg2[%c18_260, %c0_261] : memref<27x512xbf16, #tpu.memory_space<vmem>>, vector<1x512xbf16>
    %299 = vector.broadcast %298 : vector<1x512xbf16> to vector<8x512xbf16>
    %300 = arith.mulf %297, %299 : vector<8x512xbf16>
    %c144_262 = arith.constant 144 : index
    %c0_263 = arith.constant 0 : index
    %301 = vector.load %arg16[%c144_262, %c0_263] : memref<216x512xbf16, #tpu.memory_space<vmem>>, vector<8x512xbf16>
    tpu.vector_store %arg16[%c144_262, %c0_263], %300 {strides = array<i32>} : memref<216x512xbf16, #tpu.memory_space<vmem>>, vector<8x512xbf16>,
    %c0_264 = arith.constant 0 : index
    %c184_265 = arith.constant 184 : index
    %302 = vector.load %arg17[%c0_264, %c184_265] : memref<8x768xbf16, #tpu.memory_space<vmem>>, vector<8x512xbf16>
    %c19_266 = arith.constant 19 : index
    %c0_267 = arith.constant 0 : index
    %303 = vector.load %arg2[%c19_266, %c0_267] : memref<27x512xbf16, #tpu.memory_space<vmem>>, vector<1x512xbf16>
    %304 = vector.broadcast %303 : vector<1x512xbf16> to vector<8x512xbf16>
    %305 = arith.mulf %302, %304 : vector<8x512xbf16>
    %c152_268 = arith.constant 152 : index
    %c0_269 = arith.constant 0 : index
    %306 = vector.load %arg16[%c152_268, %c0_269] : memref<216x512xbf16, #tpu.memory_space<vmem>>, vector<8x512xbf16>
    tpu.vector_store %arg16[%c152_268, %c0_269], %305 {strides = array<i32>} : memref<216x512xbf16, #tpu.memory_space<vmem>>, vector<8x512xbf16>,
    %c0_270 = arith.constant 0 : index
    %c185_271 = arith.constant 185 : index
    %307 = vector.load %arg17[%c0_270, %c185_271] : memref<8x768xbf16, #tpu.memory_space<vmem>>, vector<8x512xbf16>
    %c20_272 = arith.constant 20 : index
    %c0_273 = arith.constant 0 : index
    %308 = vector.load %arg2[%c20_272, %c0_273] : memref<27x512xbf16, #tpu.memory_space<vmem>>, vector<1x512xbf16>
    %309 = vector.broadcast %308 : vector<1x512xbf16> to vector<8x512xbf16>
    %310 = arith.mulf %307, %309 : vector<8x512xbf16>
    %c160_274 = arith.constant 160 : index
    %c0_275 = arith.constant 0 : index
    %311 = vector.load %arg16[%c160_274, %c0_275] : memref<216x512xbf16, #tpu.memory_space<vmem>>, vector<8x512xbf16>
    tpu.vector_store %arg16[%c160_274, %c0_275], %310 {strides = array<i32>} : memref<216x512xbf16, #tpu.memory_space<vmem>>, vector<8x512xbf16>,
    %c0_276 = arith.constant 0 : index
    %c191_277 = arith.constant 191 : index
    %312 = vector.load %arg17[%c0_276, %c191_277] : memref<8x768xbf16, #tpu.memory_space<vmem>>, vector<8x512xbf16>
    %c21_278 = arith.constant 21 : index
    %c0_279 = arith.constant 0 : index
    %313 = vector.load %arg2[%c21_278, %c0_279] : memref<27x512xbf16, #tpu.memory_space<vmem>>, vector<1x512xbf16>
    %314 = vector.broadcast %313 : vector<1x512xbf16> to vector<8x512xbf16>
    %315 = arith.mulf %312, %314 : vector<8x512xbf16>
    %c168_280 = arith.constant 168 : index
    %c0_281 = arith.constant 0 : index
    %316 = vector.load %arg16[%c168_280, %c0_281] : memref<216x512xbf16, #tpu.memory_space<vmem>>, vector<8x512xbf16>
    tpu.vector_store %arg16[%c168_280, %c0_281], %315 {strides = array<i32>} : memref<216x512xbf16, #tpu.memory_space<vmem>>, vector<8x512xbf16>,
    %c0_282 = arith.constant 0 : index
    %c192_283 = arith.constant 192 : index
    %317 = vector.load %arg17[%c0_282, %c192_283] : memref<8x768xbf16, #tpu.memory_space<vmem>>, vector<8x512xbf16>
    %c22_284 = arith.constant 22 : index
    %c0_285 = arith.constant 0 : index
    %318 = vector.load %arg2[%c22_284, %c0_285] : memref<27x512xbf16, #tpu.memory_space<vmem>>, vector<1x512xbf16>
    %319 = vector.broadcast %318 : vector<1x512xbf16> to vector<8x512xbf16>
    %320 = arith.mulf %317, %319 : vector<8x512xbf16>
    %c176_286 = arith.constant 176 : index
    %c0_287 = arith.constant 0 : index
    %321 = vector.load %arg16[%c176_286, %c0_287] : memref<216x512xbf16, #tpu.memory_space<vmem>>, vector<8x512xbf16>
    tpu.vector_store %arg16[%c176_286, %c0_287], %320 {strides = array<i32>} : memref<216x512xbf16, #tpu.memory_space<vmem>>, vector<8x512xbf16>,
    %c0_288 = arith.constant 0 : index
    %c193_289 = arith.constant 193 : index
    %322 = vector.load %arg17[%c0_288, %c193_289] : memref<8x768xbf16, #tpu.memory_space<vmem>>, vector<8x512xbf16>
    %c23_290 = arith.constant 23 : index
    %c0_291 = arith.constant 0 : index
    %323 = vector.load %arg2[%c23_290, %c0_291] : memref<27x512xbf16, #tpu.memory_space<vmem>>, vector<1x512xbf16>
    %324 = vector.broadcast %323 : vector<1x512xbf16> to vector<8x512xbf16>
    %325 = arith.mulf %322, %324 : vector<8x512xbf16>
    %c184_292 = arith.constant 184 : index
    %c0_293 = arith.constant 0 : index
    %326 = vector.load %arg16[%c184_292, %c0_293] : memref<216x512xbf16, #tpu.memory_space<vmem>>, vector<8x512xbf16>
    tpu.vector_store %arg16[%c184_292, %c0_293], %325 {strides = array<i32>} : memref<216x512xbf16, #tpu.memory_space<vmem>>, vector<8x512xbf16>,
    %c0_294 = arith.constant 0 : index
    %c199_295 = arith.constant 199 : index
    %327 = vector.load %arg17[%c0_294, %c199_295] : memref<8x768xbf16, #tpu.memory_space<vmem>>, vector<8x512xbf16>
    %c24_296 = arith.constant 24 : index
    %c0_297 = arith.constant 0 : index
    %328 = vector.load %arg2[%c24_296, %c0_297] : memref<27x512xbf16, #tpu.memory_space<vmem>>, vector<1x512xbf16>
    %329 = vector.broadcast %328 : vector<1x512xbf16> to vector<8x512xbf16>
    %330 = arith.mulf %327, %329 : vector<8x512xbf16>
    %c192_298 = arith.constant 192 : index
    %c0_299 = arith.constant 0 : index
    %331 = vector.load %arg16[%c192_298, %c0_299] : memref<216x512xbf16, #tpu.memory_space<vmem>>, vector<8x512xbf16>
    tpu.vector_store %arg16[%c192_298, %c0_299], %330 {strides = array<i32>} : memref<216x512xbf16, #tpu.memory_space<vmem>>, vector<8x512xbf16>,
    %c0_300 = arith.constant 0 : index
    %c200_301 = arith.constant 200 : index
    %332 = vector.load %arg17[%c0_300, %c200_301] : memref<8x768xbf16, #tpu.memory_space<vmem>>, vector<8x512xbf16>
    %c25_302 = arith.constant 25 : index
    %c0_303 = arith.constant 0 : index
    %333 = vector.load %arg2[%c25_302, %c0_303] : memref<27x512xbf16, #tpu.memory_space<vmem>>, vector<1x512xbf16>
    %334 = vector.broadcast %333 : vector<1x512xbf16> to vector<8x512xbf16>
    %335 = arith.mulf %332, %334 : vector<8x512xbf16>
    %c200_304 = arith.constant 200 : index
    %c0_305 = arith.constant 0 : index
    %336 = vector.load %arg16[%c200_304, %c0_305] : memref<216x512xbf16, #tpu.memory_space<vmem>>, vector<8x512xbf16>
    tpu.vector_store %arg16[%c200_304, %c0_305], %335 {strides = array<i32>} : memref<216x512xbf16, #tpu.memory_space<vmem>>, vector<8x512xbf16>,
    %c0_306 = arith.constant 0 : index
    %c201_307 = arith.constant 201 : index
    %337 = vector.load %arg17[%c0_306, %c201_307] : memref<8x768xbf16, #tpu.memory_space<vmem>>, vector<8x512xbf16>
    %c26_308 = arith.constant 26 : index
    %c0_309 = arith.constant 0 : index
    %338 = vector.load %arg2[%c26_308, %c0_309] : memref<27x512xbf16, #tpu.memory_space<vmem>>, vector<1x512xbf16>
    %339 = vector.broadcast %338 : vector<1x512xbf16> to vector<8x512xbf16>
    %340 = arith.mulf %337, %339 : vector<8x512xbf16>
    %c208_310 = arith.constant 208 : index
    %c0_311 = arith.constant 0 : index
    %341 = vector.load %arg16[%c208_310, %c0_311] : memref<216x512xbf16, #tpu.memory_space<vmem>>, vector<8x512xbf16>
    tpu.vector_store %arg16[%c208_310, %c0_311], %340 {strides = array<i32>} : memref<216x512xbf16, #tpu.memory_space<vmem>>, vector<8x512xbf16>,
    %c0_312 = arith.constant 0 : index
    %c0_313 = arith.constant 0 : index
    %342 = vector.load %arg8[%c0_312, %c0_313] : memref<8x216xbf16, #tpu.memory_space<vmem>>, vector<8x216xbf16>
    %c0_314 = arith.constant 0 : index
    %c0_315 = arith.constant 0 : index
    %343 = vector.load %arg16[%c0_314, %c0_315] : memref<216x512xbf16, #tpu.memory_space<vmem>>, vector<216x512xbf16>
    %cst_316 = arith.constant dense<0.000000e+00> : vector<8x512xf32>
    %344 = tpu.matmul %342, %343, %cst_316 {dimension_numbers = #tpu.dot_dimension_numbers<[1], [0], [0], [1], [0, 0, 1, 1], [], []>} : vector<8x216xbf16>, vector<216x512xbf16>, vector<8x512xf32> -> vector<8x512xf32>
    %c0_317 = arith.constant 0 : index
    %c0_318 = arith.constant 0 : index
    %345 = vector.load %arg13[%c0_317, %c0_318] : memref<8x8xf32, #tpu.memory_space<vmem>>, vector<8x8xf32>
    %c0_319 = arith.constant 0 : index
    %c0_320 = arith.constant 0 : index
    %346 = vector.load %arg9[%c0_319, %c0_320] : memref<8x1xf32, #tpu.memory_space<vmem>>, vector<8x1xf32>
    %c0_321 = arith.constant 0 : index
    %c0_322 = arith.constant 0 : index
    %347 = vector.load %arg10[%c0_321, %c0_322] : memref<8x1xf32, #tpu.memory_space<vmem>>, vector<8x1xf32>
    %cst_323 = arith.constant dense<0.000000e+00> : vector<8xf32>
    %348 = vector.multi_reduction <add>, %344, %cst_323 [1] : vector<8x512xf32> to vector<8xf32>
    %349 = vector.shape_cast %348 : vector<8xf32> to vector<8x1xf32>
    %cst_324 = arith.constant dense<0.000000e+00> : vector<8x1xf32>
    %350 = tpu.matmul %345, %349, %cst_324 {dimension_numbers = #tpu.dot_dimension_numbers<[1], [0], [0], [1], [0, 0, 1, 1], [], []>} : vector<8x8xf32>, vector<8x1xf32>, vector<8x1xf32> -> vector<8x1xf32>
    %351 = vector.broadcast %350 : vector<8x1xf32> to vector<8x512xf32>
    %352 = arith.subf %344, %351 : vector<8x512xf32>
    %353 = arith.mulf %352, %352 : vector<8x512xf32>
    %cst_325 = arith.constant dense<0.000000e+00> : vector<8xf32>
    %354 = vector.multi_reduction <add>, %353, %cst_325 [1] : vector<8x512xf32> to vector<8xf32>
    %355 = vector.shape_cast %354 : vector<8xf32> to vector<8x1xf32>
    %cst_326 = arith.constant dense<0.000000e+00> : vector<8x1xf32>
    %356 = tpu.matmul %345, %355, %cst_326 {dimension_numbers = #tpu.dot_dimension_numbers<[1], [0], [0], [1], [0, 0, 1, 1], [], []>} : vector<8x8xf32>, vector<8x1xf32>, vector<8x1xf32> -> vector<8x1xf32>
    %cst_327 = arith.constant 9.99999974E-6 : f32
    %357 = vector.broadcast %cst_327 : f32 to vector<8x1xf32>
    %358 = arith.addf %356, %357 : vector<8x1xf32>
    %359 = math.rsqrt %358 : vector<8x1xf32>
    %360 = vector.broadcast %359 : vector<8x1xf32> to vector<8x512xf32>
    %361 = arith.mulf %352, %360 : vector<8x512xf32>
    %362 = vector.broadcast %346 : vector<8x1xf32> to vector<8x512xf32>
    %363 = arith.mulf %361, %362 : vector<8x512xf32>
    %364 = vector.broadcast %347 : vector<8x1xf32> to vector<8x512xf32>
    %365 = arith.addf %363, %364 : vector<8x512xf32>
    %366 = arith.negf %365 : vector<8x512xf32>
    %367 = math.exp %366 : vector<8x512xf32>
    %cst_328 = arith.constant 1.000000e+00 : f32
    %368 = vector.broadcast %cst_328 : f32 to vector<8x512xf32>
    %369 = arith.addf %368, %367 : vector<8x512xf32>
    %370 = arith.divf %368, %369 : vector<8x512xf32>
    %371 = arith.mulf %365, %370 : vector<8x512xf32>
    %c0_329 = arith.constant 0 : index
    %c0_330 = arith.constant 0 : index
    %c128_331 = arith.constant 128 : index
    %372 = vector.load %arg1[%c0_329, %c0_330, %c128_331] : memref<1x8x768xbf16, #tpu.memory_space<vmem>>, vector<1x8x512xbf16>
    %373 = vector.shape_cast %372 : vector<1x8x512xbf16> to vector<8x512xbf16>
    %c0_332 = arith.constant 0 : index
    %c0_333 = arith.constant 0 : index
    %374 = vector.load %arg11[%c0_332, %c0_333] : memref<8x8xbf16, #tpu.memory_space<vmem>>, vector<8x8xbf16>
    %cst_334 = arith.constant dense<0.000000e+00> : vector<8x512xf32>
    %375 = tpu.matmul %374, %373, %cst_334 {dimension_numbers = #tpu.dot_dimension_numbers<[1], [0], [0], [1], [0, 0, 1, 1], [], []>} : vector<8x8xbf16>, vector<8x512xbf16>, vector<8x512xf32> -> vector<8x512xf32>
    %c0_335 = arith.constant 0 : index
    %c0_336 = arith.constant 0 : index
    %376 = vector.load %arg12[%c0_335, %c0_336] : memref<8x1xf32, #tpu.memory_space<vmem>>, vector<8x1xf32>
    %377 = vector.broadcast %376 : vector<8x1xf32> to vector<8x512xf32>
    %378 = arith.addf %375, %377 : vector<8x512xf32>
    %379 = arith.addf %371, %378 : vector<8x512xf32>
    %380 = arith.truncf %379 : vector<8x512xf32> to vector<8x512xbf16>
    %c0_337 = arith.constant 0 : index
    %c0_338 = arith.constant 0 : index
    %c0_339 = arith.constant 0 : index
    %381 = vector.load %arg14[%c0_337, %c0_338, %c0_339] : memref<1x8x512xbf16, #tpu.memory_space<vmem>>, vector<1x8x512xbf16>
    %382 = vector.shape_cast %381 : vector<1x8x512xbf16> to vector<8x512xbf16>
    %383 = vector.shape_cast %380 : vector<8x512xbf16> to vector<1x8x512xbf16>
    tpu.vector_store %arg14[%c0_337, %c0_338, %c0_339], %383 {strides = array<i32>} : memref<1x8x512xbf16, #tpu.memory_space<vmem>>, vector<1x8x512xbf16>,
    return
  }
  func.func @transform_0(%arg0: i32) -> (i32, i32, i32) {
    %c0_i32 = arith.constant 0 : i32
    %c0_i32_0 = arith.constant 0 : i32
    %c0_i32_1 = arith.constant 0 : i32
    return %arg0, %c0_i32, %c0_i32_0 : i32, i32, i32
  }
  func.func @transform_1(%arg0: i32) -> (i32, i32) {
    %c0_i32 = arith.constant 0 : i32
    %c0_i32_0 = arith.constant 0 : i32
    %c0_i32_1 = arith.constant 0 : i32
    return %c0_i32, %c0_i32_0 : i32, i32
  }
  func.func @transform_2(%arg0: i32) -> (i32, i32, i32) {
    %c0_i32 = arith.constant 0 : i32
    %c0_i32_0 = arith.constant 0 : i32
    %c0_i32_1 = arith.constant 0 : i32
    return %arg0, %c0_i32, %c0_i32_0 : i32, i32, i32
  }
  func.func @transform_3(%arg0: i32) -> (i32, i32, i32) {
    %c0_i32 = arith.constant 0 : i32
    %c0_i32_0 = arith.constant 0 : i32
    %c0_i32_1 = arith.constant 0 : i32
    return %arg0, %c0_i32, %c0_i32_0 : i32, i32, i32
  }
  func.func @transform_4(%arg0: i32) -> (i32, i32) {
    %c0_i32 = arith.constant 0 : i32
    %c0_i32_0 = arith.constant 0 : i32
    %c0_i32_1 = arith.constant 0 : i32
    return %c0_i32, %c0_i32_0 : i32, i32
  }
  func.func @transform_5(%arg0: i32) -> (i32, i32) {
    %c0_i32 = arith.constant 0 : i32
    %c0_i32_0 = arith.constant 0 : i32
    %c0_i32_1 = arith.constant 0 : i32
    return %c0_i32, %c0_i32_0 : i32, i32
  }
  func.func @transform_6(%arg0: i32) -> (i32, i32) {
    %c0_i32 = arith.constant 0 : i32
    %c0_i32_0 = arith.constant 0 : i32
    %c0_i32_1 = arith.constant 0 : i32
    return %c0_i32, %c0_i32_0 : i32, i32
  }
  func.func @transform_7(%arg0: i32) -> (i32, i32) {
    %c0_i32 = arith.constant 0 : i32
    %c0_i32_0 = arith.constant 0 : i32
    %c0_i32_1 = arith.constant 0 : i32
    return %c0_i32, %c0_i32_0 : i32, i32
  }
  func.func @transform_8(%arg0: i32) -> (i32, i32) {
    %c0_i32 = arith.constant 0 : i32
    %c0_i32_0 = arith.constant 0 : i32
    %c0_i32_1 = arith.constant 0 : i32
    return %c0_i32, %c0_i32_0 : i32, i32
  }
  func.func @transform_9(%arg0: i32) -> (i32, i32) {
    %c0_i32 = arith.constant 0 : i32
    %c0_i32_0 = arith.constant 0 : i32
    %c0_i32_1 = arith.constant 0 : i32
    return %c0_i32, %c0_i32_0 : i32, i32
  }
  func.func @transform_10(%arg0: i32) -> (i32, i32) {
    %c0_i32 = arith.constant 0 : i32
    %c0_i32_0 = arith.constant 0 : i32
    %c0_i32_1 = arith.constant 0 : i32
    return %c0_i32, %c0_i32_0 : i32, i32
  }
  func.func @transform_11(%arg0: i32) -> (i32, i32) {
    %c0_i32 = arith.constant 0 : i32
    %c0_i32_0 = arith.constant 0 : i32
    %c0_i32_1 = arith.constant 0 : i32
    return %c0_i32, %c0_i32_0 : i32, i32
  }
  func.func @transform_12(%arg0: i32) -> (i32, i32) {
    %c0_i32 = arith.constant 0 : i32
    %c0_i32_0 = arith.constant 0 : i32
    %c0_i32_1 = arith.constant 0 : i32
    return %c0_i32, %c0_i32_0 : i32, i32
  }
  func.func @transform_13(%arg0: i32) -> (i32, i32, i32) {
    %c0_i32 = arith.constant 0 : i32
    %c0_i32_0 = arith.constant 0 : i32
    %c0_i32_1 = arith.constant 0 : i32
    return %arg0, %c0_i32, %c0_i32_0 : i32, i32, i32
  }
}

</mosaic_0001>

<bundles_post_ra>
// kernel: tpu_custom_call.1
= control target key start
LH: loop header
LB: loop body
LE: loop exit
PB: predicated region body
PF: predicated region fallthrough
CT: control target
= control target key end

     0   :  { %s11197_s0 = inlined_call_operand.hbm [shape: bf16[2,8,768], index: 0, kind: input, shape index: {}]   ;;  %s11198_s1 = inlined_call_operand.hbm [shape: bf16[27,512], index: 1, kind: input, shape index: {}]   ;;  %s11199_s2 = inlined_call_operand.vmem [shape: f32[2,8,1], index: 2, kind: input, shape index: {}]   ;;  %s11200_s3 = inlined_call_operand.vmem [shape: f32[2,8,1], index: 3, kind: input, shape index: {}]   ;;  %s11201_s4 = inlined_call_operand.vmem [shape: bf16[8,216], index: 4, kind: input, shape index: {}]   ;;  %s11202_s5 = inlined_call_operand.vmem [shape: f32[8,1], index: 5, kind: input, shape index: {}]   ;;  %s11203_s6 = inlined_call_operand.vmem [shape: f32[8,1], index: 6, kind: input, shape index: {}]   ;;  %s11204_s7 = inlined_call_operand.vmem [shape: bf16[8,216], index: 7, kind: input, shape index: {}]   ;;  %s11205_s8 = inlined_call_operand.vmem [shape: f32[8,1], index: 8, kind: input, shape index: {}]   ;;  %s11206_s9 = inlined_call_operand.vmem [shape: f32[8,1], index: 9, kind: input, shape index: {}]   ;;  %s11207_s10 = inlined_call_operand.vmem [shape: bf16[8,8], index: 10, kind: input, shape index: {}]   ;;  %s11208_s11 = inlined_call_operand.vmem [shape: f32[8,1], index: 11, kind: input, shape index: {}]   ;;  %s11209_s12 = inlined_call_operand.vmem [shape: f32[8,8], index: 12, kind: input, shape index: {}]   ;;  %s11210_s13 = inlined_call_operand.hbm [shape: bf16[2,8,512], index: 13, kind: output, shape index: {}]  }
   0x1   :  { %11434 = sst [smem:[#allocation114_spill]] %s11198_s1 }
   0x2   :  { %11435 = sst [smem:[#allocation115_spill]] %s11208_s11 }
   0x3   :  { %11436 = sst [smem:[#allocation116_spill]] %s11210_s13 }
   0x4   :  { %18 = vsyncpa [#allocation6], 0 }
   0x5   :  { %20 = vsyncpa [#allocation6 + $0x1], 0 }
   0x6   :  { %21 = vsyncpa [#allocation9], 0 }
   0x7   :  { %22 = vsyncpa [#allocation7], 0 }
   0x8   :  { %24 = vsyncpa [#allocation7 + $0x1], 0  ;;  %s8257_s25 = smov 0   ;;  %s8259_s26 = smov 0  }
   0x9   :  { %s8261_s27 = smov 0   ;;  %s8263_s28 = smov 0  }
   0xa LB: > { %11437 = sst [smem:[#allocation14_spill]] %s8152_s25  ;;  %s8281_s15 = sadd.s32 4294967295, %s8164_s28   ;;  %s8164_s28 = sphi %s8263_s28, %s11963_s28   ;;  %s8160_s27 = sphi %s8261_s27, %s11965_s27   ;;  %s8156_s26 = sphi %s8259_s26, %s11967_s26   ;;  %s8152_s25 = sphi %s8257_s25, %s11966_s25  }
   0xb   : > { %11438 = sst [smem:[#allocation15_spill]] %s8160_s27  ;;  %p6835_p0 = scmp.ge.s32.totalorder %s8164_s28, 1 }
   0xc   : > { %11439 = sst [smem:[#allocation16_spill]] %s8164_s28  ;;  %p51_p1 = scmp.eq.s32.totalorder %s8281_s15, 0 }
   0xd   : > { %s11440_s1 = sld [smem:[#allocation114_spill]]  ;;  %p349_p2 = scmp.lt.s32.totalorder %s8164_s28, 3 }
   0xe   : > { %s8166_s17 = smov [#allocation8]   ;;  %s8167_s19 = smov 256  }
   0xf   : > { %p8286_p3 = pnand %p6835_p0, %p349_p2  ;;  %s362_s18 = sshll.u32 %s8166_s17, 4  ;;  %s363_s18 = int_to_ptr.vmem [resolvable:$true] %s362_s18 }
  0x10   : > { %s8168_s20 = smov 16   ;;  %s6834_s21 = sadd.s32 4294967294, %s8164_s28  }
  0x11   : > { %p7405_p4 = pneg %p8286_p3  ;;  %s8297_s22 = sadd.s32 1, %s8164_s28  }
  0x12   : > { %11442 = sst [smem:[#allocation17_spill]] %s8297_s22  ;;  %s37_s23 = sadd.s32 1, %s8160_s27 }
  0x13   : > { %s360_s14 = sshll.u32 %s11440_s1, 4  ;;  %p7406_p6 = pnand %p7405_p4, %p51_p1  ;;  %s361_s14 = int_to_ptr.hbm [resolvable:$true] %s360_s14 }
  0x14   : > { %s34_s24 = ssub.s32 %s8164_s28, %s8297_s22  ;;  %p44_p7 = scmp.ne.s32.totalorder %s8160_s27, %s8156_s26 }
  0x15   : > { %7408 = dma.hbm_to_vmem [thread:$0]  (!%p7406_p6), %s361_s14, 1024, %s363_s18, [#allocation9], %s8167_s19, %s8167_s19, %s8168_s20  }
  0x16   : > { %p35_p8 = scmp.eq.s32.totalorder %s34_s24, 0  ;;  %p45_p9 = scmp.eq.s32.totalorder %s8164_s28, 0 }
  0x17   : > { %p50_p10 = scmp.ne.s32.totalorder %s8156_s26, %s8152_s25  ;;  %p336_p11 = scmp.eq.s32.totalorder %s8281_s15, 1 }
  0x18   : > { %s8309_s29 = scalar_select %p35_p8, %s8160_s27, %s37_s23  }
  0x19   : > { %p46_p12 = por %p45_p9, %p44_p7  ;;  %p8313_p13 = por %p51_p1, %p50_p10 }
  0x1a   : > { %11443 = sst [smem:[#allocation18_spill]] %s8309_s29  ;;  %p8317_p0 = por %p336_p11, %p44_p7 }
  0x1b   : > { %p342_p2 = scmp.eq.s32.totalorder %s6834_s21, 1  ;;  %p7418_p4 = scmp.lt.s32.totalorder %s8164_s28, 2 }
  0x1c   : > { %s11445_s14 = scalar_select %p8317_p0, 1, 0 }
  0x1d   : > { %s403_s17 = sand.u32 1, %s8160_s27   ;;  %p8323_p6 = por %p342_p2, %p50_p10 }
  0x1e   : > { %11446 = sst [smem:[#allocation19_spill]] %s11445_s14  ;;  %s7394_s19 = smul.u32 24, %s403_s17 }
  0x1f   : > { %s11447_s18 = scalar_select %p8323_p6, 1, 0 }
  0x20   : > { %p8327_p8 = pnand %p7418_p4, %p46_p12  ;;  %s7395_s23 = smul.u32 24, %s8164_s28 }
  0x21   : > { %11448 = sst [smem:[#allocation20_spill]] %s11447_s18  ;;  %s407_s22 = scalar_lea.vmem [#allocation5], %s7394_s19 }
  0x22   : > { %s412_s29 = scalar_lea.hbm %s11197_s0, %s7395_s23  ;;  %s416_s25 = sshll.u32 %s407_s22, 4  ;;  %s417_s25 = int_to_ptr.vmem [resolvable:$true] %s416_s25 }
  0x23   : > { %s414_s21 = sshll.u32 %s412_s29, 4  ;;  %s404_s27 = scalar_lea.sflag [#allocation6], %s403_s17  ;;  %s415_s21 = int_to_ptr.hbm [resolvable:$true] %s414_s21 }
  0x24   : > { %s8064_s14 = sshra.s32 %s415_s21, 4  ;;  %p8068_p9 = pneg %p8327_p8  ;;  %s8065_s14 = int_to_ptr.hbm [resolvable:$true] %s8064_s14 }
  0x25   : > { %s8066_s18 = scalar_lea.hbm %s8065_s14, 24  ;;  %s8071_s11 = scalar_lea.hbm %s11197_s0, 48 }
  0x26   : > { %p8067_p7 = scmp.ne.s32.totalorder %s8065_s14, %s8066_s18  ;;  %p8072_p12 = scmp.lt.s32.totalorder %s8065_s14, %s11197_s0 }
  0x27   : > { %p8073_p2 = scmp.lt.s32.totalorder %s8071_s11, %s8066_s18 }
  0x28   : > { %p8069_p10 = pnand %p8068_p9, %p8067_p7 }
  0x29   : > { %p8074_p4 = por %p8073_p2, %p8072_p12 }
  0x2a   : > { %p8070_p11 = pneg %p8069_p10 }
  0x2c   : > { %p8075_p5 = pnand %p8074_p4, %p8070_p11 }
  0x2e   : > { %8078 = shalt.err (!%p8075_p5)
}
  0x2f   : > { %7412 = dma.hbm_to_vmem [thread:$0]  (!%p8327_p8), %s415_s21, 384, %s417_s25, %s404_s27  }
  0x30   : > { %439 = sbr.rel (%p8286_p3) target bundleno = 2743 (0xab7), region = 72 }
  0x35   : > { %s8348_s22 = sand.u32 1, %s8156_s26  }
  0x36   : > { %s7396_s13 = smul.u32 24, %s8348_s22  ;;  %s442_s28 = scalar_lea.sflag [#allocation6], %s8348_s22 }
  0x38   : > { %s8352_s29 = scalar_lea.vmem [#allocation5], %s7396_s13 }
  0x39   : > { %8139 = dma.done.wait (%p8313_p13), %s442_s28, 384  }
  0x3a   : > { %8141 = vsyncadd (%p8313_p13), %s442_s28, 4294966912 }
  0x3b   : > { %8143 = dma.done.wait (%p51_p1), [#allocation9], 1024  }
  0x3c   : > { %8145 = vsyncadd (%p51_p1), [#allocation9], 4294966272  ;;  %v2847_v0 = vld [vmem:[#allocation8 + $0x30] sm:$0x22]  ;;  %v1759_v1 = vld [vmem:[#allocation8 + $0x10] sm:$0x88] }
  0x3d   : > { %v1620_v2 = vld [vmem:[#allocation8 + $0x18] sm:$0x44]  ;;  %v2851_v3 = vunpack.c.l.b16 %v2847_v0  ;;  %v2852_v4 = vunpack.c.h.b16 %v2847_v0  ;;  %v1763_v5 = vunpack.c.l.b16 %v1759_v1  ;;  %v1764_v6 = vunpack.c.h.b16 %v1759_v1  ;;  %v2848_v7 = vld [vmem:[#allocation8 + $0x38] sm:$0x22]  ;;  %v1760_v36 = vld [vmem:[#allocation8 + $0x18] sm:$0x88] }
  0x3e   : > { %v1625_v8 = vunpack.c.l.b16 %v1620_v2  ;;  %v1626_v9 = vunpack.c.h.b16 %v1620_v2  ;;  %v2853_v10 = vunpack.c.l.b16 %v2848_v7  ;;  %v2854_v11 = vunpack.c.h.b16 %v2848_v7  ;;  %v1849_v41 = vld [vmem:[#allocation8 + $0x10] sm:$0x88]  ;;  %v1850_v46 = vld [vmem:[#allocation8 + $0x18] sm:$0x88]  ;;  %v1619_v51 = vld [vmem:[#allocation8 + $0x10] sm:$0x44] }
  0x3f   : > { %v2855_v12 = vpack.c.b16 %v2851_v3, %v2851_v3  ;;  %v2856_v13 = vpack.c.b16 %v2852_v4, %v2852_v4  ;;  %v1767_v14 = vpack.c.b16 %v1763_v5, %v1763_v5  ;;  %v1768_v15 = vpack.c.b16 %v1764_v6, %v1764_v6  ;;  %s8169_s11 = smov 73   ;;  %s11284_s25 = smov 1  }
  0x40   : > { %v1629_v16 = vpack.c.b16 %v1625_v8, %v1625_v8  ;;  %v1630_v17 = vpack.c.b16 %v1626_v9, %v1626_v9  ;;  %v2857_v18 = vpack.c.b16 %v2853_v10, %v2853_v10  ;;  %v2858_v19 = vpack.c.b16 %v2854_v11, %v2854_v11  ;;  %s8171_s27 = smov 127   ;;  %s11282_s16 = smov 7  }
  0x41   : > { %v2860_v20 = vpack.i.b16 %v2855_v12, %v2855_v12  ;;  %v2864_v21 = vpack.i.b16 %v2856_v13, %v2856_v13  ;;  %v1772_v22 = vpack.i.b16 %v1767_v14, %v1767_v14  ;;  %v1776_v23 = vpack.i.b16 %v1768_v15, %v1768_v15  ;;  %s11286_s30 = smov 120   ;;  %s11246_s14 = smov 121  }
  0x42   : > { %v1640_v24 = vpack.i.b16 %v1629_v16, %v1629_v16  ;;  %v1644_v25 = vpack.i.b16 %v1630_v17, %v1630_v17  ;;  %v2868_v26 = vpack.i.b16 %v2857_v18, %v2857_v18  ;;  %v2872_v27 = vpack.i.b16 %v2858_v19, %v2858_v19  ;;  %v1435_v16 = vld [vmem:[#allocation8 + $0x10] sm:$0x22]  ;;  %s8175_s17 = smov 71   ;;  %s8176_s18 = smov 72  }
  0x43   : > { %v2862_v28 = vperm.slane %v2860_v20, 1  ;;  %v2866_v29 = vperm.slane %v2864_v21, 1  ;;  %v1774_v30 = vperm.slane %v1772_v22, 3  ;;  %v1778_v31 = vperm.slane %v1776_v23, 3  ;;  %s11220_s19 = smov 119   ;;  %s8178_s20 = smov 64  }
  0x44   : > { %v1642_v32 = vperm.slane %v1640_v24, 2  ;;  %v1646_v33 = vperm.slane %v1644_v25, 2  ;;  %v2870_v34 = vperm.slane %v2868_v26, 1  ;;  %v2874_v35 = vperm.slane %v2872_v27, 1  ;;  %s11268_s24 = smov 65   ;;  %s11266_s21 = smov 57  }
  0x45   : > { %v2880_v37 = vunpack.c.l.bf16 %v2862_v28  ;;  %v2881_v38 = vunpack.c.l.bf16 %v2866_v29  ;;  %v1792_v39 = vunpack.c.l.bf16 %v1774_v30  ;;  %v1793_v40 = vunpack.c.l.bf16 %v1778_v31  ;;  %v1525_v29 = vld [vmem:[#allocation8 + $0x10] sm:$0x22]  ;;  %s11264_s1 = smov 63   ;;  %s11260_s23 = smov 55  }
  0x46   : > { %v1654_v42 = vunpack.c.l.bf16 %v1642_v32  ;;  %v1655_v43 = vunpack.c.l.bf16 %v1646_v33  ;;  %v2882_v44 = vunpack.c.l.bf16 %v2870_v34  ;;  %v2883_v45 = vunpack.c.l.bf16 %v2874_v35  ;;  %v1436_v34 = vld [vmem:[#allocation8 + $0x18] sm:$0x22]  ;;  %s11262_s13 = smov 56   ;;  %s11257_s28 = smov 8  }
  0x47   : > { %v7484_v47 = vpack.i.bf16 %v2881_v38, %v2880_v37  ;;  %v7474_v48 = vpack.i.bf16 %v1793_v40, %v1792_v39  ;;  %v1765_v49 = vunpack.c.l.b16 %v1760_v36  ;;  %v1766_v50 = vunpack.c.h.b16 %v1760_v36  ;;  %v1526_v39 = vld [vmem:[#allocation8 + $0x18] sm:$0x22]  ;;  %p502_p1 = scmp.lt.s32.totalorder %s8281_s15, 1 }
  0x48   : > { %v7499_v52 = vpack.i.bf16 %v1655_v43, %v1654_v42  ;;  %v7489_v53 = vpack.i.bf16 %v2883_v45, %v2882_v44  ;;  %v1853_v54 = vunpack.c.l.b16 %v1849_v41  ;;  %v1854_v55 = vunpack.c.h.b16 %v1849_v41 }
  0x49   : > { %7485 = vrot.lane.b32.xlu2 %v7484_v47, %s8169_s11  ;;  %7475 = vrot.lane.b32.xlu0 %v7474_v48, %s11284_s25  ;;  %v1769_v56 = vpack.c.b16 %v1765_v49, %v1765_v49  ;;  %v1770_v57 = vpack.c.b16 %v1766_v50, %v1766_v50  ;;  %v1855_v58 = vunpack.c.l.b16 %v1850_v46  ;;  %v1856_v59 = vunpack.c.h.b16 %v1850_v46 }
  0x4a   : > { %7500 = vrot.lane.b32.xlu1 %v7499_v52, %s8171_s27  ;;  %v1857_v60 = vpack.c.b16 %v1853_v54, %v1853_v54  ;;  %v1858_v61 = vpack.c.b16 %v1854_v55, %v1854_v55  ;;  %v1623_v62 = vunpack.c.l.b16 %v1619_v51  ;;  %v1624_v63 = vunpack.c.h.b16 %v1619_v51 }
  0x4b   : > { %v1780_v0 = vpack.i.b16 %v1769_v56, %v1769_v56  ;;  %v1784_v1 = vpack.i.b16 %v1770_v57, %v1770_v57  ;;  %v1859_v2 = vpack.c.b16 %v1855_v58, %v1855_v58  ;;  %v1860_v3 = vpack.c.b16 %v1856_v59, %v1856_v59 }
  0x4c   : > { %v1862_v4 = vshrl.u32 %v1857_v60, 16  ;;  %v1867_v5 = vshrl.u32 %v1858_v61, 16  ;;  %v1627_v6 = vpack.c.b16 %v1623_v62, %v1623_v62  ;;  %v1628_v7 = vpack.c.b16 %v1624_v63, %v1624_v63  ;;  %v2668_v60 = vld [vmem:[#allocation8 + $0x38] sm:$0x11] }
  0x4d   : > { %v1782_v8 = vperm.slane %v1780_v0, 3  ;;  %v1786_v9 = vperm.slane %v1784_v1, 3  ;;  %v1872_v10 = vshrl.u32 %v1859_v2, 16  ;;  %v1877_v11 = vshrl.u32 %v1860_v3, 16 }
  0x4e   : > { %v1863_v12 = vpack.i.b16 %v1862_v4, %v1862_v4  ;;  %v1868_v13 = vpack.i.b16 %v1867_v5, %v1867_v5  ;;  %v1632_v14 = vpack.i.b16 %v1627_v6, %v1627_v6  ;;  %v1636_v15 = vpack.i.b16 %v1628_v7, %v1628_v7 }
  0x4f   : > { %v1794_v17 = vunpack.c.l.bf16 %v1782_v8  ;;  %v1795_v18 = vunpack.c.l.bf16 %v1786_v9  ;;  %v1873_v19 = vpack.i.b16 %v1872_v10, %v1872_v10  ;;  %v1878_v20 = vpack.i.b16 %v1877_v11, %v1877_v11 }
  0x50   : > { %v1865_v21 = vperm.slane %v1863_v12, 3  ;;  %v1870_v22 = vperm.slane %v1868_v13, 3  ;;  %v1634_v23 = vperm.slane %v1632_v14, 2  ;;  %v1638_v24 = vperm.slane %v1636_v15, 2  ;;  %v2667_v13 = vld [vmem:[#allocation8 + $0x30] sm:$0x11] }
  0x51   : > { %7490 = vrot.lane.b32.xlu2 %v7489_v53, %s8169_s11  ;;  %v7479_v25 = vpack.i.bf16 %v1795_v18, %v1794_v17  ;;  %v1875_v26 = vperm.slane %v1873_v19, 3  ;;  %v1880_v27 = vperm.slane %v1878_v20, 3  ;;  %v1439_v28 = vunpack.c.l.b16 %v1435_v16 }
  0x52   : > { %v1886_v30 = vunpack.c.l.bf16 %v1865_v21  ;;  %v1887_v31 = vunpack.c.l.bf16 %v1870_v22  ;;  %v1652_v32 = vunpack.c.l.bf16 %v1634_v23  ;;  %v1653_v33 = vunpack.c.l.bf16 %v1638_v24 }
  0x53   : > { %7480 = vrot.lane.b32.xlu0 %v7479_v25, %s11284_s25  ;;  %v1888_v35 = vunpack.c.l.bf16 %v1875_v26  ;;  %v1889_v36 = vunpack.c.l.bf16 %v1880_v27  ;;  %v1440_v37 = vunpack.c.h.b16 %v1435_v16  ;;  %v1443_v38 = vpack.c.b16 %v1439_v28, %v1439_v28  ;;  %v2755_v26 = vld [vmem:[#allocation8 + $0x30] sm:$0x11]  ;;  %v2756_v27 = vld [vmem:[#allocation8 + $0x38] sm:$0x11] }
  0x54   : > { %v7514_v40 = vpack.i.bf16 %v1887_v31, %v1886_v30  ;;  %v7494_v41 = vpack.i.bf16 %v1653_v33, %v1652_v32  ;;  %v1529_v42 = vunpack.c.l.b16 %v1525_v29  ;;  %v1530_v43 = vunpack.c.h.b16 %v1525_v29 }
  0x55   : > { %v7519_v44 = vpack.i.bf16 %v1889_v36, %v1888_v35  ;;  %v1444_v45 = vpack.c.b16 %v1440_v37, %v1440_v37  ;;  %v1448_v46 = vpack.i.b16 %v1443_v38, %v1443_v38  ;;  %v1441_v47 = vunpack.c.l.b16 %v1436_v34 }
  0x56   : > { %7515 = vrot.lane.b32.xlu1 %v7514_v40, %s11282_s16  ;;  %v1533_v48 = vpack.c.b16 %v1529_v42, %v1529_v42  ;;  %v1534_v49 = vpack.c.b16 %v1530_v43, %v1530_v43  ;;  %v1442_v50 = vunpack.c.h.b16 %v1436_v34  ;;  %v1531_v51 = vunpack.c.l.b16 %v1526_v39 }
  0x57   : > { %v1450_v52 = vperm.slane %v1448_v46, 1  ;;  %v1452_v53 = vpack.i.b16 %v1444_v45, %v1444_v45  ;;  %v1445_v54 = vpack.c.b16 %v1441_v47, %v1441_v47  ;;  %v1532_v55 = vunpack.c.h.b16 %v1526_v39 }
  0x58   : > { %v1538_v56 = vshrl.u32 %v1533_v48, 16  ;;  %v1543_v57 = vshrl.u32 %v1534_v49, 16  ;;  %v1446_v58 = vpack.c.b16 %v1442_v50, %v1442_v50  ;;  %v1535_v59 = vpack.c.b16 %v1531_v51, %v1531_v51  ;;  %v1252_v48 = vld [vmem:[#allocation8 + $0x18] sm:$0x11] }
  0x59   : > { %v1454_v61 = vperm.slane %v1452_v53, 1  ;;  %v1468_v62 = vunpack.c.l.bf16 %v1450_v52  ;;  %v1456_v63 = vpack.i.b16 %v1445_v54, %v1445_v54  ;;  %v1536_v0 = vpack.c.b16 %v1532_v55, %v1532_v55 }
  0x5a   : > { %v1539_v1 = vpack.i.b16 %v1538_v56, %v1538_v56  ;;  %v1544_v2 = vpack.i.b16 %v1543_v57, %v1543_v57  ;;  %v1460_v3 = vpack.i.b16 %v1446_v58, %v1446_v58  ;;  %v1548_v4 = vshrl.u32 %v1535_v59, 16  ;;  %v1251_v57 = vld [vmem:[#allocation8 + $0x10] sm:$0x11] }
  0x5b   : > { %7495 = vrot.lane.b32.xlu0 %v7494_v41, %s8171_s27  ;;  %v1469_v5 = vunpack.c.l.bf16 %v1454_v61  ;;  %v1458_v6 = vperm.slane %v1456_v63, 1  ;;  %v1553_v7 = vshrl.u32 %v1536_v0, 16  ;;  %v2673_v8 = vunpack.c.l.b16 %v2668_v60 }
  0x5c   : > { %v1541_v9 = vperm.slane %v1539_v1, 1  ;;  %v1546_v10 = vperm.slane %v1544_v2, 1  ;;  %v1462_v11 = vperm.slane %v1460_v3, 1  ;;  %v1549_v12 = vpack.i.b16 %v1548_v4, %v1548_v4 }
  0x5d   : > { %v7504_v14 = vpack.i.bf16 %v1469_v5, %v1468_v62  ;;  %v1470_v15 = vunpack.c.l.bf16 %v1458_v6  ;;  %v1554_v16 = vpack.i.b16 %v1553_v7, %v1553_v7  ;;  %v2674_v17 = vunpack.c.h.b16 %v2668_v60 }
  0x5e   : > { %7520 = vrot.lane.b32.xlu1 %v7519_v44, %s11282_s16  ;;  %v1562_v18 = vunpack.c.l.bf16 %v1541_v9  ;;  %v1563_v19 = vunpack.c.l.bf16 %v1546_v10  ;;  %v1471_v20 = vunpack.c.l.bf16 %v1462_v11  ;;  %v1551_v21 = vperm.slane %v1549_v12, 1 }
  0x5f   : > { %7505 = vrot.lane.b32.xlu2 %v7504_v14, %s11286_s30  ;;  %v1556_v22 = vperm.slane %v1554_v16, 1  ;;  %v2677_v23 = vpack.c.b16 %v2673_v8, %v2673_v8  ;;  %v2678_v24 = vpack.c.b16 %v2674_v17, %v2674_v17  ;;  %v2671_v25 = vunpack.c.l.b16 %v2667_v13  ;;  %v1341_v14 = vld [vmem:[#allocation8 + $0x10] sm:$0x11] }
  0x60   : > { %v7524_v28 = vpack.i.bf16 %v1563_v19, %v1562_v18  ;;  %v7509_v29 = vpack.i.bf16 %v1471_v20, %v1470_v15  ;;  %v1564_v30 = vunpack.c.l.bf16 %v1551_v21  ;;  %v2672_v31 = vunpack.c.h.b16 %v2667_v13 }
  0x61   : > { %v1565_v32 = vunpack.c.l.bf16 %v1556_v22  ;;  %v2688_v33 = vpack.i.b16 %v2677_v23, %v2677_v23  ;;  %v2692_v34 = vpack.i.b16 %v2678_v24, %v2678_v24  ;;  %v2675_v35 = vpack.c.b16 %v2671_v25, %v2671_v25  ;;  %v2487_v23 = vld [vmem:[#allocation8 + $0x20] sm:$0x88] }
  0x62   : > { %v2676_v36 = vpack.c.b16 %v2672_v31, %v2672_v31  ;;  %v2759_v37 = vunpack.c.l.b16 %v2755_v26  ;;  %v2760_v38 = vunpack.c.h.b16 %v2755_v26  ;;  %v2761_v39 = vunpack.c.l.b16 %v2756_v27 }
  0x63   : > { %7510 = vrot.lane.b32.xlu0 %v7509_v29, %s11286_s30  ;;  %v7529_v40 = vpack.i.bf16 %v1565_v32, %v1564_v30  ;;  %v2690_v41 = vperm.slane %v2688_v33, 0  ;;  %v2694_v42 = vperm.slane %v2692_v34, 0  ;;  %v2680_v43 = vpack.i.b16 %v2675_v35, %v2675_v35  ;;  %v1342_v32 = vld [vmem:[#allocation8 + $0x18] sm:$0x11] }
  0x64   : > { %v2684_v44 = vpack.i.b16 %v2676_v36, %v2676_v36  ;;  %v2763_v45 = vpack.c.b16 %v2759_v37, %v2759_v37  ;;  %v2764_v46 = vpack.c.b16 %v2760_v38, %v2760_v38  ;;  %v2762_v47 = vunpack.c.h.b16 %v2756_v27 }
  0x65   : > { %v2702_v49 = vunpack.c.l.bf16 %v2690_v41  ;;  %v2703_v50 = vunpack.c.l.bf16 %v2694_v42  ;;  %v2682_v51 = vperm.slane %v2680_v43, 0  ;;  %v2765_v52 = vpack.c.b16 %v2761_v39, %v2761_v39 }
  0x66   : > { %7525 = vrot.lane.b32.xlu1 %v7524_v28, %s11246_s14  ;;  %v2686_v53 = vperm.slane %v2684_v44, 0  ;;  %v2768_v54 = vshrl.u32 %v2763_v45, 16  ;;  %v2773_v55 = vshrl.u32 %v2764_v46, 16  ;;  %v2766_v56 = vpack.c.b16 %v2762_v47, %v2762_v47  ;;  %v2488_v45 = vld [vmem:[#allocation8 + $0x28] sm:$0x88] }
  0x67   : > { %7530 = vrot.lane.b32.xlu2 %v7529_v40, %s11246_s14  ;;  %v7539_v58 = vpack.i.bf16 %v2703_v50, %v2702_v49  ;;  %v2700_v59 = vunpack.c.l.bf16 %v2682_v51  ;;  %v2778_v60 = vshrl.u32 %v2765_v52, 16  ;;  %v1257_v61 = vunpack.c.l.b16 %v1252_v48 }
  0x68   : > { %v2701_v62 = vunpack.c.l.bf16 %v2686_v53  ;;  %v2769_v63 = vpack.i.b16 %v2768_v54, %v2768_v54  ;;  %v2774_v0 = vpack.i.b16 %v2773_v55, %v2773_v55  ;;  %v2783_v1 = vshrl.u32 %v2766_v56, 16 }
  0x69   : > { %v2779_v2 = vpack.i.b16 %v2778_v60, %v2778_v60  ;;  %v1258_v3 = vunpack.c.h.b16 %v1252_v48  ;;  %v1261_v4 = vpack.c.b16 %v1257_v61, %v1257_v61  ;;  %v1255_v5 = vunpack.c.l.b16 %v1251_v57 }
  0x6a   : > { %v7534_v6 = vpack.i.bf16 %v2701_v62, %v2700_v59  ;;  %v2771_v7 = vperm.slane %v2769_v63, 0  ;;  %v2776_v8 = vperm.slane %v2774_v0, 0  ;;  %v2784_v9 = vpack.i.b16 %v2783_v1, %v2783_v1 }
  0x6b   : > { %v2781_v10 = vperm.slane %v2779_v2, 0  ;;  %v1262_v11 = vpack.c.b16 %v1258_v3, %v1258_v3  ;;  %v1272_v12 = vpack.i.b16 %v1261_v4, %v1261_v4  ;;  %v1256_v13 = vunpack.c.h.b16 %v1251_v57  ;;  %v2576_v2 = vld [vmem:[#allocation8 + $0x28] sm:$0x88] }
  0x6c   : > { %7535 = vrot.lane.b32.xlu0 %v7534_v6, %s8175_s17  ;;  %v2792_v15 = vunpack.c.l.bf16 %v2771_v7  ;;  %v2793_v16 = vunpack.c.l.bf16 %v2776_v8  ;;  %v2786_v17 = vperm.slane %v2784_v9, 0  ;;  %v1259_v18 = vpack.c.b16 %v1255_v5, %v1255_v5 }
  0x6d   : > { %v2794_v19 = vunpack.c.l.bf16 %v2781_v10  ;;  %v1274_v20 = vperm.slane %v1272_v12, 0  ;;  %v1276_v21 = vpack.i.b16 %v1262_v11, %v1262_v11  ;;  %v1260_v22 = vpack.c.b16 %v1256_v13, %v1256_v13 }
  0x6e   : > { %7540 = vrot.lane.b32.xlu1 %v7539_v58, %s8175_s17  ;;  %v7544_v24 = vpack.i.bf16 %v2793_v16, %v2792_v15  ;;  %v2795_v25 = vunpack.c.l.bf16 %v2786_v17  ;;  %v1264_v26 = vpack.i.b16 %v1259_v18, %v1259_v18  ;;  %v1345_v27 = vunpack.c.l.b16 %v1341_v14  ;;  %v2575_v15 = vld [vmem:[#allocation8 + $0x20] sm:$0x88] }
  0x6f   : > { %v1278_v28 = vperm.slane %v1276_v21, 0  ;;  %v1286_v29 = vunpack.c.l.bf16 %v1274_v20  ;;  %v1268_v30 = vpack.i.b16 %v1260_v22, %v1260_v22  ;;  %v1346_v31 = vunpack.c.h.b16 %v1341_v14  ;;  %v1157_v20 = vld [vmem:[#allocation8] sm:$0x88] }
  0x70   : > { %7545 = vrot.lane.b32.xlu2 %v7544_v24, %s8176_s18  ;;  %v7549_v33 = vpack.i.bf16 %v2795_v25, %v2794_v19  ;;  %v1266_v34 = vperm.slane %v1264_v26, 0  ;;  %v1349_v35 = vpack.c.b16 %v1345_v27, %v1345_v27  ;;  %v2491_v36 = vunpack.c.l.b16 %v2487_v23 }
  0x71   : > { %v1287_v37 = vunpack.c.l.bf16 %v1278_v28  ;;  %v1270_v38 = vperm.slane %v1268_v30, 0  ;;  %v1350_v39 = vpack.c.b16 %v1346_v31, %v1346_v31  ;;  %v2492_v40 = vunpack.c.h.b16 %v2487_v23 }
  0x72   : > { %v1284_v41 = vunpack.c.l.bf16 %v1266_v34  ;;  %v1354_v42 = vshrl.u32 %v1349_v35, 16  ;;  %v2495_v43 = vpack.c.b16 %v2491_v36, %v2491_v36  ;;  %v1347_v44 = vunpack.c.l.b16 %v1342_v32 }
  0x73   : > { %v7559_v46 = vpack.i.bf16 %v1287_v37, %v1286_v29  ;;  %v1285_v47 = vunpack.c.l.bf16 %v1270_v38  ;;  %v1359_v48 = vshrl.u32 %v1350_v39, 16  ;;  %v2496_v49 = vpack.c.b16 %v2492_v40, %v2492_v40  ;;  %v1068_v37 = vld [vmem:[#allocation8 + $0x8] sm:$0x88] }
  0x74   : > { %7550 = vrot.lane.b32.xlu0 %v7549_v33, %s8176_s18  ;;  %v1355_v50 = vpack.i.b16 %v1354_v42, %v1354_v42  ;;  %v2500_v51 = vpack.i.b16 %v2495_v43, %v2495_v43  ;;  %v1348_v52 = vunpack.c.h.b16 %v1342_v32  ;;  %v1351_v53 = vpack.c.b16 %v1347_v44, %v1347_v44 }
  0x75   : > { %v7554_v54 = vpack.i.bf16 %v1285_v47, %v1284_v41  ;;  %v1360_v55 = vpack.i.b16 %v1359_v48, %v1359_v48  ;;  %v2504_v56 = vpack.i.b16 %v2496_v49, %v2496_v49  ;;  %v2493_v57 = vunpack.c.l.b16 %v2488_v45 }
  0x76   : > { %v1357_v58 = vperm.slane %v1355_v50, 0  ;;  %v2502_v59 = vperm.slane %v2500_v51, 3  ;;  %v1352_v60 = vpack.c.b16 %v1348_v52, %v1348_v52  ;;  %v1364_v61 = vshrl.u32 %v1351_v53, 16 }
  0x77   : > { %7555 = vrot.lane.b32.xlu1 %v7554_v54, %s8169_s11  ;;  %v1362_v62 = vperm.slane %v1360_v55, 0  ;;  %v2506_v63 = vperm.slane %v2504_v56, 3  ;;  %v2494_v0 = vunpack.c.h.b16 %v2488_v45  ;;  %v2497_v1 = vpack.c.b16 %v2493_v57, %v2493_v57  ;;  %v1067_v54 = vld [vmem:[#allocation8] sm:$0x88] }
  0x78   : > { %7560 = vrot.lane.b32.xlu2 %v7559_v46, %s8169_s11  ;;  %v1378_v3 = vunpack.c.l.bf16 %v1357_v58  ;;  %v2520_v4 = vunpack.c.l.bf16 %v2502_v59  ;;  %v1365_v5 = vpack.i.b16 %v1364_v61, %v1364_v61  ;;  %v1369_v6 = vshrl.u32 %v1352_v60, 16 }
  0x79   : > { %v1379_v7 = vunpack.c.l.bf16 %v1362_v62  ;;  %v2521_v8 = vunpack.c.l.bf16 %v2506_v63  ;;  %v2498_v9 = vpack.c.b16 %v2494_v0, %v2494_v0  ;;  %v2508_v10 = vpack.i.b16 %v2497_v1, %v2497_v1 }
  0x7a   : > { %v1367_v11 = vperm.slane %v1365_v5, 0  ;;  %v1370_v12 = vpack.i.b16 %v1369_v6, %v1369_v6  ;;  %v2581_v13 = vunpack.c.l.b16 %v2576_v2  ;;  %v2582_v14 = vunpack.c.h.b16 %v2576_v2 }
  0x7b   : > { %v7564_v16 = vpack.i.bf16 %v1379_v7, %v1378_v3  ;;  %v7574_v17 = vpack.i.bf16 %v2521_v8, %v2520_v4  ;;  %v2510_v18 = vperm.slane %v2508_v10, 3  ;;  %v2512_v19 = vpack.i.b16 %v2498_v9, %v2498_v9  ;;  %v2308_v3 = vld [vmem:[#allocation8 + $0x28] sm:$0x44] }
  0x7c   : > { %v1372_v21 = vperm.slane %v1370_v12, 0  ;;  %v1380_v22 = vunpack.c.l.bf16 %v1367_v11  ;;  %v2585_v23 = vpack.c.b16 %v2581_v13, %v2581_v13  ;;  %v2586_v24 = vpack.c.b16 %v2582_v14, %v2582_v14  ;;  %v2307_v12 = vld [vmem:[#allocation8 + $0x20] sm:$0x44] }
  0x7d   : > { %7565 = vrot.lane.b32.xlu0 %v7564_v16, %s11220_s19  ;;  %v2514_v25 = vperm.slane %v2512_v19, 3  ;;  %v2522_v26 = vunpack.c.l.bf16 %v2510_v18  ;;  %v2579_v27 = vunpack.c.l.b16 %v2575_v15  ;;  %v2580_v28 = vunpack.c.h.b16 %v2575_v15 }
  0x7e   : > { %v1381_v29 = vunpack.c.l.bf16 %v1372_v21  ;;  %v2598_v30 = vshrl.u32 %v2585_v23, 16  ;;  %v2603_v31 = vshrl.u32 %v2586_v24, 16  ;;  %v1161_v32 = vunpack.c.l.b16 %v1157_v20  ;;  %v1158_v21 = vld [vmem:[#allocation8 + $0x8] sm:$0x88] }
  0x7f   : > { %v2523_v33 = vunpack.c.l.bf16 %v2514_v25  ;;  %v2583_v34 = vpack.c.b16 %v2579_v27, %v2579_v27  ;;  %v2584_v35 = vpack.c.b16 %v2580_v28, %v2580_v28  ;;  %v1162_v36 = vunpack.c.h.b16 %v1157_v20 }
  0x80   : > { %7575 = vrot.lane.b32.xlu2 %v7574_v17, %s8178_s20  ;;  %v7569_v38 = vpack.i.bf16 %v1381_v29, %v1380_v22  ;;  %v2599_v39 = vpack.i.b16 %v2598_v30, %v2598_v30  ;;  %v2604_v40 = vpack.i.b16 %v2603_v31, %v2603_v31  ;;  %v1165_v41 = vpack.c.b16 %v1161_v32, %v1161_v32 }
  0x81   : > { %v7579_v42 = vpack.i.bf16 %v2523_v33, %v2522_v26  ;;  %v2588_v43 = vshrl.u32 %v2583_v34, 16  ;;  %v2593_v44 = vshrl.u32 %v2584_v35, 16  ;;  %v1166_v45 = vpack.c.b16 %v1162_v36, %v1162_v36  ;;  %v2396_v34 = vld [vmem:[#allocation8 + $0x28] sm:$0x44] }
  0x82   : > { %7570 = vrot.lane.b32.xlu1 %v7569_v38, %s11220_s19  ;;  %v2601_v46 = vperm.slane %v2599_v39, 3  ;;  %v2606_v47 = vperm.slane %v2604_v40, 3  ;;  %v1170_v48 = vshrl.u32 %v1165_v41, 16  ;;  %v1073_v49 = vunpack.c.l.b16 %v1068_v37  ;;  %s11255_s19 = smov 9  }
  0x83   : > { %v2589_v50 = vpack.i.b16 %v2588_v43, %v2588_v43  ;;  %v2594_v51 = vpack.i.b16 %v2593_v44, %v2593_v44  ;;  %v1175_v52 = vshrl.u32 %v1166_v45, 16  ;;  %v1074_v53 = vunpack.c.h.b16 %v1068_v37 }
  0x84   : > { %v2614_v55 = vunpack.c.l.bf16 %v2601_v46  ;;  %v2615_v56 = vunpack.c.l.bf16 %v2606_v47  ;;  %v1171_v57 = vpack.i.b16 %v1170_v48, %v1170_v48  ;;  %v1077_v58 = vpack.c.b16 %v1073_v49, %v1073_v49 }
  0x85   : > { %7580 = vrot.lane.b32.xlu0 %v7579_v42, %s8178_s20  ;;  %v2591_v59 = vperm.slane %v2589_v50, 3  ;;  %v2596_v60 = vperm.slane %v2594_v51, 3  ;;  %v1176_v61 = vpack.i.b16 %v1175_v52, %v1175_v52  ;;  %v1078_v62 = vpack.c.b16 %v1074_v53, %v1074_v53  ;;  %v2395_v51 = vld [vmem:[#allocation8 + $0x20] sm:$0x44] }
  0x86   : > { %v7589_v63 = vpack.i.bf16 %v2615_v56, %v2614_v55  ;;  %v1173_v0 = vperm.slane %v1171_v57, 3  ;;  %v1088_v1 = vpack.i.b16 %v1077_v58, %v1077_v58  ;;  %v1071_v2 = vunpack.c.l.b16 %v1067_v54 }
  0x87   : > { %v2612_v4 = vunpack.c.l.bf16 %v2591_v59  ;;  %v2613_v5 = vunpack.c.l.bf16 %v2596_v60  ;;  %v1178_v6 = vperm.slane %v1176_v61, 3  ;;  %v1092_v7 = vpack.i.b16 %v1078_v62, %v1078_v62  ;;  %v883_v60 = vld [vmem:[#allocation8] sm:$0x44] }
  0x88   : > { %7590 = vrot.lane.b32.xlu2 %v7589_v63, %s11268_s24  ;;  %v1194_v8 = vunpack.c.l.bf16 %v1173_v0  ;;  %v1090_v9 = vperm.slane %v1088_v1, 3  ;;  %v1072_v10 = vunpack.c.h.b16 %v1067_v54  ;;  %v1075_v11 = vpack.c.b16 %v1071_v2, %v1071_v2 }
  0x89   : > { %v7584_v13 = vpack.i.bf16 %v2613_v5, %v2612_v4  ;;  %v1195_v14 = vunpack.c.l.bf16 %v1178_v6  ;;  %v1094_v15 = vperm.slane %v1092_v7, 3  ;;  %v2313_v16 = vunpack.c.l.b16 %v2308_v3 }
  0x8a   : > { %v1102_v17 = vunpack.c.l.bf16 %v1090_v9  ;;  %v1076_v18 = vpack.c.b16 %v1072_v10, %v1072_v10  ;;  %v1080_v19 = vpack.i.b16 %v1075_v11, %v1075_v11  ;;  %v2314_v20 = vunpack.c.h.b16 %v2308_v3  ;;  %v973_v9 = vld [vmem:[#allocation8] sm:$0x44] }
  0x8b   : > { %7585 = vrot.lane.b32.xlu1 %v7584_v13, %s11268_s24  ;;  %v7604_v22 = vpack.i.bf16 %v1195_v14, %v1194_v8  ;;  %v1103_v23 = vunpack.c.l.bf16 %v1094_v15  ;;  %v2317_v24 = vpack.c.b16 %v2313_v16, %v2313_v16  ;;  %v2311_v25 = vunpack.c.l.b16 %v2307_v12 }
  0x8c   : > { %v1082_v26 = vperm.slane %v1080_v19, 3  ;;  %v1084_v27 = vpack.i.b16 %v1076_v18, %v1076_v18  ;;  %v2318_v28 = vpack.c.b16 %v2314_v20, %v2314_v20  ;;  %v2312_v29 = vunpack.c.h.b16 %v2307_v12 }
  0x8d   : > { %v7599_v30 = vpack.i.bf16 %v1103_v23, %v1102_v17  ;;  %v2328_v31 = vpack.i.b16 %v2317_v24, %v2317_v24  ;;  %v2315_v32 = vpack.c.b16 %v2311_v25, %v2311_v25  ;;  %v1163_v33 = vunpack.c.l.b16 %v1158_v21 }
  0x8e   : > { %v1086_v35 = vperm.slane %v1084_v27, 3  ;;  %v1100_v36 = vunpack.c.l.bf16 %v1082_v26  ;;  %v2332_v37 = vpack.i.b16 %v2318_v28, %v2318_v28  ;;  %v2316_v38 = vpack.c.b16 %v2312_v29, %v2312_v29  ;;  %v884_v26 = vld [vmem:[#allocation8 + $0x8] sm:$0x44] }
  0x8f   : > { %v2330_v39 = vperm.slane %v2328_v31, 2  ;;  %v2320_v40 = vpack.i.b16 %v2315_v32, %v2315_v32  ;;  %v1164_v41 = vunpack.c.h.b16 %v1158_v21  ;;  %v1167_v42 = vpack.c.b16 %v1163_v33, %v1163_v33 }
  0x90   : > { %7605 = vrot.lane.b32.xlu2 %v7604_v22, %s8176_s18  ;;  %v1101_v43 = vunpack.c.l.bf16 %v1086_v35  ;;  %v2334_v44 = vperm.slane %v2332_v37, 2  ;;  %v2324_v45 = vpack.i.b16 %v2316_v38, %v2316_v38  ;;  %v2401_v46 = vunpack.c.l.b16 %v2396_v34 }
  0x91   : > { %v2342_v47 = vunpack.c.l.bf16 %v2330_v39  ;;  %v2322_v48 = vperm.slane %v2320_v40, 2  ;;  %v1168_v49 = vpack.c.b16 %v1164_v41, %v1164_v41  ;;  %v1180_v50 = vshrl.u32 %v1167_v42, 16  ;;  %v974_v39 = vld [vmem:[#allocation8 + $0x8] sm:$0x44] }
  0x92   : > { %v7594_v52 = vpack.i.bf16 %v1101_v43, %v1100_v36  ;;  %v2343_v53 = vunpack.c.l.bf16 %v2334_v44  ;;  %v2326_v54 = vperm.slane %v2324_v45, 2  ;;  %v2402_v55 = vunpack.c.h.b16 %v2396_v34 }
  0x93   : > { %7600 = vrot.lane.b32.xlu1 %v7599_v30, %s8175_s17  ;;  %v2340_v56 = vunpack.c.l.bf16 %v2322_v48  ;;  %v1181_v57 = vpack.i.b16 %v1180_v50, %v1180_v50  ;;  %v1185_v58 = vshrl.u32 %v1168_v49, 16  ;;  %v2405_v59 = vpack.c.b16 %v2401_v46, %v2401_v46 }
  0x94   : > { %7595 = vrot.lane.b32.xlu0 %v7594_v52, %s8175_s17  ;;  %v7619_v61 = vpack.i.bf16 %v2343_v53, %v2342_v47  ;;  %v2341_v62 = vunpack.c.l.bf16 %v2326_v54  ;;  %v2406_v63 = vpack.c.b16 %v2402_v55, %v2402_v55  ;;  %v2399_v0 = vunpack.c.l.b16 %v2395_v51 }
  0x95   : > { %v1183_v1 = vperm.slane %v1181_v57, 3  ;;  %v1186_v2 = vpack.i.b16 %v1185_v58, %v1185_v58  ;;  %v2418_v3 = vshrl.u32 %v2405_v59, 16  ;;  %v2400_v4 = vunpack.c.h.b16 %v2395_v51 }
  0x96   : > { %v7614_v5 = vpack.i.bf16 %v2341_v62, %v2340_v56  ;;  %v2423_v6 = vshrl.u32 %v2406_v63, 16  ;;  %v2403_v7 = vpack.c.b16 %v2399_v0, %v2399_v0  ;;  %v887_v8 = vunpack.c.l.b16 %v883_v60  ;;  %v2128_v63 = vld [vmem:[#allocation8 + $0x28] sm:$0x22] }
  0x97   : > { %v1188_v10 = vperm.slane %v1186_v2, 3  ;;  %v1196_v11 = vunpack.c.l.bf16 %v1183_v1  ;;  %v2419_v12 = vpack.i.b16 %v2418_v3, %v2418_v3  ;;  %v2404_v13 = vpack.c.b16 %v2400_v4, %v2400_v4 }
  0x98   : > { %7620 = vrot.lane.b32.xlu2 %v7619_v61, %s11266_s21  ;;  %v2424_v14 = vpack.i.b16 %v2423_v6, %v2423_v6  ;;  %v2408_v15 = vshrl.u32 %v2403_v7, 16  ;;  %v888_v16 = vunpack.c.h.b16 %v883_v60  ;;  %v891_v17 = vpack.c.b16 %v887_v8, %v887_v8  ;;  %v2127_v7 = vld [vmem:[#allocation8 + $0x20] sm:$0x22] }
  0x99   : > { %v1197_v18 = vunpack.c.l.bf16 %v1188_v10  ;;  %v2421_v19 = vperm.slane %v2419_v12, 2  ;;  %v2413_v20 = vshrl.u32 %v2404_v13, 16  ;;  %v977_v21 = vunpack.c.l.b16 %v973_v9  ;;  %v2215_v12 = vld [vmem:[#allocation8 + $0x20] sm:$0x22] }
  0x9a   : > { %v2426_v22 = vperm.slane %v2424_v14, 2  ;;  %v2409_v23 = vpack.i.b16 %v2408_v15, %v2408_v15  ;;  %v892_v24 = vpack.c.b16 %v888_v16, %v888_v16  ;;  %v896_v25 = vpack.i.b16 %v891_v17, %v891_v17 }
  0x9b   : > { %7615 = vrot.lane.b32.xlu1 %v7614_v5, %s11266_s21  ;;  %v7609_v27 = vpack.i.bf16 %v1197_v18, %v1196_v11  ;;  %v2434_v28 = vunpack.c.l.bf16 %v2421_v19  ;;  %v2414_v29 = vpack.i.b16 %v2413_v20, %v2413_v20  ;;  %v978_v30 = vunpack.c.h.b16 %v973_v9 }
  0x9c   : > { %v2435_v31 = vunpack.c.l.bf16 %v2426_v22  ;;  %v2411_v32 = vperm.slane %v2409_v23, 2  ;;  %v898_v33 = vperm.slane %v896_v25, 2  ;;  %v900_v34 = vpack.i.b16 %v892_v24, %v892_v24 }
  0x9d   : > { %7610 = vrot.lane.b32.xlu0 %v7609_v27, %s8176_s18  ;;  %v2416_v35 = vperm.slane %v2414_v29, 2  ;;  %v981_v36 = vpack.c.b16 %v977_v21, %v977_v21  ;;  %v982_v37 = vpack.c.b16 %v978_v30, %v978_v30  ;;  %v889_v38 = vunpack.c.l.b16 %v884_v26 }
  0x9e   : > { %v7629_v40 = vpack.i.bf16 %v2435_v31, %v2434_v28  ;;  %v2432_v41 = vunpack.c.l.bf16 %v2411_v32  ;;  %v902_v42 = vperm.slane %v900_v34, 2  ;;  %v916_v43 = vunpack.c.l.bf16 %v898_v33  ;;  %v2216_v32 = vld [vmem:[#allocation8 + $0x28] sm:$0x22] }
  0x9f   : > { %v2433_v44 = vunpack.c.l.bf16 %v2416_v35  ;;  %v986_v45 = vshrl.u32 %v981_v36, 16  ;;  %v991_v46 = vshrl.u32 %v982_v37, 16  ;;  %v890_v47 = vunpack.c.h.b16 %v884_v26 }
  0xa0   : > { %v917_v48 = vunpack.c.l.bf16 %v902_v42  ;;  %v893_v49 = vpack.c.b16 %v889_v38, %v889_v38  ;;  %v979_v50 = vunpack.c.l.b16 %v974_v39  ;;  %v980_v51 = vunpack.c.h.b16 %v974_v39 }
  0xa1   : > { %v7624_v52 = vpack.i.bf16 %v2433_v44, %v2432_v41  ;;  %v987_v53 = vpack.i.b16 %v986_v45, %v986_v45  ;;  %v992_v54 = vpack.i.b16 %v991_v46, %v991_v46  ;;  %v894_v55 = vpack.c.b16 %v890_v47, %v890_v47 }
  0xa2   : > { %v7634_v56 = vpack.i.bf16 %v917_v48, %v916_v43  ;;  %v904_v57 = vpack.i.b16 %v893_v49, %v893_v49  ;;  %v983_v58 = vpack.c.b16 %v979_v50, %v979_v50  ;;  %v984_v59 = vpack.c.b16 %v980_v51, %v980_v51 }
  0xa3   : > { %7630 = vrot.lane.b32.xlu1 %v7629_v40, %s11264_s1  ;;  %v989_v60 = vperm.slane %v987_v53, 2  ;;  %v994_v61 = vperm.slane %v992_v54, 2  ;;  %v908_v62 = vpack.i.b16 %v894_v55, %v894_v55  ;;  %v8395_v6 = vpop.permute.xlu2 %7485  ;;  %v2133_v11 = vunpack.c.l.b16 %v2128_v63  ;;  %v700_v40 = vld [vmem:[#allocation8 + $0x8] sm:$0x22]  ;;  %v699_v53 = vld [vmem:[#allocation8] sm:$0x22] }
  0xa4   : > { %7635 = vrot.lane.b32.xlu2 %v7634_v56, %s8178_s20  ;;  %v906_v0 = vperm.slane %v904_v57, 2  ;;  %v996_v1 = vshrl.u32 %v983_v58, 16  ;;  %v1001_v2 = vshrl.u32 %v984_v59, 16  ;;  %v2134_v15 = vunpack.c.h.b16 %v2128_v63 }
  0xa5   : > { %7625 = vrot.lane.b32.xlu0 %v7624_v52, %s11264_s1  ;;  %v1010_v3 = vunpack.c.l.bf16 %v989_v60  ;;  %v1011_v4 = vunpack.c.l.bf16 %v994_v61  ;;  %v910_v5 = vperm.slane %v908_v62, 2  ;;  %v2137_v18 = vpack.c.b16 %v2133_v11, %v2133_v11 }
  0xa6   : > { %v918_v8 = vunpack.c.l.bf16 %v906_v0  ;;  %v997_v9 = vpack.i.b16 %v996_v1, %v996_v1  ;;  %v1002_v10 = vpack.i.b16 %v1001_v2, %v1001_v2  ;;  %v2131_v19 = vunpack.c.l.b16 %v2127_v7 }
  0xa7   : > { %v7644_v13 = vpack.i.bf16 %v1011_v4, %v1010_v3  ;;  %v919_v14 = vunpack.c.l.bf16 %v910_v5  ;;  %v2138_v21 = vpack.c.b16 %v2134_v15, %v2134_v15  ;;  %v2132_v22 = vunpack.c.h.b16 %v2127_v7  ;;  %v789_v7 = vld [vmem:[#allocation8] sm:$0x22] }
  0xa8   : > { %v999_v16 = vperm.slane %v997_v9, 2  ;;  %v1004_v17 = vperm.slane %v1002_v10, 2  ;;  %v2219_v23 = vunpack.c.l.b16 %v2215_v12  ;;  %v2148_v26 = vpack.i.b16 %v2137_v18, %v2137_v18 }
  0xa9   : > { %v7639_v20 = vpack.i.bf16 %v919_v14, %v918_v8  ;;  %v2135_v27 = vpack.c.b16 %v2131_v19, %v2131_v19  ;;  %v2152_v28 = vpack.i.b16 %v2138_v21, %v2138_v21  ;;  %v2136_v29 = vpack.c.b16 %v2132_v22, %v2132_v22 }
  0xaa   : > { %v1012_v24 = vunpack.c.l.bf16 %v999_v16  ;;  %v1013_v25 = vunpack.c.l.bf16 %v1004_v17  ;;  %v2220_v30 = vunpack.c.h.b16 %v2215_v12  ;;  %v2223_v31 = vpack.c.b16 %v2219_v23, %v2219_v23 }
  0xab   : > { %7645 = vrot.lane.b32.xlu1 %v7644_v13, %s11268_s24  ;;  %v2150_v34 = vperm.slane %v2148_v26, 1  ;;  %v2140_v35 = vpack.i.b16 %v2135_v27, %v2135_v27  ;;  %v2154_v36 = vperm.slane %v2152_v28, 1  ;;  %v2144_v37 = vpack.i.b16 %v2136_v29, %v2136_v29  ;;  %v8400_v48 = vpop.permute.xlu2 %7490  ;;  %v1943_v28 = vld [vmem:[#allocation8 + $0x20] sm:$0x11] }
  0xac   : > { %v7649_v33 = vpack.i.bf16 %v1013_v25, %v1012_v24  ;;  %v2224_v38 = vpack.c.b16 %v2220_v30, %v2220_v30  ;;  %v2228_v39 = vshrl.u32 %v2223_v31, 16  ;;  %v2221_v43 = vunpack.c.l.b16 %v2216_v32 }
  0xad   : > { %7640 = vrot.lane.b32.xlu0 %v7639_v20, %s8178_s20  ;;  %v2162_v41 = vunpack.c.l.bf16 %v2150_v34  ;;  %v2142_v42 = vperm.slane %v2140_v35, 1  ;;  %v2163_v44 = vunpack.c.l.bf16 %v2154_v36  ;;  %v2146_v45 = vperm.slane %v2144_v37, 1  ;;  %v790_v35 = vld [vmem:[#allocation8 + $0x8] sm:$0x22] }
  0xae   : > { %7650 = vrot.lane.b32.xlu2 %v7649_v33, %s11268_s24  ;;  %v2229_v46 = vpack.i.b16 %v2228_v39, %v2228_v39  ;;  %v2233_v47 = vshrl.u32 %v2224_v38, 16  ;;  %v2222_v50 = vunpack.c.h.b16 %v2216_v32  ;;  %v2225_v51 = vpack.c.b16 %v2221_v43, %v2221_v43 }
  0xaf   : > { %v2160_v49 = vunpack.c.l.bf16 %v2142_v42  ;;  %v705_v52 = vunpack.c.l.b16 %v700_v40  ;;  %v7659_v54 = vpack.i.bf16 %v2163_v44, %v2162_v41  ;;  %v2161_v55 = vunpack.c.l.bf16 %v2146_v45 }
  0xb0   : > { %v2231_v56 = vperm.slane %v2229_v46, 1  ;;  %v2234_v57 = vpack.i.b16 %v2233_v47, %v2233_v47  ;;  %v2226_v58 = vpack.c.b16 %v2222_v50, %v2222_v50  ;;  %v2238_v59 = vshrl.u32 %v2225_v51, 16 }
  0xb1   : > { %v706_v60 = vunpack.c.h.b16 %v700_v40  ;;  %v709_v61 = vpack.c.b16 %v705_v52, %v705_v52  ;;  %v7654_v62 = vpack.i.bf16 %v2161_v55, %v2160_v49  ;;  %v703_v1 = vunpack.c.l.b16 %v699_v53 }
  0xb2   : > { %v2236_v63 = vperm.slane %v2234_v57, 1  ;;  %v2252_v0 = vunpack.c.l.bf16 %v2231_v56  ;;  %v2239_v2 = vpack.i.b16 %v2238_v59, %v2238_v59  ;;  %v2243_v3 = vshrl.u32 %v2226_v58, 16 }
  0xb3   : > { %7660 = vrot.lane.b32.xlu1 %v7659_v54, %s11260_s23  ;;  %v710_v4 = vpack.c.b16 %v706_v60, %v706_v60  ;;  %v720_v5 = vpack.i.b16 %v709_v61, %v709_v61  ;;  %v704_v9 = vunpack.c.h.b16 %v699_v53  ;;  %v707_v10 = vpack.c.b16 %v703_v1, %v703_v1 }
  0xb4   : > { %v2253_v8 = vunpack.c.l.bf16 %v2236_v63  ;;  %v2241_v11 = vperm.slane %v2239_v2, 1  ;;  %v2244_v12 = vpack.i.b16 %v2243_v3, %v2243_v3  ;;  %v793_v18 = vunpack.c.l.b16 %v789_v7  ;;  %v1944_v63 = vld [vmem:[#allocation8 + $0x28] sm:$0x11] }
  0xb5   : > { %7655 = vrot.lane.b32.xlu0 %v7654_v62, %s11260_s23  ;;  %v722_v13 = vperm.slane %v720_v5, 1  ;;  %v724_v14 = vpack.i.b16 %v710_v4, %v710_v4  ;;  %v708_v16 = vpack.c.b16 %v704_v9, %v704_v9  ;;  %v712_v17 = vpack.i.b16 %v707_v10, %v707_v10  ;;  %v2034_v2 = vld [vmem:[#allocation8 + $0x28] sm:$0x11] }
  0xb6   : > { %v7664_v15 = vpack.i.bf16 %v2253_v8, %v2252_v0  ;;  %v2246_v19 = vperm.slane %v2244_v12, 1  ;;  %v2254_v20 = vunpack.c.l.bf16 %v2241_v11  ;;  %v794_v26 = vunpack.c.h.b16 %v789_v7  ;;  %v2033_v7 = vld [vmem:[#allocation8 + $0x20] sm:$0x11] }
  0xb7   : > { %v726_v21 = vperm.slane %v724_v14, 1  ;;  %v734_v22 = vunpack.c.l.bf16 %v722_v13  ;;  %v714_v23 = vperm.slane %v712_v17, 1  ;;  %v716_v24 = vpack.i.b16 %v708_v16, %v708_v16 }
  0xb8   : > { %7665 = vrot.lane.b32.xlu2 %v7664_v15, %s11262_s13  ;;  %v797_v27 = vpack.c.b16 %v793_v18, %v793_v18  ;;  %v2255_v29 = vunpack.c.l.bf16 %v2246_v19  ;;  %v798_v33 = vpack.c.b16 %v794_v26, %v794_v26  ;;  %v1947_v39 = vunpack.c.l.b16 %v1943_v28 }
  0xb9   : > { %v8405_v25 = vpop.permute.xlu2 %7505  ;;  %v735_v30 = vunpack.c.l.bf16 %v726_v21  ;;  %v718_v31 = vperm.slane %v716_v24, 1  ;;  %v732_v32 = vunpack.c.l.bf16 %v714_v23  ;;  %v1948_v43 = vunpack.c.h.b16 %v1943_v28 }
  0xba   : > { %v802_v34 = vshrl.u32 %v797_v27, 16  ;;  %v7669_v37 = vpack.i.bf16 %v2255_v29, %v2254_v20  ;;  %v807_v42 = vshrl.u32 %v798_v33, 16  ;;  %v1951_v44 = vpack.c.b16 %v1947_v39, %v1947_v39 }
  0xbb   : > { %v8407_v36 = vpop.permute.xlu0 %7475  ;;  %v7679_v38 = vpack.i.bf16 %v735_v30, %v734_v22  ;;  %v733_v40 = vunpack.c.l.bf16 %v718_v31  ;;  %v795_v45 = vunpack.c.l.b16 %v790_v35  ;;  %v796_v46 = vunpack.c.h.b16 %v790_v35 }
  0xbc   : > { %v803_v41 = vpack.i.b16 %v802_v34, %v802_v34  ;;  %v8410_v47 = vpop.permute.xlu1 %7500  ;;  %v808_v51 = vpack.i.b16 %v807_v42, %v807_v42  ;;  %v1952_v52 = vpack.c.b16 %v1948_v43, %v1948_v43  ;;  %v1956_v53 = vpack.i.b16 %v1951_v44, %v1951_v44 }
  0xbd   : > { %7670 = vrot.lane.b32.xlu0 %v7669_v37, %s11262_s13  ;;  %v7674_v49 = vpack.i.bf16 %v733_v40, %v732_v32  ;;  %v799_v54 = vpack.c.b16 %v795_v45, %v795_v45  ;;  %v800_v55 = vpack.c.b16 %v796_v46, %v796_v46  ;;  %v1949_v10 = vunpack.c.l.b16 %v1944_v63  ;;  %v605_v46 = vld [vmem:[#allocation8] sm:$0x11] }
  0xbe   : > { %v805_v50 = vperm.slane %v803_v41, 1  ;;  %v810_v56 = vperm.slane %v808_v51, 1  ;;  %v1960_v58 = vpack.i.b16 %v1952_v52, %v1952_v52  ;;  %v1958_v60 = vperm.slane %v1956_v53, 0 }
  0xbf   : > { %7675 = vrot.lane.b32.xlu1 %v7674_v49, %s11266_s21  ;;  %v812_v61 = vshrl.u32 %v799_v54, 16  ;;  %v817_v62 = vshrl.u32 %v800_v55, 16  ;;  %v1950_v11 = vunpack.c.h.b16 %v1944_v63  ;;  %v2039_v15 = vunpack.c.l.b16 %v2034_v2  ;;  %v515_v55 = vld [vmem:[#allocation8 + $0x8] sm:$0x11] }
  0xc0   : > { %7680 = vrot.lane.b32.xlu2 %v7679_v38, %s11266_s21  ;;  %v826_v57 = vunpack.c.l.bf16 %v805_v50  ;;  %v827_v0 = vunpack.c.l.bf16 %v810_v56  ;;  %v1962_v1 = vperm.slane %v1960_v58, 0  ;;  %v1976_v3 = vunpack.c.l.bf16 %v1958_v60  ;;  %v514_v60 = vld [vmem:[#allocation8] sm:$0x11] }
  0xc1   : > { %v8414_v59 = vpop.permute.xlu2 %7530  ;;  %v813_v4 = vpack.i.b16 %v812_v61, %v812_v61  ;;  %v818_v5 = vpack.i.b16 %v817_v62, %v817_v62  ;;  %v2040_v16 = vunpack.c.h.b16 %v2034_v2  ;;  %v1953_v18 = vpack.c.b16 %v1949_v10, %v1949_v10 }
  0xc2   : > { %v7684_v8 = vpack.i.bf16 %v827_v0, %v826_v57  ;;  %v1977_v9 = vunpack.c.l.bf16 %v1962_v1  ;;  %v1954_v19 = vpack.c.b16 %v1950_v11, %v1950_v11  ;;  %v2037_v20 = vunpack.c.l.b16 %v2033_v7 }
  0xc3   : > { %v815_v13 = vperm.slane %v813_v4, 1  ;;  %v820_v14 = vperm.slane %v818_v5, 1  ;;  %v2043_v23 = vpack.c.b16 %v2039_v15, %v2039_v15  ;;  %v2044_v24 = vpack.c.b16 %v2040_v16, %v2040_v16 }
  0xc4   : > { %v7694_v17 = vpack.i.bf16 %v1977_v9, %v1976_v3  ;;  %v1964_v27 = vpack.i.b16 %v1953_v18, %v1953_v18  ;;  %v1968_v28 = vpack.i.b16 %v1954_v19, %v1954_v19  ;;  %v2038_v29 = vunpack.c.h.b16 %v2033_v7 }
  0xc5   : > { %v8416_v12 = vpop.permute.xlu0 %7480  ;;  %7685 = vrot.lane.b32.xlu0 %v7684_v8, %s11264_s1  ;;  %v828_v21 = vunpack.c.l.bf16 %v815_v13  ;;  %v829_v22 = vunpack.c.l.bf16 %v820_v14  ;;  %v2041_v30 = vpack.c.b16 %v2037_v20, %v2037_v20  ;;  %v2056_v32 = vshrl.u32 %v2043_v23, 16 }
  0xc6   : > { %v2061_v33 = vshrl.u32 %v2044_v24, 16  ;;  %v1966_v35 = vperm.slane %v1964_v27, 0  ;;  %v1970_v37 = vperm.slane %v1968_v28, 0  ;;  %v2042_v38 = vpack.c.b16 %v2038_v29, %v2038_v29  ;;  %v2844_v29 = vld [vmem:[%s8352_s29 + $0x4] sm:$0xff] }
  0xc7   : > { %v7689_v31 = vpack.i.bf16 %v829_v22, %v828_v21  ;;  %v2046_v39 = vshrl.u32 %v2041_v30, 16  ;;  %v2057_v40 = vpack.i.b16 %v2056_v32, %v2056_v32  ;;  %v609_v58 = vunpack.c.l.b16 %v605_v46 }
  0xc8   : > { %v8419_v26 = vpop.permute.xlu1 %7515  ;;  %7695 = vrot.lane.b32.xlu2 %v7694_v17, %s11257_s28  ;;  %v2062_v41 = vpack.i.b16 %v2061_v33, %v2061_v33  ;;  %v1978_v42 = vunpack.c.l.bf16 %v1966_v35  ;;  %v1979_v43 = vunpack.c.l.bf16 %v1970_v37  ;;  %v2051_v45 = vshrl.u32 %v2042_v38, 16 }
  0xc9   : > { %7690 = vrot.lane.b32.xlu1 %v7689_v31, %s11264_s1  ;;  %v2047_v44 = vpack.i.b16 %v2046_v39, %v2046_v39  ;;  %v2059_v50 = vperm.slane %v2057_v40, 0  ;;  %v610_v0 = vunpack.c.h.b16 %v605_v46  ;;  %v613_v2 = vpack.c.b16 %v609_v58, %v609_v58 }
  0xca   : > { %v8422_v34 = vpop.permute.xlu2 %7545  ;;  %v2064_v51 = vperm.slane %v2062_v41, 0  ;;  %v7699_v52 = vpack.i.bf16 %v1979_v43, %v1978_v42  ;;  %v2052_v54 = vpack.i.b16 %v2051_v45, %v2051_v45  ;;  %v520_v3 = vunpack.c.l.b16 %v515_v55  ;;  %v1757_v41 = vld [vmem:[%s8352_s29 + $0xc] sm:$0xff] }
  0xcb   : > { %v2049_v53 = vperm.slane %v2047_v44, 0  ;;  %v2072_v56 = vunpack.c.l.bf16 %v2059_v50  ;;  %v521_v4 = vunpack.c.h.b16 %v515_v55  ;;  %v614_v8 = vpack.c.b16 %v610_v0, %v610_v0 }
  0xcc   : > { %v2073_v57 = vunpack.c.l.bf16 %v2064_v51  ;;  %v2054_v62 = vperm.slane %v2052_v54, 0  ;;  %v518_v9 = vunpack.c.l.b16 %v514_v60  ;;  %v519_v10 = vunpack.c.h.b16 %v514_v60 }
  0xcd   : > { %v8425_v49 = vpop.permute.xlu0 %7495  ;;  %7700 = vrot.lane.b32.xlu0 %v7699_v52, %s11257_s28  ;;  %v2070_v63 = vunpack.c.l.bf16 %v2049_v53  ;;  %v618_v11 = vshrl.u32 %v613_v2, 16  ;;  %v524_v13 = vpack.c.b16 %v520_v3, %v520_v3  ;;  %v525_v14 = vpack.c.b16 %v521_v4, %v521_v4 }
  0xce   : > { %v7709_v1 = vpack.i.bf16 %v2073_v57, %v2072_v56  ;;  %v2071_v7 = vunpack.c.l.bf16 %v2054_v62  ;;  %v623_v16 = vshrl.u32 %v614_v8, 16  ;;  %v522_v17 = vpack.c.b16 %v518_v9, %v518_v9  ;;  %v606_v57 = vld [vmem:[#allocation8 + $0x8] sm:$0x11] }
  0xcf   : > { %v523_v18 = vpack.c.b16 %v519_v10, %v519_v10  ;;  %v619_v20 = vpack.i.b16 %v618_v11, %v618_v11  ;;  %v535_v21 = vpack.i.b16 %v524_v13, %v524_v13  ;;  %v539_v22 = vpack.i.b16 %v525_v14, %v525_v14 }
  0xd0   : > { %v8427_v61 = vpop.permute.xlu1 %7520  ;;  %7710 = vrot.lane.b32.xlu2 %v7709_v1, %s11255_s19  ;;  %v7704_v15 = vpack.i.bf16 %v2071_v7, %v2070_v63  ;;  %v7478_v23 = vunpack.i.h.bf16 %v8407_v36  ;;  %v624_v24 = vpack.i.b16 %v623_v16, %v623_v16  ;;  %v527_v27 = vpack.i.b16 %v522_v17, %v522_v17 }
  0xd1   : > { %v531_v28 = vpack.i.b16 %v523_v18, %v523_v18  ;;  %v7483_v30 = vunpack.i.h.bf16 %v8416_v12  ;;  %v621_v31 = vperm.slane %v619_v20, 0  ;;  %v537_v32 = vperm.slane %v535_v21, 0 }
  0xd2   : > { %v8430_v5 = vpop.permute.xlu2 %7560  ;;  %7705 = vrot.lane.b32.xlu1 %v7704_v15, %s11255_s19  ;;  %v541_v33 = vperm.slane %v539_v22, 0  ;;  %v7482_v37 = vunpack.i.l.bf16 %v8416_v12  ;;  %v626_v38 = vperm.slane %v624_v24, 0  ;;  %v529_v39 = vperm.slane %v527_v27, 0 }
  0xd3   : > { %v533_v40 = vperm.slane %v531_v28, 0  ;;  %v7477_v42 = vunpack.i.l.bf16 %v8407_v36  ;;  %v642_v43 = vunpack.c.l.bf16 %v621_v31  ;;  %v549_v44 = vunpack.c.l.bf16 %v537_v32 }
  0xd4   : > { %v550_v45 = vunpack.c.l.bf16 %v541_v33  ;;  %v8446_v50 = vunpack.c.l.bf16 %v2844_v29  ;;  %v643_v51 = vunpack.c.l.bf16 %v626_v38  ;;  %v547_v52 = vunpack.c.l.bf16 %v529_v39  ;;  %v1432_v39 = vld [vmem:[%s8352_s29] sm:$0xff] }
  0xd5   : > { %v8433_v19 = vpop.permute.xlu0 %7510  ;;  %v548_v53 = vunpack.c.l.bf16 %v533_v40  ;;  %vm11359_vm0 = vcmask 7168   ;;  %v8448_v55 = vunpack.c.l.bf16 %v1757_v41  ;;  %v8450_v56 = vunpack.c.h.bf16 %v1757_v41 }
  0xd6   : > { %v7719_v54 = vpack.i.bf16 %v550_v45, %v549_v44  ;;  %v7724_v58 = vpack.i.bf16 %v643_v51, %v642_v43  ;;  %v1810_v36 = vsel %vm11359_vm0, %v7478_v23, %v7482_v37  ;;  %v1811_v62 = vsel %vm11359_vm0, %v7482_v37, %v7483_v30 }
  0xd7   : > { %v7714_v60 = vpack.i.bf16 %v548_v53, %v547_v52  ;;  %v8456_v63 = vunpack.c.h.bf16 %v2844_v29  ;;  %v1809_v0 = vsel %vm11359_vm0, %v7477_v42, %v7478_v23  ;;  %v611_v2 = vunpack.c.l.b16 %v606_v57 }
  0xd8   : > { %v8439_v35 = vpop.permute.xlu1 %7525  ;;  %7725 = vrot.lane.b32.xlu2 %v7724_v58, %s11262_s13  ;;  %v612_v3 = vunpack.c.h.b16 %v606_v57  ;;  %v1817_v4 = vmul.f32 %v7477_v42, %v8446_v50  ;;  %v1819_v7 = vmul.f32 %v1810_v36, %v8448_v55  ;;  %v1820_v8 = vmul.f32 %v1811_v62, %v8450_v56 }
  0xd9   : > { %7715 = vrot.lane.b32.xlu0 %v7714_v60, %s11260_s23  ;;  %v1818_v9 = vmul.f32 %v1809_v0, %v8456_v63  ;;  %v7488_v11 = vunpack.i.h.bf16 %v8395_v6  ;;  %v7487_v13 = vunpack.i.l.bf16 %v8395_v6  ;;  %v615_v14 = vpack.c.b16 %v611_v2, %v611_v2  ;;  %v1617_v2 = vld [vmem:[%s8352_s29 + $0x8] sm:$0xff] }
  0xda   : > { %v8444_v46 = vpop.permute.xlu2 %7575  ;;  %7720 = vrot.lane.b32.xlu1 %v7719_v54, %s11260_s23  ;;  %v616_v15 = vpack.c.b16 %v612_v3, %v612_v3  ;;  %v7523_v16 = vunpack.i.h.bf16 %v8427_v61  ;;  %v7522_v17 = vunpack.i.l.bf16 %v8427_v61  ;;  %vm11353_vm1 = vcmask 596992  }
  0xdb   : > { %v628_v20 = vshrl.u32 %v615_v14, 16  ;;  %v7518_v22 = vunpack.i.h.bf16 %v8419_v26  ;;  %v1823_v23 = vpack.c.bf16 %v1820_v8, %v1819_v7  ;;  %v1822_v24 = vpack.c.bf16 %v1818_v9, %v1817_v4 }
  0xdc   : > { %v633_v21 = vshrl.u32 %v616_v15, 16  ;;  %v2896_v29 = vsel %vm11353_vm1, %v7487_v13, %v7488_v11  ;;  %vm11360_vm2 = vcmask 56320   ;;  %v2904_v38 = vmul.f32 %v7487_v13, %v8446_v50 }
  0xdd   : > { %v629_v27 = vpack.i.b16 %v628_v20, %v628_v20  ;;  %v1904_v31 = vsel %vm11360_vm2, %v7518_v22, %v7522_v17  ;;  %v1905_v32 = vsel %vm11360_vm2, %v7522_v17, %v7523_v16  ;;  %v7517_v40 = vunpack.i.l.bf16 %v8419_v26 }
  0xde   : > { %v8459_v1 = vpop.permute.xlu0 %7535  ;;  %v634_v28 = vpack.i.b16 %v633_v21, %v633_v21  ;;  %v2905_v41 = vmul.f32 %v2896_v29, %v8456_v63  ;;  %v1913_v45 = vmul.f32 %v1904_v31, %v8448_v55  ;;  %v1914_v51 = vmul.f32 %v1905_v32, %v8450_v56 }
  0xdf   : > { %v631_v33 = vperm.slane %v629_v27, 0  ;;  %v7498_v52 = vunpack.i.h.bf16 %v8425_v49  ;;  %v7497_v53 = vunpack.i.l.bf16 %v8425_v49  ;;  %v8498_v57 = vunpack.c.l.bf16 %v1432_v39 }
  0xe0   : > { %v8468_v10 = vpop.permute.xlu1 %7540  ;;  %1830 = vrot.lane.b32.xlu2 %v1823_v23, %s8171_s27  ;;  %v636_v37 = vperm.slane %v634_v28, 0  ;;  %v11240_v60 = vunpack.i.h.bf16 %v8410_v47  ;;  %v7502_v36 = vunpack.i.l.bf16 %v8410_v47  ;;  %v2909_v62 = vpack.c.bf16 %v2905_v41, %v2904_v38 }
  0xe1   : > { %v644_v43 = vunpack.c.l.bf16 %v631_v33  ;;  %v1903_v0 = vsel %vm11360_vm2, %v7517_v40, %v7518_v22  ;;  %v1917_v3 = vpack.c.bf16 %v1914_v51, %v1913_v45  ;;  %v8507_v4 = vunpack.c.l.bf16 %v1617_v2 }
  0xe2   : > { %v8474_v18 = vpop.permute.xlu2 %7590  ;;  %1828 = vrot.lane.b32.xlu1 %v1822_v24, %s8171_s27  ;;  %v645_v44 = vunpack.c.l.bf16 %v636_v37  ;;  %vm11358_vm3 = vcmask 1039360   ;;  %v8509_v49 = vunpack.c.h.bf16 %v1432_v39  ;;  %v1911_v9 = vmul.f32 %v7517_v40, %v8446_v50 }
  0xe3   : > { %v1670_v7 = vsel %vm11358_vm3, %v7498_v52, %v7502_v36  ;;  %v1669_v8 = vsel %vm11358_vm3, %v7497_v53, %v7498_v52  ;;  %v1912_v13 = vmul.f32 %v1903_v0, %v8456_v63  ;;  %v8517_v14 = vunpack.c.h.bf16 %v1617_v2 }
  0xe4   : > { %v7729_v26 = vpack.i.bf16 %v645_v44, %v644_v43  ;;  %v7493_v15 = vunpack.i.h.bf16 %v8400_v48  ;;  %v7492_v17 = vunpack.i.l.bf16 %v8400_v48  ;;  %v1671_v20 = vsel %vm11358_vm3, %v7502_v36, %v11240_v60 }
  0xe5   : > { %v7508_v21 = vunpack.i.h.bf16 %v8405_v25  ;;  %v1677_v22 = vmul.f32 %v7497_v53, %v8498_v57  ;;  %v1679_v23 = vmul.f32 %v1670_v7, %v8507_v4  ;;  %v1678_v24 = vmul.f32 %v1669_v8, %v8509_v49 }
  0xe6   : > { %v8490_v42 = vpop.permute.xlu0 %7550  ;;  %7730 = vrot.lane.b32.xlu0 %v7729_v26, %s11262_s13  ;;  %v7528_v27 = vunpack.i.h.bf16 %v8439_v35  ;;  %v7527_v28 = vunpack.i.l.bf16 %v8439_v35  ;;  %v11236_v29 = vunpack.i.h.bf16 %v8433_v19  ;;  %v7512_v31 = vunpack.i.l.bf16 %v8433_v19 }
  0xe7   : > { %v1916_v33 = vpack.c.bf16 %v1912_v13, %v1911_v9  ;;  %v1680_v37 = vmul.f32 %v1671_v20, %v8517_v14  ;;  %vm11254_vm4 = vcmask 990208   ;;  %vm11241_vm5 = vcmask 982016  }
  0xe8   : > { %2915 = vrot.lane.b32.xlu2 %v2909_v62, %s11260_s23  ;;  %v2897_v38 = vsel %vm11353_vm1, %v7488_v11, %v7492_v17  ;;  %v2898_v39 = vsel %vm11353_vm1, %v7492_v17, %v7493_v15  ;;  %v1682_v41 = vpack.c.bf16 %v1678_v24, %v1677_v22  ;;  %v1579_v44 = vsel %vm11254_vm4, %v7527_v28, %v7528_v27 }
  0xe9   : > { %v8496_v54 = vpop.permute.xlu1 %7555  ;;  %v1683_v40 = vpack.c.bf16 %v1680_v37, %v1679_v23  ;;  %v1486_v45 = vsel %vm11241_vm5, %v7508_v21, %v7512_v31  ;;  %v1487_v6 = vsel %vm11241_vm5, %v7512_v31, %v11236_v29  ;;  %v2906_v11 = vmul.f32 %v2897_v38, %v8448_v55 }
  0xea   : > { %v8500_v58 = vpop.permute.xlu2 %7605  ;;  %1924 = vrot.lane.b32.xlu1 %v1917_v3, %s11246_s14  ;;  %v2907_v51 = vmul.f32 %v2898_v39, %v8450_v56  ;;  %v7507_v52 = vunpack.i.l.bf16 %v8405_v25  ;;  %v1587_v53 = vmul.f32 %v7527_v28, %v8498_v57  ;;  %v1588_v26 = vmul.f32 %v8509_v49, %v1579_v44 }
  0xeb   : > { %v1495_v36 = vmul.f32 %v8507_v4, %v1486_v45  ;;  %v1496_v62 = vmul.f32 %v8517_v14, %v1487_v6  ;;  %v11239_v0 = vunpack.i.h.bf16 %v8468_v10  ;;  %v7542_v2 = vunpack.i.l.bf16 %v8468_v10 }
  0xec   : > { %v7538_v3 = vunpack.i.h.bf16 %v8459_v1  ;;  %v7537_v7 = vunpack.i.l.bf16 %v8459_v1  ;;  %v2910_v8 = vpack.c.bf16 %v2907_v51, %v2906_v11  ;;  %vm11340_vm6 = vcmask 580608  }
  0xed   : > { %v1485_v25 = vsel %vm11241_vm5, %v7507_v52, %v7508_v21  ;;  %v1592_v13 = vpack.c.bf16 %v1588_v26, %v1587_v53  ;;  %v1499_v17 = vpack.c.bf16 %v1496_v62, %v1495_v36  ;;  %v2718_v23 = vsel %vm11340_vm6, %v7542_v2, %v11239_v0 }
  0xee   : > { %1922 = vrot.lane.b32.xlu0 %v1916_v33, %s11246_s14  ;;  %v2717_v22 = vsel %vm11340_vm6, %v7538_v3, %v7542_v2  ;;  %v2716_v1 = vsel %vm11340_vm6, %v7537_v7, %v7538_v3  ;;  %v1493_v24 = vmul.f32 %v7507_v52, %v8498_v57  ;;  %v1494_v21 = vmul.f32 %v8509_v49, %v1485_v25 }
  0xef   : > { %v8532_v32 = vpop.permute.xlu0 %7565  ;;  %v11229_v31 = vunpack.i.h.bf16 %v8414_v59  ;;  %v7532_v33 = vunpack.i.l.bf16 %v8414_v59  ;;  %v7548_v37 = vunpack.i.h.bf16 %v8422_v34  ;;  %v2724_v38 = vmul.f32 %v7537_v7, %v8446_v50 }
  0xf0   : > { %1690 = vrot.lane.b32.xlu2 %v1683_v40, %s11284_s25  ;;  %v2726_v39 = vmul.f32 %v2717_v22, %v8448_v55  ;;  %v2727_v40 = vmul.f32 %v2718_v23, %v8450_v56  ;;  %v11235_v44 = vunpack.i.h.bf16 %v8490_v42  ;;  %v7552_v45 = vunpack.i.l.bf16 %v8490_v42 }
  0xf1   : > { %v7558_v6 = vunpack.i.h.bf16 %v8496_v54  ;;  %v7557_v11 = vunpack.i.l.bf16 %v8496_v54  ;;  %v1498_v51 = vpack.c.bf16 %v1494_v21, %v1493_v24  ;;  %vm11352_vm7 = vcmask 588800  }
  0xf2   : > { %v8544_v43 = vpop.permute.xlu2 %7620  ;;  %1688 = vrot.lane.b32.xlu1 %v1682_v41, %s11284_s25  ;;  %v2725_v41 = vmul.f32 %v2716_v1, %v8456_v63  ;;  %v1580_v52 = vsel %vm11254_vm4, %v7528_v27, %v7532_v33  ;;  %v1581_v53 = vsel %vm11254_vm4, %v7532_v33, %v11229_v31  ;;  %v2730_v26 = vpack.c.bf16 %v2727_v40, %v2726_v39 }
  0xf3   : > { %v1301_v2 = vsel %vm11353_vm1, %v7557_v11, %v7558_v6  ;;  %v2809_v3 = vsel %vm11352_vm7, %v7548_v37, %v7552_v45  ;;  %v2810_v54 = vsel %vm11352_vm7, %v7552_v45, %v11235_v44  ;;  %v1589_v27 = vmul.f32 %v8507_v4, %v1580_v52 }
  0xf4   : > { %v8541_v35 = vpop.permute.xlu1 %7570  ;;  %v2729_v36 = vpack.c.bf16 %v2725_v41, %v2724_v38  ;;  %v7547_v25 = vunpack.i.l.bf16 %v8422_v34  ;;  %v2818_v22 = vmul.f32 %v2809_v3, %v8448_v55  ;;  %v2819_v23 = vmul.f32 %v2810_v54, %v8450_v56 }
  0xf5   : > { %v7568_v24 = vunpack.i.h.bf16 %v8532_v32  ;;  %v7567_v21 = vunpack.i.l.bf16 %v8532_v32  ;;  %v11226_v33 = vunpack.i.h.bf16 %v8541_v35  ;;  %v7572_v38 = vunpack.i.l.bf16 %v8541_v35 }
  0xf6   : > { %2917 = vrot.lane.b32.xlu0 %v2910_v8, %s11260_s23  ;;  %v1590_v8 = vmul.f32 %v8517_v14, %v1581_v53  ;;  %vm11237_vm8 = vcmask 973824   ;;  %v2808_v34 = vsel %vm11352_vm7, %v7547_v25, %v7548_v37  ;;  %v2822_v41 = vpack.c.bf16 %v2819_v23, %v2818_v22 }
  0xf7   : > { %v8565_v9 = vpop.permute.xlu0 %7580  ;;  %v1397_v32 = vsel %vm11237_vm8, %v7572_v38, %v11226_v33  ;;  %v2816_v52 = vmul.f32 %v7547_v25, %v8446_v50  ;;  %v2817_v37 = vmul.f32 %v2808_v34, %v8456_v63  ;;  %v1403_v3 = vmul.f32 %v7567_v21, %v8498_v57 }
  0xf8   : > { %1598 = vrot.lane.b32.xlu2 %v1592_v13, %s11282_s16  ;;  %v1309_v13 = vmul.f32 %v7557_v11, %v8498_v57  ;;  %v1593_v39 = vpack.c.bf16 %v1590_v8, %v1589_v27  ;;  %v1396_v11 = vsel %vm11237_vm8, %v7568_v24, %v7572_v38  ;;  %v1406_v27 = vmul.f32 %v8517_v14, %v1397_v32 }
  0xf9   : > { %v1405_v54 = vmul.f32 %v8507_v4, %v1396_v11  ;;  %v11232_v25 = vunpack.i.h.bf16 %v8565_v9  ;;  %v2821_v23 = vpack.c.bf16 %v2817_v37, %v2816_v52  ;;  %vm11365_vm9 = vcmask 531456  }
  0xfa   : > { %1506 = vrot.lane.b32.xlu1 %v1499_v17, %s11257_s28  ;;  %v1310_v17 = vmul.f32 %v8509_v49, %v1301_v2  ;;  %v7578_v2 = vunpack.i.h.bf16 %v8444_v46  ;;  %vm11345_vm10 = vcmask 523264   ;;  %vm748_vm11 = vcmask 465920  }
  0xfb   : > { %vm11366_vm12 = vcmask 515072   ;;  %vm11368_vm13 = vcmask 449536   ;;  %vm11367_vm14 = vcmask 457728   ;;  %vm11338_vm15 = vcmask 1043456  }
  0xfc   : > { %v1314_v40 = vpack.c.bf16 %v1310_v17, %v1309_v13  ;;  %v7582_v13 = vunpack.i.l.bf16 %v8565_v9  ;;  %vm11259_vm5 = vcmask 72704  }
  0xfd   : > { %v8568_v20 = vpop.permute.xlu1 %7585 }
  0xfe   : > { %v8579_v28 = vpop.permute.xlu2 %7635  ;;  %1504 = vrot.lane.b32.xlu0 %v1498_v51, %s11257_s28  ;;  %v1395_v51 = vsel %vm11237_vm8, %v7567_v21, %v7568_v24  ;;  %v7588_v17 = vunpack.i.h.bf16 %v8568_v20  ;;  %v7587_v22 = vunpack.i.l.bf16 %v8568_v20  ;;  %v2538_v20 = vsel %vm11345_vm10, %v7582_v13, %v11232_v25 }
  0xff   : > { %v1404_v8 = vmul.f32 %v8509_v49, %v1395_v51  ;;  %v7577_v51 = vunpack.i.l.bf16 %v8444_v46  ;;  %vm1514_vm8 = vcmask 64512  }
 0x100   : > { %2737 = vrot.lane.b32.xlu2 %v2730_v26, %s11266_s21  ;;  %v11223_v26 = vunpack.i.h.bf16 %v8430_v5  ;;  %v2636_v52 = vmul.f32 %v7587_v22, %v8446_v50 }
 0x101   : > { %v1408_v34 = vpack.c.bf16 %v1404_v8, %v1403_v3  ;;  %v2547_v3 = vmul.f32 %v2538_v20, %v8450_v56  ;;  %v2544_v20 = vmul.f32 %v7577_v51, %v8446_v50 }
 0x102   : > { %2735 = vrot.lane.b32.xlu1 %v2729_v36, %s11266_s21  ;;  %v7562_v36 = vunpack.i.l.bf16 %v8430_v5 }
 0x104   : > { %v1302_v21 = vsel %vm11353_vm1, %v7558_v6, %v7562_v36  ;;  %v1303_v38 = vsel %vm11353_vm1, %v7562_v36, %v11223_v26  ;;  %v2212_v26 = vld [vmem:[%s8352_s29 + $0x4] sm:$0xff] }
 0x105   : > { %v8597_v62 = vpop.permute.xlu1 %7600  ;;  %v1311_v6 = vmul.f32 %v8507_v4, %v1302_v21  ;;  %v1312_v11 = vmul.f32 %v8517_v14, %v1303_v38 }
 0x106   : > { %v8604_v7 = vpop.permute.xlu0 %7595  ;;  %1600 = vrot.lane.b32.xlu0 %v1593_v39, %s11282_s16  ;;  %v1409_v39 = vpack.c.bf16 %v1406_v27, %v1405_v54  ;;  %v11222_v27 = vunpack.i.h.bf16 %v8597_v62  ;;  %v7602_v8 = vunpack.i.l.bf16 %v8597_v62 }
 0x107   : > { %v1315_v21 = vpack.c.bf16 %v1312_v11, %v1311_v6  ;;  %v7592_v6 = vunpack.i.l.bf16 %v8474_v18  ;;  %v7608_v11 = vunpack.i.h.bf16 %v8500_v58 }
 0x108   : > { %v8615_v1 = vpop.permute.xlu2 %7650  ;;  %1320 = vrot.lane.b32.xlu2 %v1314_v40, %s11260_s23  ;;  %v2628_v40 = vsel %vm11365_vm9, %v7587_v22, %v7588_v17  ;;  %v2536_v22 = vsel %vm11345_vm10, %v7577_v51, %v7578_v2 }
 0x109   : > { %v2637_v37 = vmul.f32 %v2628_v40, %v8456_v63  ;;  %v1119_v40 = vsel %vm11340_vm6, %v7602_v8, %v11222_v27 }
 0x10a   : > { %2829 = vrot.lane.b32.xlu1 %v2822_v41, %s11262_s13  ;;  %v2537_v41 = vsel %vm11345_vm10, %v7578_v2, %v7582_v13  ;;  %v7598_v13 = vunpack.i.h.bf16 %v8604_v7  ;;  %v11233_v2 = vunpack.i.h.bf16 %v8474_v18 }
 0x10b   : > { %v2546_v36 = vmul.f32 %v2537_v41, %v8448_v55  ;;  %v2641_v38 = vpack.c.bf16 %v2637_v37, %v2636_v52 }
 0x10d   : > { %v8623_v45 = vpop.permute.xlu1 %7615 }
 0x10e   : > { %2827 = vrot.lane.b32.xlu0 %v2821_v23, %s11262_s13  ;;  %v7597_v23 = vunpack.i.l.bf16 %v8604_v7  ;;  %v2545_v7 = vmul.f32 %v2536_v22, %v8456_v63 }
 0x10f   : > { %v8634_v53 = vpop.permute.xlu0 %7610 }
 0x110   : > { %1416 = vrot.lane.b32.xlu2 %v1409_v39, %s11255_s19  ;;  %v2550_v39 = vpack.c.bf16 %v2547_v3, %v2546_v36  ;;  %v1117_v41 = vsel %vm11340_vm6, %v7597_v23, %v7598_v13  ;;  %v1125_v52 = vmul.f32 %v7597_v23, %v8498_v57  ;;  %v1128_v36 = vmul.f32 %v8517_v14, %v1119_v40 }
 0x111   : > { %v1126_v51 = vmul.f32 %v8509_v49, %v1117_v41  ;;  %v7612_v22 = vunpack.i.l.bf16 %v8634_v53  ;;  %v2629_v23 = vsel %vm11365_vm9, %v7588_v17, %v7592_v6 }
 0x112   : > { %v8647_v24 = vpop.permute.xlu2 %7665  ;;  %1414 = vrot.lane.b32.xlu1 %v1408_v34, %s11255_s19  ;;  %v1118_v34 = vsel %vm11340_vm6, %v7598_v13, %v7602_v8  ;;  %v7618_v8 = vunpack.i.h.bf16 %v8623_v45  ;;  %v7617_v13 = vunpack.i.l.bf16 %v8623_v45  ;;  %v2638_v17 = vmul.f32 %v2629_v23, %v8448_v55 }
 0x113   : > { %v1127_v37 = vmul.f32 %v8507_v4, %v1118_v34  ;;  %v2630_v34 = vsel %vm11365_vm9, %v7592_v6, %v11233_v2  ;;  %v1130_v41 = vpack.c.bf16 %v1126_v51, %v1125_v52  ;;  %v7607_v52 = vunpack.i.l.bf16 %v8500_v58 }
 0x114   : > { %v2356_v27 = vsel %vm748_vm11, %v7617_v13, %v7618_v8  ;;  %v2639_v6 = vmul.f32 %v2630_v34, %v8450_v56 }
 0x115   : > { %v8663_v32 = vpop.permute.xlu1 %7630  ;;  %v1131_v40 = vpack.c.bf16 %v1128_v36, %v1127_v37  ;;  %v2364_v37 = vmul.f32 %v7617_v13, %v8446_v50  ;;  %v2365_v36 = vmul.f32 %v2356_v27, %v8456_v63  ;;  %v1211_v50 = vsel %vm11352_vm7, %v7607_v52, %v7608_v11 }
 0x116   : > { %1322 = vrot.lane.b32.xlu0 %v1315_v21, %s11260_s23  ;;  %v11224_v21 = vunpack.i.h.bf16 %v8634_v53  ;;  %v2642_v34 = vpack.c.bf16 %v2639_v6, %v2638_v17  ;;  %v8733_v63 = vunpack.c.l.bf16 %v2212_v26  ;;  %v1220_v6 = vmul.f32 %v8509_v49, %v1211_v50 }
 0x117   : > { %v8670_v54 = vpop.permute.xlu0 %7625  ;;  %v2369_v58 = vpack.c.bf16 %v2365_v36, %v2364_v37  ;;  %v7622_v36 = vunpack.i.l.bf16 %v8544_v43 }
 0x118   : > { %2647 = vrot.lane.b32.xlu2 %v2641_v38, %s11264_s1  ;;  %v2549_v38 = vpack.c.bf16 %v2545_v7, %v2544_v20  ;;  %v1212_v20 = vsel %vm11352_vm7, %v7608_v11, %v7612_v22  ;;  %v1213_v7 = vsel %vm11352_vm7, %v7612_v22, %v11224_v21  ;;  %v11225_v22 = vunpack.i.h.bf16 %v8663_v32 }
 0x119   : > { %v1221_v51 = vmul.f32 %v8507_v4, %v1212_v20  ;;  %v7627_v23 = vunpack.i.l.bf16 %v8670_v54  ;;  %v8738_v20 = vunpack.c.h.bf16 %v2212_v26  ;;  %v1219_v11 = vmul.f32 %v7607_v52, %v8498_v57 }
 0x11a   : > { %v8676_v46 = vpop.permute.xlu2 %7680  ;;  %2557 = vrot.lane.b32.xlu1 %v2550_v39, %s8178_s20  ;;  %v11228_v26 = vunpack.i.h.bf16 %v8544_v43 }
 0x11d   : > { %v8696_v3 = vpop.permute.xlu1 %7645 }
 0x11e   : > { %2555 = vrot.lane.b32.xlu0 %v2549_v38, %s8178_s20  ;;  %v1222_v38 = vmul.f32 %v8517_v14, %v1213_v7  ;;  %v7647_v31 = vunpack.i.l.bf16 %v8696_v3 }
 0x11f   : > { %v8702_v39 = vpop.permute.xlu0 %7640 }
 0x120   : > { %1138 = vrot.lane.b32.xlu2 %v1131_v40, %s11266_s21  ;;  %v7632_v40 = vunpack.i.l.bf16 %v8663_v32  ;;  %v1225_v27 = vpack.c.bf16 %v1222_v38, %v1221_v51  ;;  %v2456_v51 = vmul.f32 %v7627_v23, %v8733_v63  ;;  %v11227_v50 = vunpack.i.h.bf16 %v8702_v39 }
 0x122   : > { %v8709_v45 = vpop.permute.xlu2 %7695  ;;  %1136 = vrot.lane.b32.xlu1 %v1130_v41, %s11266_s21  ;;  %v7628_v41 = vunpack.i.h.bf16 %v8670_v54  ;;  %v2450_v54 = vsel %vm11366_vm12, %v7632_v40, %v11225_v22  ;;  %v2357_v22 = vsel %vm748_vm11, %v7618_v8, %v7622_v36 }
 0x124   : > { %v2449_v7 = vsel %vm11366_vm12, %v7628_v41, %v7632_v40  ;;  %v2448_v17 = vsel %vm11366_vm12, %v7627_v23, %v7628_v41  ;;  %v2459_v40 = vmul.f32 %v2450_v54, %v8450_v56  ;;  %v7638_v41 = vunpack.i.h.bf16 %v8579_v28 }
 0x125   : > { %v8730_v21 = vpop.permute.xlu1 %7660  ;;  %v2458_v38 = vmul.f32 %v2449_v7, %v8448_v55  ;;  %v2457_v52 = vmul.f32 %v2448_v17, %v8738_v20  ;;  %v2358_v23 = vsel %vm748_vm11, %v7622_v36, %v11228_v26 }
 0x126   : > { %2649 = vrot.lane.b32.xlu0 %v2642_v34, %s11264_s1  ;;  %v7637_v34 = vunpack.i.l.bf16 %v8579_v28 }
 0x127   : > { %v8736_v13 = vpop.permute.xlu0 %7655  ;;  %v2462_v7 = vpack.c.bf16 %v2459_v40, %v2458_v38  ;;  %v2461_v54 = vpack.c.bf16 %v2457_v52, %v2456_v51 }
 0x128   : > { %2375 = vrot.lane.b32.xlu2 %v2369_v58, %s8175_s17  ;;  %v7642_v58 = vunpack.i.l.bf16 %v8702_v39  ;;  %v933_v8 = vsel %vm11345_vm10, %v7637_v34, %v7638_v41  ;;  %v941_v51 = vmul.f32 %v7637_v34, %v8498_v57 }
 0x12a   : > { %1232 = vrot.lane.b32.xlu1 %v1225_v27, %s11262_s13  ;;  %v8749_v37 = vpop.permute.xlu2 %7710  ;;  %v1224_v27 = vpack.c.bf16 %v1220_v6, %v1219_v11  ;;  %v934_v28 = vsel %vm11345_vm10, %v7638_v41, %v7642_v58  ;;  %v935_v33 = vsel %vm11345_vm10, %v7642_v58, %v11227_v50  ;;  %v2366_v11 = vmul.f32 %v2357_v22, %v8448_v55  ;;  %v8786_v58 = vld [vmem:[%s8352_s29 + $0x10] sm:$0xff]  }
 0x12b   : > { %v2367_v6 = vmul.f32 %v2358_v23, %v8450_v56  ;;  %v943_v40 = vmul.f32 %v8507_v4, %v934_v28  ;;  %v944_v52 = vmul.f32 %v8517_v14, %v935_v33  ;;  %v942_v41 = vmul.f32 %v8509_v49, %v933_v8 }
 0x12c   : > { %v7652_v22 = vunpack.i.l.bf16 %v8615_v1  ;;  %v7648_v23 = vunpack.i.h.bf16 %v8696_v3  ;;  %v1791_v50 = vunpack.c.h.bf16 %v8786_v58 }
 0x12d   : > { %v947_v33 = vpack.c.bf16 %v944_v52, %v943_v40  ;;  %v946_v28 = vpack.c.bf16 %v942_v41, %v941_v51  ;;  %v7662_v40 = vunpack.i.l.bf16 %v8730_v21  ;;  %v7658_v52 = vunpack.i.h.bf16 %v8736_v13 }
 0x12e   : > { %1230 = vrot.lane.b32.xlu0 %v1224_v27, %s11262_s13  ;;  %v11230_v27 = vunpack.i.h.bf16 %v8615_v1  ;;  %v1028_v8 = vsel %vm11365_vm9, %v7648_v23, %v7652_v22  ;;  %v1821_v51 = vmul.f32 %v7483_v30, %v1791_v50  ;;  %v1027_v30 = vsel %vm11365_vm9, %v7647_v31, %v7648_v23 }
 0x12f   : > { %v8777_v36 = vpop.permute.xlu0 %7670  ;;  %v1036_v23 = vmul.f32 %v8509_v49, %v1027_v30  ;;  %v7668_v49 = vunpack.i.h.bf16 %v8647_v24 }
 0x130   : > { %2469 = vrot.lane.b32.xlu2 %v2462_v7, %s11268_s24  ;;  %v8792_v7 = vld [vmem:[%s8352_s29 + $0x10] sm:$0xff]   ;;  %v1029_v26 = vsel %vm11365_vm9, %v7652_v22, %v11230_v27  ;;  %v1824_v3 = vpack.c.bf16 %v1821_v51, %v1821_v51  ;;  %v7672_v30 = vunpack.i.l.bf16 %v8777_v36 }
 0x131   : > { %v8766_v17 = vpop.permute.xlu1 %7675  ;;  %v2879_v34 = vunpack.c.h.bf16 %v8792_v7  ;;  %v1038_v48 = vmul.f32 %v8517_v14, %v1029_v26  ;;  %v8834_v51 = vld [vmem:[%s8352_s29 + $0x10] sm:$0xff]  }
 0x132   : > { %2467 = vrot.lane.b32.xlu1 %v2461_v54, %s11268_s24  ;;  %v8780_v38 = vpop.permute.xlu2 %7725  ;;  %v2370_v54 = vpack.c.bf16 %v2367_v6, %v2366_v11  ;;  %v2269_v2 = vsel %vm11367_vm14, %v7668_v49, %v7672_v30 }
 0x133   : > { %v2908_v11 = vmul.f32 %v7493_v15, %v2879_v34  ;;  %v11231_v15 = vunpack.i.h.bf16 %v8730_v21  ;;  %v7657_v34 = vunpack.i.l.bf16 %v8736_v13  ;;  %v1035_v13 = vmul.f32 %v7647_v31, %v8498_v57 }
 0x135   : > { %v2911_v12 = vpack.c.bf16 %v2908_v11, %v2908_v11  ;;  %v2178_v26 = vsel %vm11368_vm13, %v7662_v40, %v11231_v15 }
 0x136   : > { %2377 = vrot.lane.b32.xlu0 %v2370_v54, %s8175_s17  ;;  %v1037_v54 = vmul.f32 %v8507_v4, %v1028_v8  ;;  %v2184_v8 = vmul.f32 %v7657_v34, %v8733_v63  ;;  %v2187_v31 = vmul.f32 %v2178_v26, %v8450_v56 }
 0x137   : > { %v8812_v41 = vpop.permute.xlu0 %7685 }
 0x138   : > { %954 = vrot.lane.b32.xlu2 %v947_v33, %s8178_s20  ;;  %v1041_v50 = vpack.c.bf16 %v1038_v48, %v1037_v54  ;;  %v2177_v33 = vsel %vm11368_vm13, %v7658_v52, %v7662_v40  ;;  %v7678_v54 = vunpack.i.h.bf16 %v8766_v17  ;;  %v7677_v40 = vunpack.i.l.bf16 %v8766_v17  ;;  %v696_v48 = vld [vmem:[%s8352_s29] sm:$0xff] }
 0x139   : > { %v2186_v11 = vmul.f32 %v2177_v33, %v8448_v55  ;;  %v1885_v33 = vunpack.c.h.bf16 %v8834_v51  ;;  %v8851_v27 = vunpack.c.l.bf16 %v696_v48  ;;  %v8853_v15 = vunpack.c.h.bf16 %v696_v48 }
 0x13a   : > { %952 = vrot.lane.b32.xlu1 %v946_v28, %s8178_s20  ;;  %v8814_v22 = vpop.permute.xlu2 %1830  ;;  %v2176_v28 = vsel %vm11368_vm13, %v7657_v34, %v7658_v52  ;;  %v11234_v34 = vunpack.i.h.bf16 %v8777_v36  ;;  %v749_v25 = vsel %vm748_vm11, %v7677_v40, %v7678_v54  ;;  %v7688_v48 = vunpack.i.h.bf16 %v8812_v41 }
 0x13b   : > { %v8805_v6 = vpop.permute.xlu1 %7690  ;;  %v2190_v26 = vpack.c.bf16 %v2187_v31, %v2186_v11  ;;  %v1915_v11 = vmul.f32 %v7523_v16, %v1885_v33  ;;  %v7687_v31 = vunpack.i.l.bf16 %v8812_v41 }
 0x13d   : > { %v1918_v16 = vpack.c.bf16 %v1915_v11, %v1915_v11  ;;  %v843_v33 = vsel %vm11366_vm12, %v7687_v31, %v7688_v48 }
 0x13e   : > { %2919 = vrot.lane.b32.xlu0 %v2911_v12, %s11260_s23  ;;  %v2185_v12 = vmul.f32 %v8738_v20, %v2176_v28  ;;  %v852_v11 = vmul.f32 %v843_v33, %v8853_v15 }
 0x140   : > { %1832 = vrot.lane.b32.xlu2 %v1824_v3, %s8171_s27  ;;  %v1040_v3 = vpack.c.bf16 %v1036_v23, %v1035_v13  ;;  %v2189_v28 = vpack.c.bf16 %v2185_v12, %v2184_v8  ;;  %v2270_v13 = vsel %vm11367_vm14, %v7672_v30, %v11234_v34  ;;  %v7667_v23 = vunpack.i.l.bf16 %v8647_v24 }
 0x141   : > { %v757_v8 = vmul.f32 %v7677_v40, %v8851_v27  ;;  %v758_v12 = vmul.f32 %v749_v25, %v8853_v15  ;;  %v7692_v30 = vunpack.i.l.bf16 %v8805_v6  ;;  %v2279_v61 = vmul.f32 %v2270_v13, %v8450_v56 }
 0x142   : > { %1048 = vrot.lane.b32.xlu1 %v1041_v50, %s11264_s1  ;;  %v8841_v57 = vpop.permute.xlu2 %2915  ;;  %v8848_v50 = vpop.permute.xlu0 %7700  ;;  %v2268_v40 = vsel %vm11367_vm14, %v7667_v23, %v7668_v49  ;;  %v11242_v56 = vunpack.i.h.bf16 %v8676_v46  ;;  %v851_v49 = vmul.f32 %v7687_v31, %v8851_v27 }
 0x143   : > { %v762_v41 = vpack.c.bf16 %v758_v12, %v757_v8  ;;  %v844_v44 = vsel %vm11366_vm12, %v7688_v48, %v7692_v30  ;;  %v2277_v13 = vmul.f32 %v8738_v20, %v2268_v40  ;;  %v7698_v8 = vunpack.i.h.bf16 %v8709_v45 }
 0x144   : > { %v8839_v52 = vpop.permute.xlu1 %7705  ;;  %v853_v48 = vmul.f32 %v8507_v4, %v844_v44  ;;  %v7697_v12 = vunpack.i.l.bf16 %v8709_v45  ;;  %v7702_v31 = vunpack.i.l.bf16 %v8848_v50  ;;  %v856_v44 = vpack.c.bf16 %v852_v11, %v851_v49  ;;  %v1708_v49 = vld [vmem:[#allocation8 + $0x10] sm:$0x44] }
 0x146   : > { %1046 = vrot.lane.b32.xlu0 %v1040_v3, %s11264_s1  ;;  %v11238_v3 = vunpack.i.h.bf16 %v8805_v6  ;;  %v1994_v17 = vsel %vm1514_vm8, %v7698_v8, %v7702_v31  ;;  %v2001_v11 = vmul.f32 %v7697_v12, %v8733_v63 }
 0x148   : > { %2197 = vrot.lane.b32.xlu2 %v2190_v26, %s8169_s11  ;;  %v845_v29 = vsel %vm11366_vm12, %v7692_v30, %v11238_v3  ;;  %v11244_v30 = vunpack.i.h.bf16 %v8848_v50 }
 0x14a   : > { %2195 = vrot.lane.b32.xlu1 %v2189_v28, %s8169_s11  ;;  %v8874_v24 = vpop.permute.xlu2 %1690  ;;  %v2278_v28 = vmul.f32 %v2269_v2, %v8448_v55  ;;  %v2276_v55 = vmul.f32 %v7667_v23, %v8733_v63  ;;  %v7682_v2 = vunpack.i.l.bf16 %v8676_v46  ;;  %v854_v23 = vmul.f32 %v8517_v14, %v845_v29 }
 0x14b   : > { %v8883_v25 = vpop.permute.xlu0 %7715 }
 0x14c   : > { %v8876_v26 = vpop.permute.xlu1 %7720  ;;  %v2282_v34 = vpack.c.bf16 %v2279_v61, %v2278_v28  ;;  %v8906_v61 = vld [vmem:[%s8352_s29 + $0xc] sm:$0xff]  ;;  %v2281_v33 = vpack.c.bf16 %v2277_v13, %v2276_v55  ;;  %v750_v29 = vsel %vm748_vm11, %v7678_v54, %v7682_v2  ;;  %v751_v45 = vsel %vm748_vm11, %v7682_v2, %v11242_v56 }
 0x14d   : > { %v857_v3 = vpack.c.bf16 %v854_v23, %v853_v48  ;;  %v1973_v0 = vunpack.c.l.bf16 %v8906_v61  ;;  %v1974_v60 = vunpack.c.h.bf16 %v8906_v61  ;;  %v1995_v54 = vsel %vm1514_vm8, %v7702_v31, %v11244_v30 }
 0x14e   : > { %1926 = vrot.lane.b32.xlu0 %v1918_v16, %s11246_s14  ;;  %v11243_v16 = vrot.slane %v8814_v22, 4  ;;  %v1993_v2 = vsel %vm1514_vm8, %v7697_v12, %v7698_v8  ;;  %v1712_v13 = vunpack.c.l.b16 %v1708_v49  ;;  %v759_v23 = vmul.f32 %v8507_v4, %v750_v29  ;;  %s11452_s14 = smov 119  }
 0x14f   : > { %v1713_v61 = vunpack.c.h.b16 %v1708_v49  ;;  %v11245_v31 = vunpack.i.h.bf16 %v8749_v37  ;;  %v2004_v8 = vmul.f32 %v1995_v54, %v1974_v60  ;;  %v7712_v12 = vunpack.i.l.bf16 %v8749_v37 }
 0x150   : > { %768 = vrot.lane.b32.xlu2 %v762_v41, %s8175_s17  ;;  %v1716_v4 = vpack.c.b16 %v1712_v13, %v1712_v13 }
 0x151   : > { %v1717_v29 = vpack.c.b16 %v1713_v61, %v1713_v61  ;;  %v2089_v30 = vsel %vm11259_vm5, %v7712_v12, %v11245_v31 }
 0x152   : > { %2289 = vrot.lane.b32.xlu1 %v2282_v34, %s8176_s18  ;;  %v8903_v28 = vpop.permute.xlu2 %1598  ;;  %v1721_v54 = vshrl.u32 %v1716_v4, 16  ;;  %v7707_v4 = vunpack.i.l.bf16 %v8839_v52 }
 0x154   : > { %v1829_v34 = vpop.permute.xlu1 %1828  ;;  %v1722_v13 = vpack.i.b16 %v1721_v54, %v1721_v54 }
 0x155   : > { %v1834_v40 = vrot.slane %v1829_v34, 4 }
 0x156   : > { %2287 = vrot.lane.b32.xlu0 %v2281_v33, %s8176_s18  ;;  %v2002_v33 = vmul.f32 %v8738_v20, %v1993_v2  ;;  %v1726_v2 = vshrl.u32 %v1717_v29, 16 }
 0x157   : > { %v1837_v41 = vsel %vm11338_vm15, %v1834_v40, %v11243_v16  ;;  %v2003_v40 = vmul.f32 %v1994_v17, %v1973_v0 }
 0x158   : > { %v1839_v55 = vsel %vm11358_vm3, %v1829_v34, %v1837_v41  ;;  %v8928_v48 = vpop.permute.xlu0 %7730  ;;  %864 = vrot.lane.b32.xlu2 %v857_v3, %s11268_s24  ;;  %v760_v34 = vmul.f32 %v8517_v14, %v751_v45  ;;  %v8937_v41 = vld [vmem:[%s8352_s29 + $0x10] sm:$0xff]   ;;  %v1651_v14 = vunpack.c.l.bf16 %v8792_v7  ;;  %v2006_v56 = vpack.c.bf16 %v2002_v33, %v2001_v11 }
 0x159   : > { %1844 = vst [vmem:[#allocation2 + $0xe0] sm:$0xff] %v1839_v55  ;;  %v7708_v55 = vunpack.i.h.bf16 %v8839_v52  ;;  %v2699_v17 = vunpack.c.h.bf16 %v8937_v41  ;;  %v2007_v49 = vpack.c.bf16 %v2004_v8, %v2003_v40  ;;  %v1727_v61 = vpack.i.b16 %v1726_v2, %v1726_v2 }
 0x15a   : > { %862 = vrot.lane.b32.xlu1 %v856_v44, %s11268_s24  ;;  %v8941_v3 = vpop.permute.xlu2 %2737  ;;  %v763_v45 = vpack.c.bf16 %v760_v34, %v759_v23  ;;  %v11450_v23 = vunpack.i.h.bf16 %v8410_v47  ;;  %v11451_v11 = vunpack.i.h.bf16 %v8468_v10  ;;  %v1724_v8 = vperm.slane %v1722_v13, 2 }
 0x15b   : > { %v2088_v16 = vsel %vm11259_vm5, %v7708_v55, %v7712_v12  ;;  %v1729_v33 = vperm.slane %v1727_v61, 2  ;;  %v11248_v12 = vrot.slane %v8874_v24, 4  ;;  %v2098_v2 = vmul.f32 %v2089_v30, %v1974_v60 }
 0x15c   : > { %v8943_v44 = vpop.permute.xlu1 %1924  ;;  %v1681_v34 = vmul.f32 %v11450_v23, %v1651_v14  ;;  %v2728_v40 = vmul.f32 %v11451_v11, %v2699_v17  ;;  %v2097_v54 = vmul.f32 %v2088_v16, %v1973_v0  ;;  %v11250_v47 = vunpack.i.h.bf16 %v8876_v26  ;;  %v8971_v0 = vld [vmem:[%s8352_s29 + $0x8] sm:$0xff] }
 0x15d   : > { %v11249_v7 = vrot.slane %v8943_v44, 4  ;;  %v7722_v52 = vunpack.i.l.bf16 %v8876_v26  ;;  %v1744_v23 = vunpack.c.l.bf16 %v1724_v8  ;;  %v7718_v10 = vunpack.i.h.bf16 %v8883_v25 }
 0x15e   : > { %770 = vrot.lane.b32.xlu0 %v763_v45, %s8175_s17  ;;  %v7717_v17 = vunpack.i.l.bf16 %v8883_v25  ;;  %v1684_v30 = vpack.c.bf16 %v1681_v34, %v1681_v34  ;;  %v2731_v25 = vpack.c.bf16 %v2728_v40, %v2728_v40  ;;  %v2087_v31 = vsel %vm11259_vm5, %v7707_v4, %v7708_v55 }
 0x15f   : > { %v1748_v16 = vmul.f32 %v8733_v63, %v1744_v23  ;;  %v11251_v34 = vunpack.c.h.bf16 %v8971_v0  ;;  %v566_v40 = vsel %vm11368_vm13, %v7722_v52, %v11250_v47  ;;  %v2095_v55 = vmul.f32 %v7707_v4, %v8733_v63  ;;  %v9001_v63 = vld [vmem:[%s8352_s29 + $0x10] sm:$0xff]  }
 0x160   : > { %v1923_v29 = vpop.permute.xlu0 %1922  ;;  %2014 = vrot.lane.b32.xlu2 %v2007_v49, %s11286_s30  ;;  %v7732_v4 = vunpack.i.l.bf16 %v8928_v48 }
 0x161   : > { %v1928_v45 = vrot.slane %v1923_v29, 4 }
 0x162   : > { %2012 = vrot.lane.b32.xlu1 %v2006_v56, %s11286_s30  ;;  %v8963_v14 = vpop.permute.xlu2 %1320  ;;  %v1745_v56 = vunpack.c.l.bf16 %v1729_v33  ;;  %v2101_v33 = vpack.c.bf16 %v2098_v2, %v2097_v54  ;;  %v564_v54 = vsel %vm11368_vm13, %v7717_v17, %v7718_v10 }
 0x163   : > { %v1931_v13 = vsel %vm11338_vm15, %v1928_v45, %v11249_v7 }
 0x164   : > { %v1689_v49 = vpop.permute.xlu1 %1688  ;;  %v1933_v60 = vsel %vm11254_vm4, %v1923_v29, %v1931_v13  ;;  %v1749_v11 = vmul.f32 %v8738_v20, %v1745_v56  ;;  %v11252_v29 = vunpack.c.l.bf16 %v8971_v0  ;;  %v565_v56 = vsel %vm11368_vm13, %v7718_v10, %v7722_v52 }
 0x165   : > { %v1694_v61 = vrot.slane %v1689_v49, 4  ;;  %1938 = vst [vmem:[#allocation2 + $0xf0] sm:$0xff] %v1933_v60  ;;  %v1467_v13 = vunpack.c.l.bf16 %v8786_v58  ;;  %v2921_v60 = vrot.slane %v8841_v57, 4  ;;  %v572_v52 = vmul.f32 %v7717_v17, %v8851_v27 }
 0x166   : > { %1692 = vrot.lane.b32.xlu0 %v1684_v30, %s11284_s25  ;;  %v1752_v23 = vpack.c.bf16 %v1749_v11, %v1748_v16  ;;  %v575_v58 = vmul.f32 %v566_v40, %v11251_v34 }
 0x167   : > { %v1697_v8 = vsel %vm11338_vm15, %v1694_v61, %v11248_v12 }
 0x168   : > { %v1699_v45 = vsel %vm11359_vm0, %v1689_v49, %v1697_v8  ;;  %v8990_v2 = vpop.permute.xlu0 %2917  ;;  %2739 = vrot.lane.b32.xlu2 %v2731_v25, %s11266_s21  ;;  %v2096_v49 = vmul.f32 %v8738_v20, %v2087_v31  ;;  %1754 = vst [vmem:[#allocation2 + $0xd0] sm:$0xff] %v1752_v23  ;;  %v574_v20 = vmul.f32 %v565_v56, %v11252_v29  ;;  %v6958_v8 = vld [vmem:[#allocation2 + $0xe0] sm:$0xf]  ;;  %v7317_v23 = vld [vmem:[#allocation2 + $0xe4] sm:$0xf]  ;;  %v2791_v56 = vunpack.c.h.bf16 %v9001_v63 }
 0x169   : > { %1704 = vst [vmem:[#allocation2 + $0xc0] sm:$0xff] %v1699_v45  ;;  %v11253_v10 = vrot.slane %v8990_v2, 4  ;;  %v573_v31 = vmul.f32 %v8853_v15, %v564_v54 }
 0x16a   : > { %2108 = vrot.lane.b32.xlu1 %v2101_v33, %s11452_s14  ;;  %v9004_v30 = vpop.permute.xlu2 %1416  ;;  %v2100_v33 = vpack.c.bf16 %v2096_v49, %v2095_v55  ;;  %v578_v34 = vpack.c.bf16 %v575_v58, %v574_v20  ;;  %v11455_v20 = vunpack.i.h.bf16 %v8928_v48 }
 0x16b   : > { %v2924_v11 = vsel %vm11338_vm15, %v2921_v60, %v11253_v10  ;;  %v577_v29 = vpack.c.bf16 %v573_v31, %v572_v52  ;;  %v11453_v10 = vunpack.i.h.bf16 %v8433_v19  ;;  %v11456_v19 = vunpack.i.h.bf16 %v8490_v42 }
 0x16c   : > { %v9006_v16 = vpop.permute.xlu1 %1506  ;;  %v2925_v25 = vsel %vm11368_vm13, %v8841_v57, %v2924_v11  ;;  %v7319_v45 = vld [vmem:[#allocation2 + $0xec] sm:$0xf0]  ;;  %v6960_v12 = vld [vmem:[#allocation2 + $0xf0] sm:$0xf0]  ;;  %v11454_v57 = vunpack.i.h.bf16 %v8780_v38  ;;  %v661_v52 = vsel %vm11367_vm14, %v7732_v4, %v11455_v20  ;;  %v7727_v31 = vunpack.i.l.bf16 %v8780_v38 }
 0x16d   : > { %v6959_v7 = vor.u32 %v7319_v45, %v6958_v8  ;;  %v6963_v40 = vor.u32 %v7317_v23, %v6960_v12  ;;  %v3151_v47 = vunpack.c.l.b16 %v2925_v25  ;;  %v3152_v54 = vunpack.c.h.b16 %v2925_v25 }
 0x16e   : > { %2106 = vrot.lane.b32.xlu0 %v2100_v33, %s11452_s14  ;;  %v1497_v61 = vmul.f32 %v11453_v10, %v1467_v13  ;;  %v660_v55 = vsel %vm11367_vm14, %v11454_v57, %v7732_v4  ;;  %v1511_v49 = vrot.slane %v9006_v16, 4  ;;  %v2820_v13 = vmul.f32 %v11456_v19, %v2791_v56  ;;  %v9051_v57 = vld [vmem:[%s8352_s29 + $0x10] sm:$0xff]  }
 0x16f   : > { %3280 = vmatpush.bf16.msra.mxu0 %v6959_v7  ;;  %3306 = vmatpush.bf16.msra.mxu2 %v6963_v40  ;;  %v7315_v12 = vld [vmem:[#allocation2 + $0xcc] sm:$0xf0]  ;;  %v6944_v11 = vld [vmem:[#allocation2 + $0xd0] sm:$0xf0]  ;;  %v3207_v8 = vpack.c.b16 %v3151_v47, %v3151_v47  ;;  %v3208_v25 = vpack.c.b16 %v3152_v54, %v3152_v54  ;;  %v11457_v42 = vunpack.c.l.bf16 %v8971_v0  ;;  %v2742_v56 = vrot.slane %v8941_v3, 4 }
 0x170   : > { %v6942_v17 = vld [vmem:[#allocation2 + $0xc0] sm:$0xf]  ;;  %v7313_v60 = vld [vmem:[#allocation2 + $0xc4] sm:$0xf]  ;;  %v1505_v58 = vpop.permute.xlu0 %1504  ;;  %585 = vrot.lane.b32.xlu2 %v578_v34, %s8169_s11 }
 0x171   : > { %v6943_v7 = vor.u32 %v7315_v12, %v6942_v17  ;;  %v6947_v10 = vor.u32 %v7313_v60, %v6944_v11  ;;  %v1510_v47 = vrot.slane %v1505_v58, 4  ;;  %v3269_v33 = vsel %vm11338_vm15, %v3207_v8, 0  ;;  %v9048_v60 = vld [vmem:[%s8352_s29 + $0x10] sm:$0xff]  }
 0x172   : > { %583 = vrot.lane.b32.xlu1 %v577_v29, %s8169_s11  ;;  %v3272_v45 = vsel %vm11338_vm15, %v3208_v25, 0  ;;  %v9037_v4 = vpop.permute.xlu2 %2647  ;;  %3295 = vmatpush.bf16.msra.mxu1 %v3269_v33  ;;  %v669_v34 = vmul.f32 %v660_v55, %v11457_v42  ;;  %v11458_v29 = vunpack.c.h.bf16 %v8971_v0  ;;  %v2823_v11 = vpack.c.bf16 %v2820_v13, %v2820_v13  ;;  %v9084_v42 = vld [vmem:[%s8352_s29 + $0x10] sm:$0xff]  }
 0x173   : > { %3321 = vmatpush.bf16.msra.mxu3 %v3272_v45  ;;  %v1513_v40 = vsel %vm11338_vm15, %v1510_v47, %v1511_v49  ;;  %3281 = vmatpush.bf16.msra.mxu0 %v6943_v7  ;;  %v11459_v55 = vunpack.i.h.bf16 %v8780_v38  ;;  %v1500_v25 = vpack.c.bf16 %v1497_v61, %v1497_v61  ;;  %v2611_v19 = vunpack.c.h.bf16 %v9048_v60 }
 0x174   : > { %v2736_v23 = vpop.permute.xlu1 %2735  ;;  %v670_v17 = vmul.f32 %v661_v52, %v11458_v29  ;;  %3307 = vmatpush.bf16.msra.mxu2 %v6947_v10  ;;  %v1515_v12 = vsel %vm1514_vm8, %v1505_v58, %v1513_v40  ;;  %v2519_v58 = vunpack.c.h.bf16 %v9051_v57  ;;  %v667_v13 = vmul.f32 %v7727_v31, %v8851_v27 }
 0x175   : > { %v2741_v54 = vrot.slane %v2736_v23, 4  ;;  %1520 = vst [vmem:[#allocation2 + $0xa0] sm:$0xff] %v1515_v12  ;;  %v659_v8 = vsel %vm11367_vm14, %v7727_v31, %v11459_v55  ;;  %v1604_v61 = vrot.slane %v8903_v28, 4  ;;  %v11460_v45 = vunpack.i.h.bf16 %v8474_v18 }
 0x176   : > { %2831 = vrot.lane.b32.xlu0 %v2823_v11, %s11262_s13  ;;  %v673_v52 = vpack.c.bf16 %v670_v17, %v669_v34  ;;  %v668_v38 = vmul.f32 %v8853_v15, %v659_v8  ;;  %v11461_v27 = vunpack.i.h.bf16 %v8565_v9  ;;  %v1561_v17 = vunpack.c.l.bf16 %v8834_v51 }
 0x177   : > { %v2744_v0 = vsel %vm11338_vm15, %v2741_v54, %v2742_v56  ;;  %v1377_v40 = vunpack.c.l.bf16 %v9001_v63  ;;  %v2339_v54 = vunpack.c.h.bf16 %v9084_v42 }
 0x178   : > { %v2745_v20 = vsel %vm748_vm11, %v2736_v23, %v2744_v0  ;;  %v9065_v7 = vpop.permute.xlu0 %1600  ;;  %1508 = vrot.lane.b32.xlu2 %v1500_v25, %s11257_s28  ;;  %v2640_v23 = vmul.f32 %v11460_v45, %v2611_v19  ;;  %v2548_v31 = vmul.f32 %v11461_v27, %v2519_v58  ;;  %v672_v29 = vpack.c.bf16 %v668_v38, %v667_v13  ;;  %s11509_s28 = smov 63  }
 0x179   : > { %2750 = vst [vmem:[#allocation2 + $0x180] sm:$0xff] %v2745_v20  ;;  %v1605_v10 = vrot.slane %v9065_v7, 4  ;;  %v11462_v0 = vunpack.i.h.bf16 %v8414_v59  ;;  %v11464_v20 = vunpack.i.h.bf16 %v8544_v43  ;;  %v1421_v19 = vrot.slane %v9004_v30, 4 }
 0x17a   : > { %680 = vrot.lane.b32.xlu1 %v673_v52, %s8176_s18  ;;  %v9072_v47 = vpop.permute.xlu2 %1138  ;;  %v2643_v18 = vpack.c.bf16 %v2640_v23, %v2640_v23  ;;  %v2551_v9 = vpack.c.bf16 %v2548_v31, %v2548_v31  ;;  %v1283_v27 = vunpack.c.l.bf16 %v8937_v41 }
 0x17b   : > { %v1607_v15 = vsel %vm11338_vm15, %v1604_v61, %v1605_v10  ;;  %v1591_v55 = vmul.f32 %v11462_v0, %v1561_v17  ;;  %v2368_v52 = vmul.f32 %v11464_v20, %v2339_v54 }
 0x17c   : > { %v9074_v33 = vpop.permute.xlu1 %2829  ;;  %v1609_v34 = vsel %vm11360_vm2, %v8903_v28, %v1607_v15  ;;  %v11463_v28 = vunpack.i.h.bf16 %v8541_v35  ;;  %v6926_v58 = vld [vmem:[#allocation2 + $0xa0] sm:$0xf]  ;;  %v7309_v35 = vld [vmem:[#allocation2 + $0xa4] sm:$0xf] }
 0x17d   : > { %1614 = vst [vmem:[#allocation2 + $0xb0] sm:$0xff] %v1609_v34  ;;  %v2834_v12 = vrot.slane %v9074_v33, 4  ;;  %v1594_v61 = vpack.c.bf16 %v1591_v55, %v1591_v55  ;;  %v2371_v17 = vpack.c.bf16 %v2368_v52, %v2368_v52  ;;  %v9139_v52 = vld [vmem:[%s8352_s29 + $0x10] sm:$0xff]  }
 0x17e   : > { %678 = vrot.lane.b32.xlu0 %v672_v29, %s8176_s18  ;;  %v1407_v63 = vmul.f32 %v11463_v28, %v1377_v40  ;;  %v1193_v40 = vunpack.c.l.bf16 %v9048_v60  ;;  %v9125_v60 = vld [vmem:[%s8352_s29 + $0x10] sm:$0xff]  }
 0x180   : > { %v2828_v11 = vpop.permute.xlu0 %2827  ;;  %2651 = vrot.lane.b32.xlu2 %v2643_v18, %s11264_s1  ;;  %v1410_v34 = vpack.c.bf16 %v1407_v63, %v1407_v63  ;;  %v1099_v18 = vunpack.c.l.bf16 %v9051_v57  ;;  %v7038_v20 = vld [vmem:[#allocation2 + $0x180] sm:$0xf] }
 0x181   : > { %v2833_v51 = vrot.slane %v2828_v11, 4 }
 0x182   : > { %2559 = vrot.lane.b32.xlu1 %v2551_v9, %s8178_s20  ;;  %v9099_v8 = vpop.permute.xlu2 %2375  ;;  %v11465_v9 = vunpack.i.h.bf16 %v8430_v5  ;;  %v11467_v5 = vunpack.i.h.bf16 %v8597_v62 }
 0x183   : > { %v2836_v59 = vsel %vm11338_vm15, %v2833_v51, %v2834_v12  ;;  %v11466_v51 = vunpack.i.h.bf16 %v8634_v53  ;;  %v2431_v53 = vunpack.c.h.bf16 %v9125_v60 }
 0x184   : > { %v1415_v25 = vpop.permute.xlu1 %1414  ;;  %v2837_v38 = vsel %vm11367_vm14, %v2828_v11, %v2836_v59  ;;  %v7311_v45 = vld [vmem:[#allocation2 + $0xac] sm:$0xf0]  ;;  %v6928_v23 = vld [vmem:[#allocation2 + $0xb0] sm:$0xf0]  ;;  %v1313_v54 = vmul.f32 %v11465_v9, %v1283_v27  ;;  %v1326_v11 = vrot.slane %v8963_v14, 4  ;;  %v1129_v63 = vmul.f32 %v11467_v5, %v1099_v18 }
 0x185   : > { %v1420_v13 = vrot.slane %v1415_v25, 4  ;;  %2842 = vst [vmem:[#allocation2 + $0x190] sm:$0xff] %v2837_v38  ;;  %v6927_v31 = vor.u32 %v7311_v45, %v6926_v58  ;;  %v6931_v43 = vor.u32 %v7309_v35, %v6928_v23  ;;  %v1223_v28 = vmul.f32 %v11466_v51, %v1193_v40  ;;  %v7337_v38 = vld [vmem:[#allocation2 + $0x184] sm:$0xf] }
 0x186   : > { %1602 = vrot.lane.b32.xlu0 %v1594_v61, %s11282_s16  ;;  %v1316_v58 = vpack.c.bf16 %v1313_v54, %v1313_v54  ;;  %v915_v35 = vunpack.c.l.bf16 %v9084_v42  ;;  %v1132_v27 = vpack.c.bf16 %v1129_v63, %v1129_v63  ;;  %v11470_v51 = vunpack.i.h.bf16 %v8777_v36 }
 0x187   : > { %v1423_v15 = vsel %vm11338_vm15, %v1420_v13, %v1421_v19  ;;  %3282 = vmatpush.bf16.msra.mxu0 %v6927_v31  ;;  %3308 = vmatpush.bf16.msra.mxu2 %v6931_v43  ;;  %v1226_v23 = vpack.c.bf16 %v1223_v28, %v1223_v28  ;;  %v2251_v31 = vunpack.c.h.bf16 %v9139_v52  ;;  %v1143_v28 = vrot.slane %v9072_v47, 4 }
 0x188   : > { %v1425_v29 = vsel %vm11259_vm5, %v1415_v25, %v1423_v15  ;;  %v9116_v41 = vpop.permute.xlu0 %1322  ;;  %2379 = vrot.lane.b32.xlu2 %v2371_v17, %s8175_s17  ;;  %v11468_v15 = vunpack.i.h.bf16 %v8663_v32  ;;  %v11469_v17 = vunpack.i.h.bf16 %v8702_v39 }
 0x189   : > { %1430 = vst [vmem:[#allocation2 + $0x90] sm:$0xff] %v1425_v29  ;;  %v1327_v0 = vrot.slane %v9116_v41, 4  ;;  %v9153_v29 = vld [vmem:[%s8352_s29 + $0x10] sm:$0xff]   ;;  %v2280_v32 = vmul.f32 %v11470_v51, %v2251_v31 }
 0x18a   : > { %1418 = vrot.lane.b32.xlu1 %v1410_v34, %s11255_s19  ;;  %v9127_v57 = vpop.permute.xlu2 %2469  ;;  %v2460_v34 = vmul.f32 %v11468_v15, %v2431_v53  ;;  %v945_v40 = vmul.f32 %v11469_v17, %v915_v35  ;;  %s11506_s19 = smov 57  }
 0x18b   : > { %v1329_v25 = vsel %vm11338_vm15, %v1326_v11, %v1327_v0  ;;  %v2283_v35 = vpack.c.bf16 %v2280_v32, %v2280_v32 }
 0x18c   : > { %v9129_v55 = vpop.permute.xlu1 %2557  ;;  %v1331_v59 = vsel %vm11368_vm13, %v8963_v14, %v1329_v25  ;;  %v7339_v13 = vld [vmem:[#allocation2 + $0x18c] sm:$0xf0]  ;;  %v7040_v61 = vld [vmem:[#allocation2 + $0x190] sm:$0xf0]  ;;  %v9166_v25 = vld [vmem:[%s8352_s29 + $0x10] sm:$0xff]   ;;  %v948_v53 = vpack.c.bf16 %v945_v40, %v945_v40 }
 0x18d   : > { %1336 = vst [vmem:[#allocation2 + $0x80] sm:$0xff] %v1331_v59  ;;  %v7039_v62 = vor.u32 %v7339_v13, %v7038_v20  ;;  %v7043_v45 = vor.u32 %v7337_v38, %v7040_v61  ;;  %v2562_v14 = vrot.slane %v9129_v55, 4  ;;  %v2463_v20 = vpack.c.bf16 %v2460_v34, %v2460_v34 }
 0x18e   : > { %1324 = vrot.lane.b32.xlu0 %v1316_v58, %s11260_s23  ;;  %v2159_v13 = vunpack.c.h.bf16 %v9153_v29  ;;  %v2653_v34 = vrot.slane %v9037_v4, 4  ;;  %s9488_s23 = scalar_select %p502_p1, %s8281_s15, 1 }
 0x18f   : > { %3296 = vmatpush.bf16.msra.mxu1 %v7039_v62  ;;  %3322 = vmatpush.bf16.msra.mxu3 %v7043_v45  ;;  %v2032_v62 = vld [vmem:[%s8352_s29 + $0x10] sm:$0xff]  }
 0x190   : > { %v2556_v43 = vpop.permute.xlu0 %2555  ;;  %1234 = vrot.lane.b32.xlu2 %v1226_v23, %s11262_s13  ;;  %v7307_v18 = vld [vmem:[#allocation2 + $0x8c] sm:$0xf0]  ;;  %v6912_v9 = vld [vmem:[#allocation2 + $0x90] sm:$0xf0]  ;;  %v2069_v23 = vunpack.c.h.bf16 %v2032_v62  ;;  %s6842_s13 = sshll.u32 %s9488_s23, 3  ;;  %s11486_s23 = smov 121  }
 0x191   : > { %v2561_v42 = vrot.slane %v2556_v43, 4 }
 0x192   : > { %1140 = vrot.lane.b32.xlu1 %v1132_v27, %s11266_s21  ;;  %v9157_v54 = vpop.permute.xlu2 %954  ;;  %v1975_v27 = vunpack.c.h.bf16 %v9166_v25  ;;  %s11511_s21 = smov 55  }
 0x193   : > { %v2564_v5 = vsel %vm11338_vm15, %v2561_v42, %v2562_v14 }
 0x194   : > { %v1137_v11 = vpop.permute.xlu1 %1136  ;;  %v2565_v39 = vsel %vm11345_vm10, %v2556_v43, %v2564_v5  ;;  %v6910_v59 = vld [vmem:[#allocation2 + $0x80] sm:$0xf]  ;;  %v7305_v58 = vld [vmem:[#allocation2 + $0x84] sm:$0xf]  ;;  %v11471_v43 = vunpack.i.h.bf16 %v8730_v21 }
 0x195   : > { %v1142_v63 = vrot.slane %v1137_v11, 4  ;;  %2570 = vst [vmem:[#allocation2 + $0x160] sm:$0xff] %v2565_v39  ;;  %v6911_v36 = vor.u32 %v7307_v18, %v6910_v59  ;;  %v6915_v38 = vor.u32 %v7305_v58, %v6912_v9  ;;  %v11472_v18 = vunpack.i.h.bf16 %v8749_v37 }
 0x196   : > { %2471 = vrot.lane.b32.xlu0 %v2463_v20, %s11268_s24  ;;  %v2188_v15 = vmul.f32 %v11471_v43, %v2159_v13  ;;  %v1009_v39 = vunpack.c.l.bf16 %v9125_v60  ;;  %v11474_v20 = vrot.slane %v8814_v22, 4  ;;  %v825_v59 = vunpack.c.l.bf16 %v2032_v62 }
 0x197   : > { %v1145_v61 = vsel %vm11338_vm15, %v1142_v63, %v1143_v28  ;;  %3283 = vmatpush.bf16.msra.mxu0 %v6911_v36  ;;  %3309 = vmatpush.bf16.msra.mxu2 %v6915_v38  ;;  %v2099_v9 = vmul.f32 %v11472_v18, %v2069_v23  ;;  %v546_v36 = vunpack.c.l.bf16 %v9139_v52  ;;  %v11475_v60 = vunpack.i.h.bf16 %v8615_v1 }
 0x198   : > { %v1147_v45 = vsel %vm748_vm11, %v1137_v11, %v1145_v61  ;;  %v9177_v31 = vpop.permute.xlu0 %2649  ;;  %956 = vrot.lane.b32.xlu2 %v948_v53, %s8178_s20  ;;  %v11473_v11 = vunpack.i.h.bf16 %v8848_v50  ;;  %v2191_v63 = vpack.c.bf16 %v2188_v15, %v2188_v15  ;;  %v11477_v52 = vunpack.i.h.bf16 %v8805_v6 }
 0x199   : > { %1152 = vst [vmem:[#allocation2 + $0x60] sm:$0xff] %v1147_v45  ;;  %v2654_v42 = vrot.slane %v9177_v31, 4  ;;  %v2102_v58 = vpack.c.bf16 %v2099_v9, %v2099_v9  ;;  %v1039_v61 = vmul.f32 %v11475_v60, %v1009_v39 }
 0x19a   : > { %2291 = vrot.lane.b32.xlu1 %v2283_v35, %s8176_s18  ;;  %v1833_v17 = vpop.permute.xlu2 %1832  ;;  %v2005_v51 = vmul.f32 %v11473_v11, %v1975_v27  ;;  %v855_v23 = vmul.f32 %v11477_v52, %v825_v59  ;;  %v2474_v27 = vrot.slane %v9127_v57, 4 }
 0x19b   : > { %v2656_v21 = vsel %vm11338_vm15, %v2653_v34, %v2654_v42  ;;  %v1836_v32 = vrot.slane %v1833_v17, 4  ;;  %v1042_v17 = vpack.c.bf16 %v1039_v61, %v1039_v61 }
 0x19c   : > { %v9185_v40 = vpop.permute.xlu1 %1232  ;;  %v2657_v5 = vsel %vm11366_vm12, %v9037_v4, %v2656_v21  ;;  %v2008_v13 = vpack.c.bf16 %v2005_v51, %v2005_v51  ;;  %v7022_v43 = vld [vmem:[#allocation2 + $0x160] sm:$0xf]  ;;  %v7333_v9 = vld [vmem:[#allocation2 + $0x164] sm:$0xf] }
 0x19d   : > { %2662 = vst [vmem:[#allocation2 + $0x170] sm:$0xff] %v2657_v5  ;;  %v1840_v37 = vsel %vm11338_vm15, %v11474_v20, %v1836_v32  ;;  %v1237_v4 = vrot.slane %v9185_v40, 4 }
 0x19e   : > { %2199 = vrot.lane.b32.xlu0 %v2191_v63, %s8169_s11  ;;  %v1841_v50 = vsel %vm11358_vm3, %v8814_v22, %v1840_v37  ;;  %v11476_v22 = vunpack.i.h.bf16 %v8876_v26  ;;  %v731_v26 = vunpack.c.l.bf16 %v9153_v29  ;;  %v858_v63 = vpack.c.bf16 %v855_v23, %v855_v23 }
 0x19f   : > { %1845 = vst [vmem:[#allocation2 + $0xe8] sm:$0xff] %v1841_v50  ;;  %v11478_v29 = vunpack.i.h.bf16 %v8676_v46  ;;  %v2381_v37 = vrot.slane %v9099_v8, 4 }
 0x1a0   : > { %v1231_v38 = vpop.permute.xlu0 %1230  ;;  %2110 = vrot.lane.b32.xlu2 %v2102_v58, %s11452_s14  ;;  %v576_v35 = vmul.f32 %v11476_v22, %v546_v36 }
 0x1a1   : > { %v1236_v53 = vrot.slane %v1231_v38, 4  ;;  %v761_v20 = vmul.f32 %v11478_v29, %v731_v26  ;;  %v11480_v26 = vrot.slane %v8990_v2, 4 }
 0x1a2   : > { %2016 = vrot.lane.b32.xlu1 %v2008_v13, %s11286_s30  ;;  %v9209_v62 = vpop.permute.xlu2 %2197  ;;  %v579_v5 = vpack.c.bf16 %v576_v35, %v576_v35  ;;  %v959_v13 = vrot.slane %v9157_v54, 4  ;;  %v641_v35 = vunpack.c.l.bf16 %v9166_v25 }
 0x1a3   : > { %v1239_v1 = vsel %vm11338_vm15, %v1236_v53, %v1237_v4  ;;  %v764_v61 = vpack.c.bf16 %v761_v20, %v761_v20 }
 0x1a4   : > { %v2468_v45 = vpop.permute.xlu1 %2467  ;;  %v1241_v34 = vsel %vm11367_vm14, %v1231_v38, %v1239_v1  ;;  %v7335_v18 = vld [vmem:[#allocation2 + $0x16c] sm:$0xf0]  ;;  %v7024_v11 = vld [vmem:[#allocation2 + $0x170] sm:$0xf0]  ;;  %v6894_v38 = vld [vmem:[#allocation2 + $0x60] sm:$0xf] }
 0x1a5   : > { %v2473_v15 = vrot.slane %v2468_v45, 4  ;;  %1246 = vst [vmem:[#allocation2 + $0x70] sm:$0xff] %v1241_v34  ;;  %v7023_v51 = vor.u32 %v7335_v18, %v7022_v43  ;;  %v7027_v6 = vor.u32 %v7333_v9, %v7024_v11 }
 0x1a6   : > { %1050 = vrot.lane.b32.xlu0 %v1042_v17, %s11264_s1  ;;  %s509_s1 = scalar_lea.vmem %s11200_s3, %s6842_s13 }
 0x1a7   : > { %v2476_v21 = vsel %vm11338_vm15, %v2473_v15, %v2474_v27  ;;  %3297 = vmatpush.bf16.msra.mxu1 %v7023_v51  ;;  %3323 = vmatpush.bf16.msra.mxu3 %v7027_v6  ;;  %v11479_v15 = vunpack.i.h.bf16 %v8928_v48 }
 0x1a8   : > { %v2477_v32 = vsel %vm11365_vm9, %v2468_v45, %v2476_v21  ;;  %v9226_v39 = vpop.permute.xlu0 %2377  ;;  %587 = vrot.lane.b32.xlu2 %v579_v5, %s8169_s11  ;;  %v7301_v45 = vld [vmem:[#allocation2 + $0x64] sm:$0xf] }
 0x1a9   : > { %2482 = vst [vmem:[#allocation2 + $0x150] sm:$0xff] %v2477_v32  ;;  %v2382_v59 = vrot.slane %v9226_v39, 4  ;;  %v671_v34 = vmul.f32 %v11479_v15, %v641_v35 }
 0x1aa   : > { %866 = vrot.lane.b32.xlu1 %v858_v63, %s11268_s24  ;;  %v9234_v50 = vpop.permute.xlu2 %768  ;;  %s505_s24 = scalar_lea.vmem %s11199_s2, %s6842_s13  ;;  %s11498_s13 = smov 65  }
 0x1ab   : > { %v2384_v36 = vsel %vm11338_vm15, %v2381_v37, %v2382_v59  ;;  %v674_v21 = vpack.c.bf16 %v671_v34, %v671_v34 }
 0x1ac   : > { %v953_v58 = vpop.permute.xlu1 %952  ;;  %v2385_v60 = vsel %vm11340_vm6, %v9099_v8, %v2384_v36  ;;  %v7303_v53 = vld [vmem:[#allocation2 + $0x6c] sm:$0xf0]  ;;  %v6896_v22 = vld [vmem:[#allocation2 + $0x70] sm:$0xf0] }
 0x1ad   : > { %v958_v46 = vrot.slane %v953_v58, 4  ;;  %2390 = vst [vmem:[#allocation2 + $0x140] sm:$0xff] %v2385_v60  ;;  %v6895_v52 = vor.u32 %v7303_v53, %v6894_v38  ;;  %v6899_v23 = vor.u32 %v7301_v45, %v6896_v22  ;;  %v2202_v38 = vrot.slane %v9209_v62, 4 }
 0x1ae   : > { %772 = vrot.lane.b32.xlu0 %v764_v61, %s8175_s17 }
 0x1af   : > { %v961_v1 = vsel %vm11338_vm15, %v958_v46, %v959_v13  ;;  %3284 = vmatpush.bf16.msra.mxu0 %v6895_v52  ;;  %3310 = vmatpush.bf16.msra.mxu2 %v6899_v23  ;;  %v11481_v23 = vrot.slane %v8943_v44, 4 }
 0x1b0   : > { %v963_v43 = vsel %vm11345_vm10, %v953_v58, %v961_v1  ;;  %v2920_v8 = vpop.permute.xlu0 %2919  ;;  %v7331_v25 = vld [vmem:[#allocation2 + $0x14c] sm:$0xf0]  ;;  %v7008_v18 = vld [vmem:[#allocation2 + $0x150] sm:$0xf0] }
 0x1b1   : > { %968 = vst [vmem:[#allocation2 + $0x40] sm:$0xff] %v963_v43  ;;  %v2923_v17 = vrot.slane %v2920_v8, 4 }
 0x1b2   : > { %v9250_v9 = vpop.permute.xlu2 %864 }
 0x1b3   : > { %v2926_v51 = vsel %vm11338_vm15, %v11480_v26, %v2923_v17 }
 0x1b4   : > { %v9252_v11 = vpop.permute.xlu1 %1048  ;;  %v9259_v6 = vsel %vm11368_vm13, %v8990_v2, %v2926_v51  ;;  %v7006_v32 = vld [vmem:[#allocation2 + $0x140] sm:$0xf]  ;;  %v7329_v5 = vld [vmem:[#allocation2 + $0x144] sm:$0xf] }
 0x1b5   : > { %v7007_v48 = vor.u32 %v7331_v25, %v7006_v32  ;;  %v7011_v63 = vor.u32 %v7329_v5, %v7008_v18  ;;  %v1053_v29 = vrot.slane %v9252_v11, 4 }
 0x1b6   : > { %682 = vrot.lane.b32.xlu0 %v674_v21, %s8176_s18 }
 0x1b7   : > { %3298 = vmatpush.bf16.msra.mxu1 %v7007_v48  ;;  %3324 = vmatpush.bf16.msra.mxu3 %v7011_v63 }
 0x1b8   : > { %v1047_v20 = vpop.permute.xlu0 %1046  ;;  %v6878_v43 = vld [vmem:[#allocation2 + $0x40] sm:$0xf]  ;;  %v7297_v17 = vld [vmem:[#allocation2 + $0x44] sm:$0xf] }
 0x1b9   : > { %v1052_v37 = vrot.slane %v1047_v20, 4 }
 0x1ba   : > { %v9263_v58 = vpop.permute.xlu2 %2014 }
 0x1bb   : > { %v1055_v2 = vsel %vm11338_vm15, %v1052_v37, %v1053_v29 }
 0x1bc   : > { %v2196_v36 = vpop.permute.xlu1 %2195  ;;  %v1057_v60 = vsel %vm11366_vm12, %v1047_v20, %v1055_v2  ;;  %v869_v20 = vrot.slane %v9250_v9, 4 }
 0x1bd   : > { %v2201_v46 = vrot.slane %v2196_v36, 4  ;;  %1062 = vst [vmem:[#allocation2 + $0x50] sm:$0xff] %v1057_v60  ;;  %v774_v60 = vrot.slane %v9234_v50, 4 }
 0x1bf   : > { %v2204_v61 = vsel %vm11338_vm15, %v2201_v46, %v2202_v38 }
 0x1c0   : > { %v2205_v53 = vsel %vm11353_vm1, %v2196_v36, %v2204_v61  ;;  %v1927_v45 = vpop.permute.xlu0 %1926 }
 0x1c1   : > { %2210 = vst [vmem:[#allocation2 + $0x120] sm:$0xff] %v2205_v53  ;;  %v1930_v22 = vrot.slane %v1927_v45, 4 }
 0x1c2   : > { %v2740_v35 = vpop.permute.xlu2 %2739 }
 0x1c3   : > { %v1934_v1 = vsel %vm11338_vm15, %v11481_v23, %v1930_v22  ;;  %v2743_v8 = vrot.slane %v2740_v35, 4  ;;  %v2019_v22 = vrot.slane %v9263_v58, 4 }
 0x1c4   : > { %v9274_v52 = vpop.permute.xlu1 %2289  ;;  %v1935_v15 = vsel %vm11254_vm4, %v8943_v44, %v1934_v1  ;;  %v7299_v34 = vld [vmem:[#allocation2 + $0x4c] sm:$0xf0]  ;;  %v6880_v25 = vld [vmem:[#allocation2 + $0x50] sm:$0xf0]  ;;  %vm11482_vm4 = vcmask 982016  }
 0x1c5   : > { %1939 = vst [vmem:[#allocation2 + $0xf8] sm:$0xff] %v1935_v15  ;;  %v6879_v18 = vor.u32 %v7299_v34, %v6878_v43  ;;  %v6883_v26 = vor.u32 %v7297_v17, %v6880_v25  ;;  %v2746_v51 = vsel %vm11338_vm15, %v2742_v56, %v2743_v8  ;;  %v2294_v32 = vrot.slane %v9274_v52, 4 }
 0x1c6   : > { %v2747_v21 = vsel %vm748_vm11, %v8941_v3, %v2746_v51 }
 0x1c7   : > { %3285 = vmatpush.bf16.msra.mxu0 %v6879_v18  ;;  %3311 = vmatpush.bf16.msra.mxu2 %v6883_v26  ;;  %2751 = vst [vmem:[#allocation2 + $0x188] sm:$0xff] %v2747_v21  ;;  %v1709_v21 = vld [vmem:[#allocation8 + $0x18] sm:$0x44] }
 0x1c8   : > { %v2288_v5 = vpop.permute.xlu0 %2287  ;;  %v6990_v23 = vld [vmem:[#allocation2 + $0x120] sm:$0xf]  ;;  %v7325_v34 = vld [vmem:[#allocation2 + $0x124] sm:$0xf] }
 0x1c9   : > { %v2293_v44 = vrot.slane %v2288_v5, 4 }
 0x1ca   : > { %v9287_v63 = vpop.permute.xlu2 %585 }
 0x1cb   : > { %v2296_v37 = vsel %vm11338_vm15, %v2293_v44, %v2294_v32  ;;  %v1714_v44 = vunpack.c.l.b16 %v1709_v21 }
 0x1cc   : > { %v863_v48 = vpop.permute.xlu1 %862  ;;  %v2297_v36 = vsel %vm11352_vm7, %v2288_v5, %v2296_v37 }
 0x1cd   : > { %v868_v56 = vrot.slane %v863_v48, 4  ;;  %2302 = vst [vmem:[#allocation2 + $0x130] sm:$0xff] %v2297_v36 }
 0x1cf   : > { %v871_v3 = vsel %vm11338_vm15, %v868_v56, %v869_v20  ;;  %v1718_v56 = vpack.c.b16 %v1714_v44, %v1714_v44 }
 0x1d0   : > { %v873_v2 = vsel %vm11365_vm9, %v863_v48, %v871_v3  ;;  %v9298_v46 = vpop.permute.xlu0 %770  ;;  %v1715_v48 = vunpack.c.h.b16 %v1709_v21 }
 0x1d1   : > { %878 = vst [vmem:[#allocation2 + $0x30] sm:$0xff] %v873_v2  ;;  %v775_v61 = vrot.slane %v9298_v46, 4  ;;  %v1707_v2 = vld [vmem:[%s8352_s29 + $0xc] sm:$0xff] }
 0x1d2   : > { %v1509_v45 = vpop.permute.xlu2 %1508  ;;  %v1719_v36 = vpack.c.b16 %v1715_v48, %v1715_v48  ;;  %v1742_v21 = vunpack.c.l.bf16 %v1707_v2  ;;  %v1743_v48 = vunpack.c.h.bf16 %v1707_v2 }
 0x1d3   : > { %v777_v35 = vsel %vm11338_vm15, %v774_v60, %v775_v61  ;;  %v1512_v43 = vrot.slane %v1509_v45, 4 }
 0x1d4   : > { %v2013_v53 = vpop.permute.xlu1 %2012  ;;  %v779_v8 = vsel %vm11340_vm6, %v9234_v50, %v777_v35  ;;  %v7327_v15 = vld [vmem:[#allocation2 + $0x12c] sm:$0xf0]  ;;  %v6992_v17 = vld [vmem:[#allocation2 + $0x130] sm:$0xf0] }
 0x1d5   : > { %v2018_v1 = vrot.slane %v2013_v53, 4  ;;  %784 = vst [vmem:[#allocation2 + $0x20] sm:$0xff] %v779_v8  ;;  %v6991_v25 = vor.u32 %v7327_v15, %v6990_v23  ;;  %v6995_v18 = vor.u32 %v7325_v34, %v6992_v17  ;;  %v1516_v51 = vsel %vm11338_vm15, %v1511_v49, %v1512_v43 }
 0x1d6   : > { %v1517_v50 = vsel %vm1514_vm8, %v9006_v16, %v1516_v51  ;;  %v1736_v23 = vshrl.u32 %v1719_v36, 16  ;;  %v11483_v16 = vrot.slane %v8874_v24, 4 }
 0x1d7   : > { %v2021_v26 = vsel %vm11338_vm15, %v2018_v1, %v2019_v22  ;;  %3299 = vmatpush.bf16.msra.mxu1 %v6991_v25  ;;  %3325 = vmatpush.bf16.msra.mxu3 %v6995_v18  ;;  %1521 = vst [vmem:[#allocation2 + $0xa8] sm:$0xff] %v1517_v50 }
 0x1d8   : > { %v2023_v5 = vsel %vm11482_vm4, %v2013_v53, %v2021_v26  ;;  %v1693_v37 = vpop.permute.xlu0 %1692  ;;  %v7295_v60 = vld [vmem:[#allocation2 + $0x2c] sm:$0xf0]  ;;  %v6864_v45 = vld [vmem:[#allocation2 + $0x30] sm:$0xf0]  ;;  %v1731_v53 = vshrl.u32 %v1718_v56, 16  ;;  %v1737_v25 = vpack.i.b16 %v1736_v23, %v1736_v23  ;;  %vm11484_vm4 = vcmask 973824  }
 0x1d9   : > { %2028 = vst [vmem:[#allocation2 + $0x100] sm:$0xff] %v2023_v5  ;;  %v1696_v3 = vrot.slane %v1693_v37, 4 }
 0x1da   : > { %v2652_v35 = vpop.permute.xlu2 %2651  ;;  %v1732_v17 = vpack.i.b16 %v1731_v53, %v1731_v53  ;;  %v1739_v44 = vperm.slane %v1737_v25, 2  ;;  %v590_v53 = vrot.slane %v9287_v63, 4 }
 0x1db   : > { %v1700_v1 = vsel %vm11338_vm15, %v11483_v16, %v1696_v3  ;;  %v2655_v43 = vrot.slane %v2652_v35, 4 }
 0x1dc   : > { %v9318_v49 = vpop.permute.xlu1 %2108  ;;  %v1701_v8 = vsel %vm11359_vm0, %v8874_v24, %v1700_v1  ;;  %v6862_v15 = vld [vmem:[#allocation2 + $0x20] sm:$0xf]  ;;  %v7293_v34 = vld [vmem:[#allocation2 + $0x24] sm:$0xf]  ;;  %v1734_v50 = vperm.slane %v1732_v17, 2  ;;  %v1747_v36 = vunpack.c.l.bf16 %v1739_v44  ;;  %v3153_v17 = vunpack.c.l.b16 %v9259_v6 }
 0x1dd   : > { %1705 = vst [vmem:[#allocation2 + $0xc8] sm:$0xff] %v1701_v8  ;;  %v6863_v18 = vor.u32 %v7295_v60, %v6862_v15  ;;  %v6867_v26 = vor.u32 %v7293_v34, %v6864_v45  ;;  %v2658_v51 = vsel %vm11338_vm15, %v2654_v42, %v2655_v43  ;;  %v2113_v24 = vrot.slane %v9318_v49, 4 }
 0x1de   : > { %v2659_v5 = vsel %vm11366_vm12, %v9177_v31, %v2658_v51  ;;  %v1746_v56 = vunpack.c.l.bf16 %v1734_v50  ;;  %v1751_v42 = vmul.f32 %v1747_v36, %v1743_v48  ;;  %v7320_v50 = vld [vmem:[#allocation2 + $0xf4] sm:$0xf0] }
 0x1df   : > { %3286 = vmatpush.bf16.msra.mxu0 %v6863_v18  ;;  %3312 = vmatpush.bf16.msra.mxu2 %v6867_v26  ;;  %2663 = vst [vmem:[#allocation2 + $0x178] sm:$0xff] %v2659_v5  ;;  %v3209_v26 = vpack.c.b16 %v3153_v17, %v3153_v17  ;;  %v7046_v17 = vld [vmem:[#allocation2 + $0x188] sm:$0xf] }
 0x1e0   : > { %v2107_v37 = vpop.permute.xlu0 %2106  ;;  %v1750_v35 = vmul.f32 %v1746_v56, %v1742_v21  ;;  %v6974_v5 = vld [vmem:[#allocation2 + $0x100] sm:$0xf] }
 0x1e1   : > { %v2112_v3 = vrot.slane %v2107_v37, 4 }
 0x1e2   : > { %v2380_v60 = vpop.permute.xlu2 %2379  ;;  %v1753_v1 = vpack.c.bf16 %v1751_v42, %v1750_v35 }
 0x1e3   : > { %v2115_v31 = vsel %vm11338_vm15, %v2112_v3, %v2113_v24  ;;  %v2383_v2 = vrot.slane %v2380_v60, 4  ;;  %v6966_v60 = vld [vmem:[#allocation2 + $0xe8] sm:$0xf] }
 0x1e4   : > { %v584_v45 = vpop.permute.xlu1 %583  ;;  %v2117_v16 = vsel %vm11484_vm4, %v2107_v37, %v2115_v31  ;;  %1755 = vst [vmem:[#allocation2 + $0xd8] sm:$0xff] %v1753_v1  ;;  %v7321_v37 = vld [vmem:[#allocation2 + $0x104] sm:$0xf]  ;;  %v6967_v35 = vor.u32 %v7320_v50, %v6966_v60  ;;  %v6950_v31 = vld [vmem:[#allocation2 + $0xc8] sm:$0xf]  ;;  %v3154_v50 = vunpack.c.h.b16 %v9259_v6 }
 0x1e5   : > { %v589_v23 = vrot.slane %v584_v45, 4  ;;  %2122 = vst [vmem:[#allocation2 + $0x110] sm:$0xff] %v2117_v16  ;;  %v2386_v43 = vsel %vm11338_vm15, %v2382_v59, %v2383_v2 }
 0x1e6   : > { %v2387_v15 = vsel %vm11340_vm6, %v9226_v39, %v2386_v43 }
 0x1e7   : > { %v593_v8 = vsel %vm11338_vm15, %v589_v23, %v590_v53  ;;  %2391 = vst [vmem:[#allocation2 + $0x148] sm:$0xff] %v2387_v15 }
 0x1e8   : > { %v595_v34 = vsel %vm11353_vm1, %v584_v45, %v593_v8  ;;  %v2832_v25 = vpop.permute.xlu0 %2831 }
 0x1e9   : > { %600 = vst [vmem:[#allocation2] sm:$0xff] %v595_v34  ;;  %v2835_v18 = vrot.slane %v2832_v25, 4 }
 0x1ea   : > { %v1235_v51 = vpop.permute.xlu2 %1234 }
 0x1eb   : > { %v2838_v59 = vsel %vm11338_vm15, %v2834_v12, %v2835_v18  ;;  %v1238_v39 = vrot.slane %v1235_v51, 4  ;;  %v3275_v12 = vsel %vm11338_vm15, %v3209_v26, 0  ;;  %v7316_v2 = vld [vmem:[#allocation2 + $0xd4] sm:$0xf0] }
 0x1ec   : > { %v9346_v21 = vpop.permute.xlu1 %680  ;;  %v2839_v44 = vsel %vm11367_vm14, %v9074_v33, %v2838_v59  ;;  %v7323_v48 = vld [vmem:[#allocation2 + $0x10c] sm:$0xf0]  ;;  %v6976_v56 = vld [vmem:[#allocation2 + $0x110] sm:$0xf0]  ;;  %v6951_v1 = vor.u32 %v7316_v2, %v6950_v31  ;;  %v7318_v31 = vld [vmem:[#allocation2 + $0xec] sm:$0xf] }
 0x1ed   : > { %2843 = vst [vmem:[#allocation2 + $0x198] sm:$0xff] %v2839_v44  ;;  %v6975_v36 = vor.u32 %v7323_v48, %v6974_v5  ;;  %v6979_v3 = vor.u32 %v7321_v37, %v6976_v56  ;;  %v1242_v45 = vsel %vm11338_vm15, %v1237_v4, %v1238_v39  ;;  %v685_v33 = vrot.slane %v9346_v21, 4  ;;  %v2932_v2 = vld [vmem:[%s11201_s4] sm:$0xff] }
 0x1ee   : > { %v1243_v42 = vsel %vm11367_vm14, %v9185_v40, %v1242_v45 }
 0x1ef   : > { %3300 = vmatpush.bf16.msra.mxu1 %v6975_v36  ;;  %3326 = vmatpush.bf16.msra.mxu3 %v6979_v3  ;;  %1247 = vst [vmem:[#allocation2 + $0x78] sm:$0xff] %v1243_v42  ;;  %v6968_v36 = vld [vmem:[#allocation2 + $0xf8] sm:$0xf0] }
 0x1f0   : > { %v679_v23 = vpop.permute.xlu0 %678  ;;  %v7289_v45 = vld [vmem:[#allocation2 + $0x4] sm:$0xf] }
 0x1f1   : > { %v684_v16 = vrot.slane %v679_v23, 4 }
 0x1f2   : > { %v957_v43 = vpop.permute.xlu2 %956 }
 0x1f3   : > { %3332 = vmatpush.bf16.msrb.mxu1 %v6967_v35  ;;  %3347 = vmatpush.bf16.msrb.mxu3 %v3275_v12  ;;  %v687_v8 = vsel %vm11338_vm15, %v684_v16, %v685_v33  ;;  %v960_v15 = vrot.slane %v957_v43, 4  ;;  %v6952_v43 = vld [vmem:[#allocation2 + $0xd8] sm:$0xf0] }
 0x1f4   : > { %v2560_v4 = vpop.permute.xlu1 %2559  ;;  %v689_v34 = vsel %vm11352_vm7, %v679_v23, %v687_v8  ;;  %v7340_v25 = vld [vmem:[#allocation2 + $0x194] sm:$0xf0]  ;;  %v6971_v23 = vor.u32 %v7318_v31, %v6968_v36  ;;  %v7048_v8 = vld [vmem:[#allocation2 + $0x198] sm:$0xf0]  ;;  %v7310_v36 = vld [vmem:[#allocation2 + $0xac] sm:$0xf] }
 0x1f5   : > { %v2563_v40 = vrot.slane %v2560_v4, 4  ;;  %694 = vst [vmem:[#allocation2 + $0x10] sm:$0xff] %v689_v34  ;;  %v7047_v18 = vor.u32 %v7340_v25, %v7046_v17  ;;  %v964_v26 = vsel %vm11338_vm15, %v959_v13, %v960_v15  ;;  %v7336_v4 = vld [vmem:[#allocation2 + $0x174] sm:$0xf0]  ;;  %v7338_v25 = vld [vmem:[#allocation2 + $0x18c] sm:$0xf] }
 0x1f6   : > { %v965_v59 = vsel %vm11345_vm10, %v9157_v54, %v964_v26  ;;  %v3210_v54 = vpack.c.b16 %v3154_v50, %v3154_v50 }
 0x1f7   : > { %3333 = vmatpush.bf16.msrb.mxu1 %v6951_v1  ;;  %v2566_v51 = vsel %vm11338_vm15, %v2562_v14, %v2563_v40  ;;  %3348 = vmatpush.bf16.msrb.mxu3 %v7047_v18  ;;  %969 = vst [vmem:[#allocation2 + $0x48] sm:$0xff] %v965_v59  ;;  %v6846_v14 = vld [vmem:[#allocation2] sm:$0xf]  ;;  %v7314_v1 = vld [vmem:[#allocation2 + $0xcc] sm:$0xf]  ;;  %v2988_v40 = vunpack.c.l.b16 %v2932_v2  ;;  %v7051_v59 = vor.u32 %v7338_v25, %v7048_v8 }
 0x1f8   : > { %v2567_v5 = vsel %vm11345_vm10, %v9129_v55, %v2566_v51  ;;  %v1603_v39 = vpop.permute.xlu0 %1602  ;;  %v6955_v51 = vor.u32 %v7314_v1, %v6952_v43  ;;  %v7304_v43 = vld [vmem:[#allocation2 + $0x74] sm:$0xf0]  ;;  %v7330_v25 = vld [vmem:[#allocation2 + $0x14c] sm:$0xf] }
 0x1f9   : > { %2571 = vst [vmem:[#allocation2 + $0x168] sm:$0xff] %v2567_v5  ;;  %v1606_v44 = vrot.slane %v1603_v39, 4  ;;  %v9396_v26 = vpack.c.b16 %v2988_v40, %v2988_v40 }
 0x1fa   : > { %v2111_v48 = vpop.permute.xlu2 %2110 }
 0x1fb   : > { %v1610_v13 = vsel %vm11338_vm15, %v1605_v10, %v1606_v44  ;;  %v2114_v56 = vrot.slane %v2111_v48, 4  ;;  %v6934_v44 = vld [vmem:[#allocation2 + $0xa8] sm:$0xf] }
 0x1fc   : > { %v1419_v37 = vpop.permute.xlu1 %1418  ;;  %v1611_v55 = vsel %vm11360_vm2, %v9065_v7, %v1610_v13  ;;  %v7291_v60 = vld [vmem:[#allocation2 + $0xc] sm:$0xf0]  ;;  %v6848_v6 = vld [vmem:[#allocation2 + $0x10] sm:$0xf0] }
 0x1fd   : > { %v1422_v3 = vrot.slane %v1419_v37, 4  ;;  %1615 = vst [vmem:[#allocation2 + $0xb8] sm:$0xff] %v1611_v55  ;;  %v6847_v35 = vor.u32 %v7291_v60, %v6846_v14  ;;  %v6851_v12 = vor.u32 %v7289_v45, %v6848_v6  ;;  %v2118_v42 = vsel %vm11338_vm15, %v2113_v24, %v2114_v56  ;;  %v7032_v37 = vld [vmem:[#allocation2 + $0x178] sm:$0xf0] }
 0x1fe   : > { %v2119_v7 = vsel %vm11484_vm4, %v9318_v49, %v2118_v42  ;;  %v2989_v24 = vunpack.c.h.b16 %v2932_v2  ;;  %vm11337_vm4 = vcmask 719872  }
 0x1ff   : > { %v1426_v10 = vsel %vm11338_vm15, %v1421_v19, %v1422_v3  ;;  %3287 = vmatpush.bf16.msra.mxu0 %v6847_v35  ;;  %3313 = vmatpush.bf16.msra.mxu2 %v6851_v12  ;;  %2123 = vst [vmem:[#allocation2 + $0x118] sm:$0xff] %v2119_v7  ;;  %v3278_v19 = vsel %vm11338_vm15, %v3210_v54, 0 }
 0x200   : > { %v1427_v16 = vsel %vm11259_vm5, %v9004_v30, %v1426_v10  ;;  %v7030_v15 = vld [vmem:[#allocation2 + $0x168] sm:$0xf]  ;;  %v1325_v34 = vpop.permute.xlu0 %1324  ;;  %v9394_v17 = vpack.c.b16 %v2989_v24, %v2989_v24  ;;  %v7334_v18 = vld [vmem:[#allocation2 + $0x16c] sm:$0xf]  ;;  %vm11485_vm5 = vcmask 982016  }
 0x201   : > { %1431 = vst [vmem:[#allocation2 + $0x98] sm:$0xff] %v1427_v16  ;;  %v7031_v49 = vor.u32 %v7336_v4, %v7030_v15  ;;  %v1328_v30 = vrot.slane %v1325_v34, 4  ;;  %v7035_v3 = vor.u32 %v7334_v18, %v7032_v37  ;;  %v6904_v4 = vld [vmem:[#allocation2 + $0x78] sm:$0xf0] }
 0x202   : > { %v588_v5 = vpop.permute.xlu2 %587  ;;  %7052 = vmatmul.msk.bf16.vlgmr.msra.gmra.mxu1 %vm11337_vm4, %v9394_v17  ;;  %7053 = vmatmul.msk.bf16.vlgmr.msra.gmra.mxu3 %vm11337_vm4, %v9394_v17 }
 0x203   : > { %3358 = vmatpush.bf16.msrb.mxu0 %v6971_v23  ;;  %3373 = vmatpush.bf16.msrb.mxu2 %v3278_v19  ;;  %v1332_v39 = vsel %vm11338_vm15, %v1327_v0, %v1328_v30  ;;  %v591_v48 = vrot.slane %v588_v5, 4 }
 0x204   : > { %3349 = vmatpush.bf16.msrb.mxu3 %v7031_v49  ;;  %v1141_v50 = vpop.permute.xlu1 %1140  ;;  %3314 = vmatmul.bf16.vlgmr.msra.gmra.mxu2 %v9396_v26  ;;  %v1333_v14 = vsel %vm11368_vm13, %v9116_v41, %v1332_v39  ;;  %v7312_v56 = vld [vmem:[#allocation2 + $0xb4] sm:$0xf0]  ;;  %v6936_v54 = vld [vmem:[#allocation2 + $0xb8] sm:$0xf0] }
 0x205   : > { %v1144_v13 = vrot.slane %v1141_v50, 4  ;;  %1337 = vst [vmem:[#allocation2 + $0x88] sm:$0xff] %v1333_v14  ;;  %v6935_v0 = vor.u32 %v7312_v56, %v6934_v44  ;;  %v596_v55 = vsel %vm11338_vm15, %v590_v53, %v591_v48  ;;  %v6939_v60 = vor.u32 %v7310_v36, %v6936_v54  ;;  %3288 = vmatmul.bf16.vlgmr.msra.gmra.mxu0 %v9396_v26 }
 0x206   : > { %v597_v41 = vsel %vm11353_vm1, %v9287_v63, %v596_v55 }
 0x207   : > { %3359 = vmatpush.bf16.msrb.mxu0 %v6955_v51  ;;  %3374 = vmatpush.bf16.msrb.mxu2 %v7051_v59  ;;  %v1148_v45 = vsel %vm11338_vm15, %v1143_v28, %v1144_v13  ;;  %601 = vst [vmem:[#allocation2 + $0x8] sm:$0xff] %v597_v41 }
 0x208   : > { %v1149_v6 = vsel %vm748_vm11, %v9072_v47, %v1148_v45  ;;  %3334 = vmatpush.bf16.msrb.mxu1 %v6935_v0  ;;  %v2472_v35 = vpop.permute.xlu0 %2471  ;;  %v7308_v12 = vld [vmem:[#allocation2 + $0x94] sm:$0xf0]  ;;  %v6920_v42 = vld [vmem:[#allocation2 + $0x98] sm:$0xf0] }
 0x209   : > { %1153 = vst [vmem:[#allocation2 + $0x68] sm:$0xff] %v1149_v6  ;;  %v2475_v53 = vrot.slane %v2472_v35, 4 }
 0x20b   : > { %3360 = vmatpush.bf16.msrb.mxu0 %v6939_v60  ;;  %3375 = vmatpush.bf16.msrb.mxu2 %v7035_v3  ;;  %v2478_v28 = vsel %vm11338_vm15, %v2474_v27, %v2475_v53  ;;  %v7324_v3 = vld [vmem:[#allocation2 + $0x114] sm:$0xf0]  ;;  %v6886_v53 = vld [vmem:[#allocation2 + $0x48] sm:$0xf] }
 0x20c   : > { %v2292_v31 = vpop.permute.xlu1 %2291  ;;  %v2479_v47 = vsel %vm11365_vm9, %v9127_v57, %v2478_v28  ;;  %v6918_v10 = vld [vmem:[#allocation2 + $0x88] sm:$0xf]  ;;  %v7306_v2 = vld [vmem:[#allocation2 + $0x8c] sm:$0xf] }
 0x20d   : > { %v2295_v63 = vrot.slane %v2292_v31, 4  ;;  %2483 = vst [vmem:[#allocation2 + $0x158] sm:$0xff] %v2479_v47  ;;  %v6919_v7 = vor.u32 %v7308_v12, %v6918_v10  ;;  %v6923_v23 = vor.u32 %v7306_v2, %v6920_v42  ;;  %v7298_v12 = vld [vmem:[#allocation2 + $0x4c] sm:$0xf] }
 0x20f   : > { %v2298_v16 = vsel %vm11338_vm15, %v2294_v32, %v2295_v63  ;;  %3335 = vmatpush.bf16.msrb.mxu1 %v6919_v7  ;;  %3361 = vmatpush.bf16.msrb.mxu0 %v6923_v23  ;;  %v7014_v32 = vld [vmem:[#allocation2 + $0x148] sm:$0xf] }
 0x210   : > { %v2299_v1 = vsel %vm11352_vm7, %v9274_v52, %v2298_v16  ;;  %v6902_v27 = vld [vmem:[#allocation2 + $0x68] sm:$0xf]  ;;  %v7302_v24 = vld [vmem:[#allocation2 + $0x6c] sm:$0xf]  ;;  %v2200_v57 = vpop.permute.xlu0 %2199 }
 0x211   : > { %2303 = vst [vmem:[#allocation2 + $0x138] sm:$0xff] %v2299_v1  ;;  %v6903_v19 = vor.u32 %v7304_v43, %v6902_v27  ;;  %v6907_v8 = vor.u32 %v7302_v24, %v6904_v4  ;;  %v2203_v15 = vrot.slane %v2200_v57, 4  ;;  %v7290_v4 = vld [vmem:[#allocation2 + $0xc] sm:$0xf] }
 0x213   : > { %v2206_v34 = vsel %vm11338_vm15, %v2202_v38, %v2203_v15  ;;  %3336 = vmatpush.bf16.msrb.mxu1 %v6903_v19  ;;  %3362 = vmatpush.bf16.msrb.mxu0 %v6907_v8 }
 0x214   : > { %v2017_v40 = vpop.permute.xlu1 %2016  ;;  %v2207_v49 = vsel %vm11353_vm1, %v9209_v62, %v2206_v34  ;;  %v7332_v30 = vld [vmem:[#allocation2 + $0x154] sm:$0xf0]  ;;  %v7016_v18 = vld [vmem:[#allocation2 + $0x158] sm:$0xf0] }
 0x215   : > { %v2020_v52 = vrot.slane %v2017_v40, 4  ;;  %2211 = vst [vmem:[#allocation2 + $0x128] sm:$0xff] %v2207_v49  ;;  %v7015_v51 = vor.u32 %v7332_v30, %v7014_v32  ;;  %v7019_v59 = vor.u32 %v7330_v25, %v7016_v18 }
 0x217   : > { %v2024_v5 = vsel %vm11338_vm15, %v2019_v22, %v2020_v52  ;;  %3350 = vmatpush.bf16.msrb.mxu3 %v7015_v51  ;;  %3376 = vmatpush.bf16.msrb.mxu2 %v7019_v59 }
 0x218   : > { %v2025_v38 = vsel %vm11485_vm5, %v9263_v58, %v2024_v5  ;;  %v1051_v50 = vpop.permute.xlu0 %1050  ;;  %v7328_v44 = vld [vmem:[#allocation2 + $0x134] sm:$0xf0]  ;;  %v7000_v62 = vld [vmem:[#allocation2 + $0x138] sm:$0xf0]  ;;  %vm11496_vm5 = vcmask 990208  }
 0x219   : > { %2029 = vst [vmem:[#allocation2 + $0x108] sm:$0xff] %v2025_v38  ;;  %v1054_v39 = vrot.slane %v1051_v50, 4 }
 0x21b   : > { %v1058_v37 = vsel %vm11338_vm15, %v1053_v29, %v1054_v39  ;;  %v6984_v29 = vld [vmem:[#allocation2 + $0x118] sm:$0xf0] }
 0x21c   : > { %v867_v48 = vpop.permute.xlu1 %866  ;;  %v1059_v14 = vsel %vm11366_vm12, %v9252_v11, %v1058_v37  ;;  %v6998_v22 = vld [vmem:[#allocation2 + $0x128] sm:$0xf]  ;;  %v7326_v56 = vld [vmem:[#allocation2 + $0x12c] sm:$0xf]  ;;  %v3385_v37 = vld [vmem:[%s11202_s5] sm:$0xff] }
 0x21d   : > { %v870_v13 = vrot.slane %v867_v48, 4  ;;  %1063 = vst [vmem:[#allocation2 + $0x58] sm:$0xff] %v1059_v14  ;;  %v6999_v58 = vor.u32 %v7328_v44, %v6998_v22  ;;  %v7003_v36 = vor.u32 %v7326_v56, %v7000_v62  ;;  %v3384_v14 = vld [vmem:[%s11209_s12] sm:$0xff]  ;;  %v4906_v56 = vld [vmem:[#allocation8 + $0x10] sm:$0x88] }
 0x21f   : > { %v874_v54 = vsel %vm11338_vm15, %v869_v20, %v870_v13  ;;  %3351 = vmatpush.bf16.msrb.mxu3 %v6999_v58  ;;  %3377 = vmatpush.bf16.msrb.mxu2 %v7003_v36  ;;  %v8186_v13 = vmov 0   ;;  %v4818_v58 = vld [vmem:[#allocation8 + $0x10] sm:$0x88]  ;;  %v4500_v36 = vld [vmem:[#allocation8 + $0x10] sm:$0x22] }
 0x220   : > { %v875_v0 = vsel %vm11365_vm9, %v9250_v9, %v874_v54  ;;  %v6982_v55 = vld [vmem:[#allocation2 + $0x108] sm:$0xf]  ;;  %v7322_v60 = vld [vmem:[#allocation2 + $0x10c] sm:$0xf]  ;;  %v773_v41 = vpop.permute.xlu0 %772  ;;  %7734 = vset.pattern.permute.xlu2 %v8186_v13  ;;  %3591 = vst [vmem:[#allocation4] sm:$0xf] %v8186_v13  ;;  %7995 = vset.pattern.permute.xlu1 %v8186_v13  ;;  %v4910_v54 = vunpack.c.l.b16 %v4906_v56 }
 0x221   : > { %879 = vst [vmem:[#allocation2 + $0x38] sm:$0xff] %v875_v0  ;;  %v6983_v11 = vor.u32 %v7324_v3, %v6982_v55  ;;  %v6987_v45 = vor.u32 %v7322_v60, %v6984_v29  ;;  %v776_v6 = vrot.slane %v773_v41, 4  ;;  %3474 = vperm.xlu2 %7734, %v3385_v37   ;;  %7996 = vset.pattern.permute.xlu0 %v8186_v13  ;;  %v4911_v3 = vunpack.c.h.b16 %v4906_v56  ;;  %v4681_v60 = vld [vmem:[#allocation8 + $0x18] sm:$0x44] }
 0x222   : > { %3592 = vst [vmem:[#allocation4 + $0x14] sm:$0xf] %v8186_v13  ;;  %v4822_v0 = vunpack.c.l.b16 %v4818_v58  ;;  %v4823_v55 = vunpack.c.h.b16 %v4818_v58  ;;  %v4504_v29 = vunpack.c.l.b16 %v4500_v36  ;;  %v4687_v41 = vunpack.c.h.b16 %v4681_v60 }
 0x223   : > { %v780_v35 = vsel %vm11338_vm15, %v775_v61, %v776_v6  ;;  %3352 = vmatpush.bf16.msrb.mxu3 %v6983_v11  ;;  %3378 = vmatpush.bf16.msrb.mxu2 %v6987_v45  ;;  %v4505_v11 = vunpack.c.h.b16 %v4500_v36  ;;  %v4686_v45 = vunpack.c.l.b16 %v4681_v60  ;;  %v4914_v6 = vpack.c.b16 %v4910_v54, %v4910_v54  ;;  %v3490_v60 = vld [vmem:[%s505_s24] sm:$0xff]  ;;  %s11510_s24 = smov 56  }
 0x224   : > { %v781_v9 = vsel %vm11340_vm6, %v9298_v46, %v780_v35  ;;  %v7300_v20 = vld [vmem:[#allocation2 + $0x54] sm:$0xf0]  ;;  %v6888_v42 = vld [vmem:[#allocation2 + $0x58] sm:$0xf0]  ;;  %v4915_v35 = vpack.c.b16 %v4911_v3, %v4911_v3 }
 0x225   : > { %785 = vst [vmem:[#allocation2 + $0x28] sm:$0xff] %v781_v9  ;;  %v6887_v31 = vor.u32 %v7300_v20, %v6886_v53  ;;  %v6891_v28 = vor.u32 %v7298_v12, %v6888_v42  ;;  %v4826_v53 = vpack.c.b16 %v4822_v0, %v4822_v0  ;;  %v4827_v9 = vpack.c.b16 %v4823_v55, %v4823_v55 }
 0x226   : > { %7054 = vmatmul.msk.bf16.vlgmr.msrb.gmra.mxu3 %vm11337_vm4, %v9394_v17  ;;  %7055 = vmatmul.msk.bf16.vlgmr.msrb.gmra.mxu2 %vm11337_vm4, %v9394_v17  ;;  %v6854_v17 = vld [vmem:[#allocation2 + $0x8] sm:$0xf]  ;;  %v4508_v20 = vpack.c.b16 %v4504_v29, %v4504_v29  ;;  %v4509_v12 = vpack.c.b16 %v4505_v11, %v4505_v11  ;;  %v4690_v42 = vpack.c.b16 %v4686_v45, %v4686_v45 }
 0x227   : > { %3337 = vmatpush.bf16.msrb.mxu1 %v6887_v31  ;;  %3363 = vmatpush.bf16.msrb.mxu0 %v6891_v28  ;;  %v4691_v31 = vpack.c.b16 %v4687_v41, %v4687_v41  ;;  %v4919_v28 = vshrl.u32 %v4914_v6, 16 }
 0x228   : > { %v683_v61 = vpop.permute.xlu0 %682  ;;  %v7296_v47 = vld [vmem:[#allocation2 + $0x34] sm:$0xf0]  ;;  %v6872_v10 = vld [vmem:[#allocation2 + $0x38] sm:$0xf0] }
 0x229   : > { %v686_v63 = vrot.slane %v683_v61, 4  ;;  %v4924_v61 = vshrl.u32 %v4915_v35, 16 }
 0x22b   : > { %v690_v46 = vsel %vm11338_vm15, %v685_v33, %v686_v63  ;;  %v4831_v63 = vpack.i.b16 %v4826_v53, %v4826_v53 }
 0x22c   : > { %v691_v2 = vsel %vm11352_vm7, %v9346_v21, %v690_v46  ;;  %v6870_v7 = vld [vmem:[#allocation2 + $0x28] sm:$0xf]  ;;  %v7294_v23 = vld [vmem:[#allocation2 + $0x2c] sm:$0xf]  ;;  %v4517_v46 = vpack.i.b16 %v4509_v12, %v4509_v12 }
 0x22d   : > { %695 = vst [vmem:[#allocation2 + $0x18] sm:$0xff] %v691_v2  ;;  %v6871_v16 = vor.u32 %v7296_v47, %v6870_v7  ;;  %v6875_v1 = vor.u32 %v7294_v23, %v6872_v10  ;;  %v4835_v47 = vpack.i.b16 %v4827_v9, %v4827_v9  ;;  %v4513_v10 = vpack.i.b16 %v4508_v20, %v4508_v20  ;;  %v4320_v20 = vld [vmem:[#allocation8 + $0x10] sm:$0x11] }
 0x22e   : > { %v4701_v2 = vpack.i.b16 %v4690_v42, %v4690_v42  ;;  %v4705_v7 = vpack.i.b16 %v4691_v31, %v4691_v31 }
 0x22f   : > { %3338 = vmatpush.bf16.msrb.mxu1 %v6871_v16  ;;  %3364 = vmatpush.bf16.msrb.mxu0 %v6875_v1  ;;  %v4920_v16 = vpack.i.b16 %v4919_v28, %v4919_v28  ;;  %v4925_v1 = vpack.i.b16 %v4924_v61, %v4924_v61  ;;  %v3491_v28 = vadd.f32 1.0, %v3490_v60 }
 0x234   : > { %v7292_v43 = vld [vmem:[#allocation2 + $0x14] sm:$0xf0]  ;;  %v6856_v27 = vld [vmem:[#allocation2 + $0x18] sm:$0xf0] }
 0x235   : > { %v6855_v24 = vor.u32 %v7292_v43, %v6854_v17  ;;  %v6859_v57 = vor.u32 %v7290_v4, %v6856_v27  ;;  %v4833_v17 = vperm.slane %v4831_v63, 3  ;;  %v4837_v43 = vperm.slane %v4835_v47, 3 }
 0x236   : > { %v4703_v4 = vperm.slane %v4701_v2, 2  ;;  %v4707_v27 = vperm.slane %v4705_v7, 2  ;;  %v4324_v7 = vunpack.c.l.b16 %v4320_v20 }
 0x237   : > { %3339 = vmatpush.bf16.msrb.mxu1 %v6855_v24  ;;  %3365 = vmatpush.bf16.msrb.mxu0 %v6859_v57  ;;  %v4819_v24 = vld [vmem:[#allocation8 + $0x18] sm:$0x88]  ;;  %v4922_v57 = vperm.slane %v4920_v16, 3 }
 0x238   : > { %v4825_v37 = vunpack.c.h.b16 %v4819_v24 }
 0x23a   : > { %3340 = vmatmul.bf16.vlgmr.msrb.gmra.mxu1 %v9396_v26  ;;  %3366 = vmatmul.bf16.vlgmr.msrb.gmra.mxu0 %v9396_v26  ;;  %v4829_v6 = vpack.c.b16 %v4825_v37, %v4825_v37 }
 0x27f   : > { %v3302_v21 = vpop.f32.mrf.mxu1 }
 0x282   : > { %v3289_v33 = vpop.f32.mrf.mxu0 }
 0x283   : > { %v9465_v18 = vadd.f32 %v3302_v21, %v3289_v33  ;;  %v4927_v21 = vperm.slane %v4925_v1, 3  ;;  %v4851_v33 = vunpack.c.l.bf16 %v4833_v17  ;;  %v4843_v1 = vpack.i.b16 %v4829_v6, %v4829_v6 }
 0x285   : > { %v3328_v19 = vpop.f32.mrf.mxu3 }
 0x287   : > { %v3315_v8 = vpop.f32.mrf.mxu2  ;;  %v3304_v15 = vpop.f32.mrf.mxu1 }
 0x288   : > { %v9467_v51 = vadd.f32 %v3328_v19, %v3315_v8  ;;  %v4852_v19 = vunpack.c.l.bf16 %v4837_v43  ;;  %v4589_v8 = vld [vmem:[#allocation8 + $0x18] sm:$0x22]  ;;  %v4515_v15 = vperm.slane %v4513_v10, 1 }
 0x28a   : > { %v3291_v40 = vpop.f32.mrf.mxu0  ;;  %v3387_v26 = vadd.f32 %v9467_v51, %v9465_v18  ;;  %v4533_v56 = vunpack.c.l.bf16 %v4515_v15 }
 0x28b   : > { %v4519_v40 = vperm.slane %v4517_v46, 1 }
 0x28d   : > { %v3330_v34 = vpop.f32.mrf.mxu3  ;;  %v4534_v58 = vunpack.c.l.bf16 %v4519_v40 }
 0x28e   : > { %v4588_v34 = vld [vmem:[#allocation8 + $0x10] sm:$0x22] }
 0x28f   : > { %v3317_v32 = vpop.f32.mrf.mxu2  ;;  %v7765_v12 = vpack.i.bf16 %v4534_v58, %v4533_v56 }
 0x290   : > { %v4943_v32 = vunpack.c.l.bf16 %v4922_v57 }
 0x2a9   : > { %v3354_v52 = vpop.f32.mrf.mxu3  ;;  %v3380_v49 = vpop.f32.mrf.mxu2 }
 0x2b1   : > { %v3356_v30 = vpop.f32.mrf.mxu3  ;;  %v3382_v25 = vpop.f32.mrf.mxu2 }
 0x2b2   : > { %v4824_v30 = vunpack.c.l.b16 %v4819_v24  ;;  %v4715_v25 = vunpack.c.l.bf16 %v4703_v4  ;;  %v4325_v24 = vunpack.c.h.b16 %v4320_v20 }
 0x2b4   : > { %v4828_v13 = vpack.c.b16 %v4824_v30, %v4824_v30  ;;  %v4329_v15 = vpack.c.b16 %v4325_v24, %v4325_v24 }
 0x2b6   : > { %v4839_v35 = vpack.i.b16 %v4828_v13, %v4828_v13  ;;  %v3501_v13 = vld [vmem:[%s509_s1] sm:$0xff]  ;;  %s11513_s1 = smov 8  }
 0x2b7   : > { %v3341_v59 = vpop.f32.mrf.mxu1  ;;  %v3367_v5 = vpop.f32.mrf.mxu0 }
 0x2b8   : > { %v9471_v38 = vadd.f32 %v3354_v52, %v3341_v59  ;;  %v9473_v50 = vadd.f32 %v3380_v49, %v3367_v5  ;;  %v4944_v52 = vunpack.c.l.bf16 %v4927_v21  ;;  %v7735_v49 = vpack.i.bf16 %v4852_v19, %v4851_v33  ;;  %v3386_v5 = vld [vmem:[%s11203_s6] sm:$0xff] }
 0x2b9   : > { %v4594_v59 = vunpack.c.l.b16 %v4589_v8  ;;  %v9502_v16 = vperm.slane %v4839_v35, 3  ;;  %v4328_v33 = vpack.c.b16 %v4324_v7, %v4324_v7 }
 0x2ba   : > { %v3388_v39 = vadd.f32 %v3387_v26, %v9471_v38  ;;  %v7745_v26 = vpack.i.bf16 %v4944_v52, %v4943_v32  ;;  %v4845_v32 = vperm.slane %v4843_v1, 3 }
 0x2bc   : > { %v3389_v44 = vadd.f32 %v3388_v39, %v9473_v50  ;;  %v4716_v39 = vunpack.c.l.bf16 %v4707_v27  ;;  %7746 = vrot.lane.b32.xlu0 %v7745_v26, %s11282_s16 }
 0x2be   : > { %3390 = vadd.xlane.f32.xlu1 %v3389_v44  ;;  %v4595_v44 = vunpack.c.h.b16 %v4589_v8  ;;  %v7760_v29 = vpack.i.bf16 %v4716_v39, %v4715_v25  ;;  %v4853_v25 = vunpack.c.l.bf16 %v9502_v16  ;;  %v4680_v39 = vld [vmem:[#allocation8 + $0x10] sm:$0x44] }
 0x2bf   : > { %v3343_v62 = vpop.f32.mrf.mxu1  ;;  %v3369_v48 = vpop.f32.mrf.mxu0 }
 0x2c0   : > { %v4592_v62 = vunpack.c.l.b16 %v4588_v34  ;;  %v4907_v48 = vld [vmem:[#allocation8 + $0x18] sm:$0x88]  ;;  %v4599_v36 = vpack.c.b16 %v4595_v44, %v4595_v44 }
 0x2c1   : > { %v4912_v55 = vunpack.c.l.b16 %v4907_v48  ;;  %v4913_v41 = vunpack.c.h.b16 %v4907_v48 }
 0x2c2   : > { %v4596_v54 = vpack.c.b16 %v4592_v62, %v4592_v62  ;;  %v4616_v11 = vshrl.u32 %v4599_v36, 16  ;;  %v4408_v36 = vld [vmem:[#allocation8 + $0x10] sm:$0x11] }
 0x2c3   : > { %v4916_v47 = vpack.c.b16 %v4912_v55, %v4912_v55  ;;  %v4917_v2 = vpack.c.b16 %v4913_v41, %v4913_v41  ;;  %v4854_v41 = vunpack.c.l.bf16 %v4845_v32 }
 0x2c4   : > { %v4601_v45 = vshrl.u32 %v4596_v54, 16  ;;  %v4617_v42 = vpack.i.b16 %v4616_v11, %v4616_v11  ;;  %7766 = vrot.lane.b32.xlu0 %v7765_v12, %s11286_s30 }
 0x2c5   : > { %v4929_v21 = vshrl.u32 %v4916_v47, 16  ;;  %v4934_v8 = vshrl.u32 %v4917_v2, 16  ;;  %v7740_v7 = vpack.i.bf16 %v4854_v41, %v4853_v25 }
 0x2c6   : > { %v4602_v31 = vpack.i.b16 %v4601_v45, %v4601_v45  ;;  %v4619_v10 = vperm.slane %v4617_v42, 1 }
 0x2c7   : > { %v4930_v44 = vpack.i.b16 %v4929_v21, %v4929_v21 }
 0x2c8   : > { %v4604_v46 = vperm.slane %v4602_v31, 1  ;;  %v4628_v4 = vunpack.c.l.bf16 %v4619_v10 }
 0x2ca   : > { %v4625_v27 = vunpack.c.l.bf16 %v4604_v46 }
 0x2d7   : > { %7736 = vrot.lane.b32.xlu1 %v7735_v49, %s11284_s25  ;;  %v4333_v49 = vpack.i.b16 %v4328_v33, %v4328_v33 }
 0x2d9   : > { %v4335_v62 = vperm.slane %v4333_v49, 0 }
 0x2db   : > { %v4353_v60 = vunpack.c.l.bf16 %v4335_v62  ;;  %v5898_v62 = vld [vmem:[#allocation8 + $0x30] sm:$0x22] }
 0x2df   : > { %7761 = vrot.lane.b32.xlu1 %v7760_v29, %s8171_s27 }
 0x331   : > { %v3391_v22 = vpop.xlane.xlu1 %3390 }
 0x332   : > { %3410 = vmatpush.msra.mxu3 %v3391_v22  ;;  %v4593_v22 = vunpack.c.h.b16 %v4588_v34  ;;  %v4409_v34 = vld [vmem:[#allocation8 + $0x18] sm:$0x11] }
 0x333   : > { %7056 = vmatmul.msk.f32.vlgmr.msra.gmra.mxu3 %vm1514_vm8, %v3384_v14  ;;  %v4598_v14 = vpack.c.b16 %v4594_v59, %v4594_v59  ;;  %v4414_v37 = vunpack.c.l.b16 %v4409_v34  ;;  %v4415_v58 = vunpack.c.h.b16 %v4409_v34 }
 0x334   : > { %v4597_v0 = vpack.c.b16 %v4593_v22, %v4593_v22 }
 0x335   : > { %v4611_v3 = vshrl.u32 %v4598_v14, 16  ;;  %v4935_v14 = vpack.i.b16 %v4934_v8, %v4934_v8  ;;  %v4418_v55 = vpack.c.b16 %v4414_v37, %v4414_v37  ;;  %v4419_v45 = vpack.c.b16 %v4415_v58, %v4415_v58 }
 0x336   : > { %v4606_v9 = vshrl.u32 %v4597_v0, 16  ;;  %v4685_v0 = vunpack.c.h.b16 %v4680_v39  ;;  %v5903_v58 = vunpack.c.h.b16 %v5898_v62 }
 0x337   : > { %v4612_v53 = vpack.i.b16 %v4611_v3, %v4611_v3  ;;  %v4684_v3 = vunpack.c.l.b16 %v4680_v39  ;;  %v4431_v35 = vshrl.u32 %v4418_v55, 16  ;;  %v4937_v20 = vperm.slane %v4935_v14, 3 }
 0x338   : > { %v4607_v63 = vpack.i.b16 %v4606_v9, %v4606_v9  ;;  %v4932_v9 = vperm.slane %v4930_v44, 3  ;;  %v4436_v42 = vshrl.u32 %v4419_v45, 16  ;;  %v4689_v46 = vpack.c.b16 %v4685_v0, %v4685_v0 }
 0x339   : > { %v4614_v61 = vperm.slane %v4612_v53, 1  ;;  %v4412_v53 = vunpack.c.l.b16 %v4408_v36  ;;  %v4688_v31 = vpack.c.b16 %v4684_v3, %v4684_v3  ;;  %v5907_v55 = vpack.c.b16 %v5903_v58, %v5903_v58 }
 0x33a   : > { %v4609_v17 = vperm.slane %v4607_v63, 1  ;;  %v4437_v2 = vpack.i.b16 %v4436_v42, %v4436_v42  ;;  %v4697_v33 = vpack.i.b16 %v4689_v46, %v4689_v46 }
 0x33b   : > { %v4627_v43 = vunpack.c.l.bf16 %v4614_v61  ;;  %v4413_v61 = vunpack.c.h.b16 %v4408_v36  ;;  %v4416_v63 = vpack.c.b16 %v4412_v53, %v4412_v53  ;;  %v4693_v21 = vpack.i.b16 %v4688_v31, %v4688_v31 }
 0x33c   : > { %v4626_v57 = vunpack.c.l.bf16 %v4609_v17  ;;  %v4439_v17 = vperm.slane %v4437_v2, 0 }
 0x33d   : > { %v7780_v59 = vpack.i.bf16 %v4628_v4, %v4627_v43  ;;  %v4417_v16 = vpack.c.b16 %v4413_v61, %v4413_v61  ;;  %v4421_v1 = vshrl.u32 %v4416_v63, 16  ;;  %v4501_v43 = vld [vmem:[#allocation8 + $0x18] sm:$0x22]  ;;  %v4945_v4 = vunpack.c.l.bf16 %v4932_v9 }
 0x33e   : > { %v7775_v52 = vpack.i.bf16 %v4626_v57, %v4625_v27  ;;  %v4946_v27 = vunpack.c.l.bf16 %v4937_v20  ;;  %v4448_v8 = vunpack.c.l.bf16 %v4439_v17  ;;  %v4506_v34 = vunpack.c.l.b16 %v4501_v43 }
 0x33f   : > { %7781 = vrot.lane.b32.xlu0 %v7780_v59, %s11486_s23  ;;  %v4422_v24 = vpack.i.b16 %v4421_v1, %v4421_v1  ;;  %v4426_v57 = vshrl.u32 %v4417_v16, 16  ;;  %v4507_v32 = vunpack.c.h.b16 %v4501_v43  ;;  %v4695_v25 = vperm.slane %v4693_v21, 2  ;;  %v9523_v16 = vpop.permute.xlu2 %3474  ;;  %v4228_v1 = vld [vmem:[#allocation8] sm:$0x88] }
 0x340   : > { %7776 = vrot.lane.b32.xlu1 %v7775_v52, %s11486_s23  ;;  %v4510_v39 = vpack.c.b16 %v4506_v34, %v4506_v34  ;;  %v4232_v17 = vunpack.c.l.b16 %v4228_v1  ;;  %v4233_v43 = vunpack.c.h.b16 %v4228_v1 }
 0x341   : > { %v4511_v44 = vpack.c.b16 %v4507_v32, %v4507_v32  ;;  %v4713_v37 = vunpack.c.l.bf16 %v4695_v25 }
 0x3b6   : > { %v3412_v23 = vpop.f32.mrf.mxu3 }
 0x3b7   : > { %3417 = vperm.xlu2 %7734, %v3412_v23   ;;  %v5899_v23 = vld [vmem:[#allocation8 + $0x38] sm:$0x22] }
 0x3b8   : > { %v5904_v19 = vunpack.c.l.b16 %v5899_v23  ;;  %v5905_v40 = vunpack.c.h.b16 %v5899_v23 }
 0x3ba   : > { %v5908_v30 = vpack.c.b16 %v5904_v19, %v5904_v19  ;;  %v5909_v26 = vpack.c.b16 %v5905_v40, %v5905_v40  ;;  %v4427_v40 = vpack.i.b16 %v4426_v57, %v4426_v57 }
 0x3bc   : > { %v5919_v48 = vpack.i.b16 %v5908_v30, %v5908_v30  ;;  %v5923_v56 = vpack.i.b16 %v5909_v26, %v5909_v26  ;;  %v4429_v52 = vperm.slane %v4427_v40, 0  ;;  %v7750_v30 = vpack.i.bf16 %v4946_v27, %v4945_v4 }
 0x3bd   : > { %v4236_v4 = vpack.c.b16 %v4232_v17, %v4232_v17  ;;  %v4237_v27 = vpack.c.b16 %v4233_v43, %v4233_v43 }
 0x3be   : > { %v5921_v54 = vperm.slane %v5919_v48, 1  ;;  %v5925_v11 = vperm.slane %v5923_v56, 1  ;;  %v4446_v26 = vunpack.c.l.bf16 %v4429_v52  ;;  %v4525_v56 = vpack.i.b16 %v4511_v44, %v4511_v44 }
 0x3bf   : > { %3483 = vperm.xlu2 %7734, %v3386_v5   ;;  %v4337_v5 = vpack.i.b16 %v4329_v15, %v4329_v15  ;;  %v4424_v15 = vperm.slane %v4422_v24, 0  ;;  %v4246_v34 = vshrl.u32 %v4237_v27, 16 }
 0x3c0   : > { %v5933_v6 = vunpack.c.l.bf16 %v5921_v54  ;;  %v5934_v12 = vunpack.c.l.bf16 %v5925_v11  ;;  %v4527_v0 = vperm.slane %v4525_v56, 1 }
 0x3c1   : > { %v4339_v22 = vperm.slane %v4337_v5, 0  ;;  %v4445_v49 = vunpack.c.l.bf16 %v4424_v15  ;;  %v4699_v5 = vperm.slane %v4697_v33, 2  ;;  %v4247_v25 = vpack.i.b16 %v4246_v34, %v4246_v34 }
 0x3c2   : > { %v7790_v10 = vpack.i.bf16 %v5934_v12, %v5933_v6  ;;  %v4536_v41 = vunpack.c.l.bf16 %v4527_v0  ;;  %v5915_v6 = vpack.i.b16 %v5907_v55, %v5907_v55 }
 0x3c3   : > { %v4354_v29 = vunpack.c.l.bf16 %v4339_v22  ;;  %v7805_v48 = vpack.i.bf16 %v4446_v26, %v4445_v49  ;;  %v4714_v14 = vunpack.c.l.bf16 %v4699_v5  ;;  %v4521_v22 = vpack.i.b16 %v4510_v39, %v4510_v39  ;;  %v5719_v39 = vld [vmem:[#allocation8 + $0x38] sm:$0x11] }
 0x3c4   : > { %7791 = vrot.lane.b32.xlu1 %v7790_v10, %s8169_s11  ;;  %v5917_v20 = vperm.slane %v5915_v6, 1  ;;  %v5725_v58 = vunpack.c.h.b16 %v5719_v39 }
 0x3c5   : > { %v7795_v47 = vpack.i.bf16 %v4354_v29, %v4353_v60  ;;  %v7755_v54 = vpack.i.bf16 %v4714_v14, %v4713_v37  ;;  %v4523_v3 = vperm.slane %v4521_v22, 1  ;;  %v4321_v60 = vld [vmem:[#allocation8 + $0x18] sm:$0x11]  ;;  %v5724_v14 = vunpack.c.l.b16 %v5719_v39 }
 0x3c6   : > { %v4326_v11 = vunpack.c.l.b16 %v4321_v60 }
 0x3c7   : > { %3494 = vperm.xlu2 %7734, %v3491_v28   ;;  %v4432_v28 = vpack.i.b16 %v4431_v35, %v4431_v35  ;;  %7796 = vrot.lane.b32.xlu0 %v7795_v47, %s8169_s11  ;;  %v4535_v45 = vunpack.c.l.bf16 %v4523_v3  ;;  %v4327_v35 = vunpack.c.h.b16 %v4321_v60 }
 0x3c8   : > { %v4330_v12 = vpack.c.b16 %v4326_v11, %v4326_v11 }
 0x3c9   : > { %v4434_v23 = vperm.slane %v4432_v28, 0  ;;  %v7770_v9 = vpack.i.bf16 %v4536_v41, %v4535_v45  ;;  %v4331_v42 = vpack.c.b16 %v4327_v35, %v4327_v35  ;;  %v5932_v28 = vunpack.c.l.bf16 %v5917_v20  ;;  %v3960_v35 = vld [vmem:[#allocation8] sm:$0x44] }
 0x3ca   : > { %v4341_v61 = vpack.i.b16 %v4330_v12, %v4330_v12  ;;  %v3965_v1 = vunpack.c.h.b16 %v3960_v35 }
 0x3cb   : > { %v4447_v19 = vunpack.c.l.bf16 %v4434_v23  ;;  %v4345_v63 = vpack.i.b16 %v4331_v42, %v4331_v42 }
 0x3cc   : > { %7806 = vrot.lane.b32.xlu1 %v7805_v48, %s11452_s14  ;;  %v4343_v10 = vperm.slane %v4341_v61, 0  ;;  %v4141_v61 = vld [vmem:[#allocation8 + $0x8] sm:$0x88] }
 0x3cd   : > { %v7810_v59 = vpack.i.bf16 %v4448_v8, %v4447_v19  ;;  %v4347_v46 = vperm.slane %v4345_v63, 0  ;;  %v4241_v19 = vshrl.u32 %v4236_v4, 16  ;;  %v5806_v63 = vld [vmem:[#allocation8 + $0x30] sm:$0x11] }
 0x3ce   : > { %v4355_v2 = vunpack.c.l.bf16 %v4343_v10  ;;  %v4146_v10 = vunpack.c.l.b16 %v4141_v61  ;;  %v5811_v17 = vunpack.c.h.b16 %v5806_v63 }
 0x3cf   : > { %3504 = vperm.xlu2 %7734, %v3501_v13   ;;  %7811 = vrot.lane.b32.xlu0 %v7810_v59, %s11452_s14  ;;  %v5902_v13 = vunpack.c.l.b16 %v5898_v62 }
 0x3d0   : > { %v4150_v4 = vpack.c.b16 %v4146_v10, %v4146_v10 }
 0x3d1   : > { %v5906_v36 = vpack.c.b16 %v5902_v13, %v5902_v13  ;;  %v4249_v13 = vperm.slane %v4247_v25, 3 }
 0x3d3   : > { %v5911_v29 = vpack.i.b16 %v5906_v36, %v5906_v36  ;;  %v4229_v36 = vld [vmem:[#allocation8 + $0x8] sm:$0x88]  ;;  %v9549_v60 = vunpack.c.l.bf16 %v4249_v13 }
 0x3d4   : > { %v4234_v0 = vunpack.c.l.b16 %v4229_v36  ;;  %v4235_v11 = vunpack.c.h.b16 %v4229_v36 }
 0x3d5   : > { %v5913_v53 = vperm.slane %v5911_v29, 1  ;;  %v5728_v29 = vpack.c.b16 %v5724_v14, %v5724_v14 }
 0x3d6   : > { %v4238_v6 = vpack.c.b16 %v4234_v0, %v4234_v0  ;;  %v9559_v0 = vpop.permute.xlu1 %7736 }
 0x3d7   : > { %7741 = vrot.lane.b32.xlu2 %v7740_v7, %s11284_s25  ;;  %v5931_v31 = vunpack.c.l.bf16 %v5913_v53  ;;  %v4356_v7 = vunpack.c.l.bf16 %v4347_v46  ;;  %v5729_v53 = vpack.c.b16 %v5725_v58, %v5725_v58  ;;  %v5739_v42 = vpack.i.b16 %v5728_v29, %v5728_v29  ;;  %s11548_s25 = smov 120  }
 0x3d8   : > { %v4251_v20 = vshrl.u32 %v4238_v6, 16  ;;  %v4147_v46 = vunpack.c.h.b16 %v4141_v61 }
 0x3d9   : > { %v7785_v47 = vpack.i.bf16 %v5932_v28, %v5931_v31  ;;  %v7800_v23 = vpack.i.bf16 %v4356_v7, %v4355_v2  ;;  %v3964_v28 = vunpack.c.l.b16 %v3960_v35  ;;  %v5810_v2 = vunpack.c.l.b16 %v5806_v63 }
 0x3da   : > { %v5743_v7 = vpack.i.b16 %v5729_v53, %v5729_v53  ;;  %v4151_v27 = vpack.c.b16 %v4147_v46, %v4147_v46 }
 0x3db   : > { %v3968_v34 = vpack.c.b16 %v3964_v28, %v3964_v28 }
 0x3dd   : > { %v3973_v13 = vpack.i.b16 %v3968_v34, %v3968_v34 }
 0x3df   : > { %7751 = vrot.lane.b32.xlu2 %v7750_v30, %s11282_s16  ;;  %v3975_v61 = vperm.slane %v3973_v13, 2  ;;  %s11516_s16 = smov 9  }
 0x3e7   : > { %7756 = vrot.lane.b32.xlu2 %v7755_v54, %s8171_s27 }
 0x3ef   : > { %7771 = vrot.lane.b32.xlu2 %v7770_v9, %s11286_s30  ;;  %v4239_v9 = vpack.c.b16 %v4235_v11, %v4235_v11  ;;  %s11723_s30 = smov 7  }
 0x3f1   : > { %v4256_v31 = vshrl.u32 %v4239_v9, 16  ;;  %v9562_v9 = vpop.permute.xlu0 %7746 }
 0x3f7   : > { %7786 = vrot.lane.b32.xlu2 %v7785_v47, %s8169_s11  ;;  %v4252_v47 = vpack.i.b16 %v4251_v20, %v4251_v20  ;;  %v11279_v20 = vunpack.i.h.bf16 %v9559_v0 }
 0x3f9   : > { %v4254_v43 = vperm.slane %v4252_v47, 3 }
 0x3ff   : > { %7801 = vrot.lane.b32.xlu2 %v7800_v23, %s8169_s11  ;;  %v4257_v23 = vpack.i.b16 %v4256_v31, %v4256_v31 }
 0x411   : > { %v3418_v24 = vpop.permute.xlu2 %3417 }
 0x412   : > { %v9526_v57 = vsub.f32 %v9465_v18, %v3418_v24  ;;  %v9529_v21 = vsub.f32 %v9467_v51, %v3418_v24  ;;  %v9532_v33 = vsub.f32 %v9471_v38, %v3418_v24  ;;  %v9535_v8 = vsub.f32 %v9473_v50, %v3418_v24  ;;  %v4140_v51 = vld [vmem:[#allocation8] sm:$0x88] }
 0x413   : > { %v4144_v52 = vunpack.c.l.b16 %v4140_v51  ;;  %v4145_v49 = vunpack.c.h.b16 %v4140_v51  ;;  %v4242_v50 = vpack.i.b16 %v4241_v19, %v4241_v19  ;;  %v5814_v24 = vpack.c.b16 %v5810_v2, %v5810_v2  ;;  %v4049_v19 = vld [vmem:[#allocation8 + $0x8] sm:$0x44] }
 0x414   : > { %v3424_v15 = vmul.f32 %v9526_v57, %v9526_v57  ;;  %v3425_v40 = vmul.f32 %v9529_v21, %v9529_v21  ;;  %v3426_v18 = vmul.f32 %v9532_v33, %v9532_v33  ;;  %v3427_v38 = vmul.f32 %v9535_v8, %v9535_v8 }
 0x415   : > { %v4148_v5 = vpack.c.b16 %v4144_v52, %v4144_v52  ;;  %v4149_v26 = vpack.c.b16 %v4145_v49, %v4145_v49  ;;  %v4244_v37 = vperm.slane %v4242_v50, 3  ;;  %v4267_v51 = vunpack.c.l.bf16 %v4254_v43  ;;  %v5626_v43 = vld [vmem:[#allocation8 + $0x20] sm:$0x88] }
 0x416   : > { %v3428_v32 = vadd.f32 %v3425_v40, %v3424_v15  ;;  %v5741_v15 = vperm.slane %v5739_v42, 0  ;;  %v4259_v40 = vperm.slane %v4257_v23, 3  ;;  %v4161_v52 = vpack.i.b16 %v4150_v4, %v4150_v4 }
 0x417   : > { %v4153_v62 = vpack.i.b16 %v4148_v5, %v4148_v5  ;;  %v4157_v48 = vpack.i.b16 %v4149_v26, %v4149_v26  ;;  %v9547_v55 = vunpack.c.l.bf16 %v4244_v37  ;;  %v4165_v49 = vpack.i.b16 %v4151_v27, %v4151_v27 }
 0x418   : > { %v3429_v30 = vadd.f32 %v3428_v32, %v3426_v18  ;;  %v5815_v18 = vpack.c.b16 %v5811_v17, %v5811_v17  ;;  %v3969_v50 = vpack.c.b16 %v3965_v1, %v3965_v1  ;;  %v4054_v5 = vunpack.c.l.b16 %v4049_v19 }
 0x419   : > { %v9545_v59 = vpop.permute.xlu2 %3483  ;;  %v4155_v22 = vperm.slane %v4153_v62, 3  ;;  %v4159_v56 = vperm.slane %v4157_v48, 3  ;;  %v7825_v12 = vpack.i.bf16 %v9549_v60, %v9547_v55  ;;  %v4163_v26 = vperm.slane %v4161_v52, 3  ;;  %v9581_v52 = vpop.permute.xlu1 %7761 }
 0x41a   : > { %v3430_v44 = vadd.f32 %v3429_v30, %v3427_v38  ;;  %v5819_v38 = vshrl.u32 %v5814_v24, 16  ;;  %v4268_v30 = vunpack.c.l.bf16 %v4259_v40  ;;  %v5824_v25 = vshrl.u32 %v5815_v18, 16  ;;  %11489 = vst [vmem:[#allocation23_spill] sm:$0xff] %v9581_v52 }
 0x41b   : > { %v4173_v54 = vunpack.c.l.bf16 %v4155_v22  ;;  %v4174_v3 = vunpack.c.l.bf16 %v4159_v56  ;;  %v4167_v39 = vperm.slane %v4165_v49, 3  ;;  %v4055_v62 = vunpack.c.h.b16 %v4049_v19  ;;  %v5718_v22 = vld [vmem:[#allocation8 + $0x30] sm:$0x11] }
 0x41c   : > { %3431 = vadd.xlane.f32.xlu0 %v3430_v44  ;;  %v5820_v44 = vpack.i.b16 %v5819_v38, %v5819_v38  ;;  %v5745_v48 = vperm.slane %v5743_v7, 0  ;;  %v7830_v37 = vpack.i.bf16 %v4268_v30, %v4267_v51  ;;  %v5825_v14 = vpack.i.b16 %v5824_v25, %v5824_v25  ;;  %v3961_v7 = vld [vmem:[#allocation8 + $0x8] sm:$0x44] }
 0x41d   : > { %v7815_v41 = vpack.i.bf16 %v4174_v3, %v4173_v54  ;;  %v4175_v56 = vunpack.c.l.bf16 %v4163_v26  ;;  %v4176_v58 = vunpack.c.l.bf16 %v4167_v39  ;;  %v4058_v54 = vpack.c.b16 %v4054_v5, %v4054_v5  ;;  %v9585_v26 = vpop.permute.xlu0 %7766 }
 0x41e   : > { %v5822_v36 = vperm.slane %v5820_v44, 0  ;;  %v3977_v3 = vpack.i.b16 %v3969_v50, %v3969_v50  ;;  %v5827_v55 = vperm.slane %v5825_v14, 0  ;;  %v5722_v60 = vunpack.c.l.b16 %v5718_v22  ;;  %11490 = vst [vmem:[#allocation24_spill] sm:$0xff] %v9585_v26 }
 0x41f   : > { %7816 = vrot.lane.b32.xlu2 %v7815_v41, %s8175_s17  ;;  %v5723_v29 = vunpack.c.h.b16 %v5718_v22  ;;  %v5753_v11 = vunpack.c.l.bf16 %v5741_v15  ;;  %v7820_v41 = vpack.i.bf16 %v4176_v58, %v4175_v56  ;;  %v4059_v35 = vpack.c.b16 %v4055_v62, %v4055_v62 }
 0x420   : > { %v5843_v6 = vunpack.c.l.bf16 %v5822_v36  ;;  %v5754_v53 = vunpack.c.l.bf16 %v5745_v48  ;;  %v5844_v42 = vunpack.c.l.bf16 %v5827_v55  ;;  %v5726_v31 = vpack.c.b16 %v5722_v60, %v5722_v60  ;;  %v5807_v36 = vld [vmem:[#allocation8 + $0x38] sm:$0x11] }
 0x421   : > { %v9551_v45 = vpop.permute.xlu2 %3494  ;;  %7821 = vrot.lane.b32.xlu1 %v7820_v41, %s8175_s17  ;;  %v4071_v63 = vshrl.u32 %v4058_v54, 16  ;;  %v5727_v47 = vpack.c.b16 %v5723_v29, %v5723_v29  ;;  %v3979_v2 = vperm.slane %v3977_v3, 2  ;;  %v4076_v23 = vshrl.u32 %v4059_v35, 16  ;;  %v5538_v35 = vld [vmem:[#allocation8 + $0x20] sm:$0x88] }
 0x422   : > { %v5731_v1 = vpack.i.b16 %v5726_v31, %v5726_v31  ;;  %v7840_v27 = vpack.i.bf16 %v5754_v53, %v5753_v11  ;;  %v3966_v34 = vunpack.c.l.b16 %v3961_v7  ;;  %v3993_v18 = vunpack.c.l.bf16 %v3975_v61 }
 0x423   : > { %v5735_v17 = vpack.i.b16 %v5727_v47, %v5727_v47  ;;  %v4072_v19 = vpack.i.b16 %v4071_v63, %v4071_v63  ;;  %v3994_v51 = vunpack.c.l.bf16 %v3979_v2  ;;  %v3967_v49 = vunpack.c.h.b16 %v3961_v7 }
 0x424   : > { %v5733_v15 = vperm.slane %v5731_v1, 0  ;;  %v5630_v38 = vunpack.c.l.b16 %v5626_v43  ;;  %v11280_v30 = vunpack.i.h.bf16 %v9562_v9  ;;  %v4077_v50 = vpack.i.b16 %v4076_v23, %v4076_v23 }
 0x425   : > { %v5737_v40 = vperm.slane %v5735_v17, 0  ;;  %v5631_v5 = vunpack.c.h.b16 %v5626_v43  ;;  %v3970_v44 = vpack.c.b16 %v3966_v34, %v3966_v34  ;;  %v3971_v62 = vpack.c.b16 %v3967_v49, %v3967_v49  ;;  %v9606_v43 = vpop.permute.xlu0 %7781 }
 0x426   : > { %v5751_v25 = vunpack.c.l.bf16 %v5733_v15  ;;  %v5634_v48 = vpack.c.b16 %v5630_v38, %v5630_v38  ;;  %v4074_v13 = vperm.slane %v4072_v19, 2  ;;  %v4079_v54 = vperm.slane %v4077_v50, 2  ;;  %11494 = vst [vmem:[#allocation28_spill] sm:$0xff] %v9606_v43 }
 0x427   : > { %7831 = vrot.lane.b32.xlu2 %v7830_v37, %s8176_s18  ;;  %v5752_v39 = vunpack.c.l.bf16 %v5737_v40  ;;  %v3981_v58 = vpack.i.b16 %v3970_v44, %v3970_v44  ;;  %v3985_v3 = vpack.i.b16 %v3971_v62, %v3971_v62  ;;  %v5635_v55 = vpack.c.b16 %v5631_v5, %v5631_v5  ;;  %v3781_v44 = vld [vmem:[#allocation8 + $0x8] sm:$0x22] }
 0x428   : > { %v5639_v60 = vshrl.u32 %v5634_v48, 16  ;;  %v7855_v11 = vpack.i.bf16 %v3994_v51, %v3993_v18  ;;  %v5812_v31 = vunpack.c.l.b16 %v5807_v36  ;;  %v4087_v61 = vunpack.c.l.bf16 %v4074_v13 }
 0x429   : > { %v9556_v32 = vpop.permute.xlu2 %3504  ;;  %v7835_v56 = vpack.i.bf16 %v5752_v39, %v5751_v25  ;;  %v3987_v53 = vperm.slane %v3985_v3, 2  ;;  %v5813_v2 = vunpack.c.h.b16 %v5807_v36  ;;  %v5542_v1 = vunpack.c.l.b16 %v5538_v35 }
 0x42a   : > { %v5640_v47 = vpack.i.b16 %v5639_v60, %v5639_v60  ;;  %v11274_v17 = vunpack.i.l.bf16 %v9581_v52  ;;  %v5816_v19 = vpack.c.b16 %v5812_v31, %v5812_v31  ;;  %v5543_v18 = vunpack.c.h.b16 %v5538_v35 }
 0x42b   : > { %7836 = vrot.lane.b32.xlu1 %v7835_v56, %s8175_s17  ;;  %v3996_v7 = vunpack.c.l.bf16 %v3987_v53  ;;  %v5817_v15 = vpack.c.b16 %v5813_v2, %v5813_v2  ;;  %v11273_v38 = vunpack.i.l.bf16 %v9606_v43  ;;  %v5546_v39 = vpack.c.b16 %v5542_v1, %v5542_v1 }
 0x42c   : > { %v5642_v49 = vperm.slane %v5640_v47, 3  ;;  %v5829_v25 = vshrl.u32 %v5816_v19, 16  ;;  %v5547_v36 = vpack.c.b16 %v5543_v18, %v5543_v18  ;;  %v3787_v60 = vunpack.c.h.b16 %v3781_v44 }
 0x42d   : > { %v5834_v5 = vshrl.u32 %v5817_v15, 16  ;;  %v5551_v3 = vpack.i.b16 %v5546_v39, %v5546_v39 }
 0x42e   : > { %v5830_v56 = vpack.i.b16 %v5829_v25, %v5829_v25  ;;  %v5555_v53 = vpack.i.b16 %v5547_v36, %v5547_v36  ;;  %v4048_v25 = vld [vmem:[#allocation8] sm:$0x44] }
 0x42f   : > { %v5553_v31 = vperm.slane %v5551_v3, 3 }
 0x430   : > { %7826 = vrot.lane.b32.xlu0 %v7825_v12, %s8176_s18  ;;  %v7845_v12 = vpack.i.bf16 %v5844_v42, %v5843_v6  ;;  %v3983_v6 = vperm.slane %v3981_v58, 2  ;;  %v5644_v42 = vshrl.u32 %v5635_v55, 16  ;;  %v5835_v58 = vpack.i.b16 %v5834_v5, %v5834_v5 }
 0x431   : > { %v9565_v28 = vpop.permute.xlu2 %7741  ;;  %v3786_v55 = vunpack.c.l.b16 %v3781_v44  ;;  %v5571_v15 = vunpack.c.l.bf16 %v5553_v31 }
 0x432   : > { %v7744_v10 = vunpack.i.h.bf16 %v9565_v28  ;;  %v7743_v46 = vunpack.i.l.bf16 %v9565_v28  ;;  %7846 = vrot.lane.b32.xlu2 %v7845_v12, %s8176_s18  ;;  %v3995_v63 = vunpack.c.l.bf16 %v3983_v6  ;;  %v4088_v12 = vunpack.c.l.bf16 %v4079_v54 }
 0x433   : > { %v5645_v23 = vpack.i.b16 %v5644_v42, %v5644_v42  ;;  %v5663_v54 = vunpack.c.l.bf16 %v5642_v49  ;;  %v5832_v6 = vperm.slane %v5830_v56, 0  ;;  %v5837_v35 = vperm.slane %v5835_v58, 0  ;;  %v5358_v56 = vld [vmem:[#allocation8 + $0x20] sm:$0x44] }
 0x434   : > { %v9573_v4 = vsel %vm11359_vm0, %v7743_v46, %v7744_v10  ;;  %v9578_v24 = vsel %vm11359_vm0, %v11279_v20, %v7743_v46  ;;  %v9602_v46 = vpop.permute.xlu1 %7776  ;;  %v7860_v34 = vpack.i.bf16 %v3996_v7, %v3995_v63  ;;  %v7870_v62 = vpack.i.bf16 %v4088_v12, %v4087_v61 }
 0x435   : > { %11487 = vst [vmem:[#allocation21_spill] sm:$0xff] %v9573_v4  ;;  %v5647_v50 = vperm.slane %v5645_v23, 3  ;;  %v3790_v61 = vpack.c.b16 %v3786_v55, %v3786_v55  ;;  %v3791_v63 = vpack.c.b16 %v3787_v60, %v3787_v60  ;;  %v5845_v12 = vunpack.c.l.bf16 %v5832_v6 }
 0x436   : > { %11488 = vst [vmem:[#allocation22_spill] sm:$0xff] %v9578_v24  ;;  %v5846_v7 = vunpack.c.l.bf16 %v5837_v35  ;;  %v5557_v23 = vperm.slane %v5555_v53, 3  ;;  %v4052_v55 = vunpack.c.l.b16 %v4048_v25  ;;  %v4053_v60 = vunpack.c.h.b16 %v4048_v25  ;;  %v4997_v24 = vld [vmem:[#allocation4 + $0x14] sm:$0xf] }
 0x437   : > { %11493 = vst [vmem:[#allocation27_spill] sm:$0xff] %v9602_v46 }
 0x438   : > { %7841 = vrot.lane.b32.xlu0 %v7840_v27, %s8175_s17  ;;  %v11270_v27 = vunpack.i.h.bf16 %v9602_v46  ;;  %v7850_v18 = vpack.i.bf16 %v5846_v7, %v5845_v12  ;;  %v5572_v49 = vunpack.c.l.bf16 %v5557_v23  ;;  %v4056_v31 = vpack.c.b16 %v4052_v55, %v4052_v55 }
 0x439   : > { %v9587_v37 = vpop.permute.xlu2 %7751 }
 0x43a   : > { %v7754_v14 = vunpack.i.h.bf16 %v9587_v37  ;;  %v7753_v22 = vunpack.i.l.bf16 %v9587_v37  ;;  %7861 = vrot.lane.b32.xlu2 %v7860_v34, %s8178_s20  ;;  %v9626_v13 = vsel %vm11496_vm5, %v11270_v27, %v11273_v38  ;;  %v3801_v34 = vpack.i.b16 %v3790_v61, %v3790_v61  ;;  %7851 = vrot.lane.b32.xlu1 %v7850_v18, %s8176_s18  ;;  %v9655_v27 = vpop.permute.xlu0 %7796 }
 0x43b   : > { %11497 = vst [vmem:[#allocation30_spill] sm:$0xff] %v9626_v13  ;;  %vm11500_vm5 = vcmask 982016   ;;  %v7875_v58 = vpack.i.bf16 %v5572_v49, %v5571_v15  ;;  %v4057_v61 = vpack.c.b16 %v4053_v60, %v4053_v60  ;;  %v4061_v18 = vshrl.u32 %v4056_v31, 16 }
 0x43c   : > { %v9594_v29 = vsel %vm11360_vm2, %v7753_v22, %v7754_v14  ;;  %v9599_v41 = vsel %vm11360_vm2, %v11280_v30, %v7753_v22  ;;  %v11272_v22 = vunpack.i.h.bf16 %v9585_v26  ;;  %v9629_v42 = vpop.permute.xlu1 %7791  ;;  %v3803_v44 = vperm.slane %v3801_v34, 1  ;;  %11504 = vst [vmem:[#allocation35_spill] sm:$0xff] %v9655_v27 }
 0x43d   : > { %11491 = vst [vmem:[#allocation25_spill] sm:$0xff] %v9594_v29  ;;  %v11281_v47 = vunpack.i.h.bf16 %v9629_v42  ;;  %v7793_v1 = vunpack.i.l.bf16 %v9629_v42  ;;  %v4066_v49 = vshrl.u32 %v4057_v61, 16 }
 0x43e   : > { %11492 = vst [vmem:[#allocation26_spill] sm:$0xff] %v9599_v41  ;;  %v3815_v6 = vunpack.c.l.bf16 %v3803_v44 }
 0x43f   : > { %v9648_v3 = vsel %vm11353_vm1, %v7793_v1, %v11281_v47  ;;  %v4817_v47 = vld [vmem:[#allocation4 + $0x14] sm:$0xf] }
 0x440   : > { %7856 = vrot.lane.b32.xlu0 %v7855_v11, %s8178_s20  ;;  %v5664_v11 = vunpack.c.l.bf16 %v5647_v50  ;;  %v3805_v50 = vpack.i.b16 %v3791_v63, %v3791_v63  ;;  %11502 = vst [vmem:[#allocation33_spill] sm:$0xff] %v9648_v3  ;;  %v5363_v63 = vunpack.c.h.b16 %v5358_v56 }
 0x441   : > { %v9609_v40 = vpop.permute.xlu2 %7756 }
 0x442   : > { %v11278_v51 = vunpack.i.h.bf16 %v9609_v40  ;;  %v7885_v39 = vpack.i.bf16 %v5664_v11, %v5663_v54  ;;  %v3807_v36 = vperm.slane %v3805_v50, 1  ;;  %7876 = vrot.lane.b32.xlu2 %v7875_v58, %s8178_s20  ;;  %v5362_v54 = vunpack.c.l.b16 %v5358_v56 }
 0x443   : > { %v5367_v44 = vpack.c.b16 %v5363_v63, %v5363_v63  ;;  %v4062_v56 = vpack.i.b16 %v4061_v18, %v4061_v18  ;;  %v11275_v63 = vunpack.i.h.bf16 %v9655_v27 }
 0x444   : > { %v9619_v48 = vsel %vm11358_vm3, %v11278_v51, %v11274_v17  ;;  %v3816_v11 = vunpack.c.l.bf16 %v3807_v36  ;;  %v5366_v15 = vpack.c.b16 %v5362_v54, %v5362_v54  ;;  %v4067_v36 = vpack.i.b16 %v4066_v49, %v4066_v49  ;;  %v5539_v54 = vld [vmem:[#allocation8 + $0x28] sm:$0x88] }
 0x445   : > { %11495 = vst [vmem:[#allocation29_spill] sm:$0xff] %v9619_v48  ;;  %v4064_v31 = vperm.slane %v4062_v56, 2 }
 0x446   : > { %v7900_v58 = vpack.i.bf16 %v3816_v11, %v3815_v6  ;;  %v4069_v61 = vperm.slane %v4067_v36, 2  ;;  %v5447_v36 = vld [vmem:[#allocation8 + $0x28] sm:$0x44] }
 0x448   : > { %7871 = vrot.lane.b32.xlu0 %v7870_v62, %s11498_s13  ;;  %v5627_v62 = vld [vmem:[#allocation8 + $0x28] sm:$0x88] }
 0x449   : > { %v9633_v2 = vpop.permute.xlu2 %7771  ;;  %v5632_v35 = vunpack.c.l.b16 %v5627_v62  ;;  %v5633_v53 = vunpack.c.h.b16 %v5627_v62  ;;  %v5371_v62 = vpack.i.b16 %v5366_v15, %v5366_v15  ;;  %v4086_v15 = vunpack.c.l.bf16 %v4069_v61 }
 0x44a   : > { %11499 = vst [vmem:[#allocation31_spill] sm:$0xff] %v9633_v2  ;;  %v11277_v19 = vunpack.i.l.bf16 %v9633_v2 }
 0x44b   : > { %v5636_v7 = vpack.c.b16 %v5632_v35, %v5632_v35  ;;  %v5637_v23 = vpack.c.b16 %v5633_v53, %v5633_v53  ;;  %v5373_v35 = vperm.slane %v5371_v62, 2  ;;  %v5375_v53 = vpack.i.b16 %v5367_v44, %v5367_v44  ;;  %v3868_v44 = vld [vmem:[#allocation8] sm:$0x22] }
 0x44c   : > { %v9642_v5 = vsel %vm11500_vm5, %v11272_v22, %v11277_v19  ;;  %v5359_v19 = vld [vmem:[#allocation8 + $0x28] sm:$0x44]  ;;  %vm11547_vm5 = vcmask 72704  }
 0x44d   : > { %11501 = vst [vmem:[#allocation32_spill] sm:$0xff] %v9642_v5  ;;  %v5649_v50 = vshrl.u32 %v5636_v7, 16  ;;  %v5654_v25 = vshrl.u32 %v5637_v23, 16  ;;  %v5377_v11 = vperm.slane %v5375_v53, 2  ;;  %v4085_v23 = vunpack.c.l.bf16 %v4064_v31 }
 0x44e   : > { %v3872_v31 = vunpack.c.l.b16 %v3868_v44 }
 0x44f   : > { %v5650_v55 = vpack.i.b16 %v5649_v50, %v5649_v50  ;;  %v5655_v60 = vpack.i.b16 %v5654_v25, %v5654_v25  ;;  %v5392_v25 = vunpack.c.l.bf16 %v5377_v11  ;;  %v7865_v56 = vpack.i.bf16 %v4086_v15, %v4085_v23 }
 0x450   : > { %7886 = vrot.lane.b32.xlu0 %v7885_v39, %s11498_s13  ;;  %v5453_v11 = vunpack.c.h.b16 %v5447_v36  ;;  %v3876_v23 = vpack.c.b16 %v3872_v31, %v3872_v31 }
 0x451   : > { %v9652_v12 = vpop.permute.xlu2 %7786  ;;  %v5652_v7 = vperm.slane %v5650_v55, 3  ;;  %v5657_v6 = vperm.slane %v5655_v60, 3  ;;  %v5545_v55 = vunpack.c.h.b16 %v5539_v54  ;;  %v3780_v60 = vld [vmem:[#allocation8] sm:$0x22]  ;;  %7866 = vrot.lane.b32.xlu1 %v7865_v56, %s11498_s13 }
 0x452   : > { %11503 = vst [vmem:[#allocation34_spill] sm:$0xff] %v9652_v12  ;;  %v11271_v34 = vunpack.i.h.bf16 %v9652_v12  ;;  %v3784_v15 = vunpack.c.l.b16 %v3780_v60 }
 0x453   : > { %v5665_v49 = vunpack.c.l.bf16 %v5652_v7  ;;  %v5666_v50 = vunpack.c.l.bf16 %v5657_v6  ;;  %v5549_v61 = vpack.c.b16 %v5545_v55, %v5545_v55  ;;  %v3873_v7 = vunpack.c.h.b16 %v3868_v44 }
 0x454   : > { %v9660_v39 = vsel %vm11353_vm1, %v11271_v34, %v7793_v1  ;;  %v5391_v1 = vunpack.c.l.bf16 %v5373_v35  ;;  %v5544_v34 = vunpack.c.l.b16 %v5539_v54  ;;  %v5452_v6 = vunpack.c.l.b16 %v5447_v36 }
 0x455   : > { %11505 = vst [vmem:[#allocation36_spill] sm:$0xff] %v9660_v39  ;;  %v7890_v22 = vpack.i.bf16 %v5666_v50, %v5665_v49  ;;  %v3785_v49 = vunpack.c.h.b16 %v3780_v60  ;;  %v5563_v50 = vpack.i.b16 %v5549_v61, %v5549_v61  ;;  %v3877_v38 = vpack.c.b16 %v3873_v7, %v3873_v7 }
 0x456   : > { %v7915_v35 = vpack.i.bf16 %v5392_v25, %v5391_v1  ;;  %v5548_v53 = vpack.c.b16 %v5544_v34, %v5544_v34  ;;  %v5456_v17 = vpack.c.b16 %v5452_v6, %v5452_v6  ;;  %v3881_v1 = vshrl.u32 %v3876_v23, 16 }
 0x457   : > { %7891 = vrot.lane.b32.xlu2 %v7890_v22, %s11498_s13  ;;  %v3788_v34 = vpack.c.b16 %v3784_v15, %v3784_v15  ;;  %v3789_v25 = vpack.c.b16 %v3785_v49, %v3785_v49  ;;  %v3886_v22 = vshrl.u32 %v3877_v38, 16  ;;  %v3688_v38 = vld [vmem:[#allocation8] sm:$0x11] }
 0x458   : > { %7901 = vrot.lane.b32.xlu0 %v7900_v58, %s11506_s19  ;;  %v5559_v54 = vpack.i.b16 %v5548_v53, %v5548_v53  ;;  %v5469_v55 = vshrl.u32 %v5456_v17, 16  ;;  %v3882_v53 = vpack.i.b16 %v3881_v1, %v3881_v1  ;;  %v3869_v1 = vld [vmem:[#allocation8 + $0x8] sm:$0x22] }
 0x459   : > { %v9664_v18 = vpop.permute.xlu2 %7801  ;;  %v3793_v31 = vpack.i.b16 %v3788_v34, %v3788_v34  ;;  %v3797_v51 = vpack.i.b16 %v3789_v25, %v3789_v25  ;;  %v3887_v61 = vpack.i.b16 %v3886_v22, %v3886_v22 }
 0x45a   : > { %11507 = vst [vmem:[#allocation37_spill] sm:$0xff] %v9664_v18  ;;  %v11276_v62 = vunpack.i.l.bf16 %v9664_v18  ;;  %v5561_v56 = vperm.slane %v5559_v54, 3  ;;  %v5470_v7 = vpack.i.b16 %v5469_v55, %v5469_v55  ;;  %v5364_v54 = vunpack.c.l.b16 %v5359_v19 }
 0x45b   : > { %v3795_v20 = vperm.slane %v3793_v31, 1  ;;  %v3889_v15 = vperm.slane %v3887_v61, 1 }
 0x45c   : > { %v9672_v58 = vsel %vm11353_vm1, %v11275_v63, %v11276_v62  ;;  %v5457_v63 = vpack.c.b16 %v5453_v11, %v5453_v11  ;;  %v5565_v62 = vperm.slane %v5563_v50, 3  ;;  %v5573_v36 = vunpack.c.l.bf16 %v5561_v56 }
 0x45d   : > { %11508 = vst [vmem:[#allocation38_spill] sm:$0xff] %v9672_v58  ;;  %v3884_v11 = vperm.slane %v3882_v53, 1  ;;  %v5472_v49 = vperm.slane %v5470_v7, 2  ;;  %v5365_v56 = vunpack.c.h.b16 %v5359_v19  ;;  %v5368_v22 = vpack.c.b16 %v5364_v54, %v5364_v54 }
 0x45e   : > { %v5474_v44 = vshrl.u32 %v5457_v63, 16  ;;  %v5574_v60 = vunpack.c.l.bf16 %v5565_v62  ;;  %v3813_v63 = vunpack.c.l.bf16 %v3795_v20  ;;  %v3906_v62 = vunpack.c.l.bf16 %v3889_v15 }
 0x45f   : > { %v3905_v17 = vunpack.c.l.bf16 %v3884_v11  ;;  %v5485_v34 = vunpack.c.l.bf16 %v5472_v49  ;;  %v3693_v53 = vunpack.c.h.b16 %v3688_v38  ;;  %v5379_v61 = vpack.i.b16 %v5368_v22, %v5368_v22 }
 0x460   : > { %7916 = vrot.lane.b32.xlu0 %v7915_v35, %s11506_s19  ;;  %v5475_v6 = vpack.i.b16 %v5474_v44, %v5474_v44  ;;  %v3799_v35 = vperm.slane %v3797_v51, 1  ;;  %v7880_v23 = vpack.i.bf16 %v5574_v60, %v5573_v36  ;;  %v5369_v44 = vpack.c.b16 %v5365_v56, %v5365_v56  ;;  %v3600_v36 = vld [vmem:[#allocation8] sm:$0x11] }
 0x461   : > { %v3692_v51 = vunpack.c.l.b16 %v3688_v38  ;;  %v7905_v31 = vpack.i.bf16 %v3906_v62, %v3905_v17  ;;  %v3874_v7 = vunpack.c.l.b16 %v3869_v1  ;;  %v3697_v11 = vpack.c.b16 %v3693_v53, %v3693_v53  ;;  %v5179_v17 = vld [vmem:[#allocation8 + $0x28] sm:$0x22] }
 0x462   : > { %v5477_v50 = vperm.slane %v5475_v6, 2  ;;  %v3814_v30 = vunpack.c.l.bf16 %v3799_v35  ;;  %7881 = vrot.lane.b32.xlu1 %v7880_v23, %s8178_s20  ;;  %v5383_v6 = vpack.i.b16 %v5369_v44, %v5369_v44  ;;  %v3875_v19 = vunpack.c.h.b16 %v3869_v1 }
 0x463   : > { %v3696_v20 = vpack.c.b16 %v3692_v51, %v3692_v51  ;;  %7906 = vrot.lane.b32.xlu2 %v7905_v31, %s11509_s28  ;;  %v5381_v35 = vperm.slane %v5379_v61, 2  ;;  %v3878_v23 = vpack.c.b16 %v3874_v7, %v3874_v7  ;;  %v3604_v54 = vunpack.c.l.b16 %v3600_v36 }
 0x464   : > { %v5486_v25 = vunpack.c.l.bf16 %v5477_v50  ;;  %v7895_v55 = vpack.i.bf16 %v3814_v30, %v3813_v63  ;;  %v3605_v30 = vunpack.c.h.b16 %v3600_v36  ;;  %v5385_v15 = vperm.slane %v5383_v6, 2 }
 0x465   : > { %v3701_v49 = vshrl.u32 %v3696_v20, 16  ;;  %v3706_v50 = vshrl.u32 %v3697_v11, 16  ;;  %v3879_v38 = vpack.c.b16 %v3875_v19, %v3875_v19  ;;  %v5393_v63 = vunpack.c.l.bf16 %v5381_v35 }
 0x466   : > { %v7930_v60 = vpack.i.bf16 %v5486_v25, %v5485_v34  ;;  %v3891_v56 = vshrl.u32 %v3878_v23, 16  ;;  %v3608_v62 = vpack.c.b16 %v3604_v54, %v3604_v54  ;;  %v3609_v34 = vpack.c.b16 %v3605_v30, %v3605_v30  ;;  %v5446_v23 = vld [vmem:[#allocation8 + $0x20] sm:$0x44] }
 0x467   : > { %v5394_v25 = vunpack.c.l.bf16 %v5385_v15  ;;  %v3702_v22 = vpack.i.b16 %v3701_v49, %v3701_v49  ;;  %v3707_v1 = vpack.i.b16 %v3706_v50, %v3706_v50  ;;  %v3896_v44 = vshrl.u32 %v3879_v38, 16  ;;  %v3689_v50 = vld [vmem:[#allocation8 + $0x8] sm:$0x11] }
 0x468   : > { %7931 = vrot.lane.b32.xlu0 %v7930_v60, %s11509_s28  ;;  %v3892_v51 = vpack.i.b16 %v3891_v56, %v3891_v56  ;;  %v3613_v53 = vpack.i.b16 %v3608_v62, %v3608_v62  ;;  %v3617_v31 = vpack.i.b16 %v3609_v34, %v3609_v34  ;;  %v5184_v60 = vunpack.c.l.b16 %v5179_v17 }
 0x469   : > { %v7920_v36 = vpack.i.bf16 %v5394_v25, %v5393_v63  ;;  %v3704_v61 = vperm.slane %v3702_v22, 0  ;;  %v3709_v7 = vperm.slane %v3707_v1, 0  ;;  %v3897_v6 = vpack.i.b16 %v3896_v44, %v3896_v44  ;;  %v4998_v1 = vld [vmem:[#allocation8 + $0x20] sm:$0x11] }
 0x46a   : > { %7896 = vrot.lane.b32.xlu1 %v7895_v55, %s11506_s19  ;;  %v3894_v20 = vperm.slane %v3892_v51, 1  ;;  %v3615_v11 = vperm.slane %v3613_v53, 0  ;;  %v3619_v19 = vperm.slane %v3617_v31, 0  ;;  %v5185_v35 = vunpack.c.h.b16 %v5179_v17 }
 0x46b   : > { %v3725_v54 = vunpack.c.l.bf16 %v3704_v61  ;;  %v3726_v30 = vunpack.c.l.bf16 %v3709_v7  ;;  %v3899_v15 = vperm.slane %v3897_v6, 1  ;;  %v5188_v49 = vpack.c.b16 %v5184_v60, %v5184_v60  ;;  %7921 = vrot.lane.b32.xlu2 %v7920_v36, %s11506_s19 }
 0x46c   : > { %v3907_v55 = vunpack.c.l.bf16 %v3894_v20  ;;  %v3633_v38 = vunpack.c.l.bf16 %v3615_v11  ;;  %v3634_v56 = vunpack.c.l.bf16 %v3619_v19  ;;  %v5189_v62 = vpack.c.b16 %v5185_v35, %v5185_v35  ;;  %v3601_v19 = vld [vmem:[#allocation8 + $0x8] sm:$0x11] }
 0x46d   : > { %v7945_v63 = vpack.i.bf16 %v3726_v30, %v3725_v54  ;;  %v3908_v34 = vunpack.c.l.bf16 %v3899_v15  ;;  %v5199_v25 = vpack.i.b16 %v5188_v49, %v5188_v49  ;;  %v5450_v22 = vunpack.c.l.b16 %v5446_v23 }
 0x46e   : > { %v7935_v44 = vpack.i.bf16 %v3634_v56, %v3633_v38  ;;  %v5203_v51 = vpack.i.b16 %v5189_v62, %v5189_v62  ;;  %v5451_v17 = vunpack.c.h.b16 %v5446_v23  ;;  %v3694_v53 = vunpack.c.l.b16 %v3689_v50 }
 0x46f   : > { %v7910_v31 = vpack.i.bf16 %v3908_v34, %v3907_v55  ;;  %v5201_v60 = vperm.slane %v5199_v25, 1  ;;  %v5454_v61 = vpack.c.b16 %v5450_v22, %v5450_v22  ;;  %v3695_v7 = vunpack.c.h.b16 %v3689_v50 }
 0x470   : > { %7946 = vrot.lane.b32.xlu0 %v7945_v63, %s11510_s24  ;;  %v5205_v36 = vperm.slane %v5203_v51, 1  ;;  %v5455_v6 = vpack.c.b16 %v5451_v17, %v5451_v17  ;;  %v3698_v20 = vpack.c.b16 %v3694_v53, %v3694_v53  ;;  %v5002_v11 = vunpack.c.l.b16 %v4998_v1 }
 0x471   : > { %v5213_v35 = vunpack.c.l.bf16 %v5201_v60  ;;  %v5459_v54 = vshrl.u32 %v5454_v61, 16  ;;  %v3699_v30 = vpack.c.b16 %v3695_v7, %v3695_v7  ;;  %v5003_v15 = vunpack.c.h.b16 %v4998_v1 }
 0x472   : > { %7911 = vrot.lane.b32.xlu1 %v7910_v31, %s11509_s28  ;;  %v5214_v49 = vunpack.c.l.bf16 %v5205_v36  ;;  %v5464_v23 = vshrl.u32 %v5455_v6, 16  ;;  %v3711_v38 = vshrl.u32 %v3698_v20, 16  ;;  %v5006_v56 = vpack.c.b16 %v5002_v11, %v5002_v11  ;;  %v5266_v6 = vld [vmem:[#allocation8 + $0x20] sm:$0x22] }
 0x473   : > { %v5460_v62 = vpack.i.b16 %v5459_v54, %v5459_v54  ;;  %v3716_v55 = vshrl.u32 %v3699_v30, 16  ;;  %v5007_v63 = vpack.c.b16 %v5003_v15, %v5003_v15  ;;  %v3606_v34 = vunpack.c.l.b16 %v3601_v19  ;;  %7936 = vrot.lane.b32.xlu2 %v7935_v44, %s11511_s21  ;;  %v5087_v44 = vld [vmem:[#allocation8 + $0x28] sm:$0x11] }
 0x474   : > { %v7960_v50 = vpack.i.bf16 %v5214_v49, %v5213_v35  ;;  %v5465_v25 = vpack.i.b16 %v5464_v23, %v5464_v23  ;;  %v3712_v22 = vpack.i.b16 %v3711_v38, %v3711_v38  ;;  %v5011_v51 = vpack.i.b16 %v5006_v56, %v5006_v56 }
 0x475   : > { %v5462_v17 = vperm.slane %v5460_v62, 2  ;;  %v3717_v53 = vpack.i.b16 %v3716_v55, %v3716_v55  ;;  %v5015_v31 = vpack.i.b16 %v5007_v63, %v5007_v63  ;;  %v3607_v60 = vunpack.c.h.b16 %v3601_v19 }
 0x476   : > { %v5467_v61 = vperm.slane %v5465_v25, 2  ;;  %v3714_v1 = vperm.slane %v3712_v22, 0  ;;  %v5013_v7 = vperm.slane %v5011_v51, 0  ;;  %v3610_v36 = vpack.c.b16 %v3606_v34, %v3606_v34  ;;  %v5178_v22 = vld [vmem:[#allocation8 + $0x20] sm:$0x22] }
 0x477   : > { %v5483_v20 = vunpack.c.l.bf16 %v5462_v17  ;;  %v3719_v11 = vperm.slane %v3717_v53, 0  ;;  %v5017_v54 = vperm.slane %v5015_v31, 0  ;;  %v3611_v30 = vpack.c.b16 %v3607_v60, %v3607_v60  ;;  %v4999_v31 = vld [vmem:[#allocation8 + $0x28] sm:$0x11] }
 0x478   : > { %7961 = vrot.lane.b32.xlu0 %v7960_v50, %s11511_s21  ;;  %v5484_v35 = vunpack.c.l.bf16 %v5467_v61  ;;  %v3727_v15 = vunpack.c.l.bf16 %v3714_v1  ;;  %v5031_v49 = vunpack.c.l.bf16 %v5013_v7  ;;  %v3621_v23 = vpack.i.b16 %v3610_v36, %v3610_v36 }
 0x479   : > { %v3728_v38 = vunpack.c.l.bf16 %v3719_v11  ;;  %v5032_v56 = vunpack.c.l.bf16 %v5017_v54  ;;  %v3625_v62 = vpack.i.b16 %v3611_v30, %v3611_v30  ;;  %v5270_v19 = vunpack.c.l.b16 %v5266_v6 }
 0x47a   : > { %v7925_v55 = vpack.i.bf16 %v5484_v35, %v5483_v20  ;;  %v3623_v63 = vperm.slane %v3621_v23, 0  ;;  %v5271_v25 = vunpack.c.h.b16 %v5266_v6  ;;  %v5092_v34 = vunpack.c.l.b16 %v5087_v44 }
 0x47b   : > { %v7950_v51 = vpack.i.bf16 %v3728_v38, %v3727_v15  ;;  %v7975_v50 = vpack.i.bf16 %v5032_v56, %v5031_v49  ;;  %v3627_v17 = vperm.slane %v3625_v62, 0  ;;  %v5274_v53 = vpack.c.b16 %v5270_v19, %v5270_v19  ;;  %v9688_v49 = vpop.permute.xlu2 %7816 }
 0x47c   : > { %7926 = vrot.lane.b32.xlu1 %v7925_v55, %s11509_s28  ;;  %v3635_v60 = vunpack.c.l.bf16 %v3623_v63  ;;  %v5275_v61 = vpack.c.b16 %v5271_v25, %v5271_v25  ;;  %v5093_v1 = vunpack.c.h.b16 %v5087_v44  ;;  %v5096_v7 = vpack.c.b16 %v5092_v34, %v5092_v34  ;;  %11512 = vst [vmem:[#allocation39_spill] sm:$0xff] %v9688_v49  ;;  %v9691_v44 = vpop.permute.xlu0 %7811 }
 0x47d   : > { %7951 = vrot.lane.b32.xlu2 %v7950_v51, %s11510_s24  ;;  %v3636_v36 = vunpack.c.l.bf16 %v3627_v17  ;;  %v5279_v11 = vshrl.u32 %v5274_v53, 16  ;;  %v5182_v20 = vunpack.c.l.b16 %v5178_v22  ;;  %v5183_v54 = vunpack.c.h.b16 %v5178_v22  ;;  %11514 = vst [vmem:[#allocation40_spill] sm:$0xff] %v9691_v44 }
 0x47e   : > { %v5284_v6 = vshrl.u32 %v5275_v61, 16  ;;  %v5097_v30 = vpack.c.b16 %v5093_v1, %v5093_v1  ;;  %v5109_v35 = vshrl.u32 %v5096_v7, 16  ;;  %v5004_v15 = vunpack.c.l.b16 %v4999_v31 }
 0x47f   : > { %v7940_v23 = vpack.i.bf16 %v3636_v36, %v3635_v60  ;;  %v5280_v38 = vpack.i.b16 %v5279_v11, %v5279_v11  ;;  %v5186_v56 = vpack.c.b16 %v5182_v20, %v5182_v20  ;;  %v5187_v62 = vpack.c.b16 %v5183_v54, %v5183_v54 }
 0x480   : > { %7976 = vrot.lane.b32.xlu0 %v7975_v50, %s11513_s1  ;;  %v5285_v19 = vpack.i.b16 %v5284_v6, %v5284_v6  ;;  %v5110_v55 = vpack.i.b16 %v5109_v35, %v5109_v35  ;;  %v5114_v63 = vshrl.u32 %v5097_v30, 16  ;;  %v5005_v25 = vunpack.c.h.b16 %v4999_v31  ;;  %v5267_v31 = vld [vmem:[#allocation8 + $0x28] sm:$0x22] }
 0x481   : > { %v5282_v34 = vperm.slane %v5280_v38, 1  ;;  %v5191_v22 = vpack.i.b16 %v5186_v56, %v5186_v56  ;;  %v5195_v51 = vpack.i.b16 %v5187_v62, %v5187_v62  ;;  %v5008_v17 = vpack.c.b16 %v5004_v15, %v5004_v15 }
 0x482   : > { %v5287_v53 = vperm.slane %v5285_v19, 1  ;;  %v5112_v61 = vperm.slane %v5110_v55, 0  ;;  %v5115_v1 = vpack.i.b16 %v5114_v63, %v5114_v63  ;;  %v5009_v7 = vpack.c.b16 %v5005_v25, %v5005_v25  ;;  %v5086_v63 = vld [vmem:[#allocation8 + $0x20] sm:$0x11] }
 0x483   : > { %v5303_v50 = vunpack.c.l.bf16 %v5282_v34  ;;  %v5193_v60 = vperm.slane %v5191_v22, 1  ;;  %v5197_v36 = vperm.slane %v5195_v51, 1  ;;  %v5019_v11 = vpack.i.b16 %v5008_v17, %v5008_v17 }
 0x484   : > { %7941 = vrot.lane.b32.xlu1 %v7940_v23, %s11511_s21  ;;  %v5304_v20 = vunpack.c.l.bf16 %v5287_v53  ;;  %v5117_v54 = vperm.slane %v5115_v1, 0  ;;  %v5125_v6 = vunpack.c.l.bf16 %v5112_v61  ;;  %v5023_v30 = vpack.i.b16 %v5009_v7, %v5009_v7  ;;  %v9695_v61 = vpop.permute.xlu2 %7831  ;;  %v4905_v1 = vld [vmem:[#allocation4 + $0x14] sm:$0xf] }
 0x485   : > { %v5211_v35 = vunpack.c.l.bf16 %v5193_v60  ;;  %v5212_v38 = vunpack.c.l.bf16 %v5197_v36  ;;  %v5021_v56 = vperm.slane %v5019_v11, 0  ;;  %v4850_v15 = vunpack.c.l.bf16 %v4817_v47  ;;  %11515 = vst [vmem:[#allocation41_spill] sm:$0xff] %v9695_v61  ;;  %v8033_v36 = vld [vmem:[%s11209_s12] sm:$0xff] }
 0x486   : > { %v7965_v62 = vpack.i.bf16 %v5304_v20, %v5303_v50  ;;  %v5126_v19 = vunpack.c.l.bf16 %v5117_v54  ;;  %v5025_v55 = vperm.slane %v5023_v30, 0  ;;  %v5272_v25 = vunpack.c.l.b16 %v5267_v31 }
 0x487   : > { %v5273_v34 = vunpack.c.h.b16 %v5267_v31  ;;  %v7955_v23 = vpack.i.bf16 %v5212_v38, %v5211_v35  ;;  %v5033_v17 = vunpack.c.l.bf16 %v5021_v56  ;;  %v5090_v47 = vunpack.c.l.b16 %v5086_v63 }
 0x488   : > { %7966 = vrot.lane.b32.xlu2 %v7965_v62, %s11510_s24  ;;  %v7990_v22 = vpack.i.bf16 %v5126_v19, %v5125_v6  ;;  %v5034_v53 = vunpack.c.l.bf16 %v5025_v55  ;;  %v5276_v7 = vpack.c.b16 %v5272_v25, %v5272_v25  ;;  %v4879_v50 = vmul.f32 %v7744_v10, %v4850_v15 }
 0x489   : > { %v5277_v60 = vpack.c.b16 %v5273_v34, %v5273_v34  ;;  %v5091_v11 = vunpack.c.h.b16 %v5086_v63  ;;  %v5094_v6 = vpack.c.b16 %v5090_v47, %v5090_v47  ;;  %v4942_v30 = vunpack.c.l.bf16 %v4905_v1 }
 0x48a   : > { %7991 = vrot.lane.b32.xlu0 %v7990_v22, %s11516_s16  ;;  %v5289_v20 = vshrl.u32 %v5276_v7, 16  ;;  %v7980_v31 = vpack.i.bf16 %v5034_v53, %v5033_v17  ;;  %v4882_v56 = vpack.c.bf16 %v4879_v50, %v4879_v50  ;;  %v9711_v7 = vpop.permute.xlu1 %7806 }
 0x48b   : > { %v5294_v54 = vshrl.u32 %v5277_v60, 16  ;;  %v5095_v35 = vpack.c.b16 %v5091_v11, %v5091_v11  ;;  %v5099_v10 = vshrl.u32 %v5094_v6, 16  ;;  %v4971_v25 = vmul.f32 %v7754_v14, %v4942_v30  ;;  %11518 = vst [vmem:[#allocation43_spill] sm:$0xff] %v9711_v7  ;;  %v5897_v14 = vld [vmem:[#allocation4 + $0x14] sm:$0xf] }
 0x48c   : > { %7956 = vrot.lane.b32.xlu1 %v7955_v23, %s11511_s21  ;;  %v5290_v38 = vpack.i.b16 %v5289_v20, %v5289_v20  ;;  %v9709_v23 = vpop.permute.xlu2 %7846  ;;  %v5930_v47 = vunpack.c.l.bf16 %v5897_v14  ;;  %v11291_v11 = vunpack.i.h.bf16 %v9688_v49  ;;  %v5625_v14 = vld [vmem:[#allocation4 + $0x14] sm:$0xf] }
 0x48d   : > { %v5295_v28 = vpack.i.b16 %v5294_v54, %v5294_v54  ;;  %v5104_v15 = vshrl.u32 %v5095_v35, 16  ;;  %v5100_v55 = vpack.i.b16 %v5099_v10, %v5099_v10  ;;  %11517 = vst [vmem:[#allocation42_spill] sm:$0xff] %v9709_v23  ;;  %v4974_v1 = vpack.c.bf16 %v4971_v25, %v4971_v25  ;;  %v5717_v10 = vld [vmem:[#allocation4 + $0x14] sm:$0xf] }
 0x48e   : > { %v5292_v62 = vperm.slane %v5290_v38, 1 }
 0x48f   : > { %v3432_v51 = vpop.xlane.xlu0 %3431  ;;  %v5297_v19 = vperm.slane %v5295_v28, 1  ;;  %v5105_v63 = vpack.i.b16 %v5104_v15, %v5104_v15  ;;  %v5750_v15 = vunpack.c.l.bf16 %v5717_v10 }
 0x490   : > { %3448 = vmatpush.msra.mxu1 %v3432_v51  ;;  %7981 = vrot.lane.b32.xlu2 %v7980_v31, %s11513_s1  ;;  %v5305_v34 = vunpack.c.l.bf16 %v5292_v62  ;;  %v5102_v51 = vperm.slane %v5100_v55, 0  ;;  %v11522_v31 = vunpack.i.h.bf16 %v9629_v42 }
 0x491   : > { %7057 = vmatmul.msk.f32.vlgmr.msra.gmra.mxu1 %vm1514_vm8, %v8033_v36  ;;  %v5306_v22 = vunpack.c.l.bf16 %v5297_v19  ;;  %v5107_v17 = vperm.slane %v5105_v63, 0  ;;  %v11295_v36 = vunpack.i.l.bf16 %v9695_v61 }
 0x492   : > { %4890 = vrot.lane.b32.xlu0 %v4882_v56, %s8171_s27  ;;  %v5123_v60 = vunpack.c.l.bf16 %v5102_v51  ;;  %v5959_v35 = vmul.f32 %v11522_v31, %v5930_v47 }
 0x493   : > { %v7970_v53 = vpack.i.bf16 %v5306_v22, %v5305_v34  ;;  %v5124_v37 = vunpack.c.l.bf16 %v5107_v17  ;;  %v9722_v30 = vpop.permute.xlu1 %7821 }
 0x494   : > { %v9720_v6 = vpop.permute.xlu2 %7861  ;;  %11521 = vst [vmem:[#allocation46_spill] sm:$0xff] %v9722_v30  ;;  %v11293_v38 = vunpack.i.l.bf16 %v9722_v30  ;;  %v5962_v42 = vpack.c.bf16 %v5959_v35, %v5959_v35 }
 0x495   : > { %7971 = vrot.lane.b32.xlu1 %v7970_v53, %s11510_s24  ;;  %v7985_v50 = vpack.i.bf16 %v5124_v37, %v5123_v60  ;;  %11520 = vst [vmem:[#allocation45_spill] sm:$0xff] %v9720_v6  ;;  %v11294_v53 = vunpack.i.l.bf16 %v9720_v6 }
 0x496   : > { %v9740_v56 = vsel %vm11340_vm6, %v11291_v11, %v11293_v38 }
 0x497   : > { %11524 = vst [vmem:[#allocation48_spill] sm:$0xff] %v9740_v56 }
 0x498   : > { %4982 = vrot.lane.b32.xlu2 %v4974_v1, %s11486_s23 }
 0x49c   : > { %v9746_v34 = vpop.permute.xlu2 %7876 }
 0x49d   : > { %7986 = vrot.lane.b32.xlu1 %v7985_v50, %s11516_s16  ;;  %11526 = vst [vmem:[#allocation50_spill] sm:$0xff] %v9746_v34  ;;  %v9748_v22 = vpop.permute.xlu1 %7836  ;;  %v5662_v50 = vunpack.c.l.bf16 %v5625_v14 }
 0x49e   : > { %11527 = vst [vmem:[#allocation51_spill] sm:$0xff] %v9748_v22  ;;  %v11290_v17 = vunpack.i.h.bf16 %v9748_v22 }
 0x4a2   : > { %v9717_v20 = vpop.permute.xlu0 %7826 }
 0x4a3   : > { %11519 = vst [vmem:[#allocation44_spill] sm:$0xff] %v9717_v20  ;;  %v11288_v54 = vunpack.i.h.bf16 %v9717_v20 }
 0x4a5   : > { %v9733_v28 = vsel %vm11352_vm7, %v11288_v54, %v11295_v36  ;;  %5970 = vrot.lane.b32.xlu1 %v5962_v42, %s11511_s21 }
 0x4a6   : > { %11523 = vst [vmem:[#allocation47_spill] sm:$0xff] %v9733_v28 }
 0x4aa   : > { %v7842_v62 = vpop.permute.xlu0 %7841 }
 0x4ab   : > { %v7844_v19 = vunpack.i.h.bf16 %v7842_v62  ;;  %v7843_v55 = vunpack.i.l.bf16 %v7842_v62 }
 0x4ac   : > { %v7852_v54 = vpop.permute.xlu1 %7851 }
 0x4ad   : > { %v5779_v25 = vmul.f32 %v7844_v19, %v5750_v15  ;;  %v9744_v63 = vsel %vm11340_vm6, %v7843_v55, %v7844_v19  ;;  %v9755_v1 = vsel %vm11340_vm6, %v11290_v17, %v7843_v55  ;;  %v5805_v19 = vld [vmem:[#allocation4 + $0x14] sm:$0xf]  ;;  %v7853_v17 = vunpack.i.l.bf16 %v7852_v54 }
 0x4ae   : > { %11525 = vst [vmem:[#allocation49_spill] sm:$0xff] %v9744_v63 }
 0x4af   : > { %v5782_v51 = vpack.c.bf16 %v5779_v25, %v5779_v25  ;;  %11528 = vst [vmem:[#allocation52_spill] sm:$0xff] %v9755_v1  ;;  %v11292_v25 = vunpack.i.h.bf16 %v9709_v23  ;;  %v5537_v23 = vld [vmem:[#allocation4 + $0x14] sm:$0xf] }
 0x4b0   : > { %v5570_v20 = vunpack.c.l.bf16 %v5537_v23 }
 0x4b1   : > { %5790 = vrot.lane.b32.xlu2 %v5782_v51, %s11506_s19  ;;  %v7892_v31 = vpop.permute.xlu2 %7891  ;;  %v5842_v51 = vunpack.c.l.bf16 %v5805_v19 }
 0x4b2   : > { %v9758_v60 = vpop.permute.xlu0 %7856  ;;  %v7894_v35 = vunpack.i.h.bf16 %v7892_v31  ;;  %v7893_v10 = vunpack.i.l.bf16 %v7892_v31 }
 0x4b3   : > { %11529 = vst [vmem:[#allocation53_spill] sm:$0xff] %v9758_v60  ;;  %v11289_v37 = vunpack.i.h.bf16 %v9758_v60 }
 0x4b4   : > { %v5691_v15 = vmul.f32 %v7894_v35, %v5662_v50  ;;  %v9771_v62 = vsel %vm11365_vm9, %v7893_v10, %v7894_v35  ;;  %v9780_v50 = vsel %vm11352_vm7, %v11292_v25, %v7853_v17 }
 0x4b5   : > { %v9766_v47 = vsel %vm11345_vm10, %v11289_v37, %v11294_v53  ;;  %11532 = vst [vmem:[#allocation56_spill] sm:$0xff] %v9771_v62  ;;  %v7854_v37 = vunpack.i.h.bf16 %v7852_v54 }
 0x4b6   : > { %11530 = vst [vmem:[#allocation54_spill] sm:$0xff] %v9766_v47  ;;  %v5694_v55 = vpack.c.bf16 %v5691_v15, %v5691_v15 }
 0x4b7   : > { %v5871_v11 = vmul.f32 %v7854_v37, %v5842_v51  ;;  %11534 = vst [vmem:[#allocation58_spill] sm:$0xff] %v9780_v50  ;;  %v9783_v31 = vsel %vm11352_vm7, %v7853_v17, %v7854_v37 }
 0x4b8   : > { %11535 = vst [vmem:[#allocation59_spill] sm:$0xff] %v9783_v31 }
 0x4b9   : > { %5702 = vrot.lane.b32.xlu2 %v5694_v55, %s11509_s28  ;;  %v5874_v15 = vpack.c.bf16 %v5871_v11, %v5871_v11  ;;  %v5357_v55 = vld [vmem:[#allocation4 + $0x14] sm:$0xf] }
 0x4ba   : > { %v9768_v42 = vpop.permute.xlu0 %7871  ;;  %v5390_v25 = vunpack.c.l.bf16 %v5357_v55 }
 0x4bb   : > { %11531 = vst [vmem:[#allocation55_spill] sm:$0xff] %v9768_v42  ;;  %5882 = vrot.lane.b32.xlu1 %v5874_v15, %s11510_s24  ;;  %v11306_v38 = vunpack.i.l.bf16 %v9768_v42 }
 0x4bd   : > { %v9791_v54 = vpop.permute.xlu2 %7906 }
 0x4c2   : > { %v9775_v14 = vpop.permute.xlu0 %7886 }
 0x4c3   : > { %11533 = vst [vmem:[#allocation57_spill] sm:$0xff] %v9775_v14  ;;  %v11298_v35 = vunpack.i.h.bf16 %v9775_v14  ;;  %v9797_v36 = vpop.permute.xlu1 %7866 }
 0x4c4   : > { %11538 = vst [vmem:[#allocation62_spill] sm:$0xff] %v9797_v36  ;;  %v11305_v11 = vunpack.i.h.bf16 %v9797_v36  ;;  %v11322_v36 = vunpack.i.h.bf16 %v9746_v34 }
 0x4c5   : > { %v9789_v19 = vsel %vm11365_vm9, %v11298_v35, %v7893_v10  ;;  %v7922_v17 = vpop.permute.xlu2 %7921 }
 0x4c6   : > { %11536 = vst [vmem:[#allocation60_spill] sm:$0xff] %v9789_v19  ;;  %v7924_v37 = vunpack.i.h.bf16 %v7922_v17  ;;  %v7923_v53 = vunpack.i.l.bf16 %v7922_v17  ;;  %v9808_v15 = vsel %vm11365_vm9, %v11305_v11, %v11306_v38  ;;  %v5445_v38 = vld [vmem:[#allocation4 + $0x14] sm:$0xf] }
 0x4c8   : > { %v5419_v60 = vmul.f32 %v7924_v37, %v5390_v25  ;;  %v9801_v10 = vsel %vm748_vm11, %v7923_v53, %v7924_v37 }
 0x4ca   : > { %v9794_v51 = vpop.permute.xlu0 %7901  ;;  %v5422_v55 = vpack.c.bf16 %v5419_v60, %v5419_v60 }
 0x4cb   : > { %11537 = vst [vmem:[#allocation61_spill] sm:$0xff] %v9794_v51  ;;  %v11323_v23 = vunpack.i.l.bf16 %v9794_v51 }
 0x4cc   : > { %5430 = vrot.lane.b32.xlu1 %v5422_v55, %s8175_s17 }
 0x4cd   : > { %v9819_v37 = vpop.permute.xlu2 %7936 }
 0x4d2   : > { %v9810_v35 = vpop.permute.xlu0 %7916 }
 0x4d3   : > { %v11312_v17 = vunpack.i.h.bf16 %v9810_v35 }
 0x4d4   : > { %v7882_v11 = vpop.permute.xlu1 %7881 }
 0x4d5   : > { %v9817_v25 = vsel %vm748_vm11, %v11312_v17, %v7923_v53  ;;  %v7884_v60 = vunpack.i.h.bf16 %v7882_v11  ;;  %v7883_v22 = vunpack.i.l.bf16 %v7882_v11  ;;  %v5482_v53 = vunpack.c.l.bf16 %v5445_v38 }
 0x4d7   : > { %v5599_v49 = vmul.f32 %v7884_v60, %v5570_v20  ;;  %v9825_v55 = vsel %vm11345_vm10, %v11322_v36, %v7883_v22  ;;  %v9828_v44 = vsel %vm11345_vm10, %v7883_v22, %v7884_v60  ;;  %v9830_v46 = vpop.permute.xlu2 %7951 }
 0x4d8   : > { %11539 = vst [vmem:[#allocation63_spill] sm:$0xff] %v9825_v55  ;;  %v11325_v38 = vunpack.i.l.bf16 %v9830_v46  ;;  %v5030_v55 = vunpack.c.l.bf16 %v4997_v24 }
 0x4d9   : > { %11540 = vst [vmem:[#allocation64_spill] sm:$0xff] %v9828_v44  ;;  %v5602_v27 = vpack.c.bf16 %v5599_v49, %v5599_v49 }
 0x4da   : > { %v7932_v17 = vpop.permute.xlu0 %7931  ;;  %11541 = vst [vmem:[#allocation65_spill] sm:$0xff] %v9830_v46 }
 0x4db   : > { %v7934_v7 = vunpack.i.h.bf16 %v7932_v17  ;;  %v7933_v12 = vunpack.i.l.bf16 %v7932_v17  ;;  %5610 = vrot.lane.b32.xlu0 %v5602_v27, %s8178_s20  ;;  %v11328_v27 = vunpack.i.h.bf16 %v9791_v54 }
 0x4dc   : > { %v9837_v11 = vpop.permute.xlu1 %7896 }
 0x4dd   : > { %v5511_v26 = vmul.f32 %v7934_v7, %v5482_v53  ;;  %v9834_v20 = vsel %vm11366_vm12, %v7933_v12, %v7934_v7  ;;  %v11324_v22 = vunpack.i.h.bf16 %v9837_v11 }
 0x4de   : > { %11542 = vst [vmem:[#allocation66_spill] sm:$0xff] %v9834_v20 }
 0x4df   : > { %v5514_v60 = vpack.c.bf16 %v5511_v26, %v5511_v26  ;;  %v9845_v49 = vsel %vm748_vm11, %v11324_v22, %v11323_v23  ;;  %v5177_v22 = vld [vmem:[#allocation4 + $0x14] sm:$0xf] }
 0x4e0   : > { %v5210_v3 = vunpack.c.l.bf16 %v5177_v22 }
 0x4e2   : > { %v9848_v17 = vpop.permute.xlu0 %7946  ;;  %v9853_v53 = vpop.permute.xlu2 %7966 }
 0x4e3   : > { %5522 = vrot.lane.b32.xlu0 %v5514_v60, %s11498_s13  ;;  %v11326_v7 = vunpack.i.h.bf16 %v9848_v17 }
 0x4e4   : > { %v9855_v26 = vpop.permute.xlu1 %7911 }
 0x4e5   : > { %11543 = vst [vmem:[#allocation67_spill] sm:$0xff] %v9855_v26  ;;  %v9862_v36 = vsel %vm11367_vm14, %v11326_v7, %v11325_v38  ;;  %v11327_v23 = vunpack.i.l.bf16 %v9855_v26 }
 0x4e7   : > { %v9870_v60 = vsel %vm11366_vm12, %v11328_v27, %v11327_v23  ;;  %v5085_v27 = vld [vmem:[#allocation4 + $0x14] sm:$0xf] }
 0x4ea   : > { %v7962_v39 = vpop.permute.xlu0 %7961  ;;  %v7982_v63 = vpop.permute.xlu2 %7981 }
 0x4eb   : > { %v7964_v31 = vunpack.i.h.bf16 %v7962_v39  ;;  %v7963_v50 = vunpack.i.l.bf16 %v7962_v39  ;;  %v7984_v1 = vunpack.i.h.bf16 %v7982_v63  ;;  %v7983_v48 = vunpack.i.l.bf16 %v7982_v63 }
 0x4ed   : > { %v5239_v13 = vmul.f32 %v7964_v31, %v5210_v3  ;;  %v9873_v38 = vsel %vm11368_vm13, %v7963_v50, %v7964_v31  ;;  %v9876_v7 = vsel %vm1514_vm8, %v7983_v48, %v7984_v1 }
 0x4ee   : > { %v9878_v58 = vpop.permute.xlu1 %7926 }
 0x4ef   : > { %v5242_v5 = vpack.c.bf16 %v5239_v13, %v5239_v13  ;;  %11544 = vst [vmem:[#allocation68_spill] sm:$0xff] %v9878_v58  ;;  %v11329_v23 = vunpack.i.h.bf16 %v9878_v58  ;;  %v11332_v13 = vunpack.i.h.bf16 %v9819_v37 }
 0x4f1   : > { %5250 = vrot.lane.b32.xlu0 %v5242_v5, %s8169_s11  ;;  %v9885_v39 = vsel %vm11366_vm12, %v11329_v23, %v7933_v12  ;;  %v5122_v23 = vunpack.c.l.bf16 %v5085_v27 }
 0x4f2   : > { %11545 = vst [vmem:[#allocation69_spill] sm:$0xff] %v9885_v39  ;;  %v9887_v63 = vpop.permute.xlu0 %7976 }
 0x4f3   : > { %v11330_v3 = vunpack.i.h.bf16 %v9887_v63 }
 0x4f5   : > { %v9893_v31 = vsel %vm1514_vm8, %v11330_v3, %v7983_v48 }
 0x4f6   : > { %v9896_v22 = vpop.permute.xlu1 %7941 }
 0x4f7   : > { %11546 = vst [vmem:[#allocation70_spill] sm:$0xff] %v9896_v22  ;;  %v11331_v5 = vunpack.i.l.bf16 %v9896_v22 }
 0x4f9   : > { %v9904_v12 = vsel %vm11368_vm13, %v11332_v13, %v11331_v5  ;;  %v5265_v5 = vld [vmem:[#allocation4 + $0x14] sm:$0xf]  ;;  %v11339_v13 = vunpack.i.h.bf16 %v9853_v53 }
 0x4fc   : > { %v9906_v28 = vpop.permute.xlu0 %7991 }
 0x4fd   : > { %v7994_v48 = vunpack.i.h.bf16 %v9906_v28  ;;  %v11333_v3 = vunpack.i.l.bf16 %v9906_v28 }
 0x4fe   : > { %v9910_v56 = vpop.permute.xlu1 %7956 }
 0x4ff   : > { %v5151_v47 = vmul.f32 %v7994_v48, %v5122_v23  ;;  %v9915_v29 = vsel %vm11547_vm5, %v11333_v3, %v7994_v48  ;;  %v11334_v41 = vunpack.i.h.bf16 %v9910_v56  ;;  %v5302_v23 = vunpack.c.l.bf16 %v5265_v5 }
 0x500   : > { %v7958_v18 = vunpack.i.l.bf16 %v9910_v56 }
 0x501   : > { %v5154_v4 = vpack.c.bf16 %v5151_v47, %v5151_v47  ;;  %v9921_v27 = vsel %vm11368_vm13, %v11334_v41, %v7963_v50  ;;  %v5059_v41 = vmul.f32 %v7984_v1, %v5030_v55 }
 0x503   : > { %5162 = vrot.lane.b32.xlu1 %v5154_v4, %s11452_s14  ;;  %v5062_v30 = vpack.c.bf16 %v5059_v41, %v5059_v41 }
 0x507   : > { %v7972_v62 = vpop.permute.xlu1 %7971 }
 0x508   : > { %v7974_v44 = vunpack.i.h.bf16 %v7972_v62  ;;  %v7973_v48 = vunpack.i.l.bf16 %v7972_v62 }
 0x50a   : > { %v5331_v20 = vmul.f32 %v7974_v44, %v5302_v23  ;;  %v9928_v47 = vsel %vm11367_vm14, %v11339_v13, %v7973_v48  ;;  %v9931_v50 = vsel %vm11367_vm14, %v7973_v48, %v7974_v44  ;;  %v9935_v44 = vpop.permute.xlu2 %4982 }
 0x50b   : > { %11549 = vst [vmem:[#allocation71_spill] sm:$0xff] %v9935_v44 }
 0x50c   : > { %v5334_v4 = vpack.c.bf16 %v5331_v20, %v5331_v20 }
 0x50e   : > { %v3450_v19 = vpop.f32.mrf.mxu1  ;;  %5342 = vrot.lane.b32.xlu2 %v5334_v4, %s8176_s18 }
 0x50f   : > { %v3451_v3 = vadd.f32 1e-05, %v3450_v19 }
 0x511   : > { %7997 = vrsqrt.f32 %v3451_v3  ;;  %vm3459_vm4 = vweird.f32 %v3451_v3 }
 0x512   : > { %v9937_v20 = vpop.permute.xlu2 %5790 }
 0x513   : > { %11550 = vst [vmem:[#allocation72_spill] sm:$0xff] %v9937_v20 }
 0x516   : > { %5070 = vrot.lane.b32.xlu2 %v5062_v30, %s11548_s25 }
 0x517   : > { %v7998_v5 = vpop.eup %7997 }
 0x518   : > { %v3454_v39 = vmul.f32 %v7998_v5, %v3451_v3  ;;  %vm3460_vm5 = vweird.f32 %v7998_v5 }
 0x519   : > { %vm3461_vm15 = vmor %vm3459_vm4, %vm3460_vm5 }
 0x51a   : > { %v3455_v62 = vmul.f32 %v7998_v5, %v3454_v39  ;;  %v9939_v1 = vpop.permute.xlu2 %5702 }
 0x51b   : > { %11551 = vst [vmem:[#allocation73_spill] sm:$0xff] %v9939_v1 }
 0x51c   : > { %v3456_v19 = vmul.f32 0.5, %v3455_v62 }
 0x51e   : > { %v3457_v24 = vsub.f32 1.5, %v3456_v19 }
 0x520   : > { %v3458_v23 = vmul.f32 %v7998_v5, %v3457_v24 }
 0x522   : > { %v3462_v13 = vsel %vm3461_vm15, %v7998_v5, %v3458_v23 }
 0x523   : > { %3465 = vperm.xlu2 %7734, %v3462_v13  }
 0x568   : > { %v9941_v55 = vpop.permute.xlu2 %5342 }
 0x569   : > { %11552 = vst [vmem:[#allocation74_spill] sm:$0xff] %v9941_v55 }
 0x570   : > { %v9943_v41 = vpop.permute.xlu2 %5070 }
 0x571   : > { %11553 = vst [vmem:[#allocation75_spill] sm:$0xff] %v9943_v41 }
 0x57d   : > { %v3466_v39 = vpop.permute.xlu2 %3465 }
 0x57e   : > { %v3468_v30 = vmul.f32 %v3466_v39, %v9526_v57  ;;  %v3469_v48 = vmul.f32 %v3466_v39, %v9529_v21  ;;  %v3470_v3 = vmul.f32 %v3466_v39, %v9532_v33  ;;  %v3471_v4 = vmul.f32 %v3466_v39, %v9535_v8 }
 0x580   : > { %v3477_v13 = vmul.f32 %v9523_v16, %v3468_v30  ;;  %v3478_v5 = vmul.f32 %v9523_v16, %v3469_v48  ;;  %v3479_v62 = vmul.f32 %v9523_v16, %v3470_v3  ;;  %v3480_v19 = vmul.f32 %v9523_v16, %v3471_v4 }
 0x582   : > { %v3486_v24 = vadd.f32 %v9545_v59, %v3477_v13  ;;  %v3487_v23 = vadd.f32 %v9545_v59, %v3478_v5  ;;  %v3488_v57 = vadd.f32 %v9545_v59, %v3479_v62  ;;  %v3489_v21 = vadd.f32 %v9545_v59, %v3480_v19 }
 0x584   : > { %v3497_v33 = vmul.f32 %v9551_v45, %v3486_v24  ;;  %v3498_v8 = vmul.f32 %v9551_v45, %v3487_v23  ;;  %v3499_v39 = vmul.f32 %v9551_v45, %v3488_v57  ;;  %v3500_v30 = vmul.f32 %v9551_v45, %v3489_v21 }
 0x586   : > { %v9962_v48 = vadd.f32 %v9556_v32, %v3497_v33  ;;  %v9965_v16 = vadd.f32 %v9556_v32, %v3498_v8  ;;  %v9968_v3 = vadd.f32 %v9556_v32, %v3499_v39  ;;  %v9971_v4 = vadd.f32 %v9556_v32, %v3500_v30 }
 0x588   : > { %v7058_v59 = vmul.f32 -1.442695, %v9962_v48  ;;  %v7059_v13 = vmul.f32 -1.442695, %v9965_v16  ;;  %v7060_v5 = vmul.f32 -1.442695, %v9968_v3 }
 0x589   : > { %v7061_v45 = vmul.f32 -1.442695, %v9971_v4 }
 0x58a   : > { %7999 = vpow2.f32 %v7058_v59 }
 0x58b   : > { %8001 = vpow2.f32 %v7059_v13 }
 0x58c   : > { %8003 = vpow2.f32 %v7060_v5 }
 0x58d   : > { %8005 = vpow2.f32 %v7061_v45 }
 0x590   : > { %v8000_v62 = vpop.eup %7999 }
 0x591   : > { %v8002_v19 = vpop.eup %8001  ;;  %v3523_v24 = vadd.f32 1.0, %v8000_v62 }
 0x592   : > { %v8004_v23 = vpop.eup %8003  ;;  %v3524_v57 = vadd.f32 1.0, %v8002_v19  ;;  %v10001_v19 = vpop.permute.xlu1 %7986 }
 0x593   : > { %v8006_v21 = vpop.eup %8005  ;;  %v3525_v32 = vadd.f32 1.0, %v8004_v23  ;;  %8007 = vrcp.f32 %v3523_v24  ;;  %v3536_v8 = vand.u32 2147483647, %v3523_v24  ;;  %v3538_v39 = vand.u32 2147483648, %v3523_v24 }
 0x594   : > { %v3526_v33 = vadd.f32 1.0, %v8006_v21  ;;  %8009 = vrcp.f32 %v3524_v57  ;;  %vm3532_vm15 = vweird.f32 %v3523_v24  ;;  %vm3547_vm4 = vweird.f32 %v3524_v57 }
 0x595   : > { %8011 = vrcp.f32 %v3525_v32  ;;  %v3551_v45 = vand.u32 2147483647, %v3524_v57  ;;  %v3553_v62 = vand.u32 2147483648, %v3524_v57  ;;  %vm9977_vm5 = vcmp.eq.f32.partialorder %v3536_v8, 8.507059e+37 }
 0x596   : > { %8013 = vrcp.f32 %v3526_v33  ;;  %v3539_v23 = vor.u32 1.1754944e-38, %v3538_v39  ;;  %vm3562_vm6 = vweird.f32 %v3525_v32  ;;  %v3566_v44 = vand.u32 2147483647, %v3525_v32 }
 0x597   : > { %v3568_v6 = vand.u32 2147483648, %v3525_v32  ;;  %vm9981_vm1 = vcmp.eq.f32.partialorder %v3551_v45, 8.507059e+37  ;;  %v3554_v8 = vor.u32 1.1754944e-38, %v3553_v62  ;;  %vm3577_vm2 = vweird.f32 %v3526_v33 }
 0x598   : > { %v3581_v52 = vand.u32 2147483647, %v3526_v33  ;;  %vm3567_vm13 = vcmp.eq.f32.partialorder %v3566_v44, 8.507059e+37 }
 0x599   : > { %v8008_v30 = vpop.eup %8007 }
 0x59a   : > { %v8010_v41 = vpop.eup %8009  ;;  %v3528_v59 = vmul.f32 %v8008_v30, %v3523_v24  ;;  %vm3533_vm10 = vweird.f32 %v8008_v30 }
 0x59b   : > { %v8012_v13 = vpop.eup %8011  ;;  %v3543_v5 = vmul.f32 %v8010_v41, %v3524_v57  ;;  %vm3548_vm7 = vweird.f32 %v8010_v41  ;;  %vm3534_vm0 = vmor %vm3532_vm15, %vm3533_vm10  ;;  %vm11619_vm15 = vcmask 531456  }
 0x59c   : > { %v3529_v55 = vsub.f32 1.0, %v3528_v59  ;;  %v3558_v21 = vmul.f32 %v8012_v13, %v3525_v32  ;;  %v8014_v1 = vpop.eup %8013  ;;  %vm3563_vm3 = vweird.f32 %v8012_v13  ;;  %vm3549_vm9 = vmor %vm3547_vm4, %vm3548_vm7  ;;  %vm3582_vm7 = vcmp.eq.f32.partialorder %v3581_v52, 8.507059e+37 }
 0x59d   : > { %v3544_v20 = vsub.f32 1.0, %v3543_v5  ;;  %v3573_v34 = vmul.f32 %v8014_v1, %v3526_v33  ;;  %vm3578_vm12 = vweird.f32 %v8014_v1  ;;  %vm3564_vm14 = vmor %vm3562_vm6, %vm3563_vm3  ;;  %v7948_v52 = vunpack.i.l.bf16 %v9848_v17 }
 0x59e   : > { %v3530_v58 = vmul.f32 %v8008_v30, %v3529_v55  ;;  %v3559_v14 = vsub.f32 1.0, %v3558_v21  ;;  %v3583_v55 = vand.u32 2147483648, %v3526_v33  ;;  %v7938_v33 = vunpack.i.l.bf16 %v9819_v37 }
 0x59f   : > { %v3545_v61 = vmul.f32 %v8010_v41, %v3544_v20  ;;  %v3574_v39 = vsub.f32 1.0, %v3573_v34  ;;  %vm11571_vm3 = vcmask 457728   ;;  %vm11629_vm4 = vcmask 56320  }
 0x5a0   : > { %v3531_v59 = vadd.f32 %v8008_v30, %v3530_v58  ;;  %v3560_v43 = vmul.f32 %v8012_v13, %v3559_v14  ;;  %v3569_v58 = vor.u32 1.1754944e-38, %v3568_v6  ;;  %v7978_v6 = vunpack.i.l.bf16 %v9887_v63  ;;  %vm11573_vm6 = vmmov %vm11571_vm3 }
 0x5a1   : > { %v3546_v5 = vadd.f32 %v8010_v41, %v3545_v61  ;;  %v3575_v21 = vmul.f32 %v8014_v1, %v3574_v39  ;;  %v11561_v39 = vunpack.i.h.bf16 %v9887_v63 }
 0x5a2   : > { %v3535_v2 = vsel %vm3534_vm0, %v8008_v30, %v3531_v59  ;;  %v3561_v20 = vadd.f32 %v8012_v13, %v3560_v43  ;;  %vm3579_vm0 = vmor %vm3577_vm2, %vm3578_vm12  ;;  %v3584_v43 = vor.u32 1.1754944e-38, %v3583_v55  ;;  %v11560_v59 = vunpack.i.h.bf16 %v9810_v35 }
 0x5a3   : > { %v3540_v45 = vsel %vm9977_vm5, %v3539_v23, %v3535_v2  ;;  %v3550_v62 = vsel %vm3549_vm9, %v8010_v41, %v3546_v5  ;;  %v3576_v14 = vadd.f32 %v8014_v1, %v3575_v21  ;;  %v7918_v2 = vunpack.i.l.bf16 %v9810_v35 }
 0x5a4   : > { %v3555_v61 = vsel %vm9981_vm1, %v3554_v8, %v3550_v62  ;;  %v3565_v34 = vsel %vm3564_vm14, %v8012_v13, %v3561_v20  ;;  %v3587_v24 = vmul.f32 %v3540_v45, %v9962_v48  ;;  %v5047_v5 = vsel %vm1514_vm8, %v7978_v6, %v11561_v39 }
 0x5a5   : > { %v3570_v57 = vsel %vm3567_vm13, %v3569_v58, %v3565_v34  ;;  %v3588_v30 = vmul.f32 %v3555_v61, %v9965_v16  ;;  %v3580_v41 = vsel %vm3579_vm0, %v8014_v1, %v3576_v14  ;;  %v7968_v1 = vunpack.i.l.bf16 %v9853_v53  ;;  %vm11605_vm13 = vmmov %vm11571_vm3 }
 0x5a6   : > { %v3589_v44 = vmul.f32 %v3570_v57, %v9968_v3  ;;  %v3585_v32 = vsel %vm3582_vm7, %v3584_v43, %v3580_v41  ;;  %v11373_v3 = vunpack.i.h.bf16 %v10001_v19  ;;  %v11562_v55 = vunpack.i.h.bf16 %v9910_v56 }
 0x5a7   : > { %v3593_v13 = vpack.c.bf16 %v3588_v30, %v3587_v24  ;;  %v3590_v48 = vmul.f32 %v3585_v32, %v9971_v4  ;;  %v5407_v4 = vsel %vm748_vm11, %v7918_v2, %v11560_v59  ;;  %vm11563_vm1 = vcmask 449536  }
 0x5a8   : > { %v5227_v20 = vsel %vm11563_vm1, %v7958_v18, %v11562_v55  ;;  %v11566_v58 = vunpack.i.h.bf16 %v9819_v37  ;;  %vm11567_vm2 = vmmov %vm11563_vm1  ;;  %v7898_v61 = vunpack.i.l.bf16 %v9837_v11  ;;  %v11570_v14 = vunpack.i.h.bf16 %v9848_v17 }
 0x5a9   : > { %3595 = vst [vmem:[#allocation4 + $0x4] sm:$0xff] %v3593_v13  ;;  %v10003_v16 = vunpack.c.l.bf16 %v3593_v13  ;;  %v10005_v23 = vunpack.c.h.bf16 %v3593_v13  ;;  %v3594_v8 = vpack.c.bf16 %v3590_v48, %v3589_v44  ;;  %v11572_v57 = vunpack.i.h.bf16 %v9853_v53  ;;  %vm11599_vm10 = vmmov %vm11563_vm1 }
 0x5aa   : > { %v3649_v63 = vsel %vm11567_vm2, %v7938_v33, %v11566_v58  ;;  %v3741_v24 = vsel %vm11571_vm3, %v7948_v52, %v11570_v14  ;;  %v11369_v37 = vunpack.i.h.bf16 %v9896_v22  ;;  %v11574_v30 = vunpack.i.l.bf16 %v9906_v28 }
 0x5ab   : > { %11558 = vst [vmem:[#allocation76_spill] sm:$0xff] %v10003_v16  ;;  %v10019_v21 = vunpack.c.l.bf16 %v3594_v8  ;;  %v10021_v45 = vunpack.c.h.bf16 %v3594_v8  ;;  %v10024_v62 = vmul.f32 %v7978_v6, %v10003_v16  ;;  %v10027_v35 = vmul.f32 %v5047_v5, %v10005_v23 }
 0x5ac   : > { %11559 = vst [vmem:[#allocation77_spill] sm:$0xff] %v10005_v23  ;;  %v10034_v56 = vmul.f32 %v7958_v18, %v10003_v16  ;;  %v10037_v34 = vmul.f32 %v5227_v20, %v10005_v23  ;;  %v5319_v43 = vsel %vm11573_vm6, %v7968_v1, %v11572_v57  ;;  %vm11575_vm9 = vcmask 72704  }
 0x5ad   : > { %3596 = vst [vmem:[#allocation4 + $0xc] sm:$0xff] %v3594_v8  ;;  %v5140_v41 = vsel %vm11575_vm9, %v11373_v3, %v11574_v30  ;;  %v10053_v44 = vmul.f32 %v9893_v31, %v10019_v21  ;;  %v10057_v17 = vmul.f32 %v9876_v7, %v10021_v45  ;;  %v10064_v6 = vmul.f32 %v9915_v29, %v10021_v45 }
 0x5ae   : > { %11564 = vst [vmem:[#allocation78_spill] sm:$0xff] %v10024_v62  ;;  %v10060_v53 = vmul.f32 %v5140_v41, %v10019_v21  ;;  %v10068_v18 = vmul.f32 %v9921_v27, %v10019_v21  ;;  %v10072_v31 = vmul.f32 %v9873_v38, %v10021_v45  ;;  %v10075_v32 = vmul.f32 %v7968_v1, %v10003_v16 }
 0x5af   : > { %11565 = vst [vmem:[#allocation79_spill] sm:$0xff] %v10027_v35  ;;  %v10078_v7 = vmul.f32 %v5319_v43, %v10005_v23  ;;  %v10086_v29 = vmul.f32 %v9928_v47, %v10019_v21  ;;  %v10090_v27 = vmul.f32 %v9931_v50, %v10021_v45  ;;  %v10093_v38 = vmul.f32 %v7918_v2, %v10003_v16 }
 0x5b0   : > { %11568 = vst [vmem:[#allocation80_spill] sm:$0xff] %v10034_v56  ;;  %v3597_v28 = vld [vmem:[#allocation4] sm:$0xff]  ;;  %v10096_v1 = vmul.f32 %v5407_v4, %v10005_v23  ;;  %v10100_v8 = vmul.f32 %v9817_v25, %v10019_v21  ;;  %v10104_v59 = vmul.f32 %v9801_v10, %v10021_v45  ;;  %v7908_v25 = vunpack.i.l.bf16 %v9791_v54 }
 0x5b1   : > { %11569 = vst [vmem:[#allocation81_spill] sm:$0xff] %v10037_v34  ;;  %v10080_v13 = vunpack.c.l.bf16 %v3597_v28  ;;  %v10082_v48 = vunpack.c.h.bf16 %v3597_v28  ;;  %v11370_v5 = vunpack.i.h.bf16 %v9830_v46  ;;  %v11371_v58 = vunpack.i.h.bf16 %v9855_v26 }
 0x5b2   : > { %11576 = vst [vmem:[#allocation82_spill] sm:$0xff] %v10053_v44  ;;  %v11602_v43 = vunpack.i.h.bf16 %v9791_v54  ;;  %vm11603_vm12 = vcmask 515072   ;;  %v11604_v41 = vunpack.i.l.bf16 %v9830_v46  ;;  %v11608_v54 = vunpack.i.l.bf16 %v9794_v51 }
 0x5b3   : > { %11577 = vst [vmem:[#allocation83_spill] sm:$0xff] %v10057_v17  ;;  %v10107_v39 = vmul.f32 %v7938_v33, %v10080_v13  ;;  %v10110_v50 = vmul.f32 %v3649_v63, %v10082_v48  ;;  %v10113_v2 = vmul.f32 %v7948_v52, %v10080_v13  ;;  %v10116_v4 = vmul.f32 %v3741_v24, %v10082_v48  ;;  %vm11613_vm14 = vmmov %vm11603_vm12 }
 0x5b4   : > { %11578 = vst [vmem:[#allocation84_spill] sm:$0xff] %v10060_v53  ;;  %v3598_v47 = vld [vmem:[#allocation4 + $0x8] sm:$0xff]  ;;  %v11372_v33 = vunpack.i.h.bf16 %v9794_v51  ;;  %v10126_v20 = vmul.f32 %v7898_v61, %v10080_v13  ;;  %v11598_v52 = vunpack.i.l.bf16 %v9896_v22  ;;  %v11376_v24 = vunpack.i.h.bf16 %v9768_v42  ;;  %v11622_v22 = vld [vmem:[#allocation28_spill] sm:$0xff]  ;;  %v11625_v51 = vld [vmem:[#allocation50_spill] sm:$0xff] }
 0x5b5   : > { %11579 = vst [vmem:[#allocation85_spill] sm:$0xff] %v10064_v6  ;;  %v10120_v55 = vunpack.c.l.bf16 %v3598_v47  ;;  %v10122_v10 = vunpack.c.h.bf16 %v3598_v47  ;;  %v3921_v30 = vsel %vm11603_vm12, %v7908_v25, %v11602_v43  ;;  %v3743_v28 = vsel %vm11605_vm13, %v11604_v41, %v11370_v5  ;;  %v11620_v5 = vld [vmem:[#allocation31_spill] sm:$0xff]  ;;  %v11627_v53 = vld [vmem:[#allocation68_spill] sm:$0xff] }
 0x5b6   : > { %11580 = vst [vmem:[#allocation86_spill] sm:$0xff] %v10068_v18  ;;  %v3651_v63 = vsel %vm11599_vm10, %v11598_v52, %v11369_v37  ;;  %v11606_v47 = vunpack.i.h.bf16 %v9837_v11  ;;  %v7928_v17 = vunpack.i.l.bf16 %v11627_v53  ;;  %v7988_v44 = vunpack.i.l.bf16 %v10001_v19  ;;  %vm11655_vm10 = vmmov %vm11619_vm15 }
 0x5b7   : > { %11581 = vst [vmem:[#allocation87_spill] sm:$0xff] %v10072_v31  ;;  %v10136_v14 = vmul.f32 %v9904_v12, %v10120_v55  ;;  %v10140_v57 = vmul.f32 %v3651_v63, %v10122_v10  ;;  %v10155_v52 = vmul.f32 %v9862_v36, %v10120_v55  ;;  %v3831_v63 = vsel %vm748_vm11, %v11608_v54, %v11372_v33  ;;  %v11621_v33 = vld [vmem:[#allocation23_spill] sm:$0xff] }
 0x5b8   : > { %11582 = vst [vmem:[#allocation88_spill] sm:$0xff] %v10075_v32  ;;  %v3829_v12 = vsel %vm748_vm11, %v7898_v61, %v11606_v47  ;;  %v10163_v43 = vmul.f32 %v3743_v28, %v10122_v10  ;;  %v10170_v11 = vmul.f32 %v9845_v49, %v10120_v55  ;;  %v11612_v36 = vunpack.i.l.bf16 %v9855_v26  ;;  %v11624_v26 = vld [vmem:[#allocation41_spill] sm:$0xff] }
 0x5b9   : > { %11583 = vst [vmem:[#allocation89_spill] sm:$0xff] %v10078_v7  ;;  %v10166_v37 = vmul.f32 %v3829_v12, %v10082_v48  ;;  %v10178_v41 = vmul.f32 %v3831_v63, %v10122_v10  ;;  %v10181_v47 = vmul.f32 %v7908_v25, %v10080_v13  ;;  %v10184_v28 = vmul.f32 %v3921_v30, %v10082_v48 }
 0x5ba   : > { %11584 = vst [vmem:[#allocation90_spill] sm:$0xff] %v10082_v48  ;;  %v3923_v61 = vsel %vm11613_vm14, %v11612_v36, %v11371_v58  ;;  %v10188_v12 = vmul.f32 %v9870_v60, %v10120_v55  ;;  %v11618_v54 = vunpack.i.l.bf16 %v9768_v42  ;;  %v10200_v25 = vmul.f32 %v9808_v15, %v10120_v55 }
 0x5bb   : > { %11585 = vst [vmem:[#allocation91_spill] sm:$0xff] %v10086_v29  ;;  %v10191_v49 = vmul.f32 %v3923_v61, %v10122_v10  ;;  %v7748_v36 = vunpack.i.l.bf16 %v9562_v9  ;;  %v7738_v60 = vunpack.i.l.bf16 %v9559_v0  ;;  %v7878_v42 = vunpack.i.l.bf16 %v11625_v51 }
 0x5bc   : > { %11586 = vst [vmem:[#allocation92_spill] sm:$0xff] %v10090_v27  ;;  %v4103_v63 = vsel %vm11619_vm15, %v11618_v54, %v11376_v24  ;;  %v11623_v54 = vld [vmem:[#allocation37_spill] sm:$0xff]  ;;  %v11628_v61 = vunpack.i.h.bf16 %v9562_v9  ;;  %v11630_v3 = vunpack.i.h.bf16 %v9559_v0  ;;  %vm11631_vm5 = vcmask 7168  }
 0x5bd   : > { %11587 = vst [vmem:[#allocation93_spill] sm:$0xff] %v10093_v38  ;;  %v10203_v30 = vmul.f32 %v4103_v63, %v10122_v10  ;;  %v11626_v63 = vld [vmem:[#allocation57_spill] sm:$0xff]  ;;  %v11632_v24 = vunpack.i.h.bf16 %v9609_v40  ;;  %v11633_v15 = vunpack.i.l.bf16 %v9609_v40  ;;  %vm11634_vm0 = vcmask 1039360  }
 0x5be   : > { %11588 = vst [vmem:[#allocation94_spill] sm:$0xff] %v10096_v1  ;;  %v7888_v6 = vunpack.i.l.bf16 %v11626_v63  ;;  %v4959_v58 = vsel %vm11629_vm4, %v7748_v36, %v11628_v61  ;;  %v4867_v46 = vsel %vm11631_vm5, %v7738_v60, %v11630_v3  ;;  %v11635_v29 = vunpack.i.h.bf16 %v11620_v5  ;;  %vm11640_vm1 = vmmov %vm11634_vm0 }
 0x5bf   : > { %11589 = vst [vmem:[#allocation95_spill] sm:$0xff] %v10100_v8  ;;  %v4729_v27 = vsel %vm11634_vm0, %v11633_v15, %v11632_v24  ;;  %v11636_v31 = vunpack.i.l.bf16 %v11620_v5  ;;  %vm11637_vm7 = vcmask 982016   ;;  %v11638_v9 = vunpack.i.h.bf16 %v11621_v33 }
 0x5c0   : > { %11590 = vst [vmem:[#allocation96_spill] sm:$0xff] %v10104_v59  ;;  %v11639_v61 = vunpack.i.l.bf16 %v11621_v33  ;;  %v11641_v3 = vunpack.i.h.bf16 %v11622_v22  ;;  %vm11643_vm2 = vcmask 990208   ;;  %v11644_v24 = vunpack.i.h.bf16 %v11623_v54  ;;  %vm11718_vm4 = vmmov %vm11637_vm7 }
 0x5c1   : > { %11591 = vst [vmem:[#allocation97_spill] sm:$0xff] %v10107_v39  ;;  %v4551_v18 = vsel %vm11637_vm7, %v11636_v31, %v11635_v29  ;;  %v11645_v15 = vunpack.i.l.bf16 %v11623_v54  ;;  %vm11646_vm3 = vcmask 596992   ;;  %v11647_v31 = vunpack.i.h.bf16 %v11624_v26  ;;  %vm11720_vm5 = vmmov %vm11643_vm2 }
 0x5c2   : > { %11592 = vst [vmem:[#allocation98_spill] sm:$0xff] %v10110_v50  ;;  %v4731_v0 = vsel %vm11640_vm1, %v11639_v61, %v11638_v9  ;;  %v11648_v29 = vunpack.i.l.bf16 %v11624_v26  ;;  %vm11649_vm6 = vcmask 588800   ;;  %v11651_v61 = vld [vmem:[#allocation46_spill] sm:$0xff]  ;;  %vm11653_vm9 = vcmask 523264   ;;  %vm11727_vm0 = vmmov %vm11646_vm3 }
 0x5c3   : > { %11593 = vst [vmem:[#allocation99_spill] sm:$0xff] %v10113_v2  ;;  %v4371_v5 = vsel %vm11646_vm3, %v11645_v15, %v11644_v24  ;;  %v11656_v24 = vunpack.i.h.bf16 %v11627_v53  ;;  %v11657_v26 = vunpack.i.h.bf16 %v10001_v19  ;;  %vm11658_vm13 = vcmask 72704   ;;  %vm11671_vm14 = vmmov %vm11653_vm9  ;;  %v11685_v2 = vld [vmem:[#allocation32_spill] sm:$0xff] }
 0x5c4   : > { %11594 = vst [vmem:[#allocation100_spill] sm:$0xff] %v10116_v4  ;;  %v4283_v33 = vsel %vm11649_vm6, %v11648_v29, %v11647_v31  ;;  %v10268_v29 = vmul.f32 %v7928_v17, %v10003_v16  ;;  %v10282_v53 = vmul.f32 %v7878_v42, %v10003_v16  ;;  %v11673_v59 = vunpack.i.l.bf16 %v11651_v61  ;;  %vm11735_vm1 = vmmov %vm11727_vm0 }
 0x5c5   : > { %11595 = vst [vmem:[#allocation101_spill] sm:$0xff] %v10120_v55  ;;  %v5499_v15 = vsel %vm11603_vm12, %v7928_v17, %v11656_v24  ;;  %v5139_v31 = vsel %vm11658_vm13, %v7988_v44, %v11657_v26  ;;  %v11665_v26 = vld [vmem:[#allocation63_spill] sm:$0xff]  ;;  %v11666_v24 = vld [vmem:[#allocation64_spill] sm:$0xff]  ;;  %vm11674_vm15 = vcmask 580608   ;;  %v4875_v8 = vmul.f32 %v7738_v60, %v10003_v16  ;;  %v11679_v60 = vld [vmem:[#allocation26_spill] sm:$0xff] }
 0x5c6   : > { %11596 = vst [vmem:[#allocation102_spill] sm:$0xff] %v10122_v10  ;;  %v10289_v17 = vmul.f32 %v11665_v26, %v10019_v21  ;;  %vm11732_vm7 = vcmask 973824   ;;  %vm11744_vm6 = vmmov %vm11674_vm15  ;;  %vm11760_vm13 = vcmask 531456  }
 0x5c7   : > { %11597 = vst [vmem:[#allocation103_spill] sm:$0xff] %v10126_v20 }
 0x5c8   : > { %11600 = vst [vmem:[#allocation104_spill] sm:$0xff] %v10136_v14 }
 0x5c9   : > { %11601 = vst [vmem:[#allocation105_spill] sm:$0xff] %v10140_v57  ;;  %v11642_v57 = vunpack.i.l.bf16 %v11622_v22  ;;  %v11652_v22 = vunpack.i.h.bf16 %v11625_v51  ;;  %v11661_v51 = vld [vmem:[#allocation69_spill] sm:$0xff] }
 0x5ca   : > { %11607 = vst [vmem:[#allocation106_spill] sm:$0xff] %v10155_v52  ;;  %v10271_v52 = vmul.f32 %v5499_v15, %v10005_v23  ;;  %v10293_v15 = vmul.f32 %v11666_v24, %v10021_v45 }
 0x5cb   : > { %11609 = vst [vmem:[#allocation107_spill] sm:$0xff] %v10163_v43  ;;  %v4643_v14 = vsel %vm11643_vm2, %v11642_v57, %v11641_v3  ;;  %v11650_v43 = vld [vmem:[#allocation45_spill] sm:$0xff]  ;;  %v5587_v57 = vsel %vm11653_vm9, %v7878_v42, %v11652_v22  ;;  %v11654_v3 = vunpack.i.h.bf16 %v11626_v63  ;;  %v10275_v22 = vmul.f32 %v11661_v51, %v10019_v21  ;;  %v11663_v63 = vld [vmem:[#allocation66_spill] sm:$0xff]  ;;  %v11667_v42 = vld [vmem:[#allocation60_spill] sm:$0xff] }
 0x5cc   : > { %11610 = vst [vmem:[#allocation108_spill] sm:$0xff] %v10166_v37  ;;  %v10285_v19 = vmul.f32 %v5587_v57, %v10005_v23  ;;  %v10296_v51 = vmul.f32 %v7888_v6, %v10003_v16  ;;  %v10303_v9 = vmul.f32 %v11667_v42, %v10019_v21  ;;  %v11668_v57 = vld [vmem:[#allocation56_spill] sm:$0xff]  ;;  %v11669_v26 = vunpack.i.h.bf16 %v11650_v43  ;;  %vm11738_vm2 = vmmov %vm11732_vm7 }
 0x5cd   : > { %11611 = vst [vmem:[#allocation109_spill] sm:$0xff] %v10170_v11  ;;  %v5679_v54 = vsel %vm11655_vm10, %v7888_v6, %v11654_v3  ;;  %v10279_v3 = vmul.f32 %v11663_v63, %v10021_v45  ;;  %v11672_v6 = vunpack.i.h.bf16 %v11651_v61  ;;  %v4876_v42 = vmul.f32 %v4867_v46, %v10005_v23  ;;  %v11678_v61 = vld [vmem:[#allocation21_spill] sm:$0xff]  ;;  %vm11739_vm3 = vmmov %vm11738_vm2 }
 0x5ce   : > { %11614 = vst [vmem:[#allocation110_spill] sm:$0xff] %v10178_v41  ;;  %v10299_v63 = vmul.f32 %v5679_v54, %v10005_v23  ;;  %v4967_v41 = vmul.f32 %v7748_v36, %v10003_v16  ;;  %v10324_v11 = vmul.f32 %v7988_v44, %v10003_v16  ;;  %v11680_v46 = vld [vmem:[#allocation25_spill] sm:$0xff]  ;;  %v11681_v44 = vld [vmem:[#allocation54_spill] sm:$0xff]  ;;  %v11683_v16 = vld [vmem:[#allocation47_spill] sm:$0xff]  ;;  %vm11751_vm10 = vcmask 588800  }
 0x5cf   : > { %11615 = vst [vmem:[#allocation111_spill] sm:$0xff] %v10181_v47  ;;  %v4191_v54 = vsel %vm11674_vm15, %v11673_v59, %v11672_v6  ;;  %v4878_v59 = vmul.f32 %v11678_v61, %v10021_v45  ;;  %v10335_v6 = vmul.f32 %v11679_v60, %v10019_v21  ;;  %v10339_v36 = vmul.f32 %v11680_v46, %v10021_v45  ;;  %v11682_v60 = vld [vmem:[#allocation48_spill] sm:$0xff]  ;;  %v11684_v61 = vld [vmem:[#allocation38_spill] sm:$0xff]  ;;  %vm11749_vm9 = vmmov %vm11744_vm6 }
 0x5d0   : > { %11616 = vst [vmem:[#allocation112_spill] sm:$0xff] %v10184_v28  ;;  %v10357_v46 = vmul.f32 %v4191_v54, %v10122_v10  ;;  %v10375_v54 = vmul.f32 %v4371_v5, %v10122_v10  ;;  %v10397_v5 = vmul.f32 %v4729_v27, %v10082_v48  ;;  %v11689_v47 = vld [vmem:[#allocation52_spill] sm:$0xff]  ;;  %v11692_v27 = vld [vmem:[#allocation59_spill] sm:$0xff]  ;;  %v11707_v35 = vld [vmem:[#allocation105_spill] sm:$0xff]  ;;  %vm11784_vm15 = vcmask 1043456  }
 0x5d1   : > { %11617 = vst [vmem:[#allocation113_spill] sm:$0xff] %v10191_v49  ;;  %v10365_v49 = vmul.f32 %v11683_v16, %v10120_v55  ;;  %v11686_v16 = vld [vmem:[#allocation30_spill] sm:$0xff]  ;;  %v10416_v20 = vmul.f32 %v11692_v27, %v10021_v45  ;;  %v4973_v48 = vpack.c.bf16 %v10339_v36, %v10335_v6  ;;  %v4768_v6 = vld [vmem:[#allocation8 + $0x18] sm:$0x44]  ;;  %vm11755_vm12 = vmmov %vm11751_vm10 }
 0x5d2   : > { %11659 = vst [vmem:[#allocation50_spill] sm:$0xff] %v10268_v29  ;;  %v10386_v4 = vmul.f32 %v11686_v16, %v10120_v55  ;;  %v10404_v16 = vmul.f32 %v11689_v47, %v10019_v21  ;;  %v4773_v62 = vunpack.c.l.b16 %v4768_v6 }
 0x5d3   : > { %11660 = vst [vmem:[#allocation57_spill] sm:$0xff] %v10271_v52 }
 0x5d4   : > { %11662 = vst [vmem:[#allocation68_spill] sm:$0xff] %v10275_v22  ;;  %v11670_v22 = vunpack.i.l.bf16 %v11650_v43  ;;  %v10327_v43 = vmul.f32 %v5139_v31, %v10005_v23  ;;  %v4777_v38 = vpack.c.b16 %v4773_v62, %v4773_v62  ;;  %v11722_v62 = vld [vmem:[#allocation34_spill] sm:$0xff] }
 0x5d5   : > { %11664 = vst [vmem:[#allocation69_spill] sm:$0xff] %v10279_v3  ;;  %v10307_v3 = vmul.f32 %v11668_v57, %v10021_v45  ;;  %v4968_v57 = vmul.f32 %v4959_v58, %v10005_v23  ;;  %v10343_v58 = vmul.f32 %v11681_v44, %v10120_v55  ;;  %v10354_v23 = vmul.f32 %v11682_v60, %v10120_v55 }
 0x5d6   : > { %v4011_v24 = vsel %vm11671_vm14, %v11670_v22, %v11669_v26  ;;  %11675 = vst [vmem:[#allocation66_spill] sm:$0xff] %v10324_v11  ;;  %v11677_v22 = vld [vmem:[#allocation22_spill] sm:$0xff]  ;;  %v10372_v60 = vmul.f32 %v11684_v61, %v10120_v55  ;;  %v10379_v44 = vmul.f32 %v11685_v2, %v10120_v55  ;;  %v11687_v61 = vunpack.i.l.bf16 %v9609_v40  ;;  %v11688_v2 = vld [vmem:[#allocation29_spill] sm:$0xff] }
 0x5d7   : > { %11676 = vst [vmem:[#allocation63_spill] sm:$0xff] %v10327_v43  ;;  %v4877_v26 = vmul.f32 %v11677_v22, %v10019_v21  ;;  %v10346_v31 = vmul.f32 %v4011_v24, %v10122_v10  ;;  %v10368_v22 = vmul.f32 %v4283_v33, %v10122_v10  ;;  %v10382_v24 = vmul.f32 %v4551_v18, %v10122_v10  ;;  %v11691_v40 = vld [vmem:[#allocation58_spill] sm:$0xff]  ;;  %v11705_v43 = vld [vmem:[#allocation107_spill] sm:$0xff] }
 0x5d8   : > { %v10389_v33 = vmul.f32 %v4643_v14, %v10122_v10  ;;  %v10394_v39 = vmul.f32 %v11687_v61, %v10080_v13  ;;  %v4739_v50 = vmul.f32 %v11688_v2, %v10120_v55  ;;  %v4740_v18 = vmul.f32 %v4731_v0, %v10122_v10  ;;  %v11690_v14 = vld [vmem:[#allocation49_spill] sm:$0xff]  ;;  %v11693_v2 = vld [vmem:[#allocation36_spill] sm:$0xff] }
 0x5d9   : > { %v10408_v28 = vmul.f32 %v11690_v14, %v10021_v45  ;;  %v10412_v61 = vmul.f32 %v11691_v40, %v10019_v21  ;;  %v10420_v37 = vmul.f32 %v11693_v2, %v10019_v21  ;;  %v11694_v0 = vld [vmem:[#allocation33_spill] sm:$0xff]  ;;  %v4880_v10 = vpack.c.bf16 %v4876_v42, %v4875_v8  ;;  %v11695_v42 = vld [vmem:[#allocation24_spill] sm:$0xff]  ;;  %v11696_v2 = vld [vmem:[#allocation27_spill] sm:$0xff] }
 0x5da   : > { %v10424_v47 = vmul.f32 %v11694_v0, %v10021_v45  ;;  %v4972_v55 = vpack.c.bf16 %v4968_v57, %v4967_v41  ;;  %v7768_v57 = vunpack.i.l.bf16 %v11695_v42  ;;  %v7778_v0 = vunpack.i.l.bf16 %v11696_v2  ;;  %v11697_v41 = vld [vmem:[#allocation113_spill] sm:$0xff]  ;;  %v11721_v8 = vld [vmem:[#allocation90_spill] sm:$0xff] }
 0x5db   : > { %v4881_v40 = vpack.c.bf16 %v4878_v59, %v4877_v26  ;;  %4886 = vrot.lane.b32.xlu2 %v4880_v10, %s8171_s27  ;;  %v4743_v14 = vpack.c.bf16 %v4740_v18, %v4739_v50  ;;  %v11698_v59 = vld [vmem:[#allocation109_spill] sm:$0xff]  ;;  %v11699_v10 = vld [vmem:[#allocation110_spill] sm:$0xff]  ;;  %v11700_v50 = vld [vmem:[#allocation95_spill] sm:$0xff]  ;;  %v11717_v18 = vunpack.i.h.bf16 %v11695_v42  ;;  %v11719_v56 = vunpack.i.h.bf16 %v11696_v2 }
 0x5dc   : > { %4978 = vrot.lane.b32.xlu0 %v4972_v55, %s11486_s23  ;;  %v4742_v55 = vpack.c.bf16 %v10397_v5, %v10394_v39  ;;  %v4767_v5 = vld [vmem:[#allocation8 + $0x10] sm:$0x44]  ;;  %v11701_v26 = vld [vmem:[#allocation96_spill] sm:$0xff]  ;;  %v4557_v27 = vmul.f32 %v7768_v57, %v10080_v13 }
 0x5dd   : > { %4888 = vrot.lane.b32.xlu1 %v4881_v40, %s8171_s27  ;;  %v4771_v52 = vunpack.c.l.b16 %v4767_v5  ;;  %s11712_s27 = smov 1   ;;  %v4772_v39 = vunpack.c.h.b16 %v4767_v5  ;;  %v4549_v32 = vsel %vm11718_vm4, %v7768_v57, %v11717_v18  ;;  %v4641_v21 = vsel %vm11720_vm5, %v7778_v0, %v11719_v56  ;;  %vm11785_vm4 = vmmov %vm11720_vm5 }
 0x5de   : > { %v4649_v5 = vmul.f32 %v7778_v0, %v10080_v13  ;;  %v4650_v1 = vmul.f32 %v4641_v21, %v11721_v8  ;;  %v4558_v42 = vmul.f32 %v4549_v32, %v11721_v8  ;;  %v4790_v56 = vshrl.u32 %v4777_v38, 16  ;;  %vm11806_vm5 = vmmov %vm11784_vm15 }
 0x5df   : > { %v4775_v29 = vpack.c.b16 %v4771_v52, %v4771_v52  ;;  %v4776_v36 = vpack.c.b16 %v4772_v39, %v4772_v39  ;;  %v7788_v40 = vunpack.i.l.bf16 %v11722_v62 }
 0x5e0   : > { %v4791_v0 = vpack.i.b16 %v4790_v56, %v4790_v56  ;;  %v4562_v7 = vpack.c.bf16 %v4558_v42, %v4557_v27  ;;  %v11728_v42 = vld [vmem:[#allocation77_spill] sm:$0xff]  ;;  %v11729_v56 = vld [vmem:[#allocation43_spill] sm:$0xff] }
 0x5e1   : > { %v4780_v18 = vshrl.u32 %v4775_v29, 16  ;;  %v4785_v11 = vshrl.u32 %v4776_v36, 16 }
 0x5e2   : > { %v4793_v57 = vperm.slane %v4791_v0, 2 }
 0x5e3   : > { %4980 = vrot.lane.b32.xlu2 %v4973_v48, %s11486_s23  ;;  %v4781_v45 = vpack.i.b16 %v4780_v18, %v4780_v18  ;;  %v4766_v48 = vld [vmem:[#allocation4 + $0xc] sm:$0xff]  ;;  %v4786_v34 = vpack.i.b16 %v4785_v11, %v4785_v11  ;;  %v11725_v11 = vld [vmem:[#allocation76_spill] sm:$0xff] }
 0x5e4   : > { %4750 = vrot.lane.b32.xlu0 %v4743_v14, %s11712_s27  ;;  %v4774_v14 = vunpack.c.h.b16 %v4768_v6  ;;  %v4654_v6 = vpack.c.bf16 %v4650_v1, %v4649_v5  ;;  %v4802_v36 = vunpack.c.h.bf16 %v4766_v48  ;;  %v4805_v18 = vunpack.c.l.bf16 %v4793_v57 }
 0x5e5   : > { %4748 = vrot.lane.b32.xlu1 %v4742_v55, %s11712_s27  ;;  %v4783_v21 = vperm.slane %v4781_v45, 2  ;;  %v4788_v32 = vperm.slane %v4786_v34, 2  ;;  %v4801_v55 = vunpack.c.l.bf16 %v4766_v48  ;;  %v11724_v1 = vpack.c.bf16 %v10382_v24, %v10379_v44 }
 0x5e6   : > { %v4778_v2 = vpack.c.b16 %v4774_v14, %v4774_v14  ;;  %v11726_v5 = vunpack.i.h.bf16 %v11722_v62  ;;  %v5955_v48 = vmul.f32 %v7788_v40, %v11725_v11  ;;  %v11731_v62 = vpack.c.bf16 %v10424_v47, %v10420_v37 }
 0x5e7   : > { %v4803_v29 = vunpack.c.l.bf16 %v4783_v21  ;;  %v4804_v14 = vunpack.c.l.bf16 %v4788_v32  ;;  %v11730_v21 = vld [vmem:[#allocation35_spill] sm:$0xff] }
 0x5e8   : > { %v4795_v52 = vshrl.u32 %v4778_v2, 16  ;;  %v5947_v34 = vsel %vm11727_vm0, %v7788_v40, %v11726_v5  ;;  %v7798_v44 = vunpack.i.l.bf16 %v11730_v21  ;;  %v11733_v40 = vpack.c.bf16 %v10389_v33, %v10386_v4  ;;  %vm11807_vm0 = vmmov %vm11785_vm4 }
 0x5e9   : > { %v4807_v27 = vmul.f32 %v11725_v11, %v4803_v29  ;;  %v4808_v2 = vmul.f32 %v11728_v42, %v4804_v14  ;;  %v11734_v29 = vunpack.i.h.bf16 %v11730_v21 }
 0x5ea   : > { %v4796_v39 = vpack.i.b16 %v4795_v52, %v4795_v52  ;;  %v7808_v52 = vunpack.i.l.bf16 %v11729_v56  ;;  %v4377_v37 = vmul.f32 %v7798_v44, %v10080_v13 }
 0x5eb   : > { %4568 = vrot.lane.b32.xlu2 %v4562_v7, %s11513_s1  ;;  %v4809_v7 = vmul.f32 %v4805_v18, %v4801_v55  ;;  %v4811_v24 = vpack.c.bf16 %v4808_v2, %v4807_v27  ;;  %v11736_v18 = vld [vmem:[#allocation40_spill] sm:$0xff] }
 0x5ec   : > { %4660 = vrot.lane.b32.xlu0 %v4654_v6, %s11723_s30  ;;  %v4798_v38 = vperm.slane %v4796_v39, 2  ;;  %v5956_v6 = vmul.f32 %v5947_v34, %v11728_v42  ;;  %v7809_v39 = vunpack.i.h.bf16 %v11729_v56  ;;  %v7813_v4 = vunpack.i.l.bf16 %v11736_v18 }
 0x5ed   : > { %4570 = vrot.lane.b32.xlu1 %v11724_v1, %s11513_s1  ;;  %4813 = vst [vmem:[#allocation3 + $0xd0] sm:$0xff] %v4811_v24  ;;  %v7814_v1 = vunpack.i.h.bf16 %v11736_v18 }
 0x5ee   : > { %v4806_v45 = vunpack.c.l.bf16 %v4798_v38  ;;  %v4461_v57 = vsel %vm11732_vm7, %v7808_v52, %v7809_v39  ;;  %v5960_v55 = vpack.c.bf16 %v5956_v6, %v5955_v48  ;;  %v4369_v38 = vsel %vm11735_vm1, %v7798_v44, %v11734_v29  ;;  %v11745_v44 = vld [vmem:[#allocation51_spill] sm:$0xff]  ;;  %vm11808_vm7 = vmmov %vm11806_vm5 }
 0x5ef   : > { %v4470_v14 = vmul.f32 %v4461_v57, %v11721_v8  ;;  %v4378_v47 = vmul.f32 %v4369_v38, %v11721_v8  ;;  %v4463_v34 = vsel %vm11738_vm2, %v7813_v4, %v7814_v1  ;;  %v4462_v2 = vsel %vm11739_vm3, %v7809_v39, %v7813_v4  ;;  %v11746_v39 = vld [vmem:[#allocation44_spill] sm:$0xff]  ;;  %vm11809_vm1 = vmmov %vm11806_vm5 }
 0x5f0   : > { %v4810_v0 = vmul.f32 %v4806_v45, %v4802_v36  ;;  %v4469_v36 = vmul.f32 %v7808_v52, %v10080_v13  ;;  %v11737_v45 = vld [vmem:[#allocation39_spill] sm:$0xff]  ;;  %v11741_v52 = vld [vmem:[#allocation102_spill] sm:$0xff]  ;;  %v11742_v6 = vpack.c.bf16 %v10375_v54, %v10372_v60  ;;  %v7838_v24 = vunpack.i.l.bf16 %v11745_v44 }
 0x5f1   : > { %v4382_v27 = vpack.c.bf16 %v4378_v47, %v4377_v37  ;;  %v7818_v5 = vunpack.i.l.bf16 %v11737_v45  ;;  %v4472_v48 = vmul.f32 %v4463_v34, %v11741_v52  ;;  %v7828_v57 = vunpack.i.l.bf16 %v11746_v39 }
 0x5f2   : > { %v4812_v32 = vpack.c.bf16 %v4810_v0, %v4809_v7  ;;  %v4474_v33 = vpack.c.bf16 %v4470_v14, %v4469_v36  ;;  %v11740_v7 = vld [vmem:[#allocation101_spill] sm:$0xff]  ;;  %v11743_v0 = vunpack.i.h.bf16 %v11737_v45  ;;  %v11748_v60 = vunpack.i.h.bf16 %v11745_v44 }
 0x5f3   : > { %4662 = vrot.lane.b32.xlu2 %v11733_v40, %s11723_s30  ;;  %v4471_v56 = vmul.f32 %v4462_v2, %v11740_v7  ;;  %v11747_v40 = vpack.c.bf16 %v10357_v46, %v10354_v23  ;;  %v11750_v38 = vunpack.i.h.bf16 %v11746_v39  ;;  %v5775_v14 = vmul.f32 %v7838_v24, %v11725_v11  ;;  %v11756_v2 = vld [vmem:[#allocation62_spill] sm:$0xff] }
 0x5f4   : > { %5968 = vrot.lane.b32.xlu0 %v11731_v62, %s11511_s21  ;;  %4814 = vst [vmem:[#allocation3 + $0xd8] sm:$0xff] %v4812_v32  ;;  %v4189_v21 = vsel %vm11744_vm6, %v7818_v5, %v11743_v0  ;;  %v4197_v32 = vmul.f32 %v7818_v5, %v10080_v13  ;;  %v5767_v54 = vsel %vm11749_vm9, %v7838_v24, %v11748_v60  ;;  %v7868_v7 = vunpack.i.l.bf16 %v11756_v2  ;;  %v11774_v60 = vld [vmem:[#allocation23_spill] sm:$0xff]  ;;  %vm11815_vm6 = vmmov %vm11809_vm1 }
 0x5f5   : > { %5966 = vrot.lane.b32.xlu1 %v5960_v55, %s11511_s21  ;;  %v4198_v62 = vmul.f32 %v4189_v21, %v11721_v8  ;;  %v4475_v55 = vpack.c.bf16 %v4472_v48, %v4471_v56  ;;  %v4281_v36 = vsel %vm11751_vm10, %v7828_v57, %v11750_v38  ;;  %v5776_v37 = vmul.f32 %v5767_v54, %v11728_v42  ;;  %v11757_v48 = vld [vmem:[#allocation53_spill] sm:$0xff]  ;;  %vm11828_vm10 = vmmov %vm11809_vm1 }
 0x5f6   : > { %v4289_v47 = vmul.f32 %v7828_v57, %v10080_v13  ;;  %v4290_v23 = vmul.f32 %v4281_v36, %v11721_v8  ;;  %v11753_v45 = vpack.c.bf16 %v10368_v22, %v10365_v49  ;;  %v11758_v0 = vpack.c.bf16 %v10416_v20, %v10412_v61  ;;  %v11767_v57 = vld [vmem:[#allocation108_spill] sm:$0xff] }
 0x5f7   : > { %v4202_v29 = vpack.c.bf16 %v4198_v62, %v4197_v32  ;;  %v5780_v46 = vpack.c.bf16 %v5776_v37, %v5775_v14  ;;  %v11759_v49 = vunpack.i.h.bf16 %v11756_v2  ;;  %v11761_v44 = vpack.c.bf16 %v10408_v28, %v10404_v16  ;;  %v11780_v14 = vld [vmem:[#allocation94_spill] sm:$0xff]  ;;  %v11781_v37 = vld [vmem:[#allocation93_spill] sm:$0xff] }
 0x5f8   : > { %v4294_v4 = vpack.c.bf16 %v4290_v23, %v4289_v47  ;;  %v4109_v24 = vmul.f32 %v7868_v7, %v10080_v13  ;;  %v11763_v28 = vpack.c.bf16 %v10346_v31, %v10343_v58  ;;  %v11764_v16 = vpack.c.bf16 %v10293_v15, %v10289_v17  ;;  %v4891_v15 = vpop.permute.xlu0 %4890  ;;  %v10639_v31 = vpop.permute.xlu1 %5970  ;;  %v11790_v2 = vld [vmem:[#allocation50_spill] sm:$0xff] }
 0x5f9   : > { %v4101_v22 = vsel %vm11760_vm13, %v7868_v7, %v11759_v49  ;;  %v11770_v17 = vpack.c.bf16 %v10299_v63, %v10296_v51  ;;  %v11773_v51 = vpack.c.bf16 %v11699_v10, %v11698_v59  ;;  %v11775_v54 = vunpack.i.h.bf16 %v11774_v60  ;;  %vm11830_vm13 = vmmov %vm11809_vm1 }
 0x5fa   : > { %v4110_v32 = vmul.f32 %v4101_v22, %v11721_v8  ;;  %v11782_v47 = vpack.c.bf16 %v11780_v14, %v11781_v37  ;;  %vm11810_vm2 = vcmask 1039360   ;;  %v11813_v14 = vld [vmem:[#allocation80_spill] sm:$0xff]  ;;  %vm11819_vm9 = vcmask 7168  }
 0x5fb   : > { %4388 = vrot.lane.b32.xlu2 %v4382_v27, %s11511_s21  ;;  %vm11811_vm3 = vmmov %vm11810_vm2 }
 0x5fc   : > { %4480 = vrot.lane.b32.xlu0 %v4474_v33, %s11516_s16  ;;  %v11752_v33 = vld [vmem:[#allocation42_spill] sm:$0xff]  ;;  %v4114_v62 = vpack.c.bf16 %v4110_v32, %v4109_v24  ;;  %v11797_v32 = vld [vmem:[#allocation104_spill] sm:$0xff] }
 0x5fd   : > { %4390 = vrot.lane.b32.xlu1 %v11742_v6, %s11511_s21  ;;  %v7848_v27 = vunpack.i.l.bf16 %v11752_v33  ;;  %v11754_v5 = vunpack.i.h.bf16 %v11752_v33  ;;  %v7858_v6 = vunpack.i.l.bf16 %v11757_v48 }
 0x5ff   : > { %v5859_v34 = vsel %vm11755_vm12, %v7848_v27, %v11754_v5  ;;  %v5867_v56 = vmul.f32 %v7848_v27, %v11725_v11  ;;  %v11762_v11 = vunpack.i.h.bf16 %v11757_v48  ;;  %v4017_v20 = vmul.f32 %v7858_v6, %v10080_v13  ;;  %v11792_v48 = vld [vmem:[#allocation69_spill] sm:$0xff] }
 0x600   : > { %v5868_v52 = vmul.f32 %v5859_v34, %v11728_v42  ;;  %v11765_v13 = vpack.c.bf16 %v10203_v30, %v10200_v25  ;;  %v11771_v25 = vpack.c.bf16 %v10307_v3, %v10303_v9  ;;  %v4679_v30 = vld [vmem:[#allocation4 + $0x10] sm:$0xf]  ;;  %v10653_v63 = vpop.permute.xlu0 %5610  ;;  %v11776_v3 = vld [vmem:[#allocation112_spill] sm:$0xff]  ;;  %v11789_v34 = vld [vmem:[#allocation57_spill] sm:$0xff]  ;;  %vm11829_vm12 = vcmask 56320  }
 0x601   : > { %v4009_v42 = vsel %vm11671_vm14, %v7858_v6, %v11762_v11  ;;  %v11791_v7 = vpack.c.bf16 %v11789_v34, %v11790_v2  ;;  %v11793_v6 = vld [vmem:[#allocation68_spill] sm:$0xff]  ;;  %vm11834_vm14 = vmmov %vm11809_vm1 }
 0x602   : > { %v5872_v21 = vpack.c.bf16 %v5868_v52, %v5867_v56  ;;  %v4018_v61 = vmul.f32 %v4009_v42, %v11721_v8  ;;  %v11766_v8 = vpack.c.bf16 %v10285_v19, %v10282_v53  ;;  %v4712_v53 = vunpack.c.l.bf16 %v4679_v30  ;;  %v4499_v52 = vld [vmem:[#allocation4 + $0x10] sm:$0xf] }
 0x603   : > { %4482 = vrot.lane.b32.xlu2 %v4475_v55, %s11516_s16  ;;  %v11768_v55 = vld [vmem:[#allocation103_spill] sm:$0xff]  ;;  %v11772_v19 = vpack.c.bf16 %v11697_v41, %v10188_v12  ;;  %v11779_v41 = vpack.c.bf16 %v11701_v26, %v11700_v50  ;;  %v11786_v50 = vld [vmem:[#allocation98_spill] sm:$0xff] }
 0x604   : > { %4210 = vrot.lane.b32.xlu0 %v11747_v40, %s11506_s19  ;;  %v4022_v39 = vpack.c.bf16 %v4018_v61, %v4017_v20  ;;  %v11769_v58 = vpack.c.bf16 %v11767_v57, %v11768_v55  ;;  %v10655_v40 = vpop.permute.xlu1 %5882  ;;  %v4741_v9 = vmul.f32 %v11775_v54, %v4712_v53  ;;  %v11795_v42 = vld [vmem:[#allocation106_spill] sm:$0xff]  ;;  %v11798_v20 = vpack.c.bf16 %v11707_v35, %v11797_v32  ;;  %v11799_v61 = vld [vmem:[#allocation31_spill] sm:$0xff]  ;;  %v11803_v57 = vld [vmem:[#allocation100_spill] sm:$0xff] }
 0x605   : > { %4208 = vrot.lane.b32.xlu1 %v4202_v29, %s11506_s19  ;;  %v11777_v29 = vld [vmem:[#allocation111_spill] sm:$0xff]  ;;  %v11796_v24 = vpack.c.bf16 %v11705_v43, %v11795_v42 }
 0x606   : > { %v11778_v38 = vpack.c.bf16 %v11776_v3, %v11777_v29  ;;  %v4744_v12 = vpack.c.bf16 %v4741_v9, %v4741_v9  ;;  %v11804_v55 = vld [vmem:[#allocation99_spill] sm:$0xff] }
 0x608   : > { %v10668_v10 = vpop.permute.xlu0 %5522 }
 0x60b   : > { %4300 = vrot.lane.b32.xlu2 %v4294_v4, %s11510_s24 }
 0x60c   : > { %5786 = vrot.lane.b32.xlu0 %v5780_v46, %s11506_s19  ;;  %v10670_v59 = vpop.permute.xlu1 %5430  ;;  %v11783_v46 = vld [vmem:[#allocation71_spill] sm:$0xff] }
 0x60d   : > { %4302 = vrot.lane.b32.xlu1 %v11753_v45, %s11510_s24  ;;  %v4986_v4 = vrot.slane %v11783_v46, 4  ;;  %v11787_v45 = vld [vmem:[#allocation97_spill] sm:$0xff] }
 0x60e   : > { %v11788_v5 = vpack.c.bf16 %v11786_v50, %v11787_v45  ;;  %v11816_v45 = vld [vmem:[#allocation87_spill] sm:$0xff] }
 0x610   : > { %v10687_v56 = vpop.permute.xlu0 %5250 }
 0x613   : > { %5788 = vrot.lane.b32.xlu2 %v11761_v44, %s11506_s19  ;;  %v4532_v44 = vunpack.c.l.bf16 %v4499_v52  ;;  %v11820_v52 = vld [vmem:[#allocation89_spill] sm:$0xff] }
 0x614   : > { %5880 = vrot.lane.b32.xlu0 %v11758_v0, %s11510_s24  ;;  %v11794_v0 = vpack.c.bf16 %v11792_v48, %v11793_v6  ;;  %v10693_v49 = vpop.permute.xlu1 %5162  ;;  %v11821_v48 = vld [vmem:[#allocation88_spill] sm:$0xff] }
 0x615   : > { %5878 = vrot.lane.b32.xlu1 %v5872_v21, %s11510_s24  ;;  %v4587_v21 = vld [vmem:[#allocation4 + $0x10] sm:$0xf]  ;;  %v11822_v6 = vpack.c.bf16 %v11820_v52, %v11821_v48 }
 0x616   : > { %v4624_v11 = vunpack.c.l.bf16 %v4587_v21  ;;  %v3779_v48 = vld [vmem:[#allocation4 + $0x10] sm:$0xf] }
 0x61b   : > { %4028 = vrot.lane.b32.xlu2 %v4022_v39, %s8178_s20 }
 0x61c   : > { %4120 = vrot.lane.b32.xlu0 %v4114_v62, %s11509_s28  ;;  %v11800_v62 = vunpack.i.h.bf16 %v11799_v61  ;;  %v11824_v61 = vld [vmem:[#allocation91_spill] sm:$0xff] }
 0x61d   : > { %4030 = vrot.lane.b32.xlu1 %v11763_v28, %s8178_s20 }
 0x61e   : > { %v4561_v39 = vmul.f32 %v11800_v62, %v4532_v44 }
 0x620   : > { %v4564_v53 = vpack.c.bf16 %v4561_v39, %v4561_v39 }
 0x623   : > { %4122 = vrot.lane.b32.xlu2 %v11765_v13, %s11509_s28 }
 0x624   : > { %5608 = vrot.lane.b32.xlu0 %v11764_v16, %s8178_s20  ;;  %v11801_v16 = vld [vmem:[#allocation28_spill] sm:$0xff] }
 0x625   : > { %5606 = vrot.lane.b32.xlu1 %v11766_v8, %s8178_s20  ;;  %v11802_v13 = vunpack.i.h.bf16 %v11801_v16  ;;  %v11826_v16 = vld [vmem:[#allocation37_spill] sm:$0xff] }
 0x627   : > { %v4653_v8 = vmul.f32 %v11802_v13, %v4624_v11  ;;  %v11827_v13 = vunpack.i.h.bf16 %v11826_v16 }
 0x629   : > { %v4656_v54 = vpack.c.bf16 %v4653_v8, %v4653_v8 }
 0x62b   : > { %5698 = vrot.lane.b32.xlu2 %v11770_v17, %s11509_s28 }
 0x62c   : > { %3848 = vrot.lane.b32.xlu0 %v11769_v58, %s8175_s17  ;;  %v11805_v58 = vpack.c.bf16 %v11803_v57, %v11804_v55 }
 0x62d   : > { %5700 = vrot.lane.b32.xlu1 %v11771_v25, %s11509_s28  ;;  %v4894_v25 = vrot.slane %v4891_v15, 4 }
 0x633   : > { %3850 = vrot.lane.b32.xlu2 %v11773_v51, %s8175_s17 }
 0x634   : > { %3942 = vrot.lane.b32.xlu0 %v11772_v19, %s11498_s13 }
 0x635   : > { %3940 = vrot.lane.b32.xlu1 %v11778_v38, %s11498_s13  ;;  %v4887_v36 = vpop.permute.xlu2 %4886 }
 0x636   : > { %v4892_v19 = vrot.slane %v4887_v36, 4 }
 0x63b   : > { %4752 = vrot.lane.b32.xlu2 %v4744_v12, %s11712_s27  ;;  %v4407_v12 = vld [vmem:[#allocation4 + $0x10] sm:$0xf] }
 0x63c   : > { %5428 = vrot.lane.b32.xlu0 %v11779_v41, %s8175_s17  ;;  %v11812_v41 = vld [vmem:[#allocation81_spill] sm:$0xff] }
 0x63d   : > { %5426 = vrot.lane.b32.xlu1 %v11782_v47, %s8175_s17  ;;  %v4981_v23 = vpop.permute.xlu2 %4980  ;;  %v11814_v37 = vpack.c.bf16 %v11812_v41, %v11813_v14  ;;  %v5974_v14 = vrot.slane %v10639_v31, 4 }
 0x63e   : > { %v4985_v33 = vrot.slane %v4981_v23, 4 }
 0x640   : > { %v4989_v27 = vsel %vm11784_vm15, %v4985_v33, %v4986_v4  ;;  %v4444_v4 = vunpack.c.l.bf16 %v4407_v12  ;;  %vm11835_vm15 = vcmask 449536  }
 0x641   : > { %v4990_v26 = vsel %vm11785_vm4, %v4981_v23, %v4989_v27  ;;  %vm11836_vm4 = vmmov %vm11809_vm1 }
 0x642   : > { %4994 = vst [vmem:[#allocation3 + $0xf8] sm:$0xff] %v4990_v26  ;;  %v4473_v44 = vmul.f32 %v7814_v1, %v4444_v4 }
 0x643   : > { %5518 = vrot.lane.b32.xlu2 %v11791_v7, %s11498_s13 }
 0x644   : > { %3668 = vrot.lane.b32.xlu0 %v11788_v5, %s8169_s11  ;;  %v11817_v5 = vld [vmem:[#allocation86_spill] sm:$0xff]  ;;  %v4476_v57 = vpack.c.bf16 %v4473_v44, %v4473_v44 }
 0x645   : > { %5520 = vrot.lane.b32.xlu1 %v11794_v0, %s11498_s13  ;;  %v10695_v22 = vpop.permute.xlu2 %4568  ;;  %v11818_v34 = vpack.c.bf16 %v11816_v45, %v11817_v5 }
 0x646   : > { %v4574_v55 = vrot.slane %v10695_v22, 4 }
 0x64b   : > { %3670 = vrot.lane.b32.xlu2 %v11798_v20, %s8169_s11  ;;  %v11823_v20 = vld [vmem:[#allocation92_spill] sm:$0xff] }
 0x64c   : > { %3762 = vrot.lane.b32.xlu0 %v11796_v24, %s8176_s18  ;;  %v11825_v62 = vpack.c.bf16 %v11823_v20, %v11824_v61 }
 0x64d   : > { %3760 = vrot.lane.b32.xlu1 %v11805_v58, %s8176_s18  ;;  %v10713_v43 = vpop.permute.xlu2 %4662 }
 0x64e   : > { %v4979_v28 = vpop.permute.xlu0 %4978  ;;  %v4667_v32 = vrot.slane %v10713_v43, 4 }
 0x64f   : > { %v4984_v17 = vrot.slane %v4979_v28, 4  ;;  %v4889_v35 = vpop.permute.xlu1 %4888 }
 0x650   : > { %v4893_v60 = vrot.slane %v4889_v35, 4 }
 0x651   : > { %v4987_v30 = vsel %vm11806_vm5, %v4984_v17, %v4985_v33  ;;  %vm11842_vm5 = vmmov %vm11835_vm15 }
 0x652   : > { %v4988_v51 = vsel %vm11807_vm0, %v4979_v28, %v4987_v30  ;;  %v4895_v9 = vsel %vm11808_vm7, %v4892_v19, %v4893_v60  ;;  %v4897_v3 = vsel %vm11809_vm1, %v4893_v60, %v4894_v25  ;;  %v7367_v30 = vld [vmem:[#allocation3 + $0xcc] sm:$0xf0]  ;;  %v11831_v19 = vld [vmem:[#allocation79_spill] sm:$0xff]  ;;  %vm11854_vm0 = vmmov %vm11809_vm1  ;;  %vm11855_vm7 = vcmask 72704  }
 0x653   : > { %4993 = vst [vmem:[#allocation3 + $0xf0] sm:$0xff] %v4988_v51  ;;  %v4896_v29 = vsel %vm11810_vm2, %v4887_v36, %v4895_v9  ;;  %v4898_v15 = vsel %vm11811_vm3, %v4889_v35, %v4897_v3  ;;  %4664 = vrot.lane.b32.xlu2 %v4656_v54, %s11723_s30  ;;  %v4319_v36 = vld [vmem:[#allocation4 + $0x10] sm:$0xf]  ;;  %v7162_v3 = vld [vmem:[#allocation3 + $0xd0] sm:$0xf0]  ;;  %vm11856_vm1 = vmmov %vm11854_vm0  ;;  %s11957_s30 = sld [smem:[#allocation116_spill]] }
 0x654   : > { %4572 = vrot.lane.b32.xlu0 %v4564_v53, %s11513_s1  ;;  %4901 = vst [vmem:[#allocation3 + $0xe0] sm:$0xff] %v4896_v29  ;;  %v4352_v2 = vunpack.c.l.bf16 %v4319_v36  ;;  %v11832_v51 = vld [vmem:[#allocation78_spill] sm:$0xff]  ;;  %vm11857_vm2 = vmmov %vm11854_vm0  ;;  %s6841_s1 = sshll.u32 %s8348_s22, 4 }
 0x655   : > { %4902 = vst [vmem:[#allocation3 + $0xe8] sm:$0xff] %v4898_v15  ;;  %5246 = vrot.lane.b32.xlu1 %v11814_v37, %s8169_s11  ;;  %v10729_v47 = vpop.permute.xlu2 %4388  ;;  %v11833_v60 = vpack.c.bf16 %v11831_v19, %v11832_v51  ;;  %v4047_v29 = vld [vmem:[#allocation4 + $0x10] sm:$0xf]  ;;  %vm11858_vm3 = vmmov %vm11854_vm0 }
 0x656   : > { %v10723_v38 = vpop.permute.xlu0 %4750  ;;  %v4381_v18 = vmul.f32 %v11827_v13, %v4352_v2  ;;  %v4084_v36 = vunpack.c.l.bf16 %v4047_v29  ;;  %v11837_v2 = vld [vmem:[#allocation63_spill] sm:$0xff]  ;;  %v11850_v19 = vld [vmem:[#allocation82_spill] sm:$0xff] }
 0x657   : > { %v4755_v23 = vrot.slane %v10723_v38, 4  ;;  %v4749_v46 = vpop.permute.xlu1 %4748 }
 0x658   : > { %v4754_v33 = vrot.slane %v4749_v46, 4  ;;  %v4384_v35 = vpack.c.bf16 %v4381_v18, %v4381_v18 }
 0x65a   : > { %v7371_v27 = vld [vmem:[#allocation3 + $0xec] sm:$0xf0]  ;;  %v7178_v26 = vld [vmem:[#allocation3 + $0xf0] sm:$0xf0]  ;;  %v4757_v50 = vsel %vm11815_vm6, %v4754_v33, %v4755_v23  ;;  %vm11859_vm6 = vmmov %vm11854_vm0 }
 0x65b   : > { %v4758_v7 = vsel %vm11819_vm9, %v4749_v46, %v4757_v50  ;;  %5338 = vrot.lane.b32.xlu2 %v11822_v6, %s8176_s18  ;;  %v7176_v0 = vld [vmem:[#allocation3 + $0xe0] sm:$0xf]  ;;  %v7369_v21 = vld [vmem:[#allocation3 + $0xe4] sm:$0xf]  ;;  %vm11860_vm9 = vmmov %vm11842_vm5 }
 0x65c   : > { %5248 = vrot.lane.b32.xlu0 %v11818_v34, %s8169_s11  ;;  %4763 = vst [vmem:[#allocation3 + $0xc0] sm:$0xff] %v4758_v7  ;;  %v7177_v11 = vor.u32 %v7371_v27, %v7176_v0  ;;  %v7181_v42 = vor.u32 %v7369_v21, %v7178_v26  ;;  %v4227_v27 = vld [vmem:[#allocation4 + $0x10] sm:$0xf]  ;;  %v11840_v0 = vld [vmem:[#allocation55_spill] sm:$0xff] }
 0x65d   : > { %5340 = vrot.lane.b32.xlu1 %v11825_v62, %s8176_s18  ;;  %v10751_v28 = vpop.permute.xlu2 %4482  ;;  %v11838_v7 = vld [vmem:[#allocation66_spill] sm:$0xff]  ;;  %v4264_v6 = vunpack.c.l.bf16 %v4227_v27  ;;  %v11841_v21 = vunpack.i.h.bf16 %v11840_v0 }
 0x65e   : > { %v4661_v24 = vpop.permute.xlu0 %4660  ;;  %6329 = vmatpush.bf16.msra.mxu2 %v7177_v11  ;;  %6355 = vmatpush.bf16.msrb.mxu3 %v7181_v42  ;;  %v11839_v52 = vpack.c.bf16 %v11837_v2, %v11838_v7  ;;  %v11843_v42 = vld [vmem:[#allocation85_spill] sm:$0xff]  ;;  %v3959_v27 = vld [vmem:[#allocation4 + $0x10] sm:$0xf] }
 0x65f   : > { %v4666_v39 = vrot.slane %v4661_v24, 4  ;;  %v10758_v8 = vpop.permute.xlu1 %4570  ;;  %v4113_v44 = vmul.f32 %v11841_v21, %v4084_v36  ;;  %v4394_v36 = vrot.slane %v10729_v47, 4 }
 0x660   : > { %v4575_v17 = vrot.slane %v10758_v8, 4 }
 0x661   : > { %v4669_v1 = vsel %vm11828_vm10, %v4666_v39, %v4667_v32  ;;  %vm11867_vm10 = vmmov %vm11854_vm0 }
 0x662   : > { %v4670_v58 = vsel %vm11829_vm12, %v4661_v24, %v4669_v1  ;;  %v4577_v25 = vsel %vm11830_vm13, %v4574_v55, %v4575_v17  ;;  %v11844_v24 = vld [vmem:[#allocation84_spill] sm:$0xff]  ;;  %vm11872_vm12 = vmmov %vm11854_vm0 }
 0x663   : > { %4675 = vst [vmem:[#allocation3 + $0xb0] sm:$0xff] %v4670_v58  ;;  %v4578_v53 = vsel %vm1514_vm8, %v10695_v22, %v4577_v25  ;;  %5066 = vrot.lane.b32.xlu2 %v11833_v60, %s11548_s25  ;;  %v7160_v54 = vld [vmem:[#allocation3 + $0xc0] sm:$0xf]  ;;  %v7365_v9 = vld [vmem:[#allocation3 + $0xc4] sm:$0xf]  ;;  %v11845_v20 = vpack.c.bf16 %v11843_v42, %v11844_v24  ;;  %vm11873_vm13 = vmmov %vm11854_vm0 }
 0x664   : > { %4484 = vrot.lane.b32.xlu0 %v4476_v57, %s11516_s16  ;;  %4583 = vst [vmem:[#allocation3 + $0xa0] sm:$0xff] %v4578_v53  ;;  %v7161_v15 = vor.u32 %v7367_v30, %v7160_v54  ;;  %v7165_v12 = vor.u32 %v7365_v9, %v7162_v3  ;;  %v4139_v22 = vld [vmem:[#allocation4 + $0x10] sm:$0xf]  ;;  %v11846_v57 = vld [vmem:[#allocation72_spill] sm:$0xff]  ;;  %v11849_v53 = vld [vmem:[#allocation83_spill] sm:$0xff]  ;;  %v3812_v3 = vunpack.c.l.bf16 %v3779_v48 }
 0x665   : > { %4392 = vrot.lane.b32.xlu1 %v4384_v35, %s11511_s21  ;;  %v10775_v46 = vpop.permute.xlu2 %4300  ;;  %v4172_v45 = vunpack.c.l.bf16 %v4139_v22  ;;  %v5794_v55 = vrot.slane %v11846_v57, 4  ;;  %v11847_v58 = vld [vmem:[#allocation46_spill] sm:$0xff]  ;;  %v4487_v35 = vrot.slane %v10751_v28, 4  ;;  %v11851_v51 = vpack.c.bf16 %v11849_v53, %v11850_v19  ;;  %s11954_s21 = sld [smem:[#allocation115_spill]] }
 0x666   : > { %v5969_v41 = vpop.permute.xlu0 %5968  ;;  %6330 = vmatpush.bf16.msra.mxu2 %v7161_v15  ;;  %6356 = vmatpush.bf16.msrb.mxu3 %v7165_v12  ;;  %v11848_v25 = vunpack.i.h.bf16 %v11847_v58  ;;  %v3867_v9 = vld [vmem:[#allocation4 + $0x10] sm:$0xf]  ;;  %v4116_v22 = vpack.c.bf16 %v4113_v44, %v4113_v44  ;;  %v11861_v44 = vld [vmem:[#allocation61_spill] sm:$0xff] }
 0x667   : > { %v5973_v37 = vrot.slane %v5969_v41, 4  ;;  %v5967_v33 = vpop.permute.xlu1 %5966 }
 0x668   : > { %v5972_v50 = vrot.slane %v5967_v33, 4  ;;  %v4201_v30 = vmul.f32 %v11848_v25, %v4172_v45 }
 0x669   : > { %v5977_v4 = vsel %vm11834_vm14, %v5973_v37, %v5974_v14  ;;  %vm11874_vm14 = vcmask 457728  }
 0x66a   : > { %v10779_v26 = vsel %vm11835_vm15, %v5969_v41, %v5977_v4  ;;  %v7363_v5 = vld [vmem:[#allocation3 + $0xac] sm:$0xf0]  ;;  %v7146_v31 = vld [vmem:[#allocation3 + $0xb0] sm:$0xf0]  ;;  %v5975_v34 = vsel %vm11836_vm4, %v5972_v50, %v5973_v37  ;;  %v11852_v41 = vld [vmem:[#allocation41_spill] sm:$0xff]  ;;  %v4204_v2 = vpack.c.bf16 %v4201_v30, %v4201_v30 }
 0x66b   : > { %v5976_v11 = vsel %vm11842_vm5, %v5967_v33, %v5975_v34  ;;  %5160 = vrot.lane.b32.xlu2 %v11845_v20, %s11452_s14  ;;  %v7144_v61 = vld [vmem:[#allocation3 + $0xa0] sm:$0xf]  ;;  %v7361_v62 = vld [vmem:[#allocation3 + $0xa4] sm:$0xf]  ;;  %v11853_v14 = vunpack.i.h.bf16 %v11852_v41  ;;  %v3904_v34 = vunpack.c.l.bf16 %v3867_v9  ;;  %vm11875_vm15 = vmmov %vm11854_vm0 }
 0x66c   : > { %5158 = vrot.lane.b32.xlu0 %v11839_v52, %s11452_s14  ;;  %v7145_v39 = vor.u32 %v7363_v5, %v7144_v61  ;;  %v7149_v16 = vor.u32 %v7361_v62, %v7146_v31  ;;  %v6202_v18 = vunpack.c.l.b16 %v5976_v11  ;;  %v6203_v1 = vunpack.c.h.b16 %v5976_v11  ;;  %v3687_v20 = vld [vmem:[#allocation4 + $0x10] sm:$0xf]  ;;  %v11863_v61 = vld [vmem:[#allocation67_spill] sm:$0xff]  ;;  %vm11876_vm4 = vmmov %vm11874_vm14  ;;  %s501_s14 = scalar_lea.vmem [#allocation10], %s6841_s1 }
 0x66d   : > { %5068 = vrot.lane.b32.xlu1 %v11851_v51, %s11548_s25  ;;  %v10801_v54 = vpop.permute.xlu2 %5788  ;;  %v4293_v37 = vmul.f32 %v11853_v14, %v4264_v6  ;;  %v3992_v6 = vunpack.c.l.bf16 %v3959_v27  ;;  %v11862_v11 = vunpack.i.h.bf16 %v11861_v44  ;;  %v11864_v62 = vunpack.i.h.bf16 %v11863_v61  ;;  %v11868_v14 = vld [vmem:[#allocation65_spill] sm:$0xff]  ;;  %vm11877_vm5 = vmmov %vm11854_vm0  ;;  %s7393_s25 = sshll.u32 %s8281_s15, 4 }
 0x66e   : > { %v4481_v13 = vpop.permute.xlu0 %4480  ;;  %6331 = vmatpush.bf16.msra.mxu2 %v7145_v39  ;;  %6357 = vmatpush.bf16.msrb.mxu3 %v7149_v16  ;;  %v5793_v29 = vrot.slane %v10801_v54, 4  ;;  %v6258_v15 = vpack.c.b16 %v6202_v18, %v6202_v18  ;;  %v6259_v12 = vpack.c.b16 %v6203_v1, %v6203_v1  ;;  %v11865_v18 = vld [vmem:[#allocation45_spill] sm:$0xff]  ;;  %v3724_v58 = vunpack.c.l.bf16 %v3687_v20 }
 0x66f   : > { %v4486_v60 = vrot.slane %v4481_v13, 4  ;;  %v10810_v33 = vpop.permute.xlu1 %4390  ;;  %v4296_v0 = vpack.c.bf16 %v4293_v37, %v4293_v37  ;;  %v3841_v42 = vmul.f32 %v11862_v11, %v3812_v3  ;;  %v3933_v39 = vmul.f32 %v11864_v62, %v3904_v34 }
 0x670   : > { %v4395_v45 = vrot.slane %v10810_v33, 4  ;;  %v5797_v5 = vsel %vm11856_vm1, %v5793_v29, %v5794_v55  ;;  %v6318_v31 = vsel %vm11857_vm2, %v6258_v15, 0  ;;  %v6321_v52 = vsel %vm11858_vm3, %v6259_v12, 0  ;;  %v3599_v55 = vld [vmem:[#allocation4 + $0x10] sm:$0xf] }
 0x671   : > { %v4489_v4 = vsel %vm11854_vm0, %v4486_v60, %v4487_v35  ;;  %v5798_v7 = vsel %vm748_vm11, %v10801_v54, %v5797_v5  ;;  %6344 = vmatpush.bf16.msra.mxu0 %v6318_v31  ;;  %6370 = vmatpush.bf16.msrb.mxu1 %v6321_v52  ;;  %v3844_v25 = vpack.c.bf16 %v3841_v42, %v3841_v42  ;;  %v3632_v9 = vunpack.c.l.bf16 %v3599_v55  ;;  %v11870_v31 = vld [vmem:[#allocation70_spill] sm:$0xff]  ;;  %vm11878_vm0 = vmmov %vm11876_vm4 }
 0x672   : > { %v4490_v50 = vsel %vm11855_vm7, %v4481_v13, %v4489_v4  ;;  %v4397_v48 = vsel %vm11859_vm6, %v4394_v36, %v4395_v45  ;;  %5802 = vst [vmem:[#allocation3 + $0x188] sm:$0xff] %v5798_v7  ;;  %v3936_v53 = vpack.c.bf16 %v3933_v39, %v3933_v39  ;;  %v11869_v37 = vunpack.i.h.bf16 %v11868_v14  ;;  %vm11879_vm7 = vmmov %vm11856_vm1 }
 0x673   : > { %4495 = vst [vmem:[#allocation3 + $0x90] sm:$0xff] %v4490_v50  ;;  %v4398_v21 = vsel %vm11860_vm9, %v10729_v47, %v4397_v48  ;;  %4212 = vrot.lane.b32.xlu2 %v4204_v2, %s11506_s19  ;;  %v11866_v47 = vunpack.i.h.bf16 %v11865_v18  ;;  %v11871_v34 = vunpack.i.h.bf16 %v11870_v31  ;;  %v5886_v42 = vrot.slane %v10655_v40, 4  ;;  %vm11882_vm6 = vmmov %vm11857_vm2 }
 0x674   : > { %4124 = vrot.lane.b32.xlu0 %v4116_v22, %s11509_s28  ;;  %4403 = vst [vmem:[#allocation3 + $0x80] sm:$0xff] %v4398_v21  ;;  %v3753_v22 = vmul.f32 %v11869_v37, %v3724_v58  ;;  %vm11880_vm1 = vcmask 515072   ;;  %vm11881_vm3 = vcmask 523264   ;;  %s8114_s28 = scalar_lea.hbm %s11957_s30, 32 }
 0x675   : > { %4304 = vrot.lane.b32.xlu1 %v4296_v0, %s11510_s24  ;;  %v10835_v16 = vpop.permute.xlu2 %4028  ;;  %v4021_v1 = vmul.f32 %v11866_v47, %v3992_v6  ;;  %v3661_v2 = vmul.f32 %v11871_v34, %v3632_v9  ;;  %v4306_v6 = vrot.slane %v10775_v46, 4  ;;  %vm11883_vm9 = vmmov %vm11881_vm3 }
 0x676   : > { %v10830_v24 = vpop.permute.xlu0 %4210  ;;  %v3756_v48 = vpack.c.bf16 %v3753_v22, %v3753_v22 }
 0x677   : > { %v4215_v13 = vrot.slane %v10830_v24, 4  ;;  %v4209_v57 = vpop.permute.xlu1 %4208  ;;  %v4024_v3 = vpack.c.bf16 %v4021_v1, %v4021_v1  ;;  %v3664_v11 = vpack.c.bf16 %v3661_v2, %v3661_v2  ;;  %v5614_v2 = vrot.slane %v10653_v63, 4 }
 0x678   : > { %v4214_v30 = vrot.slane %v4209_v57, 4 }
 0x67a   : > { %v7359_v19 = vld [vmem:[#allocation3 + $0x8c] sm:$0xf0]  ;;  %v7130_v51 = vld [vmem:[#allocation3 + $0x90] sm:$0xf0]  ;;  %v4217_v60 = vsel %vm11867_vm10, %v4214_v30, %v4215_v13  ;;  %vm11884_vm10 = vmmov %vm11857_vm2 }
 0x67b   : > { %v4218_v15 = vsel %vm748_vm11, %v4209_v57, %v4217_v60  ;;  %3944 = vrot.lane.b32.xlu2 %v3936_v53, %s11498_s13  ;;  %v7128_v12 = vld [vmem:[#allocation3 + $0x80] sm:$0xf]  ;;  %v7357_v41 = vld [vmem:[#allocation3 + $0x84] sm:$0xf] }
 0x67c   : > { %3852 = vrot.lane.b32.xlu0 %v3844_v25, %s8175_s17  ;;  %4223 = vst [vmem:[#allocation3 + $0x60] sm:$0xff] %v4218_v15  ;;  %v7129_v36 = vor.u32 %v7359_v19, %v7128_v12  ;;  %v7133_v4 = vor.u32 %v7357_v41, %v7130_v51  ;;  %v4034_v15 = vrot.slane %v10835_v16, 4  ;;  %s6727_s17 = sshll.u32 %s501_s14, 4  ;;  %s6728_s17 = int_to_ptr.vmem [resolvable:$true] %s6727_s17 }
 0x67d   : > { %4032 = vrot.lane.b32.xlu1 %v4024_v3, %s8178_s20  ;;  %v10849_v5 = vpop.permute.xlu2 %4122  ;;  %s6714_s20 = scalar_lea.sflag [#allocation7], %s8348_s22 }
 0x67e   : > { %v5787_v27 = vpop.permute.xlu0 %5786  ;;  %6332 = vmatpush.bf16.msra.mxu2 %v7129_v36  ;;  %6358 = vmatpush.bf16.msrb.mxu3 %v7133_v4  ;;  %v4127_v19 = vrot.slane %v10849_v5, 4 }
 0x67f   : > { %v5792_v50 = vrot.slane %v5787_v27, 4  ;;  %v10856_v52 = vpop.permute.xlu1 %4302 }
 0x680   : > { %v4307_v21 = vrot.slane %v10856_v52, 4 }
 0x681   : > { %v5795_v7 = vsel %vm11872_vm12, %v5792_v50, %v5793_v29  ;;  %vm11885_vm12 = vcmask 7168  }
 0x682   : > { %v5796_v0 = vsel %vm748_vm11, %v5787_v27, %v5795_v7  ;;  %v4309_v44 = vsel %vm11873_vm13, %v4306_v6, %v4307_v21  ;;  %vm11886_vm13 = vmmov %vm11857_vm2 }
 0x683   : > { %5801 = vst [vmem:[#allocation3 + $0x180] sm:$0xff] %v5796_v0  ;;  %v4310_v54 = vsel %vm11874_vm14, %v10775_v46, %v4309_v44  ;;  %v7112_v57 = vld [vmem:[#allocation3 + $0x60] sm:$0xf]  ;;  %v7353_v58 = vld [vmem:[#allocation3 + $0x64] sm:$0xf]  ;;  %vm11887_vm14 = vmmov %vm11881_vm3 }
 0x684   : > { %3764 = vrot.lane.b32.xlu0 %v3756_v48, %s8176_s18  ;;  %4315 = vst [vmem:[#allocation3 + $0x70] sm:$0xff] %v4310_v54 }
 0x685   : > { %3672 = vrot.lane.b32.xlu1 %v3664_v11, %s8169_s11  ;;  %v10869_v61 = vpop.permute.xlu2 %5698  ;;  %s6725_s11 = scalar_lea.hbm %s11957_s30, %s7393_s25 }
 0x686   : > { %v5881_v29 = vpop.permute.xlu0 %5880  ;;  %s6729_s18 = sshll.u32 %s6725_s11, 4  ;;  %s6730_s18 = int_to_ptr.hbm [resolvable:$true] %s6729_s18 }
 0x687   : > { %v5885_v20 = vrot.slane %v5881_v29, 4  ;;  %v5879_v39 = vpop.permute.xlu1 %5878  ;;  %s8108_s23 = sshra.s32 %s6730_s18, 4  ;;  %s8109_s23 = int_to_ptr.hbm [resolvable:$true] %s8108_s23 }
 0x688   : > { %v5884_v47 = vrot.slane %v5879_v39, 4  ;;  %s8110_s13 = scalar_lea.hbm %s8109_s23, 16  ;;  %p8115_p8 = scmp.lt.s32.totalorder %s8109_s23, %s11957_s30 }
 0x689   : > { %v5889_v62 = vsel %vm11875_vm15, %v5885_v20, %v5886_v42  ;;  %vm11888_vm15 = vmmov %vm11857_vm2  ;;  %p8111_p3 = scmp.ne.s32.totalorder %s8109_s23, %s8110_s13  ;;  %p8116_p7 = scmp.lt.s32.totalorder %s8114_s28, %s8110_s13 }
 0x68a   : > { %v5890_v18 = vsel %vm11876_vm4, %v5881_v29, %v5889_v62  ;;  %v5887_v1 = vsel %vm11877_vm5, %v5884_v47, %v5885_v20  ;;  %v7256_v37 = vld [vmem:[#allocation3 + $0x180] sm:$0xf]  ;;  %v7389_v4 = vld [vmem:[#allocation3 + $0x184] sm:$0xf]  ;;  %vm11890_vm4 = vcmask 580608   ;;  %vm11891_vm5 = vmmov %vm11857_vm2 }
 0x68b   : > { %5894 = vst [vmem:[#allocation3 + $0x198] sm:$0xff] %v5890_v18  ;;  %v5888_v46 = vsel %vm11878_vm0, %v5879_v39, %v5887_v1  ;;  %v7355_v55 = vld [vmem:[#allocation3 + $0x6c] sm:$0xf0]  ;;  %v7114_v40 = vld [vmem:[#allocation3 + $0x70] sm:$0xf0]  ;;  %vm11892_vm0 = vmmov %vm11857_vm2  ;;  %p8112_p5 = pnand %p8111_p3, %p8317_p0  ;;  %p8117_p9 = por %p8116_p7, %p8115_p8 }
 0x68c   : > { %5893 = vst [vmem:[#allocation3 + $0x190] sm:$0xff] %v5888_v46  ;;  %v7113_v25 = vor.u32 %v7355_v55, %v7112_v57  ;;  %v7117_v30 = vor.u32 %v7353_v58, %v7114_v40  ;;  %v11889_v40 = vld [vmem:[#allocation73_spill] sm:$0xff] }
 0x68d   : > { %v10876_v60 = vpop.permute.xlu2 %3850  ;;  %p8113_p13 = pneg %p8112_p5 }
 0x68e   : > { %v4121_v53 = vpop.permute.xlu0 %4120  ;;  %6333 = vmatpush.bf16.msra.mxu2 %v7113_v25  ;;  %6359 = vmatpush.bf16.msrb.mxu3 %v7117_v30  ;;  %v3855_v46 = vrot.slane %v10876_v60, 4  ;;  %v5706_v25 = vrot.slane %v11889_v40, 4  ;;  %v5704_v30 = vrot.slane %v10869_v61, 4 }
 0x68f   : > { %v4126_v51 = vrot.slane %v4121_v53, 4  ;;  %v10881_v3 = vpop.permute.xlu1 %4030  ;;  %p8118_p10 = pnand %p8117_p9, %p8113_p13 }
 0x690   : > { %v4035_v41 = vrot.slane %v10881_v3, 4 }
 0x691   : > { %v4129_v9 = vsel %vm11879_vm7, %v4126_v51, %v4127_v19  ;;  %vm11893_vm7 = vmmov %vm11880_vm1 }
 0x692   : > { %v4130_v12 = vsel %vm11880_vm1, %v4121_v53, %v4129_v9  ;;  %v4037_v14 = vsel %vm11857_vm2, %v4034_v15, %v4035_v41  ;;  %vm11894_vm2 = vmmov %vm11892_vm0 }
 0x693   : > { %4135 = vst [vmem:[#allocation3 + $0x50] sm:$0xff] %v4130_v12  ;;  %v4038_v22 = vsel %vm11881_vm3, %v10835_v16, %v4037_v14  ;;  %v7391_v36 = vld [vmem:[#allocation3 + $0x18c] sm:$0xf0]  ;;  %v7258_v27 = vld [vmem:[#allocation3 + $0x190] sm:$0xf0]  ;;  %vm11895_vm3 = vcmask 531456  }
 0x694   : > { %4043 = vst [vmem:[#allocation3 + $0x40] sm:$0xff] %v4038_v22  ;;  %v7257_v50 = vor.u32 %v7391_v36, %v7256_v37  ;;  %v7261_v31 = vor.u32 %v7389_v4, %v7258_v27 }
 0x695   : > { %v4753_v48 = vpop.permute.xlu2 %4752 }
 0x696   : > { %v5609_v34 = vpop.permute.xlu0 %5608  ;;  %6345 = vmatpush.bf16.msra.mxu0 %v7257_v50  ;;  %6371 = vmatpush.bf16.msrb.mxu1 %v7261_v31  ;;  %v4756_v6 = vrot.slane %v4753_v48, 4 }
 0x697   : > { %v5613_v7 = vrot.slane %v5609_v34, 4  ;;  %v5607_v44 = vpop.permute.xlu1 %5606 }
 0x698   : > { %v5612_v16 = vrot.slane %v5607_v44, 4  ;;  %v4759_v54 = vsel %vm11884_vm10, %v4755_v23, %v4756_v6  ;;  %vm11898_vm10 = vmmov %vm11892_vm0 }
 0x699   : > { %v5617_v0 = vsel %vm11882_vm6, %v5613_v7, %v5614_v2  ;;  %v4760_v29 = vsel %vm11885_vm12, %v10723_v38, %v4759_v54  ;;  %vm11896_vm6 = vmmov %vm11892_vm0  ;;  %vm11899_vm12 = vcmask 56320  }
 0x69a   : > { %v5618_v11 = vsel %vm11883_vm9, %v5609_v34, %v5617_v0  ;;  %v7351_v63 = vld [vmem:[#allocation3 + $0x4c] sm:$0xf0]  ;;  %v7098_v42 = vld [vmem:[#allocation3 + $0x50] sm:$0xf0]  ;;  %v5615_v20 = vsel %vm11886_vm13, %v5612_v16, %v5613_v7  ;;  %4764 = vst [vmem:[#allocation3 + $0xc8] sm:$0xff] %v4760_v29  ;;  %vm11897_vm9 = vmmov %vm11890_vm4 }
 0x69b   : > { %5622 = vst [vmem:[#allocation3 + $0x168] sm:$0xff] %v5618_v11  ;;  %v5616_v62 = vsel %vm11887_vm14, %v5607_v44, %v5615_v20  ;;  %v7096_v39 = vld [vmem:[#allocation3 + $0x40] sm:$0xf]  ;;  %v7349_v18 = vld [vmem:[#allocation3 + $0x44] sm:$0xf]  ;;  %v5434_v44 = vrot.slane %v10670_v59, 4  ;;  %vm11900_vm13 = vmmov %vm11892_vm0 }
 0x69c   : > { %5621 = vst [vmem:[#allocation3 + $0x160] sm:$0xff] %v5616_v62  ;;  %v7097_v47 = vor.u32 %v7351_v63, %v7096_v39  ;;  %v7101_v1 = vor.u32 %v7349_v18, %v7098_v42  ;;  %vm11901_vm14 = vmmov %vm11890_vm4 }
 0x69d   : > { %v10902_v55 = vpop.permute.xlu2 %5518 }
 0x69e   : > { %v3849_v57 = vpop.permute.xlu0 %3848  ;;  %6334 = vmatpush.bf16.msra.mxu2 %v7097_v47  ;;  %6360 = vmatpush.bf16.msrb.mxu3 %v7101_v1 }
 0x69f   : > { %v3854_v23 = vrot.slane %v3849_v57, 4  ;;  %v5701_v58 = vpop.permute.xlu1 %5700 }
 0x6a0   : > { %v5705_v51 = vrot.slane %v5701_v58, 4 }
 0x6a1   : > { %v3857_v38 = vsel %vm11888_vm15, %v3854_v23, %v3855_v46  ;;  %vm11902_vm15 = vmmov %vm11892_vm0 }
 0x6a2   : > { %v3858_v53 = vsel %vm11890_vm4, %v3849_v57, %v3857_v38  ;;  %v5707_v9 = vsel %vm11891_vm5, %v5704_v30, %v5705_v51  ;;  %v5709_v15 = vsel %vm11892_vm0, %v5705_v51, %v5706_v25  ;;  %v5526_v51 = vrot.slane %v10668_v10, 4  ;;  %vm11904_vm5 = vmmov %vm11892_vm0 }
 0x6a3   : > { %3863 = vst [vmem:[#allocation3 + $0x20] sm:$0xff] %v3858_v53  ;;  %v5708_v12 = vsel %vm11893_vm7, %v10869_v61, %v5707_v9  ;;  %v5710_v14 = vsel %vm11880_vm1, %v5701_v58, %v5709_v15  ;;  %v7240_v31 = vld [vmem:[#allocation3 + $0x160] sm:$0xf]  ;;  %v7385_v2 = vld [vmem:[#allocation3 + $0x164] sm:$0xf]  ;;  %v5524_v9 = vrot.slane %v10902_v55, 4  ;;  %vm11905_vm7 = vmmov %vm11895_vm3 }
 0x6a4   : > { %5713 = vst [vmem:[#allocation3 + $0x170] sm:$0xff] %v5708_v12  ;;  %vm11903_vm4 = vcmask 596992   ;;  %vm11906_vm1 = vmmov %vm11895_vm3 }
 0x6a5   : > { %5714 = vst [vmem:[#allocation3 + $0x178] sm:$0xff] %v5710_v14  ;;  %v10917_v22 = vpop.permute.xlu2 %3670 }
 0x6a6   : > { %v10915_v37 = vpop.permute.xlu0 %3942  ;;  %v3675_v25 = vrot.slane %v10917_v22, 4 }
 0x6a7   : > { %v3947_v36 = vrot.slane %v10915_v37, 4  ;;  %v3941_v4 = vpop.permute.xlu1 %3940 }
 0x6a8   : > { %v3946_v27 = vrot.slane %v3941_v4, 4 }
 0x6aa   : > { %v3949_v50 = vsel %vm11894_vm2, %v3946_v27, %v3947_v36  ;;  %v7080_v18 = vld [vmem:[#allocation3 + $0x20] sm:$0xf]  ;;  %v7345_v57 = vld [vmem:[#allocation3 + $0x24] sm:$0xf]  ;;  %vm11907_vm2 = vmmov %vm11892_vm0 }
 0x6ab   : > { %v3950_v34 = vsel %vm11895_vm3, %v3941_v4, %v3949_v50  ;;  %v7387_v61 = vld [vmem:[#allocation3 + $0x16c] sm:$0xf0]  ;;  %v7242_v7 = vld [vmem:[#allocation3 + $0x170] sm:$0xf0]  ;;  %vm11908_vm3 = vcmask 588800  }
 0x6ac   : > { %3955 = vst [vmem:[#allocation3 + $0x30] sm:$0xff] %v3950_v34  ;;  %v7241_v48 = vor.u32 %v7387_v61, %v7240_v31  ;;  %v7245_v6 = vor.u32 %v7385_v2, %v7242_v7 }
 0x6ad   : > { %v4665_v16 = vpop.permute.xlu2 %4664 }
 0x6ae   : > { %v5429_v0 = vpop.permute.xlu0 %5428  ;;  %6346 = vmatpush.bf16.msra.mxu0 %v7241_v48  ;;  %6372 = vmatpush.bf16.msrb.mxu1 %v7245_v6  ;;  %v4668_v54 = vrot.slane %v4665_v16, 4 }
 0x6af   : > { %v5433_v11 = vrot.slane %v5429_v0, 4  ;;  %v5427_v63 = vpop.permute.xlu1 %5426 }
 0x6b0   : > { %v5432_v20 = vrot.slane %v5427_v63, 4  ;;  %v4671_v62 = vsel %vm11898_vm10, %v4667_v32, %v4668_v54  ;;  %vm11911_vm10 = vcmask 973824  }
 0x6b1   : > { %v5437_v29 = vsel %vm11896_vm6, %v5433_v11, %v5434_v44  ;;  %v4672_v39 = vsel %vm11899_vm12, %v10713_v43, %v4671_v62  ;;  %vm11909_vm6 = vmmov %vm11892_vm0 }
 0x6b2   : > { %v5438_v42 = vsel %vm11897_vm9, %v5429_v0, %v5437_v29  ;;  %v5435_v59 = vsel %vm11900_vm13, %v5432_v20, %v5433_v11  ;;  %4676 = vst [vmem:[#allocation3 + $0xb8] sm:$0xff] %v4672_v39  ;;  %v5166_v20 = vrot.slane %v10693_v49, 4  ;;  %v6205_v39 = vunpack.c.h.b16 %v10779_v26  ;;  %vm11910_vm9 = vmmov %vm11892_vm0 }
 0x6b3   : > { %5442 = vst [vmem:[#allocation3 + $0x148] sm:$0xff] %v5438_v42  ;;  %v5436_v47 = vsel %vm11901_vm14, %v5427_v63, %v5435_v59  ;;  %v7347_v1 = vld [vmem:[#allocation3 + $0x2c] sm:$0xf0]  ;;  %v7082_v23 = vld [vmem:[#allocation3 + $0x30] sm:$0xf0]  ;;  %v6204_v42 = vunpack.c.l.b16 %v10779_v26  ;;  %vm11912_vm12 = vmmov %vm11892_vm0 }
 0x6b4   : > { %5441 = vst [vmem:[#allocation3 + $0x140] sm:$0xff] %v5436_v47  ;;  %v7081_v38 = vor.u32 %v7347_v1, %v7080_v18  ;;  %v7085_v58 = vor.u32 %v7345_v57, %v7082_v23  ;;  %v6261_v26 = vpack.c.b16 %v6205_v39, %v6205_v39  ;;  %vm11913_vm13 = vmmov %vm11892_vm0 }
 0x6b5   : > { %v10935_v30 = vpop.permute.xlu2 %5338  ;;  %v6260_v57 = vpack.c.b16 %v6204_v42, %v6204_v42  ;;  %vm11915_vm14 = vmmov %vm11892_vm0 }
 0x6b6   : > { %v3669_v40 = vpop.permute.xlu0 %3668  ;;  %6335 = vmatpush.bf16.msra.mxu2 %v7081_v38  ;;  %6361 = vmatpush.bf16.msrb.mxu3 %v7085_v58 }
 0x6b7   : > { %v3674_v32 = vrot.slane %v3669_v40, 4  ;;  %v5521_v53 = vpop.permute.xlu1 %5520 }
 0x6b8   : > { %v5525_v12 = vrot.slane %v5521_v53, 4 }
 0x6b9   : > { %v3677_v43 = vsel %vm11902_vm15, %v3674_v32, %v3675_v25  ;;  %vm11916_vm15 = vmmov %vm11892_vm0 }
 0x6ba   : > { %v3678_v15 = vsel %vm11903_vm4, %v3669_v40, %v3677_v43  ;;  %v5527_v14 = vsel %vm11904_vm5, %v5524_v9, %v5525_v12  ;;  %v5529_v4 = vsel %vm11892_vm0, %v5525_v12, %v5526_v51  ;;  %v6324_v9 = vsel %vm11912_vm12, %v6260_v57, 0  ;;  %vm11917_vm5 = vmmov %vm11903_vm4  ;;  %v10995_v57 = vld [vmem:[%s11204_s7] sm:$0xff] }
 0x6bb   : > { %3683 = vst [vmem:[#allocation3] sm:$0xff] %v3678_v15  ;;  %v5528_v27 = vsel %vm11905_vm7, %v10902_v55, %v5527_v14  ;;  %v5530_v50 = vsel %vm11906_vm1, %v5521_v53, %v5529_v4  ;;  %v7224_v48 = vld [vmem:[#allocation3 + $0x140] sm:$0xf]  ;;  %v7381_v0 = vld [vmem:[#allocation3 + $0x144] sm:$0xf]  ;;  %v6327_v12 = vsel %vm11913_vm13, %v6261_v26, 0  ;;  %vm11918_vm7 = vmmov %vm11892_vm0 }
 0x6bc   : > { %5533 = vst [vmem:[#allocation3 + $0x150] sm:$0xff] %v5528_v27  ;;  %v7392_v4 = vld [vmem:[#allocation3 + $0x194] sm:$0xf0]  ;;  %v7266_v27 = vld [vmem:[#allocation3 + $0x198] sm:$0xf0]  ;;  %vm11919_vm1 = vmmov %vm11892_vm0  ;;  %vm11927_vm13 = vcmask 449536  }
 0x6bd   : > { %5534 = vst [vmem:[#allocation3 + $0x158] sm:$0xff] %v5530_v50  ;;  %v10950_v10 = vpop.permute.xlu2 %5066  ;;  %v11914_v50 = vld [vmem:[#allocation74_spill] sm:$0xff]  ;;  %vm11926_vm12 = vmmov %vm11892_vm0 }
 0x6be   : > { %v10948_v31 = vpop.permute.xlu0 %3762 }
 0x6bf   : > { %v3767_v34 = vrot.slane %v10948_v31, 4  ;;  %v3761_v61 = vpop.permute.xlu1 %3760 }
 0x6c0   : > { %v3766_v2 = vrot.slane %v3761_v61, 4 }
 0x6c2   : > { %v3769_v7 = vsel %vm11907_vm2, %v3766_v2, %v3767_v34  ;;  %v7064_v23 = vld [vmem:[#allocation3] sm:$0xf]  ;;  %v7341_v58 = vld [vmem:[#allocation3 + $0x4] sm:$0xf]  ;;  %v5344_v2 = vrot.slane %v10935_v30, 4  ;;  %vm11920_vm2 = vmmov %vm11908_vm3 }
 0x6c3   : > { %v3770_v6 = vsel %vm11908_vm3, %v3761_v61, %v3769_v7  ;;  %v7383_v55 = vld [vmem:[#allocation3 + $0x14c] sm:$0xf0]  ;;  %v7226_v44 = vld [vmem:[#allocation3 + $0x150] sm:$0xf0]  ;;  %v5346_v61 = vrot.slane %v11914_v50, 4  ;;  %vm11921_vm3 = vmmov %vm11920_vm2 }
 0x6c4   : > { %3775 = vst [vmem:[#allocation3 + $0x10] sm:$0xff] %v3770_v6  ;;  %v7225_v11 = vor.u32 %v7383_v55, %v7224_v48  ;;  %v7229_v16 = vor.u32 %v7381_v0, %v7226_v44 }
 0x6c5   : > { %v10957_v63 = vpop.permute.xlu2 %5160 }
 0x6c6   : > { %v4573_v54 = vpop.permute.xlu0 %4572  ;;  %6347 = vmatpush.bf16.msra.mxu0 %v7225_v11  ;;  %6373 = vmatpush.bf16.msrb.mxu1 %v7229_v16  ;;  %v5165_v62 = vrot.slane %v10957_v63, 4  ;;  %v7264_v11 = vld [vmem:[#allocation3 + $0x188] sm:$0xf]  ;;  %v7390_v16 = vld [vmem:[#allocation3 + $0x18c] sm:$0xf] }
 0x6c7   : > { %v4576_v29 = vrot.slane %v4573_v54, 4  ;;  %v5247_v18 = vpop.permute.xlu1 %5246  ;;  %v7269_v42 = vor.u32 %v7390_v16, %v7266_v27 }
 0x6c8   : > { %v5169_v1 = vsel %vm11910_vm9, %v5165_v62, %v5166_v20  ;;  %v5252_v53 = vrot.slane %v5247_v18, 4  ;;  %vm11924_vm9 = vmmov %vm11892_vm0 }
 0x6c9   : > { %v4579_v59 = vsel %vm11909_vm6, %v4575_v17, %v4576_v29  ;;  %v5170_v49 = vsel %vm11911_vm10, %v10957_v63, %v5169_v1  ;;  %v7265_v29 = vor.u32 %v7392_v4, %v7264_v11  ;;  %vm11923_vm6 = vcmask 72704  }
 0x6ca   : > { %v4580_v47 = vsel %vm1514_vm8, %v10758_v8, %v4579_v59  ;;  %5174 = vst [vmem:[#allocation3 + $0x118] sm:$0xff] %v5170_v49  ;;  %v5254_v8 = vrot.slane %v10687_v56, 4  ;;  %v7388_v59 = vld [vmem:[#allocation3 + $0x174] sm:$0xf0]  ;;  %v7386_v49 = vld [vmem:[#allocation3 + $0x16c] sm:$0xf] }
 0x6cb   : > { %4584 = vst [vmem:[#allocation3 + $0xa8] sm:$0xff] %v4580_v47  ;;  %v7343_v38 = vld [vmem:[#allocation3 + $0xc] sm:$0xf0]  ;;  %v7066_v40 = vld [vmem:[#allocation3 + $0x10] sm:$0xf0]  ;;  %vm11925_vm10 = vcmask 531456  }
 0x6cc   : > { %v7065_v17 = vor.u32 %v7343_v38, %v7064_v23  ;;  %v7069_v32 = vor.u32 %v7341_v58, %v7066_v40 }
 0x6cd   : > { %v4213_v15 = vpop.permute.xlu2 %4212 }
 0x6ce   : > { %v5249_v43 = vpop.permute.xlu0 %5248  ;;  %6336 = vmatpush.bf16.msra.mxu2 %v7065_v17  ;;  %6362 = vmatpush.bf16.msrb.mxu3 %v7069_v32  ;;  %v4216_v14 = vrot.slane %v4213_v15, 4  ;;  %v7384_v17 = vld [vmem:[#allocation3 + $0x154] sm:$0xf0]  ;;  %v7234_v32 = vld [vmem:[#allocation3 + $0x158] sm:$0xf0] }
 0x6cf   : > { %v5253_v51 = vrot.slane %v5249_v43, 4  ;;  %v5341_v48 = vpop.permute.xlu1 %5340 }
 0x6d0   : > { %v5345_v0 = vrot.slane %v5341_v48, 4  ;;  %v4219_v44 = vsel %vm11892_vm0, %v4215_v13, %v4216_v14  ;;  %v7382_v14 = vld [vmem:[#allocation3 + $0x14c] sm:$0xf] }
 0x6d1   : > { %v5255_v7 = vsel %vm11915_vm14, %v5252_v53, %v5253_v51  ;;  %v5257_v56 = vsel %vm11916_vm15, %v5253_v51, %v5254_v8  ;;  %v4220_v54 = vsel %vm748_vm11, %v10830_v24, %v4219_v44  ;;  %v7248_v24 = vld [vmem:[#allocation3 + $0x168] sm:$0xf]  ;;  %vm11922_vm11 = vmmov %vm11892_vm0  ;;  %v7237_v27 = vor.u32 %v7382_v14, %v7234_v32  ;;  %v7370_v32 = vld [vmem:[#allocation3 + $0xec] sm:$0xf] }
 0x6d2   : > { %6396 = vmatpush.bf16.msrb.mxu2 %v6324_v9  ;;  %6422 = vmatpush.bf16.msra.mxu3 %v6327_v12  ;;  %v5256_v6 = vsel %vm11903_vm4, %v5247_v18, %v5255_v7  ;;  %v5258_v55 = vsel %vm11917_vm5, %v5249_v43, %v5257_v56  ;;  %v5347_v20 = vsel %vm11918_vm7, %v5344_v2, %v5345_v0  ;;  %v7250_v18 = vld [vmem:[#allocation3 + $0x178] sm:$0xf0]  ;;  %v7232_v12 = vld [vmem:[#allocation3 + $0x148] sm:$0xf]  ;;  %vm11928_vm14 = vmmov %vm11892_vm0  ;;  %vm11930_vm15 = vcmask 973824  }
 0x6d3   : > { %5261 = vst [vmem:[#allocation3 + $0x120] sm:$0xff] %v5256_v6  ;;  %v5349_v39 = vsel %vm11919_vm1, %v5345_v0, %v5346_v61  ;;  %v5348_v47 = vsel %vm11920_vm2, %v10935_v30, %v5347_v20  ;;  %v7249_v26 = vor.u32 %v7388_v59, %v7248_v24  ;;  %v7253_v38 = vor.u32 %v7386_v49, %v7250_v18  ;;  %vm11931_vm4 = vmmov %vm11892_vm0 }
 0x6d4   : > { %5262 = vst [vmem:[#allocation3 + $0x128] sm:$0xff] %v5258_v55  ;;  %v5350_v13 = vsel %vm11921_vm3, %v5341_v48, %v5349_v39  ;;  %v6039_v30 = vunpack.c.l.b16 %v10995_v57  ;;  %v5072_v20 = vrot.slane %v10950_v10, 4  ;;  %vm11932_vm5 = vmmov %vm11892_vm0  ;;  %vm11933_vm0 = vcmask 982016  }
 0x6d5   : > { %4224 = vst [vmem:[#allocation3 + $0x68] sm:$0xff] %v4220_v54  ;;  %v3945_v58 = vpop.permute.xlu2 %3944  ;;  %vm11934_vm7 = vmmov %vm11933_vm0  ;;  %vm11935_vm2 = vcmask 515072  }
 0x6d6   : > { %6397 = vmatpush.bf16.msrb.mxu2 %v7265_v29  ;;  %6423 = vmatpush.bf16.msra.mxu3 %v7269_v42  ;;  %5353 = vst [vmem:[#allocation3 + $0x130] sm:$0xff] %v5348_v47  ;;  %v4485_v1 = vpop.permute.xlu0 %4484  ;;  %v3948_v40 = vrot.slane %v3945_v58, 4  ;;  %v11001_v53 = vpack.c.b16 %v6039_v30, %v6039_v30  ;;  %v11929_v29 = vld [vmem:[#allocation75_spill] sm:$0xff]  ;;  %vm11936_vm3 = vmmov %vm11919_vm1 }
 0x6d7   : > { %5354 = vst [vmem:[#allocation3 + $0x138] sm:$0xff] %v5350_v13  ;;  %v4488_v23 = vrot.slane %v4485_v1, 4  ;;  %v4393_v8 = vpop.permute.xlu1 %4392  ;;  %v5074_v42 = vrot.slane %v11929_v29, 4 }
 0x6d8   : > { %v4396_v9 = vrot.slane %v4393_v8, 4  ;;  %v3951_v15 = vsel %vm11924_vm9, %v3947_v36, %v3948_v40  ;;  %6337 = vmatmul.bf16.vlgmr.msra.gmra.mxu2 %v11001_v53  ;;  %6363 = vmatmul.bf16.vlgmr.msrb.gmra.mxu3 %v11001_v53  ;;  %v7376_v40 = vld [vmem:[#allocation3 + $0x114] sm:$0xf0]  ;;  %vm11939_vm9 = vcmask 580608  }
 0x6d9   : > { %v4491_v43 = vsel %vm11922_vm11, %v4487_v35, %v4488_v23  ;;  %v3952_v4 = vsel %vm11925_vm10, %v10915_v37, %v3951_v15  ;;  %v7233_v35 = vor.u32 %v7384_v17, %v7232_v12  ;;  %v7184_v17 = vld [vmem:[#allocation3 + $0xe8] sm:$0xf]  ;;  %vm11937_vm11 = vcmask 457728  }
 0x6da   : > { %6398 = vmatpush.bf16.msrb.mxu2 %v7249_v26  ;;  %6424 = vmatpush.bf16.msra.mxu3 %v7253_v38  ;;  %v4492_v51 = vsel %vm11923_vm6, %v10751_v28, %v4491_v43  ;;  %v7208_v50 = vld [vmem:[#allocation3 + $0x120] sm:$0xf]  ;;  %v7377_v61 = vld [vmem:[#allocation3 + $0x124] sm:$0xf]  ;;  %v4399_v28 = vsel %vm11926_vm12, %v4395_v45, %v4396_v9  ;;  %3956 = vst [vmem:[#allocation3 + $0x38] sm:$0xff] %v3952_v4  ;;  %vm11938_vm6 = vmmov %vm11919_vm1  ;;  %vm11940_vm10 = vcmask 719872  }
 0x6db   : > { %4496 = vst [vmem:[#allocation3 + $0x98] sm:$0xff] %v4492_v51  ;;  %v7216_v36 = vld [vmem:[#allocation3 + $0x128] sm:$0xf]  ;;  %v7378_v2 = vld [vmem:[#allocation3 + $0x12c] sm:$0xf]  ;;  %v4400_v7 = vsel %vm11927_vm13, %v10810_v33, %v4399_v28  ;;  %vm11941_vm12 = vmmov %vm11940_vm10 }
 0x6dc   : > { %4404 = vst [vmem:[#allocation3 + $0x88] sm:$0xff] %v4400_v7  ;;  %v7202_v51 = vld [vmem:[#allocation3 + $0x118] sm:$0xf0]  ;;  %v7366_v7 = vld [vmem:[#allocation3 + $0xcc] sm:$0xf]  ;;  %vm11942_vm13 = vmmov %vm11919_vm1 }
 0x6dd   : > { %v7379_v37 = vld [vmem:[#allocation3 + $0x12c] sm:$0xf0]  ;;  %v7210_v56 = vld [vmem:[#allocation3 + $0x130] sm:$0xf0] }
 0x6de   : > { %6399 = vmatpush.bf16.msrb.mxu2 %v7233_v35  ;;  %6425 = vmatpush.bf16.msra.mxu3 %v7237_v27  ;;  %v7209_v48 = vor.u32 %v7379_v37, %v7208_v50  ;;  %v7213_v6 = vor.u32 %v7377_v61, %v7210_v56  ;;  %v5159_v55 = vpop.permute.xlu0 %5158  ;;  %v7380_v0 = vld [vmem:[#allocation3 + $0x134] sm:$0xf0]  ;;  %v7218_v44 = vld [vmem:[#allocation3 + $0x138] sm:$0xf0] }
 0x6df   : > { %v5164_v11 = vrot.slane %v5159_v55, 4  ;;  %v7217_v16 = vor.u32 %v7380_v0, %v7216_v36  ;;  %v7221_v54 = vor.u32 %v7378_v2, %v7218_v44  ;;  %v5069_v33 = vpop.permute.xlu1 %5068  ;;  %v7372_v27 = vld [vmem:[#allocation3 + $0xf4] sm:$0xf0]  ;;  %v7168_v2 = vld [vmem:[#allocation3 + $0xc8] sm:$0xf] }
 0x6e0   : > { %6348 = vmatpush.bf16.msra.mxu0 %v7209_v48  ;;  %6374 = vmatpush.bf16.msrb.mxu1 %v7213_v6  ;;  %v5073_v59 = vrot.slane %v5069_v33, 4  ;;  %v7185_v61 = vor.u32 %v7372_v27, %v7184_v17  ;;  %v7368_v48 = vld [vmem:[#allocation3 + $0xd4] sm:$0xf0]  ;;  %v7170_v6 = vld [vmem:[#allocation3 + $0xd8] sm:$0xf0] }
 0x6e1   : > { %v5167_v45 = vsel %vm11928_vm14, %v5164_v11, %v5165_v62  ;;  %v7173_v0 = vor.u32 %v7366_v7, %v7170_v6  ;;  %vm11943_vm14 = vmmov %vm11940_vm10  ;;  %v7152_v44 = vld [vmem:[#allocation3 + $0xa8] sm:$0xf]  ;;  %v7362_v11 = vld [vmem:[#allocation3 + $0xac] sm:$0xf] }
 0x6e2   : > { %6400 = vmatpush.bf16.msrb.mxu2 %v7217_v16  ;;  %6426 = vmatpush.bf16.msra.mxu3 %v7221_v54  ;;  %v5168_v39 = vsel %vm11930_vm15, %v5159_v55, %v5167_v45  ;;  %v5075_v18 = vsel %vm11931_vm4, %v5072_v20, %v5073_v59  ;;  %v5077_v47 = vsel %vm11932_vm5, %v5073_v59, %v5074_v42  ;;  %vm11944_vm15 = vmmov %vm11940_vm10  ;;  %vm11945_vm4 = vcmask 523264   ;;  %v7364_v45 = vld [vmem:[#allocation3 + $0xb4] sm:$0xf0] }
 0x6e3   : > { %5173 = vst [vmem:[#allocation3 + $0x110] sm:$0xff] %v5168_v39  ;;  %v5076_v63 = vsel %vm11933_vm0, %v10950_v10, %v5075_v18  ;;  %v5078_v62 = vsel %vm11934_vm7, %v5069_v33, %v5077_v47  ;;  %v6040_v10 = vunpack.c.h.b16 %v10995_v57  ;;  %v7169_v55 = vor.u32 %v7368_v48, %v7168_v2  ;;  %v7154_v33 = vld [vmem:[#allocation3 + $0xb8] sm:$0xf0]  ;;  %v7360_v42 = vld [vmem:[#allocation3 + $0x94] sm:$0xf0]  ;;  %vm11946_vm5 = vmmov %vm11919_vm1 }
 0x6e4   : > { %5081 = vst [vmem:[#allocation3 + $0x100] sm:$0xff] %v5076_v63  ;;  %v7153_v29 = vor.u32 %v7364_v45, %v7152_v44  ;;  %v7136_v59 = vld [vmem:[#allocation3 + $0x88] sm:$0xf]  ;;  %v7358_v18 = vld [vmem:[#allocation3 + $0x8c] sm:$0xf]  ;;  %vm11947_vm0 = vcmask 588800   ;;  %vm11948_vm7 = vmmov %vm11919_vm1 }
 0x6e5   : > { %5082 = vst [vmem:[#allocation3 + $0x108] sm:$0xff] %v5078_v62  ;;  %v6042_v50 = vpack.c.b16 %v6040_v10, %v6040_v10 }
 0x6e6   : > { %v4125_v13 = vpop.permute.xlu0 %4124 }
 0x6e7   : > { %v4128_v1 = vrot.slane %v4125_v13, 4  ;;  %v4305_v49 = vpop.permute.xlu1 %4304  ;;  %v7137_v13 = vor.u32 %v7360_v42, %v7136_v59 }
 0x6e8   : > { %v4308_v26 = vrot.slane %v4305_v49, 4 }
 0x6e9   : > { %v4131_v24 = vsel %vm11919_vm1, %v4127_v19, %v4128_v1  ;;  %vm11949_vm1 = vcmask 596992  }
 0x6ea   : > { %v4132_v23 = vsel %vm11935_vm2, %v10849_v5, %v4131_v24  ;;  %v7375_v38 = vld [vmem:[#allocation3 + $0x10c] sm:$0xf0]  ;;  %v7194_v58 = vld [vmem:[#allocation3 + $0x110] sm:$0xf0]  ;;  %v4311_v30 = vsel %vm11936_vm3, %v4307_v21, %v4308_v26  ;;  %v7186_v21 = vld [vmem:[#allocation3 + $0xf8] sm:$0xf0] }
 0x6eb   : > { %4136 = vst [vmem:[#allocation3 + $0x58] sm:$0xff] %v4132_v23  ;;  %v4312_v19 = vsel %vm11937_vm11, %v10856_v52, %v4311_v30  ;;  %v7192_v43 = vld [vmem:[#allocation3 + $0x100] sm:$0xf]  ;;  %v7373_v8 = vld [vmem:[#allocation3 + $0x104] sm:$0xf]  ;;  %v7189_v28 = vor.u32 %v7370_v32, %v7186_v21  ;;  %vm11950_vm2 = vmmov %vm11936_vm3 }
 0x6ec   : > { %4316 = vst [vmem:[#allocation3 + $0x78] sm:$0xff] %v4312_v19  ;;  %v7193_v5 = vor.u32 %v7375_v38, %v7192_v43  ;;  %v7197_v9 = vor.u32 %v7373_v8, %v7194_v58  ;;  %v7200_v15 = vld [vmem:[#allocation3 + $0x108] sm:$0xf]  ;;  %v7374_v12 = vld [vmem:[#allocation3 + $0x10c] sm:$0xf]  ;;  %vm11951_vm3 = vmmov %vm11950_vm2 }
 0x6ed   : > { %v7201_v57 = vor.u32 %v7376_v40, %v7200_v15  ;;  %v7205_v4 = vor.u32 %v7374_v12, %v7202_v51  ;;  %v7120_v23 = vld [vmem:[#allocation3 + $0x68] sm:$0xf]  ;;  %v7090_v43 = vld [vmem:[#allocation3 + $0x38] sm:$0xf0]  ;;  %vm11952_vm11 = vmmov %vm11950_vm2 }
 0x6ee   : > { %v3853_v14 = vpop.permute.xlu0 %3852  ;;  %6349 = vmatpush.bf16.msra.mxu0 %v7193_v5  ;;  %6375 = vmatpush.bf16.msrb.mxu1 %v7197_v9 }
 0x6ef   : > { %v3856_v35 = vrot.slane %v3853_v14, 4  ;;  %6401 = vmatpush.bf16.msrb.mxu2 %v7201_v57  ;;  %6427 = vmatpush.bf16.msra.mxu3 %v7205_v4  ;;  %v4033_v36 = vpop.permute.xlu1 %4032 }
 0x6f0   : > { %v4036_v56 = vrot.slane %v4033_v36, 4 }
 0x6f1   : > { %v3859_v52 = vsel %vm11938_vm6, %v3855_v46, %v3856_v35  ;;  %7270 = vmatmul.msk.bf16.vlgmr.msra.gmra.mxu0 %vm11940_vm10, %v6042_v50  ;;  %7271 = vmatmul.msk.bf16.vlgmr.msrb.gmra.mxu1 %vm11941_vm12, %v6042_v50  ;;  %vm11953_vm6 = vmmov %vm11950_vm2 }
 0x6f2   : > { %v3860_v37 = vsel %vm11939_vm9, %v10876_v60, %v3859_v52  ;;  %6381 = vmatpush.bf16.msrb.mxu0 %v7185_v61  ;;  %6407 = vmatpush.bf16.msra.mxu1 %v7189_v28  ;;  %v4039_v46 = vsel %vm11942_vm13, %v4035_v41, %v4036_v56  ;;  %v7157_v41 = vor.u32 %v7362_v11, %v7154_v33  ;;  %v7352_v30 = vld [vmem:[#allocation3 + $0x54] sm:$0xf0] }
 0x6f3   : > { %3864 = vst [vmem:[#allocation3 + $0x28] sm:$0xff] %v3860_v37  ;;  %7272 = vmatmul.msk.bf16.vlgmr.msrb.gmra.mxu2 %vm11943_vm14, %v6042_v50  ;;  %7273 = vmatmul.msk.bf16.vlgmr.msra.gmra.mxu3 %vm11944_vm15, %v6042_v50  ;;  %v4040_v60 = vsel %vm11945_vm4, %v10881_v3, %v4039_v46  ;;  %v7138_v3 = vld [vmem:[#allocation3 + $0x98] sm:$0xf0]  ;;  %v7356_v24 = vld [vmem:[#allocation3 + $0x74] sm:$0xf0] }
 0x6f4   : > { %4044 = vst [vmem:[#allocation3 + $0x48] sm:$0xff] %v4040_v60  ;;  %v7141_v1 = vor.u32 %v7358_v18, %v7138_v3  ;;  %v7122_v49 = vld [vmem:[#allocation3 + $0x78] sm:$0xf0]  ;;  %v7121_v26 = vor.u32 %v7356_v24, %v7120_v23  ;;  %v6619_v24 = vld [vmem:[%s8352_s29 + $0x4] sm:$0xff] }
 0x6f5   : > { %v6631_v23 = vunpack.c.h.b16 %v6619_v24 }
 0x6f6   : > { %6382 = vmatpush.bf16.msrb.mxu0 %v7169_v55  ;;  %6408 = vmatpush.bf16.msra.mxu1 %v7173_v0  ;;  %v3765_v16 = vpop.permute.xlu0 %3764 }
 0x6f7   : > { %v3768_v54 = vrot.slane %v3765_v16, 4  ;;  %v3673_v39 = vpop.permute.xlu1 %3672 }
 0x6f8   : > { %v3676_v63 = vrot.slane %v3673_v39, 4 }
 0x6f9   : > { %v3771_v20 = vsel %vm11946_vm5, %v3767_v34, %v3768_v54  ;;  %v6433_v54 = vld [vmem:[%s11209_s12] sm:$0xff] }
 0x6fa   : > { %v3772_v47 = vsel %vm11947_vm0, %v10948_v31, %v3771_v20  ;;  %6383 = vmatpush.bf16.msrb.mxu0 %v7153_v29  ;;  %6409 = vmatpush.bf16.msra.mxu1 %v7157_v41  ;;  %v3679_v62 = vsel %vm11948_vm7, %v3675_v25, %v3676_v63  ;;  %v7354_v31 = vld [vmem:[#allocation3 + $0x6c] sm:$0xf]  ;;  %v7106_v25 = vld [vmem:[#allocation3 + $0x58] sm:$0xf0]  ;;  %v7088_v32 = vld [vmem:[#allocation3 + $0x28] sm:$0xf] }
 0x6fb   : > { %3776 = vst [vmem:[#allocation3 + $0x18] sm:$0xff] %v3772_v47  ;;  %v3680_v34 = vsel %vm11949_vm1, %v10917_v22, %v3679_v62  ;;  %v7125_v38 = vor.u32 %v7354_v31, %v7122_v49  ;;  %v7104_v58 = vld [vmem:[#allocation3 + $0x48] sm:$0xf]  ;;  %v7350_v10 = vld [vmem:[#allocation3 + $0x4c] sm:$0xf]  ;;  %v6434_v29 = vld [vmem:[%s11205_s8] sm:$0xff]  ;;  %v6630_v49 = vunpack.c.l.b16 %v6619_v24 }
 0x6fc   : > { %3684 = vst [vmem:[#allocation3 + $0x8] sm:$0xff] %v3680_v34  ;;  %v7105_v40 = vor.u32 %v7352_v30, %v7104_v58  ;;  %v7109_v17 = vor.u32 %v7350_v10, %v7106_v25  ;;  %v7346_v19 = vld [vmem:[#allocation3 + $0x2c] sm:$0xf]  ;;  %v7348_v22 = vld [vmem:[#allocation3 + $0x34] sm:$0xf0] }
 0x6fd   : > { %v7089_v8 = vor.u32 %v7348_v22, %v7088_v32  ;;  %v7093_v51 = vor.u32 %v7346_v19, %v7090_v43  ;;  %v6634_v31 = vpack.c.b16 %v6630_v49, %v6630_v49  ;;  %v6620_v10 = vld [vmem:[%s8352_s29 + $0xc] sm:$0xff] }
 0x6fe   : > { %6384 = vmatpush.bf16.msrb.mxu0 %v7137_v13  ;;  %6410 = vmatpush.bf16.msra.mxu1 %v7141_v1  ;;  %v6621_v30 = vld [vmem:[%s11207_s10] sm:$0xf]  ;;  %v6632_v25 = vunpack.c.l.b16 %v6620_v10 }
 0x702   : > { %6385 = vmatpush.bf16.msrb.mxu0 %v7121_v26  ;;  %6411 = vmatpush.bf16.msra.mxu1 %v7125_v38  ;;  %v7344_v5 = vld [vmem:[#allocation3 + $0x14] sm:$0xf0]  ;;  %v7074_v12 = vld [vmem:[#allocation3 + $0x18] sm:$0xf0]  ;;  %v6635_v26 = vpack.c.b16 %v6631_v23, %v6631_v23  ;;  %v6642_v38 = vsel %vm11950_vm2, %v6634_v31, 0 }
 0x703   : > { %v7072_v9 = vld [vmem:[#allocation3 + $0x8] sm:$0xf]  ;;  %v7342_v15 = vld [vmem:[#allocation3 + $0xc] sm:$0xf] }
 0x704   : > { %v7073_v14 = vor.u32 %v7344_v5, %v7072_v9  ;;  %v7077_v57 = vor.u32 %v7342_v15, %v7074_v12  ;;  %v6645_v58 = vsel %vm11951_vm3, %v6635_v26, 0 }
 0x705   : > { %6673 = vmatpush.bf16.msrb.mxu3 %v6645_v58 }
 0x706   : > { %6386 = vmatpush.bf16.msrb.mxu0 %v7105_v40  ;;  %6412 = vmatpush.bf16.msra.mxu1 %v7109_v17  ;;  %v6633_v40 = vunpack.c.h.b16 %v6620_v10  ;;  %v6636_v17 = vpack.c.b16 %v6632_v25, %v6632_v25 }
 0x708   : > { %v6637_v32 = vpack.c.b16 %v6633_v40, %v6633_v40  ;;  %7281 = vmatmul.msk.bf16.vlgmr.msrb.gmra.mxu3 %vm1514_vm8, %v6621_v30  ;;  %v6648_v19 = vsel %vm11952_vm11, %v6636_v17, 0 }
 0x70a   : > { %6387 = vmatpush.bf16.msrb.mxu0 %v7089_v8  ;;  %6413 = vmatpush.bf16.msra.mxu1 %v7093_v51  ;;  %v6651_v22 = vsel %vm11953_vm6, %v6637_v32, 0 }
 0x70e   : > { %6388 = vmatpush.bf16.msrb.mxu0 %v7073_v14  ;;  %6414 = vmatpush.bf16.msra.mxu1 %v7077_v57 }
 0x711   : > { %6389 = vmatmul.bf16.vlgmr.msrb.gmra.mxu0 %v11001_v53  ;;  %6415 = vmatmul.bf16.vlgmr.msra.gmra.mxu1 %v11001_v53 }
 0x712   : > { %6699 = vmatpush.bf16.msrb.mxu1 %v6651_v22 }
 0x721   : > { %7283 = vmatmul.msk.bf16.vlgmr.msrb.gmra.mxu1 %vm1514_vm8, %v6621_v30 }
 0x75b   : > { %v6338_v4 = vpop.f32.mrf.mxu2  ;;  %v6364_v35 = vpop.f32.mrf.mxu3 }
 0x763   : > { %v6340_v27 = vpop.f32.mrf.mxu2  ;;  %v6366_v21 = vpop.f32.mrf.mxu3 }
 0x76e   : > { %v6351_v50 = vpop.f32.mrf.mxu0  ;;  %v6377_v61 = vpop.f32.mrf.mxu1 }
 0x76f   : > { %v6352_v56 = vadd.f32 %v6351_v50, %v6338_v4  ;;  %v6378_v48 = vadd.f32 %v6377_v61, %v6364_v35  ;;  %v6435_v4 = vld [vmem:[%s11206_s9] sm:$0xff] }
 0x770   : > { %v6622_v35 = vld [vmem:[%s11954_s21] sm:$0xff] }
 0x771   : > { %v6436_v55 = vadd.f32 %v6378_v48, %v6352_v56 }
 0x776   : > { %v6403_v28 = vpop.f32.mrf.mxu2  ;;  %v6429_v52 = vpop.f32.mrf.mxu3 }
 0x777   : > { %v6353_v36 = vpop.f32.mrf.mxu0  ;;  %v6379_v2 = vpop.f32.mrf.mxu1 }
 0x77e   : > { %v6405_v7 = vpop.f32.mrf.mxu2  ;;  %v6431_v37 = vpop.f32.mrf.mxu3 }
 0x78b   : > { %v6675_v21 = vpop.f32.mrf.mxu3 }
 0x78e   : > { %v6390_v6 = vpop.f32.mrf.mxu0  ;;  %v6416_v46 = vpop.f32.mrf.mxu1 }
 0x78f   : > { %v6404_v0 = vadd.f32 %v6403_v28, %v6390_v6  ;;  %v6430_v60 = vadd.f32 %v6429_v52, %v6416_v46 }
 0x791   : > { %v6437_v53 = vadd.f32 %v6436_v55, %v6404_v0 }
 0x793   : > { %v6438_v44 = vadd.f32 %v6437_v53, %v6430_v60  ;;  %v6677_v52 = vpop.f32.mrf.mxu3 }
 0x795   : > { %6439 = vadd.xlane.f32.xlu2 %v6438_v44 }
 0x796   : > { %v6392_v11 = vpop.f32.mrf.mxu0  ;;  %v6418_v16 = vpop.f32.mrf.mxu1 }
 0x79e   : > { %v11110_v61 = vpop.f32.mrf.mxu1 }
 0x7a6   : > { %v6703_v2 = vpop.f32.mrf.mxu1 }
 0x808   : > { %v6440_v45 = vpop.xlane.xlu2 %6439 }
 0x809   : > { %6459 = vmatpush.msra.mxu2 %v6440_v45 }
 0x80a   : > { %7274 = vmatmul.msk.f32.vlgmr.msra.gmra.mxu2 %vm1514_vm8, %v6433_v54 }
 0x80b   : > { %6660 = vmatpush.bf16.msrb.mxu2 %v6642_v38 }
 0x812   : > { %7280 = vmatmul.msk.bf16.vlgmr.msrb.gmra.mxu2 %vm1514_vm8, %v6621_v30 }
 0x88d   : > { %v6461_v33 = vpop.f32.mrf.mxu2 }
 0x88e   : > { %6466 = vperm.xlu1 %7995, %v6461_v33  }
 0x895   : > { %v6662_v6 = vpop.f32.mrf.mxu2 }
 0x896   : > { %6523 = vperm.xlu1 %7995, %v6434_v29  }
 0x900   : > { %v6467_v41 = vpop.permute.xlu1 %6466 }
 0x901   : > { %v11072_v42 = vsub.f32 %v6352_v56, %v6467_v41  ;;  %v11074_v20 = vsub.f32 %v6378_v48, %v6467_v41  ;;  %v11076_v39 = vsub.f32 %v6404_v0, %v6467_v41  ;;  %v11078_v59 = vsub.f32 %v6430_v60, %v6467_v41 }
 0x903   : > { %v6473_v18 = vmul.f32 %v11072_v42, %v11072_v42  ;;  %v6474_v3 = vmul.f32 %v11074_v20, %v11074_v20  ;;  %v6475_v47 = vmul.f32 %v11076_v39, %v11076_v39  ;;  %v6476_v62 = vmul.f32 %v11078_v59, %v11078_v59 }
 0x905   : > { %v6477_v63 = vadd.f32 %v6474_v3, %v6473_v18 }
 0x907   : > { %v6478_v13 = vadd.f32 %v6477_v63, %v6475_v47 }
 0x908   : > { %v6524_v27 = vpop.permute.xlu1 %6523 }
 0x909   : > { %v6479_v1 = vadd.f32 %v6478_v13, %v6476_v62 }
 0x90b   : > { %6480 = vadd.xlane.f32.xlu0 %v6479_v1 }
 0x97e   : > { %v6481_v34 = vpop.xlane.xlu0 %6480 }
 0x97f   : > { %6497 = vmatpush.msra.mxu0 %v6481_v34 }
 0x980   : > { %7275 = vmatmul.msk.f32.vlgmr.msra.gmra.mxu0 %vm1514_vm8, %v6433_v54 }
 0x981   : > { %6686 = vmatpush.bf16.msrb.mxu0 %v6648_v19 }
 0x988   : > { %7282 = vmatmul.msk.bf16.vlgmr.msrb.gmra.mxu0 %vm1514_vm8, %v6621_v30 }
 0x9fd   : > { %v6499_v43 = vpop.f32.mrf.mxu0 }
 0x9fe   : > { %v6500_v8 = vadd.f32 1e-05, %v6499_v43 }
 0xa00   : > { %8015 = vrsqrt.f32 %v6500_v8  ;;  %vm6508_vm10 = vweird.f32 %v6500_v8 }
 0xa05   : > { %v11108_v50 = vpop.f32.mrf.mxu0 }
 0xa06   : > { %v8016_v51 = vpop.eup %8015 }
 0xa07   : > { %v6503_v5 = vmul.f32 %v8016_v51, %v6500_v8  ;;  %vm6509_vm9 = vweird.f32 %v8016_v51 }
 0xa08   : > { %vm6510_vm12 = vmor %vm6508_vm10, %vm6509_vm9 }
 0xa09   : > { %v6504_v9 = vmul.f32 %v8016_v51, %v6503_v5 }
 0xa0b   : > { %v6505_v15 = vmul.f32 0.5, %v6504_v9 }
 0xa0d   : > { %v6506_v12 = vsub.f32 1.5, %v6505_v15  ;;  %v6690_v36 = vpop.f32.mrf.mxu0 }
 0xa0f   : > { %v6507_v14 = vmul.f32 %v8016_v51, %v6506_v12 }
 0xa11   : > { %v6511_v57 = vsel %vm6510_vm12, %v8016_v51, %v6507_v14 }
 0xa12   : > { %6514 = vperm.xlu1 %7995, %v6511_v57  }
 0xa1a   : > { %6532 = vperm.xlu1 %7995, %v6435_v4  }
 0xa22   : > { %6625 = vperm.xlu1 %7995, %v6622_v35  }
 0xa84   : > { %v6515_v28 = vpop.permute.xlu1 %6514 }
 0xa85   : > { %v6517_v7 = vmul.f32 %v6515_v28, %v11072_v42  ;;  %v6518_v37 = vmul.f32 %v6515_v28, %v11074_v20  ;;  %v6519_v56 = vmul.f32 %v6515_v28, %v11076_v39  ;;  %v6520_v48 = vmul.f32 %v6515_v28, %v11078_v59  ;;  %v6664_v42 = vpop.f32.mrf.mxu2 }
 0xa87   : > { %v6526_v46 = vmul.f32 %v6524_v27, %v6517_v7  ;;  %v6527_v55 = vmul.f32 %v6524_v27, %v6518_v37  ;;  %v6528_v0 = vmul.f32 %v6524_v27, %v6519_v56  ;;  %v6529_v60 = vmul.f32 %v6524_v27, %v6520_v48 }
 0xa8c   : > { %v6533_v53 = vpop.permute.xlu1 %6532 }
 0xa8d   : > { %v11116_v44 = vadd.f32 %v6533_v53, %v6526_v46  ;;  %v11118_v11 = vadd.f32 %v6533_v53, %v6527_v55  ;;  %v11120_v16 = vadd.f32 %v6533_v53, %v6528_v0  ;;  %v11122_v54 = vadd.f32 %v6533_v53, %v6529_v60 }
 0xa8f   : > { %v7276_v45 = vmul.f32 -1.442695, %v11116_v44  ;;  %v7277_v33 = vmul.f32 -1.442695, %v11118_v11  ;;  %v7278_v29 = vmul.f32 -1.442695, %v11120_v16 }
 0xa90   : > { %v7279_v41 = vmul.f32 -1.442695, %v11122_v54 }
 0xa91   : > { %8017 = vpow2.f32 %v7276_v45 }
 0xa92   : > { %8019 = vpow2.f32 %v7277_v33 }
 0xa93   : > { %8021 = vpow2.f32 %v7278_v29 }
 0xa94   : > { %8023 = vpow2.f32 %v7279_v41  ;;  %v11131_v13 = vpop.permute.xlu1 %6625 }
 0xa95   : > { %v11134_v24 = vadd.f32 %v6675_v21, %v11131_v13  ;;  %v6663_v49 = vadd.f32 %v6662_v6, %v11131_v13  ;;  %v6689_v29 = vadd.f32 %v11108_v50, %v11131_v13 }
 0xa97   : > { %v8018_v20 = vpop.eup %8017 }
 0xa98   : > { %v8020_v39 = vpop.eup %8019  ;;  %v6551_v59 = vadd.f32 1.0, %v8018_v20 }
 0xa99   : > { %v8022_v18 = vpop.eup %8021  ;;  %v6552_v3 = vadd.f32 1.0, %v8020_v39 }
 0xa9a   : > { %v8024_v47 = vpop.eup %8023  ;;  %v6553_v63 = vadd.f32 1.0, %v8022_v18  ;;  %8025 = vrcp.f32 %v6551_v59  ;;  %vm6560_vm8 = vweird.f32 %v6551_v59  ;;  %v6564_v38 = vand.u32 2147483647, %v6551_v59 }
 0xa9b   : > { %v11128_v62 = vadd.f32 1.0, %v8024_v47  ;;  %8027 = vrcp.f32 %v6552_v3  ;;  %v6579_v1 = vand.u32 2147483647, %v6552_v3  ;;  %v6581_v31 = vand.u32 2147483648, %v6552_v3 }
 0xa9c   : > { %8029 = vrcp.f32 %v6553_v63  ;;  %vm6575_vm13 = vweird.f32 %v6552_v3  ;;  %vm6590_vm14 = vweird.f32 %v6553_v63  ;;  %v6594_v30 = vand.u32 2147483647, %v6553_v63 }
 0xa9d   : > { %8031 = vrcp.f32 %v11128_v62  ;;  %vm11137_vm15 = vcmp.eq.f32.partialorder %v6579_v1, 8.507059e+37  ;;  %v6596_v32 = vand.u32 2147483648, %v6553_v63  ;;  %vm6605_vm4 = vweird.f32 %v11128_v62 }
 0xa9e   : > { %v6566_v8 = vand.u32 2147483648, %v6551_v59  ;;  %v6582_v51 = vor.u32 1.1754944e-38, %v6581_v31  ;;  %v6609_v14 = vand.u32 2147483647, %v11128_v62  ;;  %v6611_v4 = vand.u32 2147483648, %v11128_v62 }
 0xa9f   : > { %vm6595_vm11 = vcmp.eq.f32.partialorder %v6594_v30, 8.507059e+37  ;;  %vm6565_vm6 = vcmp.eq.f32.partialorder %v6564_v38, 8.507059e+37  ;;  %v6597_v7 = vor.u32 1.1754944e-38, %v6596_v32 }
 0xaa0   : > { %v8026_v34 = vpop.eup %8025  ;;  %v6567_v28 = vor.u32 1.1754944e-38, %v6566_v8  ;;  %v6612_v46 = vor.u32 1.1754944e-38, %v6611_v4  ;;  %vm6610_vm12 = vcmp.eq.f32.partialorder %v6609_v14, 8.507059e+37 }
 0xaa1   : > { %v8028_v23 = vpop.eup %8027  ;;  %v6556_v26 = vmul.f32 %v8026_v34, %v6551_v59  ;;  %vm6561_vm5 = vweird.f32 %v8026_v34 }
 0xaa2   : > { %v8030_v58 = vpop.eup %8029  ;;  %v6571_v10 = vmul.f32 %v8028_v23, %v6552_v3  ;;  %vm6576_vm0 = vweird.f32 %v8028_v23  ;;  %vm6562_vm2 = vmor %vm6560_vm8, %vm6561_vm5 }
 0xaa3   : > { %v8032_v25 = vpop.eup %8031  ;;  %v6586_v17 = vmul.f32 %v8030_v58, %v6553_v63  ;;  %v6557_v19 = vsub.f32 1.0, %v6556_v26  ;;  %vm6591_vm7 = vweird.f32 %v8030_v58  ;;  %vm6577_vm3 = vmor %vm6575_vm13, %vm6576_vm0 }
 0xaa4   : > { %v6572_v22 = vsub.f32 1.0, %v6571_v10  ;;  %v6601_v43 = vmul.f32 %v8032_v25, %v11128_v62  ;;  %vm6606_vm1 = vweird.f32 %v8032_v25  ;;  %vm6592_vm9 = vmor %vm6590_vm14, %vm6591_vm7 }
 0xaa5   : > { %v6587_v5 = vsub.f32 1.0, %v6586_v17  ;;  %v6558_v9 = vmul.f32 %v8026_v34, %v6557_v19  ;;  %vm6607_vm10 = vmor %vm6605_vm4, %vm6606_vm1 }
 0xaa6   : > { %v6573_v15 = vmul.f32 %v8028_v23, %v6572_v22  ;;  %v6602_v12 = vsub.f32 1.0, %v6601_v43 }
 0xaa7   : > { %v6588_v57 = vmul.f32 %v8030_v58, %v6587_v5  ;;  %v6559_v35 = vadd.f32 %v8026_v34, %v6558_v9 }
 0xaa8   : > { %v6574_v27 = vadd.f32 %v8028_v23, %v6573_v15  ;;  %v6603_v21 = vmul.f32 %v8032_v25, %v6602_v12 }
 0xaa9   : > { %v6589_v52 = vadd.f32 %v8030_v58, %v6588_v57  ;;  %v6563_v36 = vsel %vm6562_vm2, %v8026_v34, %v6559_v35 }
 0xaaa   : > { %v6578_v2 = vsel %vm6577_vm3, %v8028_v23, %v6574_v27  ;;  %v6604_v37 = vadd.f32 %v8032_v25, %v6603_v21  ;;  %v6568_v56 = vsel %vm6565_vm6, %v6567_v28, %v6563_v36 }
 0xaab   : > { %v6583_v48 = vsel %vm11137_vm15, %v6582_v51, %v6578_v2  ;;  %v6593_v6 = vsel %vm6592_vm9, %v8030_v58, %v6589_v52  ;;  %v6615_v55 = vmul.f32 %v6568_v56, %v11116_v44  ;;  %v6702_v44 = vadd.f32 %v11110_v61, %v11131_v13 }
 0xaac   : > { %v6598_v0 = vsel %vm6595_vm11, %v6597_v7, %v6593_v6  ;;  %v6608_v60 = vsel %vm6607_vm10, %v8032_v25, %v6604_v37  ;;  %v6616_v53 = vmul.f32 %v6583_v48, %v11118_v11 }
 0xaad   : > { %v6613_v45 = vsel %vm6610_vm12, %v6612_v46, %v6608_v60  ;;  %v6617_v33 = vmul.f32 %v6598_v0, %v11120_v16  ;;  %v6705_v41 = vadd.f32 %v6663_v49, %v6615_v55 }
 0xaae   : > { %v6618_v42 = vmul.f32 %v6613_v45, %v11122_v54  ;;  %v6706_v20 = vadd.f32 %v11134_v24, %v6616_v53 }
 0xaaf   : > { %v6707_v11 = vadd.f32 %v6689_v29, %v6617_v33 }
 0xab0   : > { %v6708_v39 = vadd.f32 %v6702_v44, %v6618_v42  ;;  %v6709_v59 = vpack.c.bf16 %v6706_v20, %v6705_v41 }
 0xab2   : > { %v6710_v16 = vpack.c.bf16 %v6708_v39, %v6707_v11  ;;  %6711 = vst [vmem:[%s501_s14] sm:$0xff] %v6709_v59 }
 0xab4   : > { %6712 = vst [vmem:[%s501_s14 + $0x8] sm:$0xff] %v6710_v16 }
 0xab5   : > { %8121 = shalt.err (!%p8118_p10)
}
 0xab6   : > { %7403 = dma.vmem_to_hbm [thread:$0]  (%p8317_p0), %s6728_s17, 256, %s6730_s18, %s6714_s20  }
 0xab7 PF: > { %s11959_s22 = sld [smem:[#allocation14_spill]] }
 0xab8   : > { %s11961_s25 = sld [smem:[#allocation16_spill]] }
 0xabd   : > { %s6741_s15 = sand.u32 1, %s11959_s22  }
 0xabe   : > { %p11962_p11 = scmp.ge.s32.totalorder %s11961_s25, 2  ;;  %s6742_s27 = scalar_lea.sflag [#allocation7], %s6741_s15 }
 0xac0   : > { %p7414_p12 = pnand %p11962_p11, %p8323_p6 }
 0xac2   : > { %p7415_p2 = pneg %p7414_p12 }
 0xac4   : > { %8147 = dma.done.wait (%p7415_p2), %s6742_s27, 256  }
 0xac5   : > { %8149 = vsyncadd (%p7415_p2), %s6742_s27, 4294967040  ;;  %s11963_s28 = sld [smem:[#allocation17_spill]]  ;;  %s11966_s25 = smov %s8156_s26 }
 0xac6   : > { %s11964_s11 = sld [smem:[#allocation15_spill]] }
 0xac7   : > { %s11965_s27 = sld [smem:[#allocation18_spill]] }
 0xacb   : > { %p27_p4 = scmp.ge.s32.totalorder %s11963_s28, 4  }
 0xacc   : > { %s11967_s26 = smov %s11964_s11 }
 0xacd   :  { %29 = sbr.rel (!%p27_p4) target bundleno = 10 (0xa), region = 127 }
 0xad2   :  { %6748 = vsyncpa [#allocation6], 1 }
 0xad3   :  { %6750 = vsyncpa [#allocation6 + $0x1], 1 }
 0xad4   :  { %6751 = vsyncpa [#allocation9], 1 }
 0xad5   :  { %6752 = vsyncpa [#allocation7], 1 }
 0xad6   :  { %6754 = vsyncpa [#allocation7 + $0x1], 1 }

</bundles_post_ra>
